<compile_context>
chip_gen: v6e
topology: v6e:2x2x1
jax: 0.10.0
libtpu: 0.0.40
codegen_flags: <defaults>
</compile_context>

<pallas_src>
import math
import functools

import jax
import jax.numpy as jnp
from jax import lax
from jax.experimental import pallas as pl
from jax.experimental.pallas import tpu as pltpu

_VMEM_LIMIT = 64 * 1024 * 1024  # fits v7x's 64 MiB physical VMEM
_SQRT_2_OVER_PI = 0.7978845608028654


def _gelu_tanh(z):
    return 0.5 * z * (1.0 + jnp.tanh(_SQRT_2_OVER_PI * (z + 0.044715 * z * z * z)))


# ---------------------------------------------------------------------------
# Kernels
# ---------------------------------------------------------------------------
def _embed_kernel(p_ref, w_ref, b_ref, cls_ref, pos_ref, o_ref):
    # p_ref: (1, NP, Kp)  w_ref: (Kp, C)  b_ref/cls_ref: (1, C)  pos_ref: (NP+1, C)
    patches = p_ref[0].astype(jnp.float32)
    y = jnp.dot(patches, w_ref[...].astype(jnp.float32),
                preferred_element_type=jnp.float32) + b_ref[...]
    cls_row = cls_ref[...] + pos_ref[:1, :]                     # (1, C)
    tok_rows = y + pos_ref[1:, :]                               # (NP, C)
    o_ref[0] = jnp.concatenate([cls_row, tok_rows], axis=0).astype(o_ref.dtype)


def _make_layer_kernel(num_heads, head_dim, scale, eps):
    def kernel(x_ref, g1_ref, b1_ref, wqkv_ref, bqkv_ref, wproj_ref, bproj_ref,
               ls1_ref, g2_ref, b2_ref, wfc1_ref, bfc1_ref, wfc2_ref, bfc2_ref,
               ls2_ref, o_ref):
        x = x_ref[0].astype(jnp.float32)                        # (N, C)
        C = x.shape[-1]

        # ---- LayerNorm 1 ----
        mu = jnp.mean(x, axis=-1, keepdims=True)
        xc = x - mu
        var = jnp.mean(xc * xc, axis=-1, keepdims=True)
        xn = xc * lax.rsqrt(var + eps)
        xn = xn * g1_ref[...] + b1_ref[...]

        # ---- fused QKV projection (kept in VMEM) ----
        qkv = jnp.dot(xn, wqkv_ref[...], preferred_element_type=jnp.float32) + bqkv_ref[...]

        # ---- multi-head SDPA: heads sliced along lanes, output merged lane-dense ----
        head_outs = []
        for h in range(num_heads):
            lo = h * head_dim
            q = qkv[:, lo:lo + head_dim]                        # (N, D)
            k = qkv[:, C + lo:C + lo + head_dim]                # (N, D)
            v = qkv[:, 2 * C + lo:2 * C + lo + head_dim]        # (N, D)
            # q @ k^T without materializing a transpose
            s = lax.dot_general(q, k, (((1,), (1,)), ((), ())),
                                preferred_element_type=jnp.float32) * scale   # (N, N)
            s = s - jnp.max(s, axis=-1, keepdims=True)
            p = jnp.exp(s)
            p = p * pl.reciprocal(jnp.sum(p, axis=-1, keepdims=True), approx=True)
            head_outs.append(jnp.dot(p, v, preferred_element_type=jnp.float32))  # (N, D)
        attn = jnp.concatenate(head_outs, axis=-1)              # (N, C) lane-dense

        # ---- output projection + layer-scale residual ----
        attn = jnp.dot(attn, wproj_ref[...], preferred_element_type=jnp.float32) + bproj_ref[...]
        h1 = x + ls1_ref[...] * attn

        # ---- LayerNorm 2 ----
        mu2 = jnp.mean(h1, axis=-1, keepdims=True)
        hc = h1 - mu2
        var2 = jnp.mean(hc * hc, axis=-1, keepdims=True)
        hn = hc * lax.rsqrt(var2 + eps)
        hn = hn * g2_ref[...] + b2_ref[...]

        # ---- MLP (fc1 -> GELU -> fc2) + layer-scale residual ----
        z = jnp.dot(hn, wfc1_ref[...], preferred_element_type=jnp.float32) + bfc1_ref[...]
        z = _gelu_tanh(z)
        z = jnp.dot(z, wfc2_ref[...], preferred_element_type=jnp.float32) + bfc2_ref[...]

        o_ref[0] = (h1 + ls2_ref[...] * z).astype(o_ref.dtype)
    return kernel


# ---------------------------------------------------------------------------
# Pallas wrappers
# ---------------------------------------------------------------------------
def pallas_embed(patches, w_patch, b_patch, cls_tok, pos_embed):
    B, NP, Kp = patches.shape
    C = w_patch.shape[1]
    N = NP + 1
    return pl.pallas_call(
        _embed_kernel,
        out_shape=jax.ShapeDtypeStruct((B, N, C), patches.dtype),
        grid=(B,),
        in_specs=[
            pl.BlockSpec((1, NP, Kp), lambda b: (b, 0, 0)),
            pl.BlockSpec((Kp, C), lambda b: (0, 0)),
            pl.BlockSpec((1, C), lambda b: (0, 0)),
            pl.BlockSpec((1, C), lambda b: (0, 0)),
            pl.BlockSpec((N, C), lambda b: (0, 0)),
        ],
        out_specs=pl.BlockSpec((1, N, C), lambda b: (b, 0, 0)),
        compiler_params=pltpu.CompilerParams(
            dimension_semantics=("parallel",),
            vmem_limit_bytes=_VMEM_LIMIT),
    )(patches, w_patch, b_patch, cls_tok, pos_embed)


def pallas_encoder_layer(x, p, num_heads, eps):
    B, N, C = x.shape
    D = C // num_heads
    I = p["w_fc1"].shape[1]
    kernel = _make_layer_kernel(num_heads, D, D ** (-0.5), eps)
    tok = lambda b: (b, 0, 0)
    w2d = lambda b: (0, 0)
    return pl.pallas_call(
        kernel,
        out_shape=jax.ShapeDtypeStruct((B, N, C), x.dtype),
        grid=(B,),
        in_specs=[
            pl.BlockSpec((1, N, C), tok),        # x
            pl.BlockSpec((1, C), w2d),           # norm1 gamma
            pl.BlockSpec((1, C), w2d),           # norm1 beta
            pl.BlockSpec((C, 3 * C), w2d),       # w_qkv
            pl.BlockSpec((1, 3 * C), w2d),       # b_qkv
            pl.BlockSpec((C, C), w2d),           # w_proj
            pl.BlockSpec((1, C), w2d),           # b_proj
            pl.BlockSpec((1, C), w2d),           # ls1
            pl.BlockSpec((1, C), w2d),           # norm2 gamma
            pl.BlockSpec((1, C), w2d),           # norm2 beta
            pl.BlockSpec((C, I), w2d),           # w_fc1
            pl.BlockSpec((1, I), w2d),           # b_fc1
            pl.BlockSpec((I, C), w2d),           # w_fc2
            pl.BlockSpec((1, C), w2d),           # b_fc2
            pl.BlockSpec((1, C), w2d),           # ls2
        ],
        out_specs=pl.BlockSpec((1, N, C), tok),
        compiler_params=pltpu.CompilerParams(
            dimension_semantics=("parallel",),
            vmem_limit_bytes=_VMEM_LIMIT),
    )(x, p["g1"], p["b1"], p["w_qkv"], p["b_qkv"], p["w_proj"], p["b_proj"],
      p["ls1"], p["g2"], p["b2"], p["w_fc1"], p["b_fc1"], p["w_fc2"], p["b_fc2"],
      p["ls2"])


# ---------------------------------------------------------------------------
# VisionEncoder forward (eval mode: dropout / DropPath are identity)
# ---------------------------------------------------------------------------
def extract_patches(pixel_values, patch_size):
    # (B, 3, H, W) -> (B, num_patches, 3*P*P), same flattening order as Conv2d weight.
    B, Cin, Himg, Wimg = pixel_values.shape
    ph, pw = Himg // patch_size, Wimg // patch_size
    x = pixel_values.reshape(B, Cin, ph, patch_size, pw, patch_size)
    x = jnp.transpose(x, (0, 2, 4, 1, 3, 5))
    return x.reshape(B, ph * pw, Cin * patch_size * patch_size)


def vision_encoder_forward(pixel_values, params, cfg):
    patches = extract_patches(pixel_values, cfg["patch_size"])
    x = pallas_embed(patches, params["w_patch"], params["b_patch"],
                     params["cls"], params["pos"])
    for lp in params["layers"]:
        x = pallas_encoder_layer(x, lp, cfg["num_heads"], cfg["norm_eps"])
    return x


# ---------------------------------------------------------------------------
# Deterministic parameter init (xavier_uniform weights, zero biases)
# ---------------------------------------------------------------------------
def init_params(key, cfg):
    C, I, P, L = cfg["hidden_size"], cfg["intermediate_size"], cfg["patch_size"], cfg["num_layers"]
    NP = (cfg["image_size"] // P) ** 2
    N = NP + 1
    Kp = 3 * P * P
    keys = jax.random.split(key, 3 + 4 * L)

    def xavier(k, fan_in, fan_out):
        bound = math.sqrt(6.0 / (fan_in + fan_out))
        return jax.random.uniform(k, (fan_in, fan_out), jnp.float32, -bound, bound)

    params = {
        "w_patch": xavier(keys[0], Kp, C),
        "b_patch": jnp.zeros((1, C), jnp.float32),
        "cls": 0.02 * jax.random.normal(keys[1], (1, C), jnp.float32),
        "pos": 0.02 * jax.random.normal(keys[2], (N, C), jnp.float32),
        "layers": [],
    }
    ki = 3
    for _ in range(L):
        k1, k2, k3, k4 = keys[ki:ki + 4]
        ki += 4
        params["layers"].append({
            "g1": jnp.ones((1, C), jnp.float32), "b1": jnp.zeros((1, C), jnp.float32),
            "w_qkv": xavier(k1, C, 3 * C), "b_qkv": jnp.zeros((1, 3 * C), jnp.float32),
            "w_proj": xavier(k2, C, C), "b_proj": jnp.zeros((1, C), jnp.float32),
            "ls1": jnp.full((1, C), cfg["layer_scale"], jnp.float32),
            "g2": jnp.ones((1, C), jnp.float32), "b2": jnp.zeros((1, C), jnp.float32),
            "w_fc1": xavier(k3, C, I), "b_fc1": jnp.zeros((1, I), jnp.float32),
            "w_fc2": xavier(k4, I, C), "b_fc2": jnp.zeros((1, C), jnp.float32),
            "ls2": jnp.full((1, C), cfg["layer_scale"], jnp.float32),
        })
    return params


# ---------------------------------------------------------------------------
# Pure-JAX reference (for correctness check)
# ---------------------------------------------------------------------------
def _layer_reference(x, p, num_heads, eps):
    B, N, C = x.shape
    D = C // num_heads
    scale = D ** (-0.5)

    def ln(z, g, b):
        mu = z.mean(-1, keepdims=True)
        var = ((z - mu) ** 2).mean(-1, keepdims=True)
        return (z - mu) / jnp.sqrt(var + eps) * g + b

    xn = ln(x, p["g1"], p["b1"])
    qkv = xn @ p["w_qkv"] + p["b_qkv"]
    qkv = qkv.reshape(B, N, 3, num_heads, D).transpose(2, 0, 3, 1, 4)
    q, k, v = qkv[0], qkv[1], qkv[2]
    s = jnp.einsum("bhnd,bhmd->bhnm", q, k) * scale
    pa = jax.nn.softmax(s, axis=-1)
    o = jnp.einsum("bhnm,bhmd->bhnd", pa, v)
    o = o.transpose(0, 2, 1, 3).reshape(B, N, C)
    o = o @ p["w_proj"] + p["b_proj"]
    x = x + p["ls1"] * o
    hn = ln(x, p["g2"], p["b2"])
    z = hn @ p["w_fc1"] + p["b_fc1"]
    z = _gelu_tanh(z)
    z = z @ p["w_fc2"] + p["b_fc2"]
    return x + p["ls2"] * z


def vision_encoder_reference(pixel_values, params, cfg):
    patches = extract_patches(pixel_values, cfg["patch_size"])
    x = patches @ params["w_patch"] + params["b_patch"]
    B, _, C = x.shape
    cls = jnp.broadcast_to(params["cls"][None], (B, 1, C))
    x = jnp.concatenate([cls, x], axis=1) + params["pos"][None]
    for lp in params["layers"]:
        x = _layer_reference(x, lp, cfg["num_heads"], cfg["norm_eps"])
    return x


# ---------------------------------------------------------------------------
if __name__ == "__main__":
    # high-precision XLA matmuls so the pure-JAX reference is a meaningful baseline
    jax.config.update("jax_default_matmul_precision", "highest")

    # Small shapes consistent with the module: 32x32 image, patch 8 -> 16 patches + cls = 17
    # tokens, hidden 128 (lane-dense), 4 heads (D=32), mlp 256, 2 layers, batch 2.
    cfg = dict(hidden_size=128, image_size=32, patch_size=8, num_heads=4,
               num_layers=2, intermediate_size=256, layer_scale=0.1, norm_eps=1e-6)
    B = 2

    key = jax.random.PRNGKey(0)
    kx, kp = jax.random.split(key)
    pixel_values = jax.random.normal(kx, (B, 3, cfg["image_size"], cfg["image_size"]),
                                     jnp.float32)
    params = init_params(kp, cfg)

    forward = jax.jit(functools.partial(vision_encoder_forward, cfg=cfg))
    out = forward(pixel_values, params)
    out = jax.block_until_ready(out)

    ref = vision_encoder_reference(pixel_values, params, cfg)
    NP = (cfg["image_size"] // cfg["patch_size"]) ** 2
    assert out.shape == (B, NP + 1, cfg["hidden_size"])
    # tolerance accounts for the EUP approximate reciprocal in the softmax normalization
    assert jnp.allclose(out, ref, atol=5e-3, rtol=5e-3), "mismatch vs reference"

    print("KERNEL_OK")
</pallas_src>

<mosaic_0001>
module attributes {stable_mosaic.version = 11 : i64} {
  func.func @_embed_kernel(%arg0: i32, %arg1: memref<1x16x192xf32, #tpu.memory_space<vmem>>, %arg2: memref<192x128xf32, #tpu.memory_space<vmem>>, %arg3: memref<1x128xf32, #tpu.memory_space<vmem>>, %arg4: memref<1x128xf32, #tpu.memory_space<vmem>>, %arg5: memref<17x128xf32, #tpu.memory_space<vmem>>, %arg6: memref<1x17x128xf32, #tpu.memory_space<vmem>>) attributes {dimension_semantics = [#tpu.dimension_semantics<parallel>], iteration_bounds = array<i64: 2>, scalar_prefetch = 0 : i64, scratch_operands = 0 : i64, tpu.core_type = #tpu.core_type<tc>, window_params = [{transform_indices = @transform_0, window_bounds = array<i64: 1, 16, 192>}, {pipeline_mode = #tpu.pipeline_mode<synchronous>, transform_indices = @transform_1, window_bounds = array<i64: 192, 128>}, {pipeline_mode = #tpu.pipeline_mode<synchronous>, transform_indices = @transform_2, window_bounds = array<i64: 1, 128>}, {pipeline_mode = #tpu.pipeline_mode<synchronous>, transform_indices = @transform_3, window_bounds = array<i64: 1, 128>}, {pipeline_mode = #tpu.pipeline_mode<synchronous>, transform_indices = @transform_4, window_bounds = array<i64: 17, 128>}, {transform_indices = @transform_5, window_bounds = array<i64: 1, 17, 128>}]} {
    %c0 = arith.constant 0 : index
    %c0_0 = arith.constant 0 : index
    %c0_1 = arith.constant 0 : index
    %0 = vector.load %arg1[%c0, %c0_0, %c0_1] : memref<1x16x192xf32, #tpu.memory_space<vmem>>, vector<1x16x192xf32>
    %1 = vector.shape_cast %0 : vector<1x16x192xf32> to vector<16x192xf32>
    %c0_2 = arith.constant 0 : index
    %c0_3 = arith.constant 0 : index
    %2 = vector.load %arg2[%c0_2, %c0_3] : memref<192x128xf32, #tpu.memory_space<vmem>>, vector<192x128xf32>
    %cst = arith.constant dense<0.000000e+00> : vector<16x128xf32>
    %3 = tpu.matmul %1, %2, %cst {dimension_numbers = #tpu.dot_dimension_numbers<[1], [0], [0], [1], [0, 0, 1, 1], [], []>, precision = #tpu.contract_precision<fp32>} : vector<16x192xf32>, vector<192x128xf32>, vector<16x128xf32> -> vector<16x128xf32>
    %c0_4 = arith.constant 0 : index
    %c0_5 = arith.constant 0 : index
    %4 = vector.load %arg3[%c0_4, %c0_5] : memref<1x128xf32, #tpu.memory_space<vmem>>, vector<1x128xf32>
    %5 = vector.broadcast %4 : vector<1x128xf32> to vector<16x128xf32>
    %6 = arith.addf %3, %5 : vector<16x128xf32>
    %c0_6 = arith.constant 0 : index
    %c0_7 = arith.constant 0 : index
    %7 = vector.load %arg4[%c0_6, %c0_7] : memref<1x128xf32, #tpu.memory_space<vmem>>, vector<1x128xf32>
    %c0_8 = arith.constant 0 : index
    %c0_9 = arith.constant 0 : index
    %8 = vector.load %arg5[%c0_8, %c0_9] : memref<17x128xf32, #tpu.memory_space<vmem>>, vector<1x128xf32>
    %9 = arith.addf %7, %8 : vector<1x128xf32>
    %c1 = arith.constant 1 : index
    %c0_10 = arith.constant 0 : index
    %10 = vector.load %arg5[%c1, %c0_10] : memref<17x128xf32, #tpu.memory_space<vmem>>, vector<16x128xf32>
    %11 = arith.addf %6, %10 : vector<16x128xf32>
    %12 = tpu.concatenate %9, %11 in 0 : vector<1x128xf32>, vector<16x128xf32> -> vector<17x128xf32>
    %c0_11 = arith.constant 0 : index
    %c0_12 = arith.constant 0 : index
    %c0_13 = arith.constant 0 : index
    %13 = vector.load %arg6[%c0_11, %c0_12, %c0_13] : memref<1x17x128xf32, #tpu.memory_space<vmem>>, vector<1x17x128xf32>
    %14 = vector.shape_cast %13 : vector<1x17x128xf32> to vector<17x128xf32>
    %15 = vector.shape_cast %12 : vector<17x128xf32> to vector<1x17x128xf32>
    tpu.vector_store %arg6[%c0_11, %c0_12, %c0_13], %15 {strides = array<i32>} : memref<1x17x128xf32, #tpu.memory_space<vmem>>, vector<1x17x128xf32>,
    return
  }
  func.func @transform_0(%arg0: i32) -> (i32, i32, i32) {
    %c0_i32 = arith.constant 0 : i32
    %c0_i32_0 = arith.constant 0 : i32
    %c0_i32_1 = arith.constant 0 : i32
    return %arg0, %c0_i32, %c0_i32_0 : i32, i32, i32
  }
  func.func @transform_1(%arg0: i32) -> (i32, i32) {
    %c0_i32 = arith.constant 0 : i32
    %c0_i32_0 = arith.constant 0 : i32
    %c0_i32_1 = arith.constant 0 : i32
    return %c0_i32, %c0_i32_0 : i32, i32
  }
  func.func @transform_2(%arg0: i32) -> (i32, i32) {
    %c0_i32 = arith.constant 0 : i32
    %c0_i32_0 = arith.constant 0 : i32
    %c0_i32_1 = arith.constant 0 : i32
    return %c0_i32, %c0_i32_0 : i32, i32
  }
  func.func @transform_3(%arg0: i32) -> (i32, i32) {
    %c0_i32 = arith.constant 0 : i32
    %c0_i32_0 = arith.constant 0 : i32
    %c0_i32_1 = arith.constant 0 : i32
    return %c0_i32, %c0_i32_0 : i32, i32
  }
  func.func @transform_4(%arg0: i32) -> (i32, i32) {
    %c0_i32 = arith.constant 0 : i32
    %c0_i32_0 = arith.constant 0 : i32
    %c0_i32_1 = arith.constant 0 : i32
    return %c0_i32, %c0_i32_0 : i32, i32
  }
  func.func @transform_5(%arg0: i32) -> (i32, i32, i32) {
    %c0_i32 = arith.constant 0 : i32
    %c0_i32_0 = arith.constant 0 : i32
    %c0_i32_1 = arith.constant 0 : i32
    return %arg0, %c0_i32, %c0_i32_0 : i32, i32, i32
  }
}

module attributes {stable_mosaic.version = 11 : i64} {
  func.func @kernel(%arg0: i32, %arg1: memref<1x17x128xf32, #tpu.memory_space<vmem>>, %arg2: memref<1x128xf32, #tpu.memory_space<vmem>>, %arg3: memref<1x128xf32, #tpu.memory_space<vmem>>, %arg4: memref<128x384xf32, #tpu.memory_space<vmem>>, %arg5: memref<1x384xf32, #tpu.memory_space<vmem>>, %arg6: memref<128x128xf32, #tpu.memory_space<vmem>>, %arg7: memref<1x128xf32, #tpu.memory_space<vmem>>, %arg8: memref<1x128xf32, #tpu.memory_space<vmem>>, %arg9: memref<1x128xf32, #tpu.memory_space<vmem>>, %arg10: memref<1x128xf32, #tpu.memory_space<vmem>>, %arg11: memref<128x256xf32, #tpu.memory_space<vmem>>, %arg12: memref<1x256xf32, #tpu.memory_space<vmem>>, %arg13: memref<256x128xf32, #tpu.memory_space<vmem>>, %arg14: memref<1x128xf32, #tpu.memory_space<vmem>>, %arg15: memref<1x128xf32, #tpu.memory_space<vmem>>, %arg16: memref<1x17x128xf32, #tpu.memory_space<vmem>>) attributes {dimension_semantics = [#tpu.dimension_semantics<parallel>], iteration_bounds = array<i64: 2>, scalar_prefetch = 0 : i64, scratch_operands = 0 : i64, tpu.core_type = #tpu.core_type<tc>, window_params = [{transform_indices = @transform_0, window_bounds = array<i64: 1, 17, 128>}, {pipeline_mode = #tpu.pipeline_mode<synchronous>, transform_indices = @transform_1, window_bounds = array<i64: 1, 128>}, {pipeline_mode = #tpu.pipeline_mode<synchronous>, transform_indices = @transform_2, window_bounds = array<i64: 1, 128>}, {pipeline_mode = #tpu.pipeline_mode<synchronous>, transform_indices = @transform_3, window_bounds = array<i64: 128, 384>}, {pipeline_mode = #tpu.pipeline_mode<synchronous>, transform_indices = @transform_4, window_bounds = array<i64: 1, 384>}, {pipeline_mode = #tpu.pipeline_mode<synchronous>, transform_indices = @transform_5, window_bounds = array<i64: 128, 128>}, {pipeline_mode = #tpu.pipeline_mode<synchronous>, transform_indices = @transform_6, window_bounds = array<i64: 1, 128>}, {pipeline_mode = #tpu.pipeline_mode<synchronous>, transform_indices = @transform_7, window_bounds = array<i64: 1, 128>}, {pipeline_mode = #tpu.pipeline_mode<synchronous>, transform_indices = @transform_8, window_bounds = array<i64: 1, 128>}, {pipeline_mode = #tpu.pipeline_mode<synchronous>, transform_indices = @transform_9, window_bounds = array<i64: 1, 128>}, {pipeline_mode = #tpu.pipeline_mode<synchronous>, transform_indices = @transform_10, window_bounds = array<i64: 128, 256>}, {pipeline_mode = #tpu.pipeline_mode<synchronous>, transform_indices = @transform_11, window_bounds = array<i64: 1, 256>}, {pipeline_mode = #tpu.pipeline_mode<synchronous>, transform_indices = @transform_12, window_bounds = array<i64: 256, 128>}, {pipeline_mode = #tpu.pipeline_mode<synchronous>, transform_indices = @transform_13, window_bounds = array<i64: 1, 128>}, {pipeline_mode = #tpu.pipeline_mode<synchronous>, transform_indices = @transform_14, window_bounds = array<i64: 1, 128>}, {transform_indices = @transform_15, window_bounds = array<i64: 1, 17, 128>}]} {
    %c0 = arith.constant 0 : index
    %c0_0 = arith.constant 0 : index
    %c0_1 = arith.constant 0 : index
    %0 = vector.load %arg1[%c0, %c0_0, %c0_1] : memref<1x17x128xf32, #tpu.memory_space<vmem>>, vector<1x17x128xf32>
    %1 = vector.shape_cast %0 : vector<1x17x128xf32> to vector<17x128xf32>
    %cst = arith.constant dense<0.000000e+00> : vector<17xf32>
    %2 = vector.multi_reduction <add>, %1, %cst [1] : vector<17x128xf32> to vector<17xf32>
    %3 = vector.shape_cast %2 : vector<17xf32> to vector<17x1xf32>
    %cst_2 = arith.constant 1.280000e+02 : f32
    %4 = vector.broadcast %cst_2 : f32 to vector<17x1xf32>
    %5 = arith.divf %3, %4 : vector<17x1xf32>
    %6 = vector.broadcast %5 : vector<17x1xf32> to vector<17x128xf32>
    %7 = arith.subf %1, %6 : vector<17x128xf32>
    %8 = arith.mulf %7, %7 : vector<17x128xf32>
    %cst_3 = arith.constant dense<0.000000e+00> : vector<17xf32>
    %9 = vector.multi_reduction <add>, %8, %cst_3 [1] : vector<17x128xf32> to vector<17xf32>
    %10 = vector.shape_cast %9 : vector<17xf32> to vector<17x1xf32>
    %cst_4 = arith.constant 1.280000e+02 : f32
    %11 = vector.broadcast %cst_4 : f32 to vector<17x1xf32>
    %12 = arith.divf %10, %11 : vector<17x1xf32>
    %cst_5 = arith.constant 9.99999997E-7 : f32
    %13 = vector.broadcast %cst_5 : f32 to vector<17x1xf32>
    %14 = arith.addf %12, %13 : vector<17x1xf32>
    %15 = math.rsqrt %14 : vector<17x1xf32>
    %16 = vector.broadcast %15 : vector<17x1xf32> to vector<17x128xf32>
    %17 = arith.mulf %7, %16 : vector<17x128xf32>
    %c0_6 = arith.constant 0 : index
    %c0_7 = arith.constant 0 : index
    %18 = vector.load %arg2[%c0_6, %c0_7] : memref<1x128xf32, #tpu.memory_space<vmem>>, vector<1x128xf32>
    %19 = vector.broadcast %18 : vector<1x128xf32> to vector<17x128xf32>
    %20 = arith.mulf %17, %19 : vector<17x128xf32>
    %c0_8 = arith.constant 0 : index
    %c0_9 = arith.constant 0 : index
    %21 = vector.load %arg3[%c0_8, %c0_9] : memref<1x128xf32, #tpu.memory_space<vmem>>, vector<1x128xf32>
    %22 = vector.broadcast %21 : vector<1x128xf32> to vector<17x128xf32>
    %23 = arith.addf %20, %22 : vector<17x128xf32>
    %c0_10 = arith.constant 0 : index
    %c0_11 = arith.constant 0 : index
    %24 = vector.load %arg4[%c0_10, %c0_11] : memref<128x384xf32, #tpu.memory_space<vmem>>, vector<128x384xf32>
    %cst_12 = arith.constant dense<0.000000e+00> : vector<17x384xf32>
    %25 = tpu.matmul %23, %24, %cst_12 {dimension_numbers = #tpu.dot_dimension_numbers<[1], [0], [0], [1], [0, 0, 1, 1], [], []>, precision = #tpu.contract_precision<fp32>} : vector<17x128xf32>, vector<128x384xf32>, vector<17x384xf32> -> vector<17x384xf32>
    %c0_13 = arith.constant 0 : index
    %c0_14 = arith.constant 0 : index
    %26 = vector.load %arg5[%c0_13, %c0_14] : memref<1x384xf32, #tpu.memory_space<vmem>>, vector<1x384xf32>
    %27 = vector.broadcast %26 : vector<1x384xf32> to vector<17x384xf32>
    %28 = arith.addf %25, %27 : vector<17x384xf32>
    %29 = vector.extract_strided_slice %28 {offsets = [0, 0], sizes = [17, 32], strides = [1, 1]} : vector<17x384xf32> to vector<17x32xf32>
    %30 = vector.extract_strided_slice %28 {offsets = [0, 128], sizes = [17, 32], strides = [1, 1]} : vector<17x384xf32> to vector<17x32xf32>
    %31 = vector.extract_strided_slice %28 {offsets = [0, 256], sizes = [17, 32], strides = [1, 1]} : vector<17x384xf32> to vector<17x32xf32>
    %cst_15 = arith.constant dense<0.000000e+00> : vector<17x17xf32>
    %32 = tpu.matmul %29, %30, %cst_15 {dimension_numbers = #tpu.dot_dimension_numbers<[1], [1], [0], [0], [0, 0, 1, 0], [], []>, precision = #tpu.contract_precision<fp32>} : vector<17x32xf32>, vector<17x32xf32>, vector<17x17xf32> -> vector<17x17xf32>
    %cst_16 = arith.constant 0.176776692 : f32
    %33 = vector.broadcast %cst_16 : f32 to vector<17x17xf32>
    %34 = arith.mulf %32, %33 : vector<17x17xf32>
    %cst_17 = arith.constant dense<0xFF800000> : vector<17xf32>
    %35 = vector.multi_reduction <maximumf>, %34, %cst_17 [1] : vector<17x17xf32> to vector<17xf32>
    %36 = vector.shape_cast %35 : vector<17xf32> to vector<17x1xf32>
    %37 = vector.broadcast %36 : vector<17x1xf32> to vector<17x17xf32>
    %38 = arith.subf %34, %37 : vector<17x17xf32>
    %39 = math.exp %38 : vector<17x17xf32>
    %cst_18 = arith.constant dense<0.000000e+00> : vector<17xf32>
    %40 = vector.multi_reduction <add>, %39, %cst_18 [1] : vector<17x17xf32> to vector<17xf32>
    %41 = vector.shape_cast %40 : vector<17xf32> to vector<17x1xf32>
    %42 = tpu.reciprocal %41 {approx = true} : vector<17x1xf32> -> vector<17x1xf32>
    %43 = vector.broadcast %42 : vector<17x1xf32> to vector<17x17xf32>
    %44 = arith.mulf %39, %43 : vector<17x17xf32>
    %cst_19 = arith.constant dense<0.000000e+00> : vector<17x32xf32>
    %45 = tpu.matmul %44, %31, %cst_19 {dimension_numbers = #tpu.dot_dimension_numbers<[1], [0], [0], [1], [0, 0, 1, 1], [], []>, precision = #tpu.contract_precision<fp32>} : vector<17x17xf32>, vector<17x32xf32>, vector<17x32xf32> -> vector<17x32xf32>
    %46 = vector.extract_strided_slice %28 {offsets = [0, 32], sizes = [17, 32], strides = [1, 1]} : vector<17x384xf32> to vector<17x32xf32>
    %47 = vector.extract_strided_slice %28 {offsets = [0, 160], sizes = [17, 32], strides = [1, 1]} : vector<17x384xf32> to vector<17x32xf32>
    %48 = vector.extract_strided_slice %28 {offsets = [0, 288], sizes = [17, 32], strides = [1, 1]} : vector<17x384xf32> to vector<17x32xf32>
    %cst_20 = arith.constant dense<0.000000e+00> : vector<17x17xf32>
    %49 = tpu.matmul %46, %47, %cst_20 {dimension_numbers = #tpu.dot_dimension_numbers<[1], [1], [0], [0], [0, 0, 1, 0], [], []>, precision = #tpu.contract_precision<fp32>} : vector<17x32xf32>, vector<17x32xf32>, vector<17x17xf32> -> vector<17x17xf32>
    %cst_21 = arith.constant 0.176776692 : f32
    %50 = vector.broadcast %cst_21 : f32 to vector<17x17xf32>
    %51 = arith.mulf %49, %50 : vector<17x17xf32>
    %cst_22 = arith.constant dense<0xFF800000> : vector<17xf32>
    %52 = vector.multi_reduction <maximumf>, %51, %cst_22 [1] : vector<17x17xf32> to vector<17xf32>
    %53 = vector.shape_cast %52 : vector<17xf32> to vector<17x1xf32>
    %54 = vector.broadcast %53 : vector<17x1xf32> to vector<17x17xf32>
    %55 = arith.subf %51, %54 : vector<17x17xf32>
    %56 = math.exp %55 : vector<17x17xf32>
    %cst_23 = arith.constant dense<0.000000e+00> : vector<17xf32>
    %57 = vector.multi_reduction <add>, %56, %cst_23 [1] : vector<17x17xf32> to vector<17xf32>
    %58 = vector.shape_cast %57 : vector<17xf32> to vector<17x1xf32>
    %59 = tpu.reciprocal %58 {approx = true} : vector<17x1xf32> -> vector<17x1xf32>
    %60 = vector.broadcast %59 : vector<17x1xf32> to vector<17x17xf32>
    %61 = arith.mulf %56, %60 : vector<17x17xf32>
    %cst_24 = arith.constant dense<0.000000e+00> : vector<17x32xf32>
    %62 = tpu.matmul %61, %48, %cst_24 {dimension_numbers = #tpu.dot_dimension_numbers<[1], [0], [0], [1], [0, 0, 1, 1], [], []>, precision = #tpu.contract_precision<fp32>} : vector<17x17xf32>, vector<17x32xf32>, vector<17x32xf32> -> vector<17x32xf32>
    %63 = vector.extract_strided_slice %28 {offsets = [0, 64], sizes = [17, 32], strides = [1, 1]} : vector<17x384xf32> to vector<17x32xf32>
    %64 = vector.extract_strided_slice %28 {offsets = [0, 192], sizes = [17, 32], strides = [1, 1]} : vector<17x384xf32> to vector<17x32xf32>
    %65 = vector.extract_strided_slice %28 {offsets = [0, 320], sizes = [17, 32], strides = [1, 1]} : vector<17x384xf32> to vector<17x32xf32>
    %cst_25 = arith.constant dense<0.000000e+00> : vector<17x17xf32>
    %66 = tpu.matmul %63, %64, %cst_25 {dimension_numbers = #tpu.dot_dimension_numbers<[1], [1], [0], [0], [0, 0, 1, 0], [], []>, precision = #tpu.contract_precision<fp32>} : vector<17x32xf32>, vector<17x32xf32>, vector<17x17xf32> -> vector<17x17xf32>
    %cst_26 = arith.constant 0.176776692 : f32
    %67 = vector.broadcast %cst_26 : f32 to vector<17x17xf32>
    %68 = arith.mulf %66, %67 : vector<17x17xf32>
    %cst_27 = arith.constant dense<0xFF800000> : vector<17xf32>
    %69 = vector.multi_reduction <maximumf>, %68, %cst_27 [1] : vector<17x17xf32> to vector<17xf32>
    %70 = vector.shape_cast %69 : vector<17xf32> to vector<17x1xf32>
    %71 = vector.broadcast %70 : vector<17x1xf32> to vector<17x17xf32>
    %72 = arith.subf %68, %71 : vector<17x17xf32>
    %73 = math.exp %72 : vector<17x17xf32>
    %cst_28 = arith.constant dense<0.000000e+00> : vector<17xf32>
    %74 = vector.multi_reduction <add>, %73, %cst_28 [1] : vector<17x17xf32> to vector<17xf32>
    %75 = vector.shape_cast %74 : vector<17xf32> to vector<17x1xf32>
    %76 = tpu.reciprocal %75 {approx = true} : vector<17x1xf32> -> vector<17x1xf32>
    %77 = vector.broadcast %76 : vector<17x1xf32> to vector<17x17xf32>
    %78 = arith.mulf %73, %77 : vector<17x17xf32>
    %cst_29 = arith.constant dense<0.000000e+00> : vector<17x32xf32>
    %79 = tpu.matmul %78, %65, %cst_29 {dimension_numbers = #tpu.dot_dimension_numbers<[1], [0], [0], [1], [0, 0, 1, 1], [], []>, precision = #tpu.contract_precision<fp32>} : vector<17x17xf32>, vector<17x32xf32>, vector<17x32xf32> -> vector<17x32xf32>
    %80 = vector.extract_strided_slice %28 {offsets = [0, 96], sizes = [17, 32], strides = [1, 1]} : vector<17x384xf32> to vector<17x32xf32>
    %81 = vector.extract_strided_slice %28 {offsets = [0, 224], sizes = [17, 32], strides = [1, 1]} : vector<17x384xf32> to vector<17x32xf32>
    %82 = vector.extract_strided_slice %28 {offsets = [0, 352], sizes = [17, 32], strides = [1, 1]} : vector<17x384xf32> to vector<17x32xf32>
    %cst_30 = arith.constant dense<0.000000e+00> : vector<17x17xf32>
    %83 = tpu.matmul %80, %81, %cst_30 {dimension_numbers = #tpu.dot_dimension_numbers<[1], [1], [0], [0], [0, 0, 1, 0], [], []>, precision = #tpu.contract_precision<fp32>} : vector<17x32xf32>, vector<17x32xf32>, vector<17x17xf32> -> vector<17x17xf32>
    %cst_31 = arith.constant 0.176776692 : f32
    %84 = vector.broadcast %cst_31 : f32 to vector<17x17xf32>
    %85 = arith.mulf %83, %84 : vector<17x17xf32>
    %cst_32 = arith.constant dense<0xFF800000> : vector<17xf32>
    %86 = vector.multi_reduction <maximumf>, %85, %cst_32 [1] : vector<17x17xf32> to vector<17xf32>
    %87 = vector.shape_cast %86 : vector<17xf32> to vector<17x1xf32>
    %88 = vector.broadcast %87 : vector<17x1xf32> to vector<17x17xf32>
    %89 = arith.subf %85, %88 : vector<17x17xf32>
    %90 = math.exp %89 : vector<17x17xf32>
    %cst_33 = arith.constant dense<0.000000e+00> : vector<17xf32>
    %91 = vector.multi_reduction <add>, %90, %cst_33 [1] : vector<17x17xf32> to vector<17xf32>
    %92 = vector.shape_cast %91 : vector<17xf32> to vector<17x1xf32>
    %93 = tpu.reciprocal %92 {approx = true} : vector<17x1xf32> -> vector<17x1xf32>
    %94 = vector.broadcast %93 : vector<17x1xf32> to vector<17x17xf32>
    %95 = arith.mulf %90, %94 : vector<17x17xf32>
    %cst_34 = arith.constant dense<0.000000e+00> : vector<17x32xf32>
    %96 = tpu.matmul %95, %82, %cst_34 {dimension_numbers = #tpu.dot_dimension_numbers<[1], [0], [0], [1], [0, 0, 1, 1], [], []>, precision = #tpu.contract_precision<fp32>} : vector<17x17xf32>, vector<17x32xf32>, vector<17x32xf32> -> vector<17x32xf32>
    %97 = tpu.concatenate %45, %62, %79, %96 in 1 : vector<17x32xf32>, vector<17x32xf32>, vector<17x32xf32>, vector<17x32xf32> -> vector<17x128xf32>
    %c0_35 = arith.constant 0 : index
    %c0_36 = arith.constant 0 : index
    %98 = vector.load %arg6[%c0_35, %c0_36] : memref<128x128xf32, #tpu.memory_space<vmem>>, vector<128x128xf32>
    %cst_37 = arith.constant dense<0.000000e+00> : vector<17x128xf32>
    %99 = tpu.matmul %97, %98, %cst_37 {dimension_numbers = #tpu.dot_dimension_numbers<[1], [0], [0], [1], [0, 0, 1, 1], [], []>, precision = #tpu.contract_precision<fp32>} : vector<17x128xf32>, vector<128x128xf32>, vector<17x128xf32> -> vector<17x128xf32>
    %c0_38 = arith.constant 0 : index
    %c0_39 = arith.constant 0 : index
    %100 = vector.load %arg7[%c0_38, %c0_39] : memref<1x128xf32, #tpu.memory_space<vmem>>, vector<1x128xf32>
    %101 = vector.broadcast %100 : vector<1x128xf32> to vector<17x128xf32>
    %102 = arith.addf %99, %101 : vector<17x128xf32>
    %c0_40 = arith.constant 0 : index
    %c0_41 = arith.constant 0 : index
    %103 = vector.load %arg8[%c0_40, %c0_41] : memref<1x128xf32, #tpu.memory_space<vmem>>, vector<1x128xf32>
    %104 = vector.broadcast %103 : vector<1x128xf32> to vector<17x128xf32>
    %105 = arith.mulf %104, %102 : vector<17x128xf32>
    %106 = arith.addf %1, %105 : vector<17x128xf32>
    %cst_42 = arith.constant dense<0.000000e+00> : vector<17xf32>
    %107 = vector.multi_reduction <add>, %106, %cst_42 [1] : vector<17x128xf32> to vector<17xf32>
    %108 = vector.shape_cast %107 : vector<17xf32> to vector<17x1xf32>
    %cst_43 = arith.constant 1.280000e+02 : f32
    %109 = vector.broadcast %cst_43 : f32 to vector<17x1xf32>
    %110 = arith.divf %108, %109 : vector<17x1xf32>
    %111 = vector.broadcast %110 : vector<17x1xf32> to vector<17x128xf32>
    %112 = arith.subf %106, %111 : vector<17x128xf32>
    %113 = arith.mulf %112, %112 : vector<17x128xf32>
    %cst_44 = arith.constant dense<0.000000e+00> : vector<17xf32>
    %114 = vector.multi_reduction <add>, %113, %cst_44 [1] : vector<17x128xf32> to vector<17xf32>
    %115 = vector.shape_cast %114 : vector<17xf32> to vector<17x1xf32>
    %cst_45 = arith.constant 1.280000e+02 : f32
    %116 = vector.broadcast %cst_45 : f32 to vector<17x1xf32>
    %117 = arith.divf %115, %116 : vector<17x1xf32>
    %cst_46 = arith.constant 9.99999997E-7 : f32
    %118 = vector.broadcast %cst_46 : f32 to vector<17x1xf32>
    %119 = arith.addf %117, %118 : vector<17x1xf32>
    %120 = math.rsqrt %119 : vector<17x1xf32>
    %121 = vector.broadcast %120 : vector<17x1xf32> to vector<17x128xf32>
    %122 = arith.mulf %112, %121 : vector<17x128xf32>
    %c0_47 = arith.constant 0 : index
    %c0_48 = arith.constant 0 : index
    %123 = vector.load %arg9[%c0_47, %c0_48] : memref<1x128xf32, #tpu.memory_space<vmem>>, vector<1x128xf32>
    %124 = vector.broadcast %123 : vector<1x128xf32> to vector<17x128xf32>
    %125 = arith.mulf %122, %124 : vector<17x128xf32>
    %c0_49 = arith.constant 0 : index
    %c0_50 = arith.constant 0 : index
    %126 = vector.load %arg10[%c0_49, %c0_50] : memref<1x128xf32, #tpu.memory_space<vmem>>, vector<1x128xf32>
    %127 = vector.broadcast %126 : vector<1x128xf32> to vector<17x128xf32>
    %128 = arith.addf %125, %127 : vector<17x128xf32>
    %c0_51 = arith.constant 0 : index
    %c0_52 = arith.constant 0 : index
    %129 = vector.load %arg11[%c0_51, %c0_52] : memref<128x256xf32, #tpu.memory_space<vmem>>, vector<128x256xf32>
    %cst_53 = arith.constant dense<0.000000e+00> : vector<17x256xf32>
    %130 = tpu.matmul %128, %129, %cst_53 {dimension_numbers = #tpu.dot_dimension_numbers<[1], [0], [0], [1], [0, 0, 1, 1], [], []>, precision = #tpu.contract_precision<fp32>} : vector<17x128xf32>, vector<128x256xf32>, vector<17x256xf32> -> vector<17x256xf32>
    %c0_54 = arith.constant 0 : index
    %c0_55 = arith.constant 0 : index
    %131 = vector.load %arg12[%c0_54, %c0_55] : memref<1x256xf32, #tpu.memory_space<vmem>>, vector<1x256xf32>
    %132 = vector.broadcast %131 : vector<1x256xf32> to vector<17x256xf32>
    %133 = arith.addf %130, %132 : vector<17x256xf32>
    %cst_56 = arith.constant 5.000000e-01 : f32
    %134 = vector.broadcast %cst_56 : f32 to vector<17x256xf32>
    %135 = arith.mulf %134, %133 : vector<17x256xf32>
    %cst_57 = arith.constant 4.471500e-02 : f32
    %136 = vector.broadcast %cst_57 : f32 to vector<17x256xf32>
    %137 = arith.mulf %136, %133 : vector<17x256xf32>
    %138 = arith.mulf %137, %133 : vector<17x256xf32>
    %139 = arith.mulf %138, %133 : vector<17x256xf32>
    %140 = arith.addf %133, %139 : vector<17x256xf32>
    %cst_58 = arith.constant 0.797884583 : f32
    %141 = vector.broadcast %cst_58 : f32 to vector<17x256xf32>
    %142 = arith.mulf %141, %140 : vector<17x256xf32>
    %143 = math.tanh %142 : vector<17x256xf32>
    %cst_59 = arith.constant 1.000000e+00 : f32
    %144 = vector.broadcast %cst_59 : f32 to vector<17x256xf32>
    %145 = arith.addf %144, %143 : vector<17x256xf32>
    %146 = arith.mulf %135, %145 : vector<17x256xf32>
    %c0_60 = arith.constant 0 : index
    %c0_61 = arith.constant 0 : index
    %147 = vector.load %arg13[%c0_60, %c0_61] : memref<256x128xf32, #tpu.memory_space<vmem>>, vector<256x128xf32>
    %cst_62 = arith.constant dense<0.000000e+00> : vector<17x128xf32>
    %148 = tpu.matmul %146, %147, %cst_62 {dimension_numbers = #tpu.dot_dimension_numbers<[1], [0], [0], [1], [0, 0, 1, 1], [], []>, precision = #tpu.contract_precision<fp32>} : vector<17x256xf32>, vector<256x128xf32>, vector<17x128xf32> -> vector<17x128xf32>
    %c0_63 = arith.constant 0 : index
    %c0_64 = arith.constant 0 : index
    %149 = vector.load %arg14[%c0_63, %c0_64] : memref<1x128xf32, #tpu.memory_space<vmem>>, vector<1x128xf32>
    %150 = vector.broadcast %149 : vector<1x128xf32> to vector<17x128xf32>
    %151 = arith.addf %148, %150 : vector<17x128xf32>
    %c0_65 = arith.constant 0 : index
    %c0_66 = arith.constant 0 : index
    %152 = vector.load %arg15[%c0_65, %c0_66] : memref<1x128xf32, #tpu.memory_space<vmem>>, vector<1x128xf32>
    %153 = vector.broadcast %152 : vector<1x128xf32> to vector<17x128xf32>
    %154 = arith.mulf %153, %151 : vector<17x128xf32>
    %155 = arith.addf %106, %154 : vector<17x128xf32>
    %c0_67 = arith.constant 0 : index
    %c0_68 = arith.constant 0 : index
    %c0_69 = arith.constant 0 : index
    %156 = vector.load %arg16[%c0_67, %c0_68, %c0_69] : memref<1x17x128xf32, #tpu.memory_space<vmem>>, vector<1x17x128xf32>
    %157 = vector.shape_cast %156 : vector<1x17x128xf32> to vector<17x128xf32>
    %158 = vector.shape_cast %155 : vector<17x128xf32> to vector<1x17x128xf32>
    tpu.vector_store %arg16[%c0_67, %c0_68, %c0_69], %158 {strides = array<i32>} : memref<1x17x128xf32, #tpu.memory_space<vmem>>, vector<1x17x128xf32>,
    return
  }
  func.func @transform_0(%arg0: i32) -> (i32, i32, i32) {
    %c0_i32 = arith.constant 0 : i32
    %c0_i32_0 = arith.constant 0 : i32
    %c0_i32_1 = arith.constant 0 : i32
    return %arg0, %c0_i32, %c0_i32_0 : i32, i32, i32
  }
  func.func @transform_1(%arg0: i32) -> (i32, i32) {
    %c0_i32 = arith.constant 0 : i32
    %c0_i32_0 = arith.constant 0 : i32
    %c0_i32_1 = arith.constant 0 : i32
    return %c0_i32, %c0_i32_0 : i32, i32
  }
  func.func @transform_2(%arg0: i32) -> (i32, i32) {
    %c0_i32 = arith.constant 0 : i32
    %c0_i32_0 = arith.constant 0 : i32
    %c0_i32_1 = arith.constant 0 : i32
    return %c0_i32, %c0_i32_0 : i32, i32
  }
  func.func @transform_3(%arg0: i32) -> (i32, i32) {
    %c0_i32 = arith.constant 0 : i32
    %c0_i32_0 = arith.constant 0 : i32
    %c0_i32_1 = arith.constant 0 : i32
    return %c0_i32, %c0_i32_0 : i32, i32
  }
  func.func @transform_4(%arg0: i32) -> (i32, i32) {
    %c0_i32 = arith.constant 0 : i32
    %c0_i32_0 = arith.constant 0 : i32
    %c0_i32_1 = arith.constant 0 : i32
    return %c0_i32, %c0_i32_0 : i32, i32
  }
  func.func @transform_5(%arg0: i32) -> (i32, i32) {
    %c0_i32 = arith.constant 0 : i32
    %c0_i32_0 = arith.constant 0 : i32
    %c0_i32_1 = arith.constant 0 : i32
    return %c0_i32, %c0_i32_0 : i32, i32
  }
  func.func @transform_6(%arg0: i32) -> (i32, i32) {
    %c0_i32 = arith.constant 0 : i32
    %c0_i32_0 = arith.constant 0 : i32
    %c0_i32_1 = arith.constant 0 : i32
    return %c0_i32, %c0_i32_0 : i32, i32
  }
  func.func @transform_7(%arg0: i32) -> (i32, i32) {
    %c0_i32 = arith.constant 0 : i32
    %c0_i32_0 = arith.constant 0 : i32
    %c0_i32_1 = arith.constant 0 : i32
    return %c0_i32, %c0_i32_0 : i32, i32
  }
  func.func @transform_8(%arg0: i32) -> (i32, i32) {
    %c0_i32 = arith.constant 0 : i32
    %c0_i32_0 = arith.constant 0 : i32
    %c0_i32_1 = arith.constant 0 : i32
    return %c0_i32, %c0_i32_0 : i32, i32
  }
  func.func @transform_9(%arg0: i32) -> (i32, i32) {
    %c0_i32 = arith.constant 0 : i32
    %c0_i32_0 = arith.constant 0 : i32
    %c0_i32_1 = arith.constant 0 : i32
    return %c0_i32, %c0_i32_0 : i32, i32
  }
  func.func @transform_10(%arg0: i32) -> (i32, i32) {
    %c0_i32 = arith.constant 0 : i32
    %c0_i32_0 = arith.constant 0 : i32
    %c0_i32_1 = arith.constant 0 : i32
    return %c0_i32, %c0_i32_0 : i32, i32
  }
  func.func @transform_11(%arg0: i32) -> (i32, i32) {
    %c0_i32 = arith.constant 0 : i32
    %c0_i32_0 = arith.constant 0 : i32
    %c0_i32_1 = arith.constant 0 : i32
    return %c0_i32, %c0_i32_0 : i32, i32
  }
  func.func @transform_12(%arg0: i32) -> (i32, i32) {
    %c0_i32 = arith.constant 0 : i32
    %c0_i32_0 = arith.constant 0 : i32
    %c0_i32_1 = arith.constant 0 : i32
    return %c0_i32, %c0_i32_0 : i32, i32
  }
  func.func @transform_13(%arg0: i32) -> (i32, i32) {
    %c0_i32 = arith.constant 0 : i32
    %c0_i32_0 = arith.constant 0 : i32
    %c0_i32_1 = arith.constant 0 : i32
    return %c0_i32, %c0_i32_0 : i32, i32
  }
  func.func @transform_14(%arg0: i32) -> (i32, i32) {
    %c0_i32 = arith.constant 0 : i32
    %c0_i32_0 = arith.constant 0 : i32
    %c0_i32_1 = arith.constant 0 : i32
    return %c0_i32, %c0_i32_0 : i32, i32
  }
  func.func @transform_15(%arg0: i32) -> (i32, i32, i32) {
    %c0_i32 = arith.constant 0 : i32
    %c0_i32_0 = arith.constant 0 : i32
    %c0_i32_1 = arith.constant 0 : i32
    return %arg0, %c0_i32, %c0_i32_0 : i32, i32, i32
  }
}

</mosaic_0001>

<bundles_post_ra>
// kernel: vision_encoder_forward.3
= control target key start
LH: loop header
LB: loop body
LE: loop exit
PB: predicated region body
PF: predicated region fallthrough
CT: control target
= control target key end

     0   :  { %s1217_s18 = smov 0   ;;  %s1907_s0 = inlined_call_operand.vmem [shape: f32[2,16,192], index: 0, kind: input, shape index: {}]   ;;  %s1908_s1 = inlined_call_operand.vmem [shape: f32[192,128], index: 1, kind: input, shape index: {}]   ;;  %s1909_s2 = inlined_call_operand.vmem [shape: f32[1,128], index: 2, kind: input, shape index: {}]   ;;  %s1910_s3 = inlined_call_operand.vmem [shape: f32[1,128], index: 3, kind: input, shape index: {}]   ;;  %s1911_s4 = inlined_call_operand.vmem [shape: f32[17,128], index: 4, kind: input, shape index: {}]   ;;  %s1912_s5 = inlined_call_operand.vmem [shape: f32[2,17,128], index: 5, kind: output, shape index: {}]  }
   0x1 LB: > { %s1156_s19 = sadd.s32 4294967295, %s1184_s18   ;;  %p1160_p0 = scmp.ge.s32.totalorder %s1184_s18, 1  ;;  %s1184_s18 = sphi %s1217_s18, %s15_s18  }
   0x2   : > { %p187_p1 = scmp.lt.s32.totalorder %s1184_s18, 3 }
   0x4   : > { %p188_p2 = pnand %p1160_p0, %p187_p1 }
   0x6   : > { %191 = sbr.rel (%p188_p2) target bundleno = 379 (0x17b), region = 40 }
   0xb   : > { %v244_v0 = vld [vmem:[%s1908_s1 + $0x78] sm:$0xff]  ;;  %v243_v1 = vld [vmem:[%s1908_s1 + $0x70] sm:$0xff]  ;;  %v242_v2 = vld [vmem:[%s1908_s1 + $0x68] sm:$0xff]  ;;  %v1186_v3 = vmov 0.0   ;;  %p1337_p3 = scmp.lt.s32.totalorder %s1156_s19, 1  ;;  %vm260_vm0 = vcmask 523264  }
   0xc   : > { %267 = vmatprep.subr.mxu0 %v1186_v3  ;;  %v1235_v4 = vand.u32 4294901760, %v244_v0  ;;  %v1237_v5 = vand.u32 4294901760, %v243_v1  ;;  %v1239_v6 = vand.u32 4294901760, %v242_v2  ;;  %v241_v7 = vld [vmem:[%s1908_s1 + $0x60] sm:$0xff]  ;;  %386 = vmatprep.subr.mxu1 %v1186_v3  ;;  %v240_v8 = vld [vmem:[%s1908_s1 + $0x58] sm:$0xff]  ;;  %v239_v9 = vld [vmem:[%s1908_s1 + $0x50] sm:$0xff] }
   0xd   : > { %v1251_v10 = vand.u32 4294901760, %v241_v7  ;;  %v1253_v11 = vand.u32 4294901760, %v240_v8  ;;  %v1255_v12 = vand.u32 4294901760, %v239_v9  ;;  %v238_v13 = vld [vmem:[%s1908_s1 + $0x48] sm:$0xff]  ;;  %v237_v14 = vld [vmem:[%s1908_s1 + $0x40] sm:$0xff]  ;;  %v236_v19 = vld [vmem:[%s1908_s1 + $0x38] sm:$0xff] }
   0xe   : > { %269 = vmatpush1.msra.mxu0 %v1235_v4  ;;  %v1265_v15 = vsub.f32 %v244_v0, %v1235_v4  ;;  %v1268_v16 = vsub.f32 %v243_v1, %v1237_v5  ;;  %v1270_v17 = vand.u32 4294901760, %v238_v13  ;;  %v1273_v18 = vsub.f32 %v242_v2, %v1239_v6  ;;  %v235_v26 = vld [vmem:[%s1908_s1 + $0x30] sm:$0xff]  ;;  %v234_v34 = vld [vmem:[%s1908_s1 + $0x28] sm:$0xff]  ;;  %v233_v41 = vld [vmem:[%s1908_s1 + $0x20] sm:$0xff]  ;;  %s1971_s19 = smov (!%p1337_p3, %s1156_s19), 1 }
   0xf   : > { %270 = vmatprep.subr.mxu0 %v1186_v3  ;;  %v1280_v20 = vsub.f32 %v241_v7, %v1251_v10  ;;  %v1283_v21 = vsub.f32 %v240_v8, %v1253_v11  ;;  %v1289_v25 = vand.u32 4294901760, %v237_v14  ;;  %v1296_v28 = vand.u32 4294901760, %v236_v19  ;;  %v232_v47 = vld [vmem:[%s1908_s1 + $0x18] sm:$0xff]  ;;  %v231_v53 = vld [vmem:[%s1908_s1 + $0x10] sm:$0xff]  ;;  %v230_v61 = vld [vmem:[%s1908_s1 + $0x8] sm:$0xff]  ;;  %s1167_s30 = sshll.u32 %s1971_s19, 5 }
  0x10   : > { %272 = vmatpush1.msra.mxu0 %v1237_v5  ;;  %v1929_v22 = vand.u32 4294901760, %v1265_v15  ;;  %v1928_v23 = vand.u32 4294901760, %v1268_v16  ;;  %v1926_v24 = vand.u32 4294901760, %v1273_v18  ;;  %v1300_v30 = vsub.f32 %v239_v9, %v1255_v12  ;;  %v229_v1 = vld [vmem:[%s1908_s1] sm:$0xff]  ;;  %s1437_s12 = scalar_lea.vmem %s1907_s0, %s1167_s30  ;;  %s1168_s10 = smul.u32 24, %s1971_s19 }
  0x11   : > { %273 = vmatprep.subr.mxu0 %v1186_v3  ;;  %v1925_v27 = vand.u32 4294901760, %v1280_v20  ;;  %v1923_v29 = vand.u32 4294901760, %v1283_v21  ;;  %v1316_v35 = vsub.f32 %v238_v13, %v1270_v17  ;;  %v1319_v36 = vand.u32 4294901760, %v235_v26 }
  0x12   : > { %275 = vmatpush1.msra.mxu0 %v1239_v6  ;;  %v390_v31 = vsub.f32 %v1265_v15, %v1929_v22  ;;  %v397_v32 = vsub.f32 %v1268_v16, %v1928_v23  ;;  %v404_v33 = vsub.f32 %v1273_v18, %v1926_v24  ;;  %v1922_v40 = vand.u32 4294901760, %v1300_v30  ;;  %s224_s15 = scalar_lea.vmem %s1912_s5, %s1168_s10 }
  0x13   : > { %276 = vmatprep.subr.mxu0 %v1186_v3  ;;  %v411_v39 = vsub.f32 %v1280_v20, %v1925_v27  ;;  %v1330_v42 = vand.u32 4294901760, %v234_v34  ;;  %v1333_v43 = vsub.f32 %v237_v14, %v1289_v25  ;;  %v418_v45 = vsub.f32 %v1283_v21, %v1923_v29  ;;  %v245_v27 = vld [vmem:[%s1908_s1 + $0x80] sm:$0xff] }
  0x14   : > { %278 = vmatpush1.msra.mxu0 %v1251_v10  ;;  %v391_v37 = vand.u32 4294901760, %v390_v31  ;;  %v398_v38 = vand.u32 4294901760, %v397_v32  ;;  %v405_v44 = vand.u32 4294901760, %v404_v33  ;;  %v1921_v46 = vand.u32 4294901760, %v1316_v35 }
  0x15   : > { %279 = vmatprep.subr.mxu0 %v1186_v3  ;;  %v1350_v48 = vsub.f32 %v236_v19, %v1296_v28  ;;  %v1354_v49 = vand.u32 4294901760, %v233_v41  ;;  %v412_v50 = vand.u32 4294901760, %v411_v39  ;;  %v425_v51 = vsub.f32 %v1300_v30, %v1922_v40 }
  0x16   : > { %281 = vmatpush1.msra.mxu0 %v1253_v11  ;;  %392 = vmatpush1.msra.mxu1 %v391_v37  ;;  %v1919_v52 = vand.u32 4294901760, %v1333_v43  ;;  %v1365_v54 = vsub.f32 %v235_v26, %v1319_v36  ;;  %v1369_v55 = vand.u32 4294901760, %v232_v47  ;;  %v419_v56 = vand.u32 4294901760, %v418_v45  ;;  %v252_v26 = vld [vmem:[%s1908_s1 + $0xb8] sm:$0xff]  ;;  %v250_v45 = vld [vmem:[%s1908_s1 + $0xa8] sm:$0xff] }
  0x17   : > { %282 = vmatprep.subr.mxu0 %v1186_v3  ;;  %393 = vmatprep.subr.mxu1 %v1186_v3  ;;  %v432_v57 = vsub.f32 %v1316_v35, %v1921_v46  ;;  %v1918_v58 = vand.u32 4294901760, %v1350_v48  ;;  %v1383_v59 = vsub.f32 %v234_v34, %v1330_v42  ;;  %v1387_v60 = vand.u32 4294901760, %v231_v53  ;;  %v251_v34 = vld [vmem:[%s1908_s1 + $0xb0] sm:$0xff] }
  0x18   : > { %284 = vmatpush1.msra.mxu0 %v1255_v12  ;;  %399 = vmatpush1.msra.mxu1 %v398_v38  ;;  %v426_v62 = vand.u32 4294901760, %v425_v51  ;;  %v439_v63 = vsub.f32 %v1333_v43, %v1919_v52  ;;  %v1916_v0 = vand.u32 4294901760, %v1365_v54  ;;  %v1401_v2 = vsub.f32 %v233_v41, %v1354_v49  ;;  %v226_v51 = vld [vmem:[%s1437_s12 + $0x8] sm:$0xff] }
  0x19   : > { %285 = vmatprep.subr.mxu0 %v1186_v3  ;;  %400 = vmatprep.subr.mxu1 %v1186_v3  ;;  %v1406_v7 = vsub.f32 %v232_v47, %v1369_v55  ;;  %v433_v8 = vand.u32 4294901760, %v432_v57  ;;  %v446_v9 = vsub.f32 %v1350_v48, %v1918_v58  ;;  %v1413_v13 = vand.u32 4294901760, %v230_v61 }
  0x1a   : > { %287 = vmatpush1.msra.mxu0 %v1270_v17  ;;  %406 = vmatpush1.msra.mxu1 %v405_v44  ;;  %v1915_v14 = vand.u32 4294901760, %v1383_v59  ;;  %v1418_v19 = vand.u32 4294901760, %v229_v1  ;;  %v440_v31 = vand.u32 4294901760, %v439_v63  ;;  %v453_v32 = vsub.f32 %v1365_v54, %v1916_v0 }
  0x1b   : > { %288 = vmatprep.subr.mxu0 %v1186_v3  ;;  %407 = vmatprep.subr.mxu1 %v1186_v3  ;;  %v1913_v33 = vand.u32 4294901760, %v1401_v2  ;;  %v1432_v37 = vsub.f32 %v231_v53, %v1387_v60  ;;  %v1914_v38 = vand.u32 4294901760, %v1406_v7  ;;  %v447_v39 = vand.u32 4294901760, %v446_v9 }
  0x1c   : > { %290 = vmatpush1.msra.mxu0 %v1289_v25  ;;  %413 = vmatpush1.msra.mxu1 %v412_v50  ;;  %v460_v41 = vsub.f32 %v1383_v59, %v1915_v14  ;;  %v1446_v44 = vand.u32 4294901760, %v252_v26  ;;  %v1452_v47 = vsub.f32 %v230_v61, %v1413_v13  ;;  %v1456_v50 = vand.u32 4294901760, %v251_v34  ;;  %v249_v61 = vld [vmem:[%s1908_s1 + $0xa0] sm:$0xff] }
  0x1d   : > { %291 = vmatprep.subr.mxu0 %v1186_v3  ;;  %414 = vmatprep.subr.mxu1 %v1186_v3  ;;  %v454_v53 = vand.u32 4294901760, %v453_v32  ;;  %v1917_v57 = vand.u32 4294901760, %v1432_v37  ;;  %v474_v63 = vsub.f32 %v1406_v7, %v1914_v38  ;;  %v225_v38 = vld [vmem:[%s1437_s12] sm:$0xff]  ;;  %v1563_v23 = vand.u32 4294901760, %v245_v27 }
  0x1e   : > { %293 = vmatpush1.msra.mxu0 %v1296_v28  ;;  %420 = vmatpush1.msra.mxu1 %v419_v56  ;;  %v467_v56 = vsub.f32 %v1401_v2, %v1913_v33  ;;  %v461_v9 = vand.u32 4294901760, %v460_v41  ;;  %v1480_v32 = vsub.f32 %v252_v26, %v1446_v44  ;;  %v1485_v33 = vand.u32 4294901760, %v249_v61  ;;  %v248_v41 = vld [vmem:[%s1908_s1 + $0x98] sm:$0xff] }
  0x1f   : > { %294 = vmatprep.subr.mxu0 %v1186_v3  ;;  %421 = vmatprep.subr.mxu1 %v1186_v3  ;;  %v475_v0 = vand.u32 4294901760, %v474_v63  ;;  %v1514_v52 = vand.u32 4294901760, %v225_v38  ;;  %v1518_v63 = vand.u32 4294901760, %v248_v41  ;;  %vm1090_vm1 = vcmask 1040384  }
  0x20   : > { %296 = vmatpush1.msra.mxu0 %v1319_v36  ;;  %427 = vmatpush1.msra.mxu1 %v426_v62  ;;  %v1468_v62 = vsub.f32 %v229_v1, %v1418_v19  ;;  %v262_v1 = vsel %vm260_vm0, %v226_v51, 0  ;;  %1937 = vst [vmem:[#allocation2_spill] sm:$0xff] %v1485_v33  ;;  %v468_v14 = vand.u32 4294901760, %v467_v56  ;;  %v1497_v51 = vsub.f32 %v251_v34, %v1456_v50  ;;  %v247_v34 = vld [vmem:[%s1908_s1 + $0x90] sm:$0xff] }
  0x21   : > { %297 = vmatprep.subr.mxu0 %v1186_v3  ;;  %428 = vmatprep.subr.mxu1 %v1186_v3  ;;  %1938 = vst [vmem:[#allocation3_spill] sm:$0xff] %v1518_v63  ;;  %v1529_v40 = vsub.f32 %v249_v61, %v1485_v33  ;;  %v1533_v29 = vand.u32 4294901760, %v247_v34  ;;  %v1547_v24 = vsub.f32 %v225_v38, %v1514_v52 }
  0x22   : > { %299 = vmatpush1.msra.mxu0 %v1330_v42  ;;  %434 = vmatpush1.msra.mxu1 %v433_v8  ;;  %v1475_v8 = vand.u32 4294901760, %v250_v45  ;;  %v1924_v26 = vand.u32 4294901760, %v1468_v62  ;;  %v1930_v46 = vand.u32 4294901760, %v1497_v51 }
  0x23   : > { %300 = vmatprep.subr.mxu0 %v1186_v3  ;;  %435 = vmatprep.subr.mxu1 %v1186_v3 }
  0x24   : > { %302 = vmatpush1.msra.mxu0 %v1354_v49  ;;  %441 = vmatpush1.msra.mxu1 %v440_v31  ;;  %v1920_v31 = vand.u32 4294901760, %v1452_v47  ;;  %v1512_v58 = vsub.f32 %v250_v45, %v1475_v8  ;;  %v246_v45 = vld [vmem:[%s1908_s1 + $0x88] sm:$0xff] }
  0x25   : > { %303 = vmatprep.subr.mxu0 %v1186_v3  ;;  %442 = vmatprep.subr.mxu1 %v1186_v3 }
  0x26   : > { %305 = vmatpush1.msra.mxu0 %v1369_v55  ;;  %448 = vmatpush1.msra.mxu1 %v447_v39  ;;  %v481_v39 = vsub.f32 %v1432_v37, %v1917_v57  ;;  %v488_v56 = vsub.f32 %v1452_v47, %v1920_v31  ;;  %v1927_v57 = vand.u32 4294901760, %v1480_v32  ;;  %v495_v31 = vsub.f32 %v1468_v62, %v1924_v26 }
  0x27   : > { %306 = vmatprep.subr.mxu0 %v1186_v3  ;;  %449 = vmatprep.subr.mxu1 %v1186_v3  ;;  %v1931_v61 = vand.u32 4294901760, %v1512_v58 }
  0x28   : > { %308 = vmatpush1.msra.mxu0 %v1387_v60  ;;  %455 = vmatpush1.msra.mxu1 %v454_v53  ;;  %v1501_v53 = vand.u32 4294901760, %v262_v1  ;;  %v518_v26 = vsub.f32 %v1480_v32, %v1927_v57  ;;  %v525_v57 = vsub.f32 %v1497_v51, %v1930_v46 }
  0x29   : > { %309 = vmatprep.subr.mxu0 %v1186_v3  ;;  %456 = vmatprep.subr.mxu1 %v1186_v3 }
  0x2a   : > { %311 = vmatpush1.msra.mxu0 %v1413_v13  ;;  %462 = vmatpush1.msra.mxu1 %v461_v9  ;;  %v482_v9 = vand.u32 4294901760, %v481_v39  ;;  %v489_v39 = vand.u32 4294901760, %v488_v56  ;;  %v496_v56 = vand.u32 4294901760, %v495_v31  ;;  %v519_v31 = vand.u32 4294901760, %v518_v26 }
  0x2b   : > { %312 = vmatprep.subr.mxu0 %v1186_v3  ;;  %463 = vmatprep.subr.mxu1 %v1186_v3  ;;  %v1939_v26 = vand.u32 4294901760, %v1529_v40 }
  0x2c   : > { %314 = vmatpush1.msra.mxu0 %v1418_v19  ;;  %469 = vmatpush1.msra.mxu1 %v468_v14  ;;  %v1536_v14 = vsub.f32 %v262_v1, %v1501_v53  ;;  %v1551_v1 = vand.u32 4294901760, %v246_v45 }
  0x2d   : > { %331 = vmatprep.subr.mxu0 %v1186_v3  ;;  %470 = vmatprep.subr.mxu1 %v1186_v3 }
  0x2e   : > { %333 = vmatpush2.msra.mxu0 %v1446_v44  ;;  %476 = vmatpush1.msra.mxu1 %v475_v0  ;;  %v1554_v0 = vsub.f32 %v248_v41, %v1518_v63  ;;  %v1567_v41 = vsub.f32 %v247_v34, %v1533_v29  ;;  %v1578_v22 = vsub.f32 %v246_v45, %v1551_v1  ;;  %v526_v34 = vand.u32 4294901760, %v525_v57 }
  0x2f   : > { %334 = vmatprep.subr.mxu0 %v1186_v3  ;;  %477 = vmatprep.subr.mxu1 %v1186_v3  ;;  %v1591_v45 = vsub.f32 %v245_v27, %v1563_v23 }
  0x30   : > { %336 = vmatpush2.msra.mxu0 %v1456_v50  ;;  %483 = vmatpush1.msra.mxu1 %v482_v9  ;;  %v532_v9 = vsub.f32 %v1512_v58, %v1931_v61  ;;  %v1940_v61 = vand.u32 4294901760, %v1536_v14  ;;  %v559_v38 = vand.u32 4294901760, %v1578_v22 }
  0x31   : > { %337 = vmatprep.subr.mxu0 %v1186_v3  ;;  %484 = vmatprep.subr.mxu1 %v1186_v3 }
  0x32   : > { %339 = vmatpush2.msra.mxu0 %v1475_v8  ;;  %490 = vmatpush1.msra.mxu1 %v489_v39  ;;  %v539_v39 = vsub.f32 %v1529_v40, %v1939_v26  ;;  %v358_v46 = vsub.f32 %v1536_v14, %v1940_v61  ;;  %v533_v57 = vand.u32 4294901760, %v532_v9  ;;  %v1943_v9 = vand.u32 4294901760, %v1567_v41 }
  0x33   : > { %340 = vmatprep.subr.mxu0 %v1186_v3  ;;  %491 = vmatprep.subr.mxu1 %v1186_v3 }
  0x34   : > { %342 = vmatpush2.msra.mxu0 %v1485_v33  ;;  %497 = vmatpush1.msra.mxu1 %v496_v56  ;;  %v1941_v56 = vand.u32 4294901760, %v1547_v24  ;;  %v1942_v33 = vand.u32 4294901760, %v1554_v0  ;;  %v540_v27 = vand.u32 4294901760, %v539_v39  ;;  %v560_v39 = vsub.f32 %v1578_v22, %v559_v38 }
  0x35   : > { %343 = vmatprep.subr.mxu0 %v1186_v3  ;;  %514 = vmatprep.subr.mxu1 %v1186_v3 }
  0x36   : > { %345 = vmatpush2.msra.mxu0 %v1518_v63  ;;  %520 = vmatpush2.msra.mxu1 %v519_v31  ;;  %v364_v26 = vsub.f32 %v1547_v24, %v1941_v56  ;;  %v546_v61 = vsub.f32 %v1554_v0, %v1942_v33  ;;  %v359_v31 = vand.u32 4294901760, %v358_v46  ;;  %v553_v56 = vsub.f32 %v1567_v41, %v1943_v9  ;;  %v227_v9 = vld [vmem:[%s1437_s12 + $0x10] sm:$0xff] }
  0x37   : > { %346 = vmatprep.subr.mxu0 %v1186_v3  ;;  %521 = vmatprep.subr.mxu1 %v1186_v3  ;;  %v566_v63 = vand.u32 4294901760, %v1591_v45 }
  0x38   : > { %348 = vmatpush2.msra.mxu0 %v1533_v29  ;;  %527 = vmatpush2.msra.mxu1 %v526_v34  ;;  %v365_v33 = vand.u32 4294901760, %v364_v26  ;;  %v547_v34 = vand.u32 4294901760, %v546_v61  ;;  %v554_v46 = vand.u32 4294901760, %v553_v56  ;;  %v561_v26 = vand.u32 4294901760, %v560_v39 }
  0x39   : > { %349 = vmatprep.subr.mxu0 %v1186_v3  ;;  %528 = vmatprep.subr.mxu1 %v1186_v3 }
  0x3a   : > { %351 = vmatpush2.msra.mxu0 %v1551_v1  ;;  %534 = vmatpush2.msra.mxu1 %v533_v57  ;;  %v567_v57 = vsub.f32 %v1591_v45, %v566_v63 }
  0x3b   : > { %352 = vmatprep.subr.mxu0 %v1186_v3  ;;  %535 = vmatprep.subr.mxu1 %v1186_v3 }
  0x3c   : > { %354 = vmatpush2.msra.mxu0 %v1563_v23  ;;  %541 = vmatpush2.msra.mxu1 %v540_v27  ;;  %v568_v61 = vand.u32 4294901760, %v567_v57  ;;  %v228_v27 = vld [vmem:[%s1437_s12 + $0x18] sm:$0xff] }
  0x3d   : > { %360 = vmatprep.mubr.f32.mxu0 %v359_v31  ;;  %542 = vmatprep.subr.mxu1 %v1186_v3  ;;  %v265_v31 = vsel %vm260_vm0, %v228_v27, 0 }
  0x3e   : > { %585 = vmatprep.subr.mxu0 %v1186_v3  ;;  %366 = vmatmul.mubr.f32.vlgmr.msra.gmra.mxu0 %v365_v33  ;;  %v1667_v56 = vand.u32 4294901760, %v265_v31  ;;  %v1673_v33 = vand.u32 4294901760, %v227_v9 }
  0x3f   : > { %548 = vmatpush2.msra.mxu1 %v547_v34  ;;  %588 = vmatpush1.msra.mxu0 %v1265_v15 }
  0x40   : > { %549 = vmatprep.subr.mxu1 %v1186_v3  ;;  %589 = vmatprep.subr.mxu0 %v1186_v3  ;;  %v1682_v34 = vsub.f32 %v265_v31, %v1667_v56  ;;  %v1687_v39 = vsub.f32 %v227_v9, %v1673_v33  ;;  %v1944_v9 = vld [vmem:[#allocation2_spill] sm:$0xff] }
  0x41   : > { %555 = vmatpush2.msra.mxu1 %v554_v46  ;;  %592 = vmatpush1.msra.mxu0 %v1268_v16 }
  0x42   : > { %556 = vmatprep.subr.mxu1 %v1186_v3  ;;  %593 = vmatprep.subr.mxu0 %v1186_v3  ;;  %v372_v46 = vand.u32 4294901760, %v1682_v34  ;;  %v378_v57 = vand.u32 4294901760, %v1687_v39 }
  0x43   : > { %562 = vmatpush2.msra.mxu1 %v561_v26  ;;  %596 = vmatpush1.msra.mxu0 %v1273_v18 }
  0x44   : > { %563 = vmatprep.subr.mxu1 %v1186_v3  ;;  %597 = vmatprep.subr.mxu0 %v1186_v3  ;;  %v373_v26 = vsub.f32 %v1682_v34, %v372_v46 }
  0x45   : > { %569 = vmatpush2.msra.mxu1 %v568_v61  ;;  %571 = vmatprep.mubr.f32.mxu1 %v1501_v53  ;;  %v379_v61 = vsub.f32 %v1687_v39, %v378_v57 }
  0x46   : > { %600 = vmatpush1.msra.mxu0 %v1280_v20  ;;  %573 = vmatmul.mubr.f32.vlgmr.msra.gmra.mxu1 %v1514_v52  ;;  %v374_v27 = vand.u32 4294901760, %v373_v26  ;;  %v1945_v26 = vld [vmem:[#allocation3_spill] sm:$0xff] }
  0x47   : > { %601 = vmatprep.subr.mxu0 %v1186_v3  ;;  %716 = vmatprep.subr.mxu1 %v1186_v3  ;;  %v380_v31 = vand.u32 4294901760, %v379_v61  ;;  %v1946_v61 = vand.u32 4294901760, %v1265_v15  ;;  %v1948_v15 = vand.u32 4294901760, %v1273_v18  ;;  %v1952_v18 = vand.u32 4294901760, %v1283_v21 }
  0x48   : > { %604 = vmatpush1.msra.mxu0 %v1283_v21  ;;  %718 = vmatpush1.msra.mxu1 %v1235_v4  ;;  %v1955_v21 = vand.u32 4294901760, %v1333_v43 }
  0x49   : > { %605 = vmatprep.subr.mxu0 %v1186_v3  ;;  %719 = vmatprep.subr.mxu1 %v1186_v3 }
  0x4a   : > { %608 = vmatpush1.msra.mxu0 %v1300_v30  ;;  %721 = vmatpush1.msra.mxu1 %v1237_v5 }
  0x4b   : > { %609 = vmatprep.subr.mxu0 %v1186_v3  ;;  %722 = vmatprep.subr.mxu1 %v1186_v3 }
  0x4c   : > { %612 = vmatpush1.msra.mxu0 %v1316_v35  ;;  %724 = vmatpush1.msra.mxu1 %v1239_v6 }
  0x4d   : > { %613 = vmatprep.subr.mxu0 %v1186_v3  ;;  %725 = vmatprep.subr.mxu1 %v1186_v3 }
  0x4e   : > { %616 = vmatpush1.msra.mxu0 %v1333_v43  ;;  %727 = vmatpush1.msra.mxu1 %v1251_v10  ;;  %v1969_v43 = vand.u32 4294901760, %v1567_v41 }
  0x4f   : > { %617 = vmatprep.subr.mxu0 %v1186_v3  ;;  %728 = vmatprep.subr.mxu1 %v1186_v3 }
  0x50   : > { %620 = vmatpush1.msra.mxu0 %v1350_v48  ;;  %730 = vmatpush1.msra.mxu1 %v1253_v11 }
  0x51   : > { %621 = vmatprep.subr.mxu0 %v1186_v3  ;;  %731 = vmatprep.subr.mxu1 %v1186_v3 }
  0x52   : > { %624 = vmatpush1.msra.mxu0 %v1365_v54  ;;  %733 = vmatpush1.msra.mxu1 %v1255_v12 }
  0x53   : > { %625 = vmatprep.subr.mxu0 %v1186_v3  ;;  %734 = vmatprep.subr.mxu1 %v1186_v3 }
  0x54   : > { %628 = vmatpush1.msra.mxu0 %v1383_v59  ;;  %736 = vmatpush1.msra.mxu1 %v1270_v17 }
  0x55   : > { %629 = vmatprep.subr.mxu0 %v1186_v3  ;;  %737 = vmatprep.subr.mxu1 %v1186_v3 }
  0x56   : > { %632 = vmatpush1.msra.mxu0 %v1401_v2  ;;  %739 = vmatpush1.msra.mxu1 %v1289_v25 }
  0x57   : > { %633 = vmatprep.subr.mxu0 %v1186_v3  ;;  %740 = vmatprep.subr.mxu1 %v1186_v3 }
  0x58   : > { %636 = vmatpush1.msra.mxu0 %v1406_v7  ;;  %742 = vmatpush1.msra.mxu1 %v1296_v28 }
  0x59   : > { %637 = vmatprep.subr.mxu0 %v1186_v3  ;;  %743 = vmatprep.subr.mxu1 %v1186_v3 }
  0x5a   : > { %640 = vmatpush1.msra.mxu0 %v1432_v37  ;;  %745 = vmatpush1.msra.mxu1 %v1319_v36 }
  0x5b   : > { %641 = vmatprep.subr.mxu0 %v1186_v3  ;;  %746 = vmatprep.subr.mxu1 %v1186_v3 }
  0x5c   : > { %644 = vmatpush1.msra.mxu0 %v1452_v47  ;;  %748 = vmatpush1.msra.mxu1 %v1330_v42 }
  0x5d   : > { %645 = vmatprep.subr.mxu0 %v1186_v3  ;;  %749 = vmatprep.subr.mxu1 %v1186_v3 }
  0x5e   : > { %648 = vmatpush1.msra.mxu0 %v1468_v62  ;;  %751 = vmatpush1.msra.mxu1 %v1354_v49 }
  0x5f   : > { %665 = vmatprep.subr.mxu0 %v1186_v3  ;;  %752 = vmatprep.subr.mxu1 %v1186_v3 }
  0x60   : > { %668 = vmatpush2.msra.mxu0 %v1480_v32  ;;  %754 = vmatpush1.msra.mxu1 %v1369_v55 }
  0x61   : > { %669 = vmatprep.subr.mxu0 %v1186_v3  ;;  %755 = vmatprep.subr.mxu1 %v1186_v3 }
  0x62   : > { %672 = vmatpush2.msra.mxu0 %v1497_v51  ;;  %757 = vmatpush1.msra.mxu1 %v1387_v60 }
  0x63   : > { %673 = vmatprep.subr.mxu0 %v1186_v3  ;;  %758 = vmatprep.subr.mxu1 %v1186_v3 }
  0x64   : > { %676 = vmatpush2.msra.mxu0 %v1512_v58  ;;  %760 = vmatpush1.msra.mxu1 %v1413_v13 }
  0x65   : > { %677 = vmatprep.subr.mxu0 %v1186_v3  ;;  %761 = vmatprep.subr.mxu1 %v1186_v3 }
  0x66   : > { %680 = vmatpush2.msra.mxu0 %v1529_v40  ;;  %763 = vmatpush1.msra.mxu1 %v1418_v19 }
  0x67   : > { %681 = vmatprep.subr.mxu0 %v1186_v3  ;;  %780 = vmatprep.subr.mxu1 %v1186_v3 }
  0x68   : > { %684 = vmatpush2.msra.mxu0 %v1554_v0  ;;  %782 = vmatpush2.msra.mxu1 %v1446_v44 }
  0x69   : > { %685 = vmatprep.subr.mxu0 %v1186_v3  ;;  %783 = vmatprep.subr.mxu1 %v1186_v3 }
  0x6a   : > { %375 = vmatprep.mubr.f32.mxu0 %v374_v27  ;;  %688 = vmatpush2.msra.mxu0 %v1567_v41  ;;  %v1947_v27 = vand.u32 4294901760, %v1268_v16  ;;  %v1949_v16 = vand.u32 4294901760, %v1536_v14  ;;  %v1082_v41 = vld [vmem:[%s1911_s4] sm:$0x1] }
  0x6b   : > { %785 = vmatpush2.msra.mxu1 %v1456_v50  ;;  %381 = vmatmul.mubr.f32.gmra.mxu0 %v380_v31  ;;  %v1950_v31 = vand.u32 4294901760, %v1280_v20  ;;  %v1953_v20 = vand.u32 4294901760, %v1300_v30  ;;  %v1965_v30 = vand.u32 4294901760, %v1497_v51 }
  0x6c   : > { %689 = vmatprep.subr.mxu0 %v1186_v3  ;;  %786 = vmatprep.subr.mxu1 %v1186_v3 }
  0x6d   : > { %692 = vmatpush2.msra.mxu0 %v1578_v22  ;;  %788 = vmatpush2.msra.mxu1 %v1475_v8 }
  0x6e   : > { %693 = vmatprep.subr.mxu0 %v1186_v3  ;;  %789 = vmatprep.subr.mxu1 %v1186_v3 }
  0x6f   : > { %696 = vmatpush2.msra.mxu0 %v1591_v45  ;;  %699 = vmatprep.mubr.f32.mxu0 %v1536_v14  ;;  %v1084_v45 = vld [vmem:[%s1911_s4 + $0x1] sm:$0xff] }
  0x70   : > { %791 = vmatpush2.msra.mxu1 %v1944_v9  ;;  %702 = vmatmul.mubr.f32.vlgmr.msra.gmra.mxu0 %v1547_v24 }
  0x71   : > { %792 = vmatprep.subr.mxu1 %v1186_v3  ;;  %827 = vmatprep.subr.mxu0 %v1186_v3 }
  0x72   : > { %794 = vmatpush2.msra.mxu1 %v1945_v26  ;;  %831 = vmatpush1.msra.mxu0 %v1946_v61  ;;  %v1951_v61 = vand.u32 4294901760, %v1547_v24  ;;  %v1962_v24 = vand.u32 4294901760, %v1452_v47 }
  0x73   : > { %578 = vmatprep.mubr.f32.mxu1 %v1667_v56  ;;  %795 = vmatprep.subr.mxu1 %v1186_v3 }
  0x74   : > { %832 = vmatprep.subr.mxu0 %v1186_v3  ;;  %580 = vmatmul.mubr.f32.gmra.mxu1 %v1673_v33 }
  0x75   : > { %797 = vmatpush2.msra.mxu1 %v1533_v29  ;;  %836 = vmatpush1.msra.mxu0 %v1947_v27 }
  0x76   : > { %798 = vmatprep.subr.mxu1 %v1186_v3  ;;  %837 = vmatprep.subr.mxu0 %v1186_v3 }
  0x77   : > { %800 = vmatpush2.msra.mxu1 %v1551_v1  ;;  %841 = vmatpush1.msra.mxu0 %v1948_v15 }
  0x78   : > { %708 = vmatprep.mubr.f32.mxu0 %v1682_v34  ;;  %801 = vmatprep.subr.mxu1 %v1186_v3 }
  0x79   : > { %842 = vmatprep.subr.mxu0 %v1186_v3  ;;  %711 = vmatmul.mubr.f32.gmra.mxu0 %v1687_v39 }
  0x7a   : > { %803 = vmatpush2.msra.mxu1 %v1563_v23  ;;  %807 = vmatprep.mubr.f32.mxu1 %v1949_v16 }
  0x7b   : > { %846 = vmatpush1.msra.mxu0 %v1950_v31  ;;  %811 = vmatmul.mubr.f32.vlgmr.msra.gmra.mxu1 %v1951_v61 }
  0x7c   : > { %847 = vmatprep.subr.mxu0 %v1186_v3  ;;  %978 = vmatprep.subr.mxu1 %v1186_v3 }
  0x7d   : > { %851 = vmatpush1.msra.mxu0 %v1952_v18  ;;  %980 = vmatpush1.msra.mxu1 %v1235_v4  ;;  %v1954_v4 = vand.u32 4294901760, %v1316_v35  ;;  %v1966_v35 = vand.u32 4294901760, %v1512_v58 }
  0x7e   : > { %852 = vmatprep.subr.mxu0 %v1186_v3  ;;  %981 = vmatprep.subr.mxu1 %v1186_v3 }
  0x7f   : > { %818 = vmatprep.mubr.f32.mxu1 %v372_v46  ;;  %856 = vmatpush1.msra.mxu0 %v1953_v20 }
  0x80   : > { %983 = vmatpush1.msra.mxu1 %v1237_v5  ;;  %857 = vmatprep.subr.mxu0 %v1186_v3  ;;  %v1956_v5 = vand.u32 4294901760, %v1350_v48 }
  0x81   : > { %822 = vmatmul.mubr.f32.gmra.mxu1 %v378_v57  ;;  %984 = vmatprep.subr.mxu1 %v1186_v3 }
  0x82   : > { %861 = vmatpush1.msra.mxu0 %v1954_v4  ;;  %986 = vmatpush1.msra.mxu1 %v1239_v6  ;;  %v1957_v6 = vand.u32 4294901760, %v1365_v54 }
  0x83   : > { %862 = vmatprep.subr.mxu0 %v1186_v3  ;;  %987 = vmatprep.subr.mxu1 %v1186_v3 }
  0x84   : > { %866 = vmatpush1.msra.mxu0 %v1955_v21  ;;  %989 = vmatpush1.msra.mxu1 %v1251_v10  ;;  %v1958_v10 = vand.u32 4294901760, %v1383_v59 }
  0x85   : > { %867 = vmatprep.subr.mxu0 %v1186_v3  ;;  %990 = vmatprep.subr.mxu1 %v1186_v3 }
  0x86   : > { %871 = vmatpush1.msra.mxu0 %v1956_v5  ;;  %992 = vmatpush1.msra.mxu1 %v1253_v11  ;;  %v1959_v11 = vand.u32 4294901760, %v1401_v2 }
  0x87   : > { %872 = vmatprep.subr.mxu0 %v1186_v3  ;;  %993 = vmatprep.subr.mxu1 %v1186_v3 }
  0x88   : > { %876 = vmatpush1.msra.mxu0 %v1957_v6  ;;  %995 = vmatpush1.msra.mxu1 %v1255_v12  ;;  %v1960_v12 = vand.u32 4294901760, %v1406_v7 }
  0x89   : > { %877 = vmatprep.subr.mxu0 %v1186_v3  ;;  %996 = vmatprep.subr.mxu1 %v1186_v3 }
  0x8a   : > { %881 = vmatpush1.msra.mxu0 %v1958_v10  ;;  %998 = vmatpush1.msra.mxu1 %v1270_v17  ;;  %v1961_v17 = vand.u32 4294901760, %v1432_v37 }
  0x8b   : > { %882 = vmatprep.subr.mxu0 %v1186_v3  ;;  %999 = vmatprep.subr.mxu1 %v1186_v3 }
  0x8c   : > { %886 = vmatpush1.msra.mxu0 %v1959_v11  ;;  %1001 = vmatpush1.msra.mxu1 %v1289_v25  ;;  %v1963_v25 = vand.u32 4294901760, %v1468_v62 }
  0x8d   : > { %887 = vmatprep.subr.mxu0 %v1186_v3  ;;  %1002 = vmatprep.subr.mxu1 %v1186_v3 }
  0x8e   : > { %891 = vmatpush1.msra.mxu0 %v1960_v12  ;;  %1004 = vmatpush1.msra.mxu1 %v1296_v28  ;;  %v1964_v28 = vand.u32 4294901760, %v1480_v32 }
  0x8f   : > { %892 = vmatprep.subr.mxu0 %v1186_v3  ;;  %1005 = vmatprep.subr.mxu1 %v1186_v3 }
  0x90   : > { %896 = vmatpush1.msra.mxu0 %v1961_v17  ;;  %1007 = vmatpush1.msra.mxu1 %v1319_v36  ;;  %v1967_v36 = vand.u32 4294901760, %v1529_v40 }
  0x91   : > { %897 = vmatprep.subr.mxu0 %v1186_v3  ;;  %1008 = vmatprep.subr.mxu1 %v1186_v3 }
  0x92   : > { %901 = vmatpush1.msra.mxu0 %v1962_v24  ;;  %1010 = vmatpush1.msra.mxu1 %v1330_v42  ;;  %v1968_v42 = vand.u32 4294901760, %v1554_v0 }
  0x93   : > { %902 = vmatprep.subr.mxu0 %v1186_v3  ;;  %1011 = vmatprep.subr.mxu1 %v1186_v3 }
  0x94   : > { %906 = vmatpush1.msra.mxu0 %v1963_v25  ;;  %1013 = vmatpush1.msra.mxu1 %v1354_v49 }
  0x95   : > { %923 = vmatprep.subr.mxu0 %v1186_v3  ;;  %1014 = vmatprep.subr.mxu1 %v1186_v3 }
  0x96   : > { %927 = vmatpush2.msra.mxu0 %v1964_v28  ;;  %1016 = vmatpush1.msra.mxu1 %v1369_v55 }
  0x97   : > { %928 = vmatprep.subr.mxu0 %v1186_v3  ;;  %1017 = vmatprep.subr.mxu1 %v1186_v3 }
  0x98   : > { %932 = vmatpush2.msra.mxu0 %v1965_v30  ;;  %1019 = vmatpush1.msra.mxu1 %v1387_v60 }
  0x99   : > { %933 = vmatprep.subr.mxu0 %v1186_v3  ;;  %1020 = vmatprep.subr.mxu1 %v1186_v3 }
  0x9a   : > { %937 = vmatpush2.msra.mxu0 %v1966_v35  ;;  %1022 = vmatpush1.msra.mxu1 %v1413_v13 }
  0x9b   : > { %938 = vmatprep.subr.mxu0 %v1186_v3  ;;  %1023 = vmatprep.subr.mxu1 %v1186_v3 }
  0x9c   : > { %942 = vmatpush2.msra.mxu0 %v1967_v36  ;;  %1025 = vmatpush1.msra.mxu1 %v1418_v19 }
  0x9d   : > { %943 = vmatprep.subr.mxu0 %v1186_v3  ;;  %1042 = vmatprep.subr.mxu1 %v1186_v3 }
  0x9e   : > { %947 = vmatpush2.msra.mxu0 %v1968_v42  ;;  %1044 = vmatpush2.msra.mxu1 %v1446_v44 }
  0x9f   : > { %948 = vmatprep.subr.mxu0 %v1186_v3  ;;  %1045 = vmatprep.subr.mxu1 %v1186_v3 }
  0xa0   : > { %952 = vmatpush2.msra.mxu0 %v1969_v43  ;;  %1047 = vmatpush2.msra.mxu1 %v1456_v50 }
  0xa1   : > { %953 = vmatprep.subr.mxu0 %v1186_v3  ;;  %1048 = vmatprep.subr.mxu1 %v1186_v3 }
  0xa2   : > { %957 = vmatpush2.msra.mxu0 %v559_v38  ;;  %1050 = vmatpush2.msra.mxu1 %v1475_v8  ;;  %v1081_v38 = vld [vmem:[%s1910_s3] sm:$0x1] }
  0xa3   : > { %958 = vmatprep.subr.mxu0 %v1186_v3  ;;  %1051 = vmatprep.subr.mxu1 %v1186_v3  ;;  %v1083_v46 = vadd.f32 %v1082_v41, %v1081_v38 }
  0xa4   : > { %962 = vmatpush2.msra.mxu0 %v566_v63  ;;  %964 = vmatprep.mubr.f32.mxu0 %v1501_v53 }
  0xa5   : > { %1053 = vmatpush2.msra.mxu1 %v1944_v9  ;;  %966 = vmatmul.mubr.f32.vlgmr.msra.gmra.mxu0 %v1514_v52 }
  0xa6   : > { %1054 = vmatprep.subr.mxu1 %v1186_v3  ;;  %971 = vmatprep.mubr.f32.mxu0 %v1667_v56 }
  0xa7   : > { %1056 = vmatpush2.msra.mxu1 %v1945_v26  ;;  %1067 = vmatprep.mubr.f32.mxu1 %v1501_v53  ;;  %v1085_v26 = vld [vmem:[%s1911_s4 + $0x9] sm:$0xff] }
  0xa8   : > { %1057 = vmatprep.subr.mxu1 %v1186_v3 }
  0xa9   : > { %1059 = vmatpush2.msra.mxu1 %v1533_v29  ;;  %973 = vmatmul.mubr.f32.gmra.mxu0 %v1673_v33  ;;  %v1164_v29 = vld [vmem:[%s1909_s2] ss:$0 sm:$0xff] }
  0xaa   : > { %1060 = vmatprep.subr.mxu1 %v1186_v3 }
  0xab   : > { %1062 = vmatpush2.msra.mxu1 %v1551_v1 }
  0xac   : > { %1063 = vmatprep.subr.mxu1 %v1186_v3 }
  0xad   : > { %1065 = vmatpush2.msra.mxu1 %v1563_v23 }
  0xae   : > { %1069 = vmatmul.mubr.f32.vlgmr.msra.gmra.mxu1 %v1514_v52 }
  0xaf   : > { %1074 = vmatprep.mubr.f32.mxu1 %v1667_v56 }
  0xb2   : > { %1076 = vmatmul.mubr.f32.gmra.mxu1 %v1673_v33 }
  0xfe   : > { %v367_v22 = vpop.f32.mrf.mxu0 }
  0xff   : > { %v368_v48 = vadd.f32 %v1164_v29, %v367_v22 }
 0x100   : > { %v369_v40 = vpop.f32.mrf.mxu0 }
 0x106   : > { %v574_v49 = vpop.f32.mrf.mxu1 }
 0x107   : > { %v575_v54 = vadd.f32 %v574_v49, %v368_v48 }
 0x108   : > { %v576_v55 = vpop.f32.mrf.mxu1 }
 0x12b   : > { %v382_v58 = vpop.f32.mrf.mxu0 }
 0x12c   : > { %v383_v47 = vadd.f32 %v1164_v29, %v382_v58 }
 0x12d   : > { %v384_v3 = vpop.f32.mrf.mxu0 }
 0x130   : > { %v703_v59 = vpop.f32.mrf.mxu0 }
 0x131   : > { %v704_v8 = vadd.f32 %v703_v59, %v575_v54 }
 0x132   : > { %v705_v23 = vpop.f32.mrf.mxu0 }
 0x134   : > { %v581_v60 = vpop.f32.mrf.mxu1 }
 0x135   : > { %v582_v32 = vadd.f32 %v581_v60, %v383_v47 }
 0x136   : > { %v583_v52 = vpop.f32.mrf.mxu1 }
 0x139   : > { %v712_v2 = vpop.f32.mrf.mxu0 }
 0x13a   : > { %v713_v14 = vadd.f32 %v712_v2, %v582_v32 }
 0x13b   : > { %v812_v7 = vpop.f32.mrf.mxu1  ;;  %v714_v13 = vpop.f32.mrf.mxu0 }
 0x13c   : > { %v813_v53 = vadd.f32 %v812_v7, %v704_v8 }
 0x13d   : > { %v814_v19 = vpop.f32.mrf.mxu1 }
 0x141   : > { %v823_v37 = vpop.f32.mrf.mxu1 }
 0x142   : > { %v824_v56 = vadd.f32 %v823_v37, %v713_v14 }
 0x143   : > { %v825_v44 = vpop.f32.mrf.mxu1 }
 0x165   : > { %v967_v50 = vpop.f32.mrf.mxu0 }
 0x166   : > { %v968_v1 = vadd.f32 %v967_v50, %v813_v53 }
 0x167   : > { %v969_v62 = vpop.f32.mrf.mxu0 }
 0x169   : > { %v974_v51 = vpop.f32.mrf.mxu0 }
 0x16a   : > { %v975_v39 = vadd.f32 %v974_v51, %v824_v56 }
 0x16b   : > { %v976_v63 = vpop.f32.mrf.mxu0 }
 0x16e   : > { %v1070_v0 = vpop.f32.mrf.mxu1 }
 0x16f   : > { %v1071_v33 = vadd.f32 %v1070_v0, %v968_v1 }
 0x170   : > { %v1072_v34 = vpop.f32.mrf.mxu1 }
 0x171   : > { %v1086_v57 = vadd.f32 %v1084_v45, %v1071_v33 }
 0x172   : > { %v1077_v9 = vpop.f32.mrf.mxu1 }
 0x173   : > { %v1091_v27 = vrot.slane %v1086_v57, 7  ;;  %v1078_v15 = vadd.f32 %v1077_v9, %v975_v39 }
 0x174   : > { %v1079_v16 = vpop.f32.mrf.mxu1 }
 0x175   : > { %v1097_v31 = vsel %vm1090_vm1, %v1083_v46, %v1091_v27  ;;  %v1087_v61 = vadd.f32 %v1085_v26, %v1078_v15 }
 0x176   : > { %1098 = vst [vmem:[%s224_s15] sm:$0xff] %v1097_v31 }
 0x177   : > { %v1092_v18 = vrot.slane %v1087_v61, 7 }
 0x179   : > { %v1093_v20 = vsel %vm1090_vm1, %v1091_v27, %v1092_v18  ;;  %1100 = vst [vmem:[%s224_s15 + $0x10] sm:$0x1] %v1092_v18 }
 0x17a   : > { %1099 = vst [vmem:[%s224_s15 + $0x8] sm:$0xff] %v1093_v20 }
 0x17b PF: > { %s15_s18 = sadd.s32 1, %s1184_s18  }
 0x17c   : > { %p12_p4 = scmp.ge.s32.totalorder %s15_s18, 4  }
 0x17e   :  { %14 = sbr.rel (!%p12_p4) target bundleno = 1 (0x1), region = 70 }

// kernel: vision_encoder_forward.4
= control target key start
LH: loop header
LB: loop body
LE: loop exit
PB: predicated region body
PF: predicated region fallthrough
CT: control target
= control target key end

     0   :  { %s12245_s18 = smov 0   ;;  %s16449_s0 = inlined_call_operand.vmem [shape: f32[2,17,128], index: 0, kind: input, shape index: {}]   ;;  %s16450_s1 = inlined_call_operand.vmem [shape: f32[1,128], index: 1, kind: input, shape index: {}]   ;;  %s16451_s2 = inlined_call_operand.vmem [shape: f32[1,128], index: 2, kind: input, shape index: {}]   ;;  %s16452_s3 = inlined_call_operand.vmem [shape: f32[128,384], index: 3, kind: input, shape index: {}]   ;;  %s16453_s4 = inlined_call_operand.vmem [shape: f32[1,384], index: 4, kind: input, shape index: {}]   ;;  %s16454_s5 = inlined_call_operand.vmem [shape: f32[128,128], index: 5, kind: input, shape index: {}]   ;;  %s16455_s6 = inlined_call_operand.vmem [shape: f32[1,128], index: 6, kind: input, shape index: {}]   ;;  %s16456_s7 = inlined_call_operand.vmem [shape: f32[1,128], index: 7, kind: input, shape index: {}]   ;;  %s16457_s8 = inlined_call_operand.vmem [shape: f32[1,128], index: 8, kind: input, shape index: {}]   ;;  %s16458_s9 = inlined_call_operand.vmem [shape: f32[1,128], index: 9, kind: input, shape index: {}]   ;;  %s16459_s10 = inlined_call_operand.vmem [shape: f32[128,256], index: 10, kind: input, shape index: {}]   ;;  %s16460_s11 = inlined_call_operand.vmem [shape: f32[1,256], index: 11, kind: input, shape index: {}]   ;;  %s16461_s12 = inlined_call_operand.vmem [shape: f32[256,128], index: 12, kind: input, shape index: {}]   ;;  %s16462_s13 = inlined_call_operand.vmem [shape: f32[1,128], index: 13, kind: input, shape index: {}]   ;;  %s16463_s14 = inlined_call_operand.vmem [shape: f32[1,128], index: 14, kind: input, shape index: {}]   ;;  %s16464_s15 = inlined_call_operand.vmem [shape: f32[2,17,128], index: 15, kind: output, shape index: {}]  }
   0x1 LB: > { %s10072_s19 = sadd.s32 4294967295, %s12158_s18   ;;  %p10076_p0 = scmp.ge.s32.totalorder %s12158_s18, 1  ;;  %s12158_s18 = sphi %s12245_s18, %s25_s18  }
   0x2   : > { %p437_p1 = scmp.lt.s32.totalorder %s12158_s18, 3 }
   0x4   : > { %p438_p2 = pnand %p10076_p0, %p437_p1 }
   0x6   : > { %441 = sbr.rel (%p438_p2) target bundleno = 4475 (0x117b), region = 80 }
   0xb   : > { %p485_p3 = scmp.lt.s32.totalorder %s10072_s19, 1  ;;  %vm502_vm0 = vcmask 1040384   ;;  %v601_v4 = vld [vmem:[%s16452_s3 + $0x170] sm:$0xff]  ;;  %v600_v5 = vld [vmem:[%s16452_s3 + $0x168] sm:$0xff]  ;;  %v598_v6 = vld [vmem:[%s16452_s3 + $0x158] sm:$0xff]  ;;  %vm12161_vm1 = vmmov 0  }
   0xc   : > { %v12285_v7 = vand.u32 4294901760, %v601_v4  ;;  %v12287_v8 = vand.u32 4294901760, %v600_v5  ;;  %v12289_v9 = vand.u32 4294901760, %v598_v6  ;;  %v597_v10 = vld [vmem:[%s16452_s3 + $0x150] sm:$0xff]  ;;  %v595_v11 = vld [vmem:[%s16452_s3 + $0x140] sm:$0xff]  ;;  %v594_v12 = vld [vmem:[%s16452_s3 + $0x138] sm:$0xff] }
   0xd   : > { %s17137_s19 = smov (!%p485_p3, %s10072_s19), 1  ;;  %v12300_v13 = vand.u32 4294901760, %v597_v10  ;;  %v12302_v14 = vand.u32 4294901760, %v595_v11  ;;  %v12304_v15 = vand.u32 4294901760, %v594_v12  ;;  %v592_v16 = vld [vmem:[%s16452_s3 + $0x128] sm:$0xff]  ;;  %v591_v56 = vld [vmem:[%s16452_s3 + $0x120] sm:$0xff] }
   0xe   : > { %s12063_s20 = smul.u32 24, %s17137_s19  ;;  %v12310_v17 = vsub.f32 %v601_v4, %v12285_v7  ;;  %v12313_v18 = vsub.f32 %v600_v5, %v12287_v8  ;;  %v12316_v19 = vsub.f32 %v598_v6, %v12289_v9  ;;  %v12318_v20 = vand.u32 4294901760, %v592_v16  ;;  %621 = vmatprep.subr.mxu0 %v12285_v7  ;;  %v589_v59 = vld [vmem:[%s16452_s3 + $0x110] sm:$0xff]  ;;  %v588_v62 = vld [vmem:[%s16452_s3 + $0x108] sm:$0xff]  ;;  %s12162_s27 = smov 96  }
   0xf   : > { %v12322_v21 = vsub.f32 %v597_v10, %v12300_v13  ;;  %v12325_v22 = vsub.f32 %v595_v11, %v12302_v14  ;;  %v12328_v23 = vsub.f32 %v594_v12, %v12304_v15  ;;  %623 = vmatpush1.msra.mxu0 %v12287_v8  ;;  %v12383_v58 = vand.u32 4294901760, %v591_v56  ;;  %v585_v10 = vld [vmem:[%s16452_s3 + $0xf0] sm:$0xff]  ;;  %s12163_s28 = smov 64   ;;  %s12164_s29 = smov 32  }
  0x10   : > { %s12261_s23 = scalar_lea.vmem %s16449_s0, %s12063_s20  ;;  %16779 = vst [vmem:[#allocation2_spill] sm:$0xff] %v12310_v17  ;;  %v16483_v24 = vand.u32 4294901760, %v12310_v17  ;;  %v16481_v25 = vand.u32 4294901760, %v12313_v18  ;;  %v16480_v26 = vand.u32 4294901760, %v12316_v19  ;;  %v12335_v27 = vsub.f32 %v592_v16, %v12318_v20  ;;  %625 = vmatprep.subr.mxu0 %v12289_v9 }
  0x11   : > { %v12264_v0 = vld [vmem:[%s12261_s23] sm:$0xff]  ;;  %v12267_v1 = vld [vmem:[%s12261_s23 + $0x10] sm:$0x1]  ;;  %v12273_v3 = vld [vmem:[%s12261_s23 + $0x8] sm:$0xff]  ;;  %v16479_v28 = vand.u32 4294901760, %v12322_v21  ;;  %v16477_v29 = vand.u32 4294901760, %v12325_v22  ;;  %627 = vmatpush1.msra.mxu0 %v12300_v13 }
  0x12   : > { %498 = vadd.xlane.f32.xlu0 %v12264_v0  ;;  %v503_v2 = vsel %vm502_vm0, %v12267_v1, 0.0  ;;  %v16476_v30 = vand.u32 4294901760, %v12328_v23  ;;  %v753_v31 = vsub.f32 %v12310_v17, %v16483_v24  ;;  %v759_v32 = vsub.f32 %v12313_v18, %v16481_v25  ;;  %629 = vmatprep.subr.mxu0 %v12302_v14 }
  0x13   : > { %504 = vadd.xlane.f32.xlu1 %v503_v2  ;;  %v765_v33 = vsub.f32 %v12316_v19, %v16480_v26  ;;  %v16473_v34 = vand.u32 4294901760, %v12335_v27  ;;  %v771_v35 = vsub.f32 %v12322_v21, %v16479_v28  ;;  %v777_v36 = vsub.f32 %v12325_v22, %v16477_v29  ;;  %631 = vmatpush1.msra.mxu0 %v12304_v15  ;;  %v586_v2 = vld [vmem:[%s16452_s3 + $0xf8] sm:$0xff] }
  0x14   : > { %v783_v37 = vsub.f32 %v12328_v23, %v16476_v30  ;;  %v754_v38 = vand.u32 4294901760, %v753_v31  ;;  %v760_v39 = vand.u32 4294901760, %v759_v32  ;;  %633 = vmatprep.subr.mxu0 %v12318_v20  ;;  %v12389_v61 = vand.u32 4294901760, %v589_v59  ;;  %v583_v31 = vld [vmem:[%s16452_s3 + $0xe0] sm:$0xff] }
  0x15   : > { %v766_v40 = vand.u32 4294901760, %v765_v33  ;;  %v789_v41 = vsub.f32 %v12335_v27, %v16473_v34  ;;  %v772_v42 = vand.u32 4294901760, %v771_v35  ;;  %v778_v43 = vand.u32 4294901760, %v777_v36  ;;  %635 = vmatpush1.msra.mxu0 %v12383_v58  ;;  %v582_v36 = vld [vmem:[%s16452_s3 + $0xd8] sm:$0xff] }
  0x16   : > { %500 = vadd.xlane.f32.xlu0 %v12273_v3  ;;  %755 = vmatprep.subr.mxu1 %v754_v38  ;;  %v784_v44 = vand.u32 4294901760, %v783_v37  ;;  %v12408_v4 = vand.u32 4294901760, %v586_v2  ;;  %v12422_v16 = vand.u32 4294901760, %v585_v10  ;;  %v12432_v35 = vand.u32 4294901760, %v583_v31 }
  0x17   : > { %761 = vmatpush1.msra.mxu1 %v760_v39  ;;  %v790_v45 = vand.u32 4294901760, %v789_v41  ;;  %637 = vmatprep.subr.mxu0 %v12389_v61  ;;  %v580_v41 = vld [vmem:[%s16452_s3 + $0xc8] sm:$0xff]  ;;  %vm2300_vm2 = vcmask 261120   ;;  %vm2880_vm3 = vcmask 138240   ;;  %vm2887_vm4 = vcmask 131072  }
  0x18   : > { %767 = vmatprep.subr.mxu1 %v766_v40  ;;  %v12420_v12 = vsub.f32 %v586_v2, %v12408_v4  ;;  %v12443_v39 = vsub.f32 %v585_v10, %v12422_v16  ;;  %v12445_v40 = vand.u32 4294901760, %v582_v36  ;;  %vm7111_vm5 = vcmask 523264  }
  0x19   : > { %773 = vmatpush1.msra.mxu1 %v772_v42  ;;  %vm7115_vm6 = vcmask 785408  }
  0x1a   : > { %779 = vmatprep.subr.mxu1 %v778_v43  ;;  %v16468_v38 = vand.u32 4294901760, %v12420_v12 }
  0x1b   : > { %785 = vmatpush1.msra.mxu1 %v784_v44  ;;  %v12455_v44 = vsub.f32 %v583_v31, %v12432_v35  ;;  %v574_v31 = vld [vmem:[%s16452_s3 + $0x98] sm:$0xff] }
  0x1c   : > { %791 = vmatprep.subr.mxu1 %v790_v45  ;;  %v12457_v45 = vand.u32 4294901760, %v580_v41 }
  0x9b   : > { %v499_v46 = vpop.xlane.xlu0 %498 }
  0x9c   : > { %v507_v47 = vmul.f32 0.0078125, %v499_v46  ;;  %v505_v48 = vpop.xlane.xlu1 %504  ;;  %v579_v46 = vld [vmem:[%s16452_s3 + $0xc0] sm:$0xff] }
  0x9d   : > { %v509_v49 = vmul.f32 0.0078125, %v505_v48  ;;  %v813_v48 = vsub.f32 %v12420_v12, %v16468_v38 }
  0x9e   : > { %v12368_v50 = vsub.f32 %v12264_v0, %v507_v47  ;;  %v12397_v0 = vsub.f32 %v591_v56, %v12383_v58  ;;  %v12476_v56 = vsub.f32 %v580_v41, %v12457_v45 }
  0x9f   : > { %v12371_v51 = vsub.f32 %v12267_v1, %v509_v49  ;;  %v501_v52 = vpop.xlane.xlu0 %500  ;;  %v12399_v1 = vand.u32 4294901760, %v588_v62  ;;  %v16467_v49 = vand.u32 4294901760, %v12443_v39 }
  0xa0   : > { %v508_v53 = vmul.f32 0.0078125, %v501_v52  ;;  %v513_v54 = vmul.f32 %v12368_v50, %v12368_v50  ;;  %v16472_v5 = vand.u32 4294901760, %v12397_v0  ;;  %v12468_v52 = vsub.f32 %v582_v36, %v12445_v40 }
  0xa1   : > { %v515_v55 = vmul.f32 %v12371_v51, %v12371_v51  ;;  %v12413_v6 = vsub.f32 %v588_v62, %v12399_v1  ;;  %639 = vmatpush1.msra.mxu0 %v12399_v1  ;;  %v814_v62 = vand.u32 4294901760, %v813_v48  ;;  %v16470_v36 = vand.u32 4294901760, %v12476_v56 }
  0xa2   : > { %v12381_v57 = vsub.f32 %v12273_v3, %v508_v53  ;;  %516 = vadd.xlane.f32.xlu1 %v513_v54  ;;  %v12406_v3 = vsub.f32 %v589_v59, %v12389_v61  ;;  %v795_v32 = vsub.f32 %v12397_v0, %v16472_v5  ;;  %641 = vmatprep.subr.mxu0 %v12408_v4  ;;  %v577_v53 = vld [vmem:[%s16452_s3 + $0xb0] sm:$0xff]  ;;  %v12478_v59 = vand.u32 4294901760, %v579_v46 }
  0xa3   : > { %v520_v60 = vsel %vm502_vm0, %v515_v55, 0.0  ;;  %v16469_v33 = vand.u32 4294901760, %v12413_v6  ;;  %643 = vmatpush1.msra.mxu0 %v12422_v16  ;;  %v16465_v55 = vand.u32 4294901760, %v12455_v44  ;;  %v16466_v2 = vand.u32 4294901760, %v12468_v52 }
  0xa4   : > { %v514_v63 = vmul.f32 %v12381_v57, %v12381_v57  ;;  %v16471_v11 = vand.u32 4294901760, %v12406_v3  ;;  %v796_v42 = vand.u32 4294901760, %v795_v32  ;;  %645 = vmatprep.subr.mxu0 %v12432_v35  ;;  %v12488_v10 = vand.u32 4294901760, %v577_v53 }
  0xa5   : > { %v807_v43 = vsub.f32 %v12413_v6, %v16469_v33  ;;  %647 = vmatpush1.msra.mxu0 %v12445_v40  ;;  %v825_v32 = vsub.f32 %v12455_v44, %v16465_v55 }
  0xa6   : > { %521 = vadd.xlane.f32.xlu1 %v520_v60  ;;  %518 = vadd.xlane.f32.xlu0 %v514_v63  ;;  %v801_v37 = vsub.f32 %v12406_v3, %v16471_v11  ;;  %v576_v60 = vld [vmem:[%s16452_s3 + $0xa8] sm:$0xff]  ;;  %v819_v63 = vsub.f32 %v12443_v39, %v16467_v49  ;;  %v12510_v48 = vsub.f32 %v577_v53, %v12488_v10  ;;  %v570_v53 = vld [vmem:[%s16452_s3 + $0x78] sm:$0xff] }
  0xa7   : > { %797 = vmatpush1.msra.mxu1 %v796_v42  ;;  %v808_v54 = vand.u32 4294901760, %v807_v43  ;;  %649 = vmatprep.subr.mxu0 %v12457_v45  ;;  %v12500_v41 = vand.u32 4294901760, %v576_v60  ;;  %v573_v42 = vld [vmem:[%s16452_s3 + $0x90] sm:$0xff]  ;;  %v826_v55 = vand.u32 4294901760, %v825_v32 }
  0xa8   : > { %v802_v47 = vand.u32 4294901760, %v801_v37  ;;  %v12498_v37 = vsub.f32 %v579_v46, %v12478_v59  ;;  %651 = vmatpush1.msra.mxu0 %v12478_v59  ;;  %v820_v43 = vand.u32 4294901760, %v819_v63  ;;  %16780 = vst [vmem:[#allocation3_spill] sm:$0xff] %v12510_v48  ;;  %v571_v46 = vld [vmem:[%s16452_s3 + $0x80] sm:$0xff]  ;;  %v16475_v38 = vand.u32 4294901760, %v12510_v48 }
  0xa9   : > { %653 = vmatprep.subr.mxu0 %v12488_v10  ;;  %v12533_v33 = vand.u32 4294901760, %v573_v42  ;;  %v12543_v11 = vand.u32 4294901760, %v571_v46 }
  0xaa   : > { %803 = vmatprep.subr.mxu1 %v802_v47  ;;  %v831_v47 = vsub.f32 %v12468_v52, %v16466_v2  ;;  %v16474_v63 = vand.u32 4294901760, %v12498_v37  ;;  %v12523_v2 = vsub.f32 %v576_v60, %v12500_v41  ;;  %655 = vmatpush1.msra.mxu0 %v12500_v41  ;;  %v568_v60 = vld [vmem:[%s16452_s3 + $0x68] sm:$0xff] }
  0xab   : > { %809 = vmatpush1.msra.mxu1 %v808_v54  ;;  %v12512_v54 = vand.u32 4294901760, %v574_v31  ;;  %v12550_v34 = vsub.f32 %v573_v42, %v12533_v33  ;;  %v12564_v30 = vand.u32 4294901760, %v568_v60  ;;  %v565_v42 = vld [vmem:[%s16452_s3 + $0x50] sm:$0xff] }
  0xac   : > { %815 = vmatprep.subr.mxu1 %v814_v62  ;;  %v837_v62 = vsub.f32 %v12476_v56, %v16470_v36  ;;  %16781 = vst [vmem:[#allocation4_spill] sm:$0xff] %v12523_v2  ;;  %v832_v49 = vand.u32 4294901760, %v831_v47  ;;  %v16478_v47 = vand.u32 4294901760, %v12523_v2  ;;  %v12595_v24 = vand.u32 4294901760, %v565_v42 }
  0xad   : > { %821 = vmatpush1.msra.mxu1 %v820_v43  ;;  %v12531_v32 = vsub.f32 %v574_v31, %v12512_v54  ;;  %657 = vmatprep.subr.mxu0 %v12512_v54  ;;  %v843_v43 = vsub.f32 %v12498_v37, %v16474_v63  ;;  %v849_v31 = vsub.f32 %v12510_v48, %v16475_v38 }
  0xae   : > { %827 = vmatprep.subr.mxu1 %v826_v55  ;;  %v838_v36 = vand.u32 4294901760, %v837_v62  ;;  %16783 = vst [vmem:[#allocation6_spill] sm:$0xff] %v12550_v34  ;;  %v12552_v55 = vand.u32 4294901760, %v570_v53  ;;  %v567_v62 = vld [vmem:[%s16452_s3 + $0x60] sm:$0xff]  ;;  %659 = vmatpush1.msra.mxu0 %v12533_v33  ;;  %v12562_v38 = vsub.f32 %v571_v46, %v12543_v11  ;;  %v564_v46 = vld [vmem:[%s16452_s3 + $0x48] sm:$0xff]  ;;  %16788 = vst [vmem:[#allocation11_spill] sm:$0xff] %v12595_v24 }
  0xaf   : > { %16782 = vst [vmem:[#allocation5_spill] sm:$0xff] %v12531_v32  ;;  %833 = vmatpush1.msra.mxu1 %v832_v49  ;;  %v16482_v5 = vand.u32 4294901760, %v12531_v32  ;;  %v844_v63 = vand.u32 4294901760, %v843_v43  ;;  %v855_v49 = vsub.f32 %v12523_v2, %v16478_v47  ;;  %661 = vmatprep.subr.mxu0 %v12543_v11  ;;  %v850_v29 = vand.u32 4294901760, %v849_v31 }
  0xb0   : > { %839 = vmatprep.subr.mxu1 %v838_v36  ;;  %16784 = vst [vmem:[#allocation7_spill] sm:$0xff] %v12562_v38  ;;  %v16488_v43 = vand.u32 4294901760, %v12550_v34  ;;  %v12575_v47 = vsub.f32 %v570_v53, %v12552_v55  ;;  %663 = vmatpush1.msra.mxu0 %v12552_v55  ;;  %v16489_v26 = vand.u32 4294901760, %v12562_v38  ;;  %v12583_v31 = vsub.f32 %v568_v60, %v12564_v30  ;;  %v562_v53 = vld [vmem:[%s16452_s3 + $0x38] sm:$0xff] }
  0xb1   : > { %v861_v36 = vsub.f32 %v12531_v32, %v16482_v5  ;;  %845 = vmatpush1.msra.mxu1 %v844_v63  ;;  %v856_v28 = vand.u32 4294901760, %v855_v49  ;;  %v12585_v25 = vand.u32 4294901760, %v567_v62  ;;  %665 = vmatprep.subr.mxu0 %v12564_v30  ;;  %v12616_v32 = vand.u32 4294901760, %v562_v53 }
  0xb2   : > { %16785 = vst [vmem:[#allocation8_spill] sm:$0xff] %v12575_v47  ;;  %16786 = vst [vmem:[#allocation9_spill] sm:$0xff] %v12583_v31  ;;  %851 = vmatprep.subr.mxu1 %v850_v29  ;;  %v867_v63 = vsub.f32 %v12550_v34, %v16488_v43  ;;  %v16494_v49 = vand.u32 4294901760, %v12575_v47  ;;  %v873_v60 = vsub.f32 %v12562_v38, %v16489_v26  ;;  %v12604_v29 = vand.u32 4294901760, %v564_v46 }
  0xb3   : > { %16787 = vst [vmem:[#allocation10_spill] sm:$0xff] %v12585_v25  ;;  %v862_v5 = vand.u32 4294901760, %v861_v36  ;;  %857 = vmatpush1.msra.mxu1 %v856_v28  ;;  %v12602_v2 = vsub.f32 %v567_v62, %v12585_v25  ;;  %v561_v36 = vld [vmem:[%s16452_s3 + $0x30] sm:$0xff]  ;;  %667 = vmatpush1.msra.mxu0 %v12585_v25  ;;  %v12614_v26 = vsub.f32 %v565_v42, %v12595_v24  ;;  %v559_v62 = vld [vmem:[%s16452_s3 + $0x20] sm:$0xff]  ;;  %v16792_v34 = vand.u32 4294901760, %v12583_v31  ;;  %v558_v42 = vld [vmem:[%s16452_s3 + $0x18] sm:$0xff] }
  0xb4   : > { %16790 = vst [vmem:[#allocation13_spill] sm:$0xff] %v12604_v29  ;;  %v868_v43 = vand.u32 4294901760, %v867_v63  ;;  %v879_v28 = vsub.f32 %v12575_v47, %v16494_v49  ;;  %669 = vmatprep.subr.mxu0 %v12595_v24  ;;  %v874_v38 = vand.u32 4294901760, %v873_v60  ;;  %v12627_v49 = vsub.f32 %v564_v46, %v12604_v29 }
  0xb5   : > { %16789 = vst [vmem:[#allocation12_spill] sm:$0xff] %v12602_v2  ;;  %863 = vmatprep.subr.mxu1 %v862_v5  ;;  %16791 = vst [vmem:[#allocation14_spill] sm:$0xff] %v12614_v26  ;;  %v885_v5 = vsub.f32 %v12583_v31, %v16792_v34  ;;  %v16507_v63 = vand.u32 4294901760, %v12602_v2  ;;  %671 = vmatpush1.msra.mxu0 %v12604_v29  ;;  %v12635_v60 = vsub.f32 %v562_v53, %v12616_v32  ;;  %v556_v34 = vld [vmem:[%s16452_s3 + $0x8] sm:$0xff] }
  0xb6   : > { %16793 = vst [vmem:[#allocation15_spill] sm:$0xff] %v12627_v49  ;;  %869 = vmatpush1.msra.mxu1 %v868_v43  ;;  %v880_v47 = vand.u32 4294901760, %v879_v28  ;;  %v12637_v48 = vand.u32 4294901760, %v561_v36  ;;  %673 = vmatprep.subr.mxu0 %v12616_v32  ;;  %v16514_v28 = vand.u32 4294901760, %v12627_v49  ;;  %v12647_v24 = vand.u32 4294901760, %v559_v62 }
  0xb7   : > { %875 = vmatprep.subr.mxu1 %v874_v38  ;;  %v886_v46 = vand.u32 4294901760, %v885_v5  ;;  %v891_v43 = vsub.f32 %v12602_v2, %v16507_v63  ;;  %v16796_v53 = vand.u32 4294901760, %v12614_v26  ;;  %v12656_v38 = vand.u32 4294901760, %v558_v42  ;;  %v555_v5 = vld [vmem:[%s16452_s3] sm:$0xff] }
  0xb8   : > { %16794 = vst [vmem:[#allocation16_spill] sm:$0xff] %v12637_v48  ;;  %16795 = vst [vmem:[#allocation17_spill] sm:$0xff] %v12647_v24  ;;  %881 = vmatpush1.msra.mxu1 %v880_v47  ;;  %v12654_v25 = vsub.f32 %v561_v36, %v12637_v48  ;;  %675 = vmatpush1.msra.mxu0 %v12637_v48  ;;  %v903_v47 = vsub.f32 %v12627_v49, %v16514_v28  ;;  %v12668_v29 = vand.u32 4294901760, %v556_v34 }
  0xb9   : > { %v897_v31 = vsub.f32 %v12614_v26, %v16796_v53  ;;  %887 = vmatprep.subr.mxu1 %v886_v46  ;;  %v892_v63 = vand.u32 4294901760, %v891_v43  ;;  %v12666_v53 = vsub.f32 %v559_v62, %v12647_v24  ;;  %677 = vmatprep.subr.mxu0 %v12647_v24  ;;  %v16798_v26 = vand.u32 4294901760, %v12635_v60 }
  0xba   : > { %v16518_v48 = vand.u32 4294901760, %v12654_v25  ;;  %v12676_v46 = vsub.f32 %v558_v42, %v12656_v38  ;;  %679 = vmatpush1.msra.mxu0 %v12656_v38  ;;  %v904_v43 = vand.u32 4294901760, %v903_v47  ;;  %v12681_v28 = vsub.f32 %v556_v34, %v12668_v29 }
  0xbb   : > { %16797 = vst [vmem:[#allocation18_spill] sm:$0xff] %v12666_v53  ;;  %v898_v36 = vand.u32 4294901760, %v897_v31  ;;  %v909_v2 = vsub.f32 %v12635_v60, %v16798_v26  ;;  %893 = vmatpush1.msra.mxu1 %v892_v63  ;;  %v16517_v62 = vand.u32 4294901760, %v12666_v53  ;;  %v12683_v49 = vand.u32 4294901760, %v555_v5  ;;  %681 = vmatprep.subr.mxu0 %v12668_v29 }
  0xbc   : > { %v915_v31 = vsub.f32 %v12654_v25, %v16518_v48  ;;  %v16522_v42 = vand.u32 4294901760, %v12676_v46  ;;  %v16521_v34 = vand.u32 4294901760, %v12681_v28 }
  0xbd   : > { %16799 = vst [vmem:[#allocation19_spill] sm:$0xff] %v12683_v49  ;;  %899 = vmatprep.subr.mxu1 %v898_v36  ;;  %v910_v26 = vand.u32 4294901760, %v909_v2  ;;  %v921_v63 = vsub.f32 %v12666_v53, %v16517_v62  ;;  %v12695_v47 = vsub.f32 %v555_v5, %v12683_v49  ;;  %683 = vmatpush1.msra.mxu0 %v12683_v49 }
  0xbe   : > { %905 = vmatpush1.msra.mxu1 %v904_v43  ;;  %v916_v2 = vand.u32 4294901760, %v915_v31  ;;  %v927_v36 = vsub.f32 %v12676_v46, %v16522_v42  ;;  %998 = vmatprep.subr.mxu0 %v12310_v17  ;;  %v933_v62 = vsub.f32 %v12681_v28, %v16521_v34  ;;  %v16527_v31 = vmov 0.0  }
  0xbf   : > { %16800 = vst [vmem:[#allocation20_spill] sm:$0xff] %v12695_v47  ;;  %911 = vmatprep.subr.mxu1 %v910_v26  ;;  %v922_v43 = vand.u32 4294901760, %v921_v63  ;;  %v16524_v48 = vand.u32 4294901760, %v12695_v47  ;;  %974 = vmatprep.mubr.f32.mxu1 %v16527_v31 }
  0xc0   : > { %917 = vmatpush1.msra.mxu1 %v916_v2  ;;  %v928_v5 = vand.u32 4294901760, %v927_v36  ;;  %v934_v53 = vand.u32 4294901760, %v933_v62  ;;  %716 = vmatprep.mubr.f32.mxu0 %v16527_v31 }
  0xc1   : > { %923 = vmatprep.subr.mxu1 %v922_v43  ;;  %v939_v26 = vsub.f32 %v12695_v47, %v16524_v48 }
  0xc2   : > { %929 = vmatpush1.msra.mxu1 %v928_v5 }
  0xc3   : > { %935 = vmatprep.subr.mxu1 %v934_v53  ;;  %v940_v63 = vand.u32 4294901760, %v939_v26  ;;  %v10079_v53 = vld [vmem:[%s16450_s1] ss:$0 sm:$0xff] }
  0xc5   : > { %941 = vmatpush1.msra.mxu1 %v940_v63 }
  0xc6   : > { %1150 = vmatprep.subr.mxu1 %v12285_v7 }
 0x12b   : > { %v517_v34 = vpop.xlane.xlu1 %516 }
 0x12c   : > { %v523_v2 = vmul.f32 0.0078125, %v517_v34  ;;  %v10080_v34 = vld [vmem:[%s16451_s2] ss:$0 sm:$0xff] }
 0x12e   : > { %v526_v36 = vadd.f32 1e-06, %v523_v2 }
 0x12f   : > { %v522_v43 = vpop.xlane.xlu1 %521  ;;  %v519_v62 = vpop.xlane.xlu0 %518 }
 0x130   : > { %12077 = vrsqrt.f32 %v526_v36  ;;  %v525_v42 = vmul.f32 0.0078125, %v522_v43  ;;  %v524_v17 = vmul.f32 0.0078125, %v519_v62 }
 0x132   : > { %v528_v48 = vadd.f32 1e-06, %v525_v42  ;;  %v527_v47 = vadd.f32 1e-06, %v524_v17 }
 0x134   : > { %12079 = vrsqrt.f32 %v528_v48 }
 0x135   : > { %12081 = vrsqrt.f32 %v527_v47 }
 0x13d   : > { %v12078_v5 = vpop.eup %12077 }
 0x13e   : > { %v532_v26 = vmul.f32 %v12078_v5, %v12368_v50 }
 0x140   : > { %v542_v63 = vmul.f32 %v10079_v53, %v532_v26  ;;  %v16802_v26 = vmov 0.0  }
 0x141   : > { %v12080_v2 = vpop.eup %12079 }
 0x142   : > { %v12082_v36 = vpop.eup %12081  ;;  %v552_v43 = vadd.f32 %v10080_v34, %v542_v63  ;;  %v534_v42 = vmul.f32 %v12080_v2, %v12371_v51 }
 0x143   : > { %v533_v17 = vmul.f32 %v12082_v36, %v12381_v57 }
 0x144   : > { %v12721_v48 = vand.u32 4294901760, %v552_v43  ;;  %v544_v47 = vmul.f32 %v10079_v53, %v534_v42 }
 0x145   : > { %v543_v62 = vmul.f32 %v10079_v53, %v533_v17 }
 0x146   : > { %16801 = vst [vmem:[#allocation21_spill] sm:$0xff] %v12721_v48  ;;  %v554_v31 = vadd.f32 %v10080_v34, %v544_v47  ;;  %976 = vmatmul.mubr.f32.vlgmr.msra.gmra.mxu1 %v12721_v48  ;;  %v12725_v50 = vsub.f32 %v552_v43, %v12721_v48  ;;  %v16817_v48 = vld [vmem:[#allocation8_spill] sm:$0xff] }
 0x147   : > { %v553_v5 = vadd.f32 %v10080_v34, %v543_v62  ;;  %1152 = vmatpush1.msra.mxu1 %v12287_v8  ;;  %981 = vmatprep.mubr.f32.mxu1 %v16802_v26 }
 0x148   : > { %v12729_v63 = vand.u32 4294901760, %v554_v31  ;;  %1154 = vmatprep.subr.mxu1 %v12289_v9  ;;  %v12733_v51 = vand.u32 4294901760, %v12725_v50 }
 0x149   : > { %v12735_v57 = vand.u32 4294901760, %v553_v5  ;;  %1156 = vmatpush1.msra.mxu1 %v12300_v13 }
 0x14a   : > { %16803 = vst [vmem:[#allocation22_spill] sm:$0xff] %v12729_v63  ;;  %1158 = vmatprep.subr.mxu1 %v12302_v14  ;;  %v720_v53 = vsub.f32 %v12725_v50, %v12733_v51  ;;  %v12746_v2 = vsub.f32 %v554_v31, %v12729_v63 }
 0x14b   : > { %16804 = vst [vmem:[#allocation23_spill] sm:$0xff] %v12735_v57  ;;  %983 = vmatmul.mubr.f32.gmra.mxu1 %v12735_v57  ;;  %v12743_v34 = vsub.f32 %v553_v5, %v12735_v57  ;;  %v16808_v5 = vld [vmem:[#allocation10_spill] sm:$0xff]  ;;  %v16816_v57 = vld [vmem:[#allocation7_spill] sm:$0xff] }
 0x14c   : > { %1160 = vmatpush1.msra.mxu1 %v12304_v15  ;;  %988 = vmatprep.mubr.f32.mxu1 %v16802_v26  ;;  %v12750_v36 = vand.u32 4294901760, %v720_v53  ;;  %v12763_v42 = vand.u32 4294901760, %v12746_v2  ;;  %v16809_v53 = vld [vmem:[#allocation3_spill] sm:$0xff] }
 0x14d   : > { %1162 = vmatprep.subr.mxu1 %v12318_v20  ;;  %v12754_v43 = vand.u32 4294901760, %v12743_v34 }
 0x14e   : > { %16805 = vst [vmem:[#allocation24_spill] sm:$0xff] %v12750_v36  ;;  %1164 = vmatpush1.msra.mxu1 %v12383_v58  ;;  %722 = vmatmul.mubr.f32.vlgmr.msra.gmra.mxu0 %v12750_v36  ;;  %v742_v47 = vsub.f32 %v12746_v2, %v12763_v42  ;;  %v16814_v36 = vld [vmem:[#allocation6_spill] sm:$0xff] }
 0x14f   : > { %1166 = vmatprep.subr.mxu1 %v12389_v61  ;;  %990 = vmatmul.mubr.f32.gmra.mxu1 %v12729_v63  ;;  %v731_v31 = vsub.f32 %v12743_v34, %v12754_v43  ;;  %v16815_v63 = vld [vmem:[#allocation16_spill] sm:$0xff] }
 0x150   : > { %1001 = vmatpush1.msra.mxu0 %v12313_v18  ;;  %1168 = vmatpush1.msra.mxu1 %v12399_v1  ;;  %v12785_v62 = vand.u32 4294901760, %v742_v47  ;;  %v16811_v47 = vld [vmem:[#allocation4_spill] sm:$0xff] }
 0x151   : > { %1004 = vmatprep.subr.mxu0 %v12316_v19  ;;  %1170 = vmatprep.subr.mxu1 %v12408_v4  ;;  %v12769_v17 = vand.u32 4294901760, %v731_v31  ;;  %v16810_v31 = vld [vmem:[#allocation11_spill] sm:$0xff] }
 0x152   : > { %1007 = vmatpush1.msra.mxu0 %v12322_v21  ;;  %1172 = vmatpush1.msra.mxu1 %v12422_v16  ;;  %16807 = vst [vmem:[#allocation26_spill] sm:$0xff] %v12785_v62 }
 0x153   : > { %16806 = vst [vmem:[#allocation25_spill] sm:$0xff] %v12769_v17  ;;  %727 = vmatprep.mubr.f32.mxu0 %v16802_v26  ;;  %1010 = vmatprep.subr.mxu0 %v12325_v22 }
 0x154   : > { %1174 = vmatprep.subr.mxu1 %v12432_v35  ;;  %733 = vmatmul.mubr.f32.gmra.mxu0 %v12769_v17  ;;  %v16813_v17 = vld [vmem:[#allocation5_spill] sm:$0xff] }
 0x155   : > { %1013 = vmatpush1.msra.mxu0 %v12328_v23  ;;  %1176 = vmatpush1.msra.mxu1 %v12445_v40 }
 0x156   : > { %1016 = vmatprep.subr.mxu0 %v12335_v27  ;;  %1178 = vmatprep.subr.mxu1 %v12457_v45 }
 0x157   : > { %1019 = vmatpush1.msra.mxu0 %v12397_v0  ;;  %1180 = vmatpush1.msra.mxu1 %v12478_v59 }
 0x158   : > { %738 = vmatprep.mubr.f32.mxu0 %v16802_v26  ;;  %1022 = vmatprep.subr.mxu0 %v12406_v3 }
 0x159   : > { %1182 = vmatprep.subr.mxu1 %v12488_v10  ;;  %744 = vmatmul.mubr.f32.gmra.mxu0 %v12785_v62  ;;  %v16812_v62 = vld [vmem:[#allocation13_spill] sm:$0xff] }
 0x15a   : > { %1025 = vmatpush1.msra.mxu0 %v12413_v6  ;;  %1184 = vmatpush1.msra.mxu1 %v12500_v41 }
 0x15b   : > { %1028 = vmatprep.subr.mxu0 %v12420_v12  ;;  %1186 = vmatprep.subr.mxu1 %v12512_v54 }
 0x15c   : > { %1031 = vmatpush1.msra.mxu0 %v12443_v39  ;;  %1188 = vmatpush1.msra.mxu1 %v12533_v33 }
 0x15d   : > { %1034 = vmatprep.subr.mxu0 %v12455_v44  ;;  %1190 = vmatprep.subr.mxu1 %v12543_v11 }
 0x15e   : > { %1037 = vmatpush1.msra.mxu0 %v12468_v52  ;;  %1192 = vmatpush1.msra.mxu1 %v12552_v55 }
 0x15f   : > { %1040 = vmatprep.subr.mxu0 %v12476_v56  ;;  %1194 = vmatprep.subr.mxu1 %v12564_v30 }
 0x160   : > { %1043 = vmatpush1.msra.mxu0 %v12498_v37  ;;  %1196 = vmatpush1.msra.mxu1 %v16808_v5 }
 0x161   : > { %1046 = vmatprep.subr.mxu0 %v16809_v53  ;;  %1198 = vmatprep.subr.mxu1 %v16810_v31  ;;  %v16818_v31 = vld [vmem:[#allocation9_spill] sm:$0xff] }
 0x162   : > { %1049 = vmatpush1.msra.mxu0 %v16811_v47  ;;  %1200 = vmatpush1.msra.mxu1 %v16812_v62  ;;  %v16819_v62 = vld [vmem:[#allocation12_spill] sm:$0xff] }
 0x163   : > { %1052 = vmatprep.subr.mxu0 %v16813_v17  ;;  %1202 = vmatprep.subr.mxu1 %v12616_v32 }
 0x164   : > { %1055 = vmatpush1.msra.mxu0 %v16814_v36  ;;  %1204 = vmatpush1.msra.mxu1 %v16815_v63  ;;  %v16820_v36 = vld [vmem:[#allocation14_spill] sm:$0xff] }
 0x165   : > { %1058 = vmatprep.subr.mxu0 %v16816_v57  ;;  %1206 = vmatprep.subr.mxu1 %v12647_v24  ;;  %v16821_v24 = vld [vmem:[#allocation15_spill] sm:$0xff] }
 0x166   : > { %1061 = vmatpush1.msra.mxu0 %v16817_v48  ;;  %1208 = vmatpush1.msra.mxu1 %v12656_v38 }
 0x167   : > { %1064 = vmatprep.subr.mxu0 %v16818_v31  ;;  %1210 = vmatprep.subr.mxu1 %v12668_v29 }
 0x168   : > { %1067 = vmatpush1.msra.mxu0 %v16819_v62  ;;  %1212 = vmatpush1.msra.mxu1 %v12683_v49  ;;  %v16822_v49 = vld [vmem:[#allocation18_spill] sm:$0xff] }
 0x169   : > { %1245 = vmatprep.mubr.f32.mxu1 %v16802_v26  ;;  %1070 = vmatprep.subr.mxu0 %v16820_v36 }
 0x16a   : > { %1249 = vmatmul.mubr.f32.vlgmr.msra.gmra.mxu1 %v12733_v51  ;;  %1456 = vmatprep.subr.mxu1 %v12285_v7  ;;  %v16823_v7 = vld [vmem:[#allocation20_spill] sm:$0xff] }
 0x16b   : > { %1073 = vmatpush1.msra.mxu0 %v16821_v24  ;;  %1458 = vmatpush1.msra.mxu1 %v12287_v8  ;;  %v16824_v8 = vld [vmem:[#allocation2_spill] sm:$0xff] }
 0x16c   : > { %1076 = vmatprep.subr.mxu0 %v12635_v60  ;;  %1460 = vmatprep.subr.mxu1 %v12289_v9  ;;  %v16825_v9 = vand.u32 4294901760, %v16824_v8  ;;  %v16846_v8 = vld [vmem:[#allocation6_spill] sm:$0xff] }
 0x16d   : > { %1079 = vmatpush1.msra.mxu0 %v12654_v25  ;;  %1254 = vmatprep.mubr.f32.mxu1 %v16802_v26 }
 0x16e   : > { %1462 = vmatpush1.msra.mxu1 %v12300_v13  ;;  %1082 = vmatprep.subr.mxu0 %v16822_v49  ;;  %v16826_v13 = vand.u32 4294901760, %v12313_v18  ;;  %v602_v18 = vld [vmem:[%s16452_s3 + $0x178] sm:$0xff] }
 0x16f   : > { %1258 = vmatmul.mubr.f32.gmra.mxu1 %v12754_v43  ;;  %1464 = vmatprep.subr.mxu1 %v12302_v14  ;;  %v16827_v14 = vand.u32 4294901760, %v12316_v19  ;;  %v16830_v19 = vand.u32 4294901760, %v12328_v23  ;;  %v16833_v23 = vand.u32 4294901760, %v12406_v3 }
 0x170   : > { %1085 = vmatpush1.msra.mxu0 %v12676_v46  ;;  %1466 = vmatpush1.msra.mxu1 %v12304_v15  ;;  %v16828_v15 = vand.u32 4294901760, %v12322_v21  ;;  %v16831_v21 = vand.u32 4294901760, %v12335_v27  ;;  %v596_v27 = vld [vmem:[%s16452_s3 + $0x148] sm:$0xff] }
 0x171   : > { %1088 = vmatprep.subr.mxu0 %v12681_v28  ;;  %1468 = vmatprep.subr.mxu1 %v12318_v20  ;;  %v16829_v20 = vand.u32 4294901760, %v12325_v22  ;;  %v16832_v22 = vand.u32 4294901760, %v12397_v0  ;;  %v16834_v0 = vand.u32 4294901760, %v12413_v6  ;;  %v593_v6 = vld [vmem:[%s16452_s3 + $0x130] sm:$0xff] }
 0x172   : > { %1091 = vmatpush1.msra.mxu0 %v16823_v7  ;;  %1124 = vmatprep.mubr.f32.mxu0 %v16802_v26 }
 0x173   : > { %1263 = vmatprep.mubr.f32.mxu1 %v16802_v26  ;;  %1470 = vmatpush1.msra.mxu1 %v12383_v58  ;;  %v12874_v58 = vand.u32 4294901760, %v602_v18 }
 0x174   : > { %1127 = vmatmul.mubr.f32.vlgmr.msra.gmra.mxu0 %v12725_v50  ;;  %1267 = vmatmul.mubr.f32.gmra.mxu1 %v12763_v42 }
 0x175   : > { %1276 = vmatprep.subr.mxu0 %v16825_v9  ;;  %1472 = vmatprep.subr.mxu1 %v12389_v61  ;;  %v599_v61 = vld [vmem:[%s16452_s3 + $0x160] sm:$0xff]  ;;  %v12896_v3 = vsub.f32 %v602_v18, %v12874_v58  ;;  %v16847_v9 = vand.u32 4294901760, %v16846_v8  ;;  %v569_v8 = vld [vmem:[%s16452_s3 + $0x70] sm:$0xff] }
 0x176   : > { %1280 = vmatpush1.msra.mxu0 %v16826_v13  ;;  %1474 = vmatpush1.msra.mxu1 %v12399_v1  ;;  %v12890_v1 = vand.u32 4294901760, %v599_v61 }
 0x177   : > { %1284 = vmatprep.subr.mxu0 %v16827_v14  ;;  %1476 = vmatprep.subr.mxu1 %v12408_v4  ;;  %v16835_v4 = vand.u32 4294901760, %v12420_v12  ;;  %v16838_v12 = vand.u32 4294901760, %v12468_v52  ;;  %v16849_v14 = vld [vmem:[#allocation17_spill] sm:$0xff] }
 0x178   : > { %1132 = vmatprep.mubr.f32.mxu0 %v16802_v26  ;;  %1288 = vmatpush1.msra.mxu0 %v16828_v15 }
 0x179   : > { %1478 = vmatpush1.msra.mxu1 %v12422_v16  ;;  %1135 = vmatmul.mubr.f32.gmra.mxu0 %v12743_v34  ;;  %v16836_v16 = vand.u32 4294901760, %v12443_v39  ;;  %v12913_v39 = vsub.f32 %v599_v61, %v12890_v1  ;;  %v16853_v61 = vld [vmem:[#allocation19_spill] sm:$0xff] }
 0x17a   : > { %1292 = vmatprep.subr.mxu0 %v16829_v20  ;;  %1480 = vmatprep.subr.mxu1 %v12432_v35  ;;  %v12901_v35 = vand.u32 4294901760, %v596_v27  ;;  %v16850_v20 = vand.u32 4294901760, %v16817_v48 }
 0x17b   : > { %1296 = vmatpush1.msra.mxu0 %v16830_v19  ;;  %1482 = vmatpush1.msra.mxu1 %v12445_v40  ;;  %v16837_v40 = vand.u32 4294901760, %v12455_v44  ;;  %v16840_v44 = vand.u32 4294901760, %v12498_v37  ;;  %v587_v37 = vld [vmem:[%s16452_s3 + $0x100] sm:$0xff]  ;;  %v16851_v19 = vand.u32 4294901760, %v16818_v31  ;;  %v16854_v31 = vand.u32 4294901760, %v16820_v36 }
 0x17c   : > { %1300 = vmatprep.subr.mxu0 %v16831_v21  ;;  %1484 = vmatprep.subr.mxu1 %v12457_v45  ;;  %v1687_v45 = vand.u32 4294901760, %v12896_v3  ;;  %v12928_v52 = vsub.f32 %v596_v27, %v12901_v35  ;;  %v12961_v15 = vand.u32 4294901760, %v587_v37 }
 0x17d   : > { %1140 = vmatprep.mubr.f32.mxu0 %v16802_v26  ;;  %1304 = vmatpush1.msra.mxu0 %v16832_v22  ;;  %v16852_v22 = vand.u32 4294901760, %v16819_v62  ;;  %v578_v62 = vld [vmem:[%s16452_s3 + $0xb8] sm:$0xff] }
 0x17e   : > { %1486 = vmatpush1.msra.mxu1 %v12478_v59  ;;  %1143 = vmatmul.mubr.f32.gmra.mxu0 %v12746_v2  ;;  %v12919_v59 = vand.u32 4294901760, %v593_v6  ;;  %v1701_v13 = vand.u32 4294901760, %v12928_v52 }
 0x17f   : > { %1308 = vmatprep.subr.mxu0 %v16833_v23  ;;  %1488 = vmatprep.subr.mxu1 %v12488_v10  ;;  %v16843_v10 = vand.u32 4294901760, %v16811_v47 }
 0x180   : > { %1312 = vmatpush1.msra.mxu0 %v16834_v0  ;;  %1490 = vmatpush1.msra.mxu1 %v12500_v41  ;;  %v16844_v41 = vld [vmem:[#allocation13_spill] sm:$0xff]  ;;  %v12949_v47 = vsub.f32 %v593_v6, %v12919_v59  ;;  %v1702_v23 = vsub.f32 %v12928_v52, %v1701_v13  ;;  %v16856_v6 = vand.u32 4294901760, %v16821_v24  ;;  %v13015_v24 = vand.u32 4294901760, %v578_v62 }
 0x181   : > { %1316 = vmatprep.subr.mxu0 %v16835_v4  ;;  %1492 = vmatprep.subr.mxu1 %v12512_v54  ;;  %v1694_v54 = vand.u32 4294901760, %v12913_v39  ;;  %v16855_v0 = vld [vmem:[#allocation21_spill] sm:$0xff] }
 0x182   : > { %1320 = vmatpush1.msra.mxu0 %v16836_v16  ;;  %1494 = vmatpush1.msra.mxu1 %v12533_v33  ;;  %v16839_v33 = vand.u32 4294901760, %v12476_v56  ;;  %v16841_v56 = vand.u32 4294901760, %v16809_v53  ;;  %v1688_v53 = vsub.f32 %v12896_v3, %v1687_v45  ;;  %v1708_v21 = vand.u32 4294901760, %v12949_v47 }
 0x183   : > { %1324 = vmatprep.subr.mxu0 %v16837_v40  ;;  %1496 = vmatprep.subr.mxu1 %v12543_v11  ;;  %v590_v11 = vld [vmem:[%s16452_s3 + $0x118] sm:$0xff] }
 0x184   : > { %1328 = vmatpush1.msra.mxu0 %v16838_v12  ;;  %1498 = vmatpush1.msra.mxu1 %v12552_v55  ;;  %v12937_v55 = vand.u32 4294901760, %v590_v11  ;;  %v1689_v48 = vand.u32 4294901760, %v1688_v53  ;;  %v1709_v36 = vsub.f32 %v12949_v47, %v1708_v21  ;;  %v575_v12 = vld [vmem:[%s16452_s3 + $0xa0] sm:$0xff] }
 0x185   : > { %1332 = vmatprep.subr.mxu0 %v16839_v33  ;;  %1500 = vmatprep.subr.mxu1 %v12564_v30  ;;  %v16842_v30 = vld [vmem:[#allocation11_spill] sm:$0xff]  ;;  %v16857_v33 = vand.u32 4294901760, %v12635_v60 }
 0x186   : > { %1336 = vmatpush1.msra.mxu0 %v16840_v44  ;;  %1502 = vmatpush1.msra.mxu1 %v16808_v5  ;;  %v16845_v5 = vand.u32 4294901760, %v16813_v17  ;;  %v584_v17 = vld [vmem:[%s16452_s3 + $0xe8] sm:$0xff]  ;;  %v12970_v18 = vsub.f32 %v590_v11, %v12937_v55  ;;  %v1703_v11 = vand.u32 4294901760, %v1702_v23  ;;  %v16858_v44 = vand.u32 4294901760, %v12654_v25 }
 0x187   : > { %1340 = vmatprep.subr.mxu0 %v16841_v56  ;;  %1504 = vmatprep.subr.mxu1 %v16842_v30  ;;  %v572_v60 = vld [vmem:[%s16452_s3 + $0x88] sm:$0xff] }
 0x188   : > { %1344 = vmatpush1.msra.mxu0 %v16843_v10  ;;  %1506 = vmatpush1.msra.mxu1 %v16844_v41  ;;  %v1715_v16 = vand.u32 4294901760, %v12970_v18  ;;  %v16859_v10 = vand.u32 4294901760, %v16822_v49  ;;  %v13032_v41 = vand.u32 4294901760, %v575_v12  ;;  %v16861_v49 = vand.u32 4294901760, %v12676_v46  ;;  %v566_v46 = vld [vmem:[%s16452_s3 + $0x58] sm:$0xff] }
 0x189   : > { %1348 = vmatprep.subr.mxu0 %v16845_v5  ;;  %1508 = vmatprep.subr.mxu1 %v12616_v32  ;;  %v16848_v32 = vand.u32 4294901760, %v16816_v57  ;;  %v581_v57 = vld [vmem:[%s16452_s3 + $0xd0] sm:$0xff]  ;;  %v1710_v5 = vand.u32 4294901760, %v1709_v36 }
 0x18a   : > { %1352 = vmatpush1.msra.mxu0 %v16847_v9  ;;  %1510 = vmatpush1.msra.mxu1 %v16815_v63  ;;  %v1695_v63 = vsub.f32 %v12913_v39, %v1694_v54  ;;  %v12993_v27 = vand.u32 4294901760, %v581_v57  ;;  %v1716_v25 = vsub.f32 %v12970_v18, %v1715_v16  ;;  %v13043_v9 = vsub.f32 %v578_v62, %v13015_v24 }
 0x18b   : > { %1356 = vmatprep.subr.mxu0 %v16848_v32  ;;  %1512 = vmatprep.subr.mxu1 %v16849_v14  ;;  %v16862_v32 = vand.u32 4294901760, %v12681_v28  ;;  %v13061_v28 = vsub.f32 %v575_v12, %v13032_v41 }
 0x18c   : > { %1360 = vmatpush1.msra.mxu0 %v16850_v20  ;;  %1514 = vmatpush1.msra.mxu1 %v12656_v38  ;;  %v12979_v38 = vand.u32 4294901760, %v584_v17  ;;  %v1696_v4 = vand.u32 4294901760, %v1695_v63  ;;  %v13022_v30 = vsub.f32 %v581_v57, %v12993_v27  ;;  %v16863_v63 = vand.u32 4294901760, %v16823_v7  ;;  %v563_v7 = vld [vmem:[%s16452_s3 + $0x40] sm:$0xff] }
 0x18d   : > { %1364 = vmatprep.subr.mxu0 %v16851_v19  ;;  %1516 = vmatprep.subr.mxu1 %v12668_v29  ;;  %v12991_v29 = vsub.f32 %v587_v37, %v12961_v15  ;;  %v16860_v37 = vld [vmem:[#allocation23_spill] sm:$0xff]  ;;  %v1717_v57 = vand.u32 4294901760, %v1716_v25  ;;  %v13063_v19 = vand.u32 4294901760, %v569_v8  ;;  %v1750_v36 = vand.u32 4294901760, %v13061_v28 }
 0x18e   : > { %1368 = vmatpush1.msra.mxu0 %v16852_v22  ;;  %1518 = vmatpush1.msra.mxu1 %v16853_v61  ;;  %v13007_v40 = vsub.f32 %v584_v17, %v12979_v38  ;;  %v13045_v17 = vand.u32 4294901760, %v572_v60  ;;  %v1736_v20 = vand.u32 4294901760, %v13022_v30  ;;  %v16864_v22 = vld [vmem:[#allocation22_spill] sm:$0xff]  ;;  %v1743_v61 = vand.u32 4294901760, %v13043_v9 }
 0x18f   : > { %1551 = vmatprep.mubr.f32.mxu1 %v16802_v26  ;;  %1372 = vmatprep.subr.mxu0 %v16854_v31  ;;  %v1722_v56 = vand.u32 4294901760, %v12991_v29  ;;  %v13078_v31 = vand.u32 4294901760, %v566_v46  ;;  %v13091_v12 = vsub.f32 %v569_v8, %v13063_v19 }
 0x190   : > { %1553 = vmatmul.mubr.f32.vlgmr.msra.gmra.mxu1 %v16855_v0  ;;  %10892 = vmatprep.subr.mxu1 %v16802_v26  ;;  %v1729_v53 = vand.u32 4294901760, %v13007_v40  ;;  %v13076_v23 = vsub.f32 %v572_v60, %v13045_v17  ;;  %v1744_v60 = vsub.f32 %v13043_v9, %v1743_v61 }
 0x191   : > { %1376 = vmatpush1.msra.mxu0 %v16856_v6  ;;  %10893 = vmatpush3.msra.mxu1 %v1689_v48  ;;  %v1723_v14 = vsub.f32 %v12991_v29, %v1722_v56  ;;  %v560_v6 = vld [vmem:[%s16452_s3 + $0x28] sm:$0xff]  ;;  %v13107_v25 = vsub.f32 %v566_v46, %v13078_v31 }
 0x192   : > { %1380 = vmatprep.subr.mxu0 %v16857_v33  ;;  %10894 = vmatprep.subr.mxu1 %v16802_v26  ;;  %v1730_v48 = vsub.f32 %v13007_v40, %v1729_v53  ;;  %v13093_v33 = vand.u32 4294901760, %v563_v7 }
 0x193   : > { %1384 = vmatpush1.msra.mxu0 %v16858_v44  ;;  %1558 = vmatprep.mubr.f32.mxu1 %v16802_v26  ;;  %v1724_v62 = vand.u32 4294901760, %v1723_v14  ;;  %v557_v44 = vld [vmem:[%s16452_s3 + $0x10] sm:$0xff] }
 0x194   : > { %10895 = vmatpush3.msra.mxu1 %v1696_v4  ;;  %1388 = vmatprep.subr.mxu0 %v16859_v10  ;;  %v1737_v4 = vsub.f32 %v13022_v30, %v1736_v20  ;;  %v1757_v10 = vand.u32 4294901760, %v13076_v23  ;;  %v13119_v14 = vsub.f32 %v563_v7, %v13093_v33  ;;  %v13121_v46 = vand.u32 4294901760, %v557_v44 }
 0x195   : > { %1560 = vmatmul.mubr.f32.gmra.mxu1 %v16860_v37  ;;  %10896 = vmatprep.subr.mxu1 %v16802_v26 }
 0x196   : > { %1392 = vmatpush1.msra.mxu0 %v16861_v49  ;;  %10897 = vmatpush3.msra.mxu1 %v1703_v11  ;;  %v1731_v11 = vand.u32 4294901760, %v1730_v48  ;;  %v1738_v8 = vand.u32 4294901760, %v1737_v4  ;;  %v1751_v49 = vsub.f32 %v13061_v28, %v1750_v36  ;;  %v16541_v48 = vand.u32 4294901760, %v13107_v25 }
 0x197   : > { %1396 = vmatprep.subr.mxu0 %v16862_v32  ;;  %10898 = vmatprep.subr.mxu1 %v16802_v26  ;;  %v16540_v32 = vand.u32 4294901760, %v13091_v12 }
 0x198   : > { %1400 = vmatpush1.msra.mxu0 %v16863_v63  ;;  %1433 = vmatprep.mubr.f32.mxu0 %v16802_v26  ;;  %v1745_v63 = vand.u32 4294901760, %v1744_v60  ;;  %v1752_v7 = vand.u32 4294901760, %v1751_v49  ;;  %v13141_v60 = vsub.f32 %v557_v44, %v13121_v46 }
 0x199   : > { %1565 = vmatprep.mubr.f32.mxu1 %v16802_v26  ;;  %10899 = vmatpush3.msra.mxu1 %v1710_v5  ;;  %v13109_v5 = vand.u32 4294901760, %v560_v6  ;;  %v1765_v4 = vsub.f32 %v13091_v12, %v16540_v32 }
 0x19a   : > { %1435 = vmatmul.mubr.f32.vlgmr.msra.gmra.mxu0 %v16855_v0  ;;  %1567 = vmatmul.mubr.f32.gmra.mxu1 %v16864_v22 }
 0x19b   : > { %10851 = vmatprep.subr.mxu0 %v16802_v26  ;;  %10900 = vmatprep.subr.mxu1 %v16802_v26  ;;  %v1766_v44 = vand.u32 4294901760, %v1765_v4 }
 0x19c   : > { %10852 = vmatpush3.msra.mxu0 %v12874_v58  ;;  %10901 = vmatpush3.msra.mxu1 %v1717_v57  ;;  %v1758_v57 = vsub.f32 %v13076_v23, %v1757_v10 }
 0x19d   : > { %10853 = vmatprep.subr.mxu0 %v16802_v26  ;;  %10902 = vmatprep.subr.mxu1 %v16802_v26 }
 0x19e   : > { %1440 = vmatprep.mubr.f32.mxu0 %v16802_v26  ;;  %10854 = vmatpush3.msra.mxu0 %v12890_v1 }
 0x19f   : > { %10903 = vmatpush3.msra.mxu1 %v1724_v62  ;;  %1442 = vmatmul.mubr.f32.gmra.mxu0 %v16860_v37  ;;  %v13131_v62 = vsub.f32 %v560_v6, %v13109_v5  ;;  %v1759_v6 = vand.u32 4294901760, %v1758_v57 }
 0x1a0   : > { %10855 = vmatprep.subr.mxu0 %v16802_v26  ;;  %10904 = vmatprep.subr.mxu1 %v16802_v26 }
 0x1a1   : > { %10856 = vmatpush3.msra.mxu0 %v12901_v35  ;;  %10905 = vmatpush3.msra.mxu1 %v1731_v11  ;;  %v1778_v11 = vand.u32 4294901760, %v13119_v14  ;;  %v1785_v49 = vand.u32 4294901760, %v13131_v62 }
 0x1a2   : > { %10857 = vmatprep.subr.mxu0 %v16802_v26  ;;  %10906 = vmatprep.subr.mxu1 %v16802_v26 }
 0x1a3   : > { %1447 = vmatprep.mubr.f32.mxu0 %v16802_v26  ;;  %10858 = vmatpush3.msra.mxu0 %v12919_v59  ;;  %v1779_v32 = vsub.f32 %v13119_v14, %v1778_v11 }
 0x1a4   : > { %10907 = vmatpush3.msra.mxu1 %v1738_v8  ;;  %1449 = vmatmul.mubr.f32.gmra.mxu0 %v16864_v22  ;;  %v1772_v8 = vsub.f32 %v13107_v25, %v16541_v48  ;;  %v1786_v48 = vsub.f32 %v13131_v62, %v1785_v49 }
 0x1a5   : > { %10859 = vmatprep.subr.mxu0 %v16802_v26  ;;  %10908 = vmatprep.subr.mxu1 %v16802_v26 }
 0x1a6   : > { %10860 = vmatpush3.msra.mxu0 %v12937_v55  ;;  %10909 = vmatpush3.msra.mxu1 %v1745_v63  ;;  %v1792_v63 = vand.u32 4294901760, %v13141_v60  ;;  %v1773_v57 = vand.u32 4294901760, %v1772_v8  ;;  %v16866_v8 = vld [vmem:[#allocation25_spill] sm:$0xff] }
 0x1a7   : > { %10861 = vmatprep.subr.mxu0 %v16802_v26  ;;  %10910 = vmatprep.subr.mxu1 %v16802_v26 }
 0x1a8   : > { %10862 = vmatpush3.msra.mxu0 %v12961_v15  ;;  %10911 = vmatpush3.msra.mxu1 %v1752_v7  ;;  %v1780_v7 = vand.u32 4294901760, %v1779_v32  ;;  %v1793_v4 = vsub.f32 %v13141_v60, %v1792_v63 }
 0x1a9   : > { %10863 = vmatprep.subr.mxu0 %v16802_v26  ;;  %10912 = vmatprep.subr.mxu1 %v16802_v26 }
 0x1aa   : > { %10864 = vmatpush3.msra.mxu0 %v12979_v38  ;;  %10913 = vmatpush3.msra.mxu1 %v1759_v6  ;;  %v1787_v6 = vand.u32 4294901760, %v1786_v48  ;;  %v1794_v32 = vand.u32 4294901760, %v1793_v4  ;;  %v16865_v48 = vld [vmem:[#allocation24_spill] sm:$0xff] }
 0x1ab   : > { %10865 = vmatprep.subr.mxu0 %v16802_v26  ;;  %10914 = vmatprep.subr.mxu1 %v16802_v26 }
 0x1ac   : > { %10866 = vmatpush3.msra.mxu0 %v12993_v27  ;;  %10915 = vmatpush3.msra.mxu1 %v1766_v44  ;;  %v16867_v44 = vld [vmem:[#allocation26_spill] sm:$0xff] }
 0x1ad   : > { %10867 = vmatprep.subr.mxu0 %v16802_v26  ;;  %10916 = vmatprep.subr.mxu1 %v16802_v26 }
 0x1ae   : > { %10868 = vmatpush3.msra.mxu0 %v13015_v24  ;;  %10917 = vmatpush3.msra.mxu1 %v1773_v57 }
 0x1af   : > { %10869 = vmatprep.subr.mxu0 %v16802_v26  ;;  %10918 = vmatprep.subr.mxu1 %v16802_v26 }
 0x1b0   : > { %10870 = vmatpush3.msra.mxu0 %v13032_v41  ;;  %10919 = vmatpush3.msra.mxu1 %v1780_v7 }
 0x1b1   : > { %10871 = vmatprep.subr.mxu0 %v16802_v26  ;;  %10920 = vmatprep.subr.mxu1 %v16802_v26 }
 0x1b2   : > { %10872 = vmatpush3.msra.mxu0 %v13045_v17  ;;  %10921 = vmatpush3.msra.mxu1 %v1787_v6 }
 0x1b3   : > { %10873 = vmatprep.subr.mxu0 %v16802_v26  ;;  %10922 = vmatprep.subr.mxu1 %v16802_v26 }
 0x1b4   : > { %10874 = vmatpush3.msra.mxu0 %v13063_v19  ;;  %10923 = vmatpush3.msra.mxu1 %v1794_v32 }
 0x1b5   : > { %10924 = vmatprep.mubr.msk.f32.mxu1 %vm12161_vm1, %v16802_v26  ;;  %10875 = vmatprep.subr.mxu0 %v16802_v26 }
 0x1b6   : > { %10925 = vmatmul.mubr.f32.vlgmr.msra.gmra.mxu1 %v16855_v0  ;;  %10974 = vmatprep.subr.mxu1 %v16802_v26 }
 0x1b7   : > { %10876 = vmatpush3.msra.mxu0 %v13078_v31  ;;  %10975 = vmatpush3.msra.mxu1 %v12874_v58 }
 0x1b8   : > { %10877 = vmatprep.subr.mxu0 %v16802_v26  ;;  %10976 = vmatprep.subr.mxu1 %v16802_v26 }
 0x1b9   : > { %10878 = vmatpush3.msra.mxu0 %v13093_v33  ;;  %10927 = vmatprep.mubr.msk.f32.mxu1 %vm12161_vm1, %v16802_v26 }
 0x1ba   : > { %10977 = vmatpush3.msra.mxu1 %v12890_v1  ;;  %10879 = vmatprep.subr.mxu0 %v16802_v26 }
 0x1bb   : > { %10928 = vmatmul.mubr.f32.gmra.mxu1 %v16860_v37  ;;  %10978 = vmatprep.subr.mxu1 %v16802_v26 }
 0x1bc   : > { %10880 = vmatpush3.msra.mxu0 %v13109_v5  ;;  %10979 = vmatpush3.msra.mxu1 %v12901_v35 }
 0x1bd   : > { %10881 = vmatprep.subr.mxu0 %v16802_v26  ;;  %10980 = vmatprep.subr.mxu1 %v16802_v26 }
 0x1be   : > { %10882 = vmatpush3.msra.mxu0 %v13121_v46  ;;  %10883 = vmatprep.mubr.msk.f32.mxu0 %vm12161_vm1, %v16802_v26 }
 0x1bf   : > { %10930 = vmatprep.mubr.msk.f32.mxu1 %vm12161_vm1, %v16802_v26  ;;  %10981 = vmatpush3.msra.mxu1 %v12919_v59 }
 0x1c0   : > { %10884 = vmatmul.mubr.f32.vlgmr.msra.gmra.mxu0 %v16865_v48  ;;  %10931 = vmatmul.mubr.f32.gmra.mxu1 %v16864_v22 }
 0x1c1   : > { %10933 = vmatprep.subr.mxu0 %v16802_v26  ;;  %10982 = vmatprep.subr.mxu1 %v16802_v26 }
 0x1c2   : > { %10934 = vmatpush3.msra.mxu0 %v12896_v3  ;;  %10983 = vmatpush3.msra.mxu1 %v12937_v55 }
 0x1c3   : > { %10935 = vmatprep.subr.mxu0 %v16802_v26  ;;  %10984 = vmatprep.subr.mxu1 %v16802_v26 }
 0x1c4   : > { %10886 = vmatprep.mubr.msk.f32.mxu0 %vm12161_vm1, %v16802_v26  ;;  %10936 = vmatpush3.msra.mxu0 %v12913_v39 }
 0x1c5   : > { %10985 = vmatpush3.msra.mxu1 %v12961_v15  ;;  %10887 = vmatmul.mubr.f32.gmra.mxu0 %v16866_v8 }
 0x1c6   : > { %10937 = vmatprep.subr.mxu0 %v16802_v26  ;;  %10986 = vmatprep.subr.mxu1 %v16802_v26 }
 0x1c7   : > { %10938 = vmatpush3.msra.mxu0 %v12928_v52  ;;  %10987 = vmatpush3.msra.mxu1 %v12979_v38 }
 0x1c8   : > { %10939 = vmatprep.subr.mxu0 %v16802_v26  ;;  %10988 = vmatprep.subr.mxu1 %v16802_v26 }
 0x1c9   : > { %10889 = vmatprep.mubr.msk.f32.mxu0 %vm12161_vm1, %v16802_v26  ;;  %10940 = vmatpush3.msra.mxu0 %v12949_v47 }
 0x1ca   : > { %10989 = vmatpush3.msra.mxu1 %v12993_v27  ;;  %10890 = vmatmul.mubr.f32.gmra.mxu0 %v16867_v44 }
 0x1cb   : > { %10941 = vmatprep.subr.mxu0 %v16802_v26  ;;  %10990 = vmatprep.subr.mxu1 %v16802_v26 }
 0x1cc   : > { %10942 = vmatpush3.msra.mxu0 %v12970_v18  ;;  %10991 = vmatpush3.msra.mxu1 %v13015_v24 }
 0x1cd   : > { %10943 = vmatprep.subr.mxu0 %v16802_v26  ;;  %10992 = vmatprep.subr.mxu1 %v16802_v26 }
 0x1ce   : > { %10944 = vmatpush3.msra.mxu0 %v12991_v29  ;;  %10993 = vmatpush3.msra.mxu1 %v13032_v41  ;;  %v13399_v29 = vld [vmem:[%s16453_s4] sm:$0x7] }
 0x1cf   : > { %10945 = vmatprep.subr.mxu0 %v16802_v26  ;;  %10994 = vmatprep.subr.mxu1 %v16802_v26 }
 0x1d0   : > { %10946 = vmatpush3.msra.mxu0 %v13007_v40  ;;  %10995 = vmatpush3.msra.mxu1 %v13045_v17 }
 0x1d1   : > { %10947 = vmatprep.subr.mxu0 %v16802_v26  ;;  %10996 = vmatprep.subr.mxu1 %v16802_v26 }
 0x1d2   : > { %10948 = vmatpush3.msra.mxu0 %v13022_v30  ;;  %10997 = vmatpush3.msra.mxu1 %v13063_v19 }
 0x1d3   : > { %10949 = vmatprep.subr.mxu0 %v16802_v26  ;;  %10998 = vmatprep.subr.mxu1 %v16802_v26 }
 0x1d4   : > { %10950 = vmatpush3.msra.mxu0 %v13043_v9  ;;  %10999 = vmatpush3.msra.mxu1 %v13078_v31 }
 0x1d5   : > { %10951 = vmatprep.subr.mxu0 %v16802_v26  ;;  %11000 = vmatprep.subr.mxu1 %v16802_v26 }
 0x1d6   : > { %10952 = vmatpush3.msra.mxu0 %v13061_v28  ;;  %11001 = vmatpush3.msra.mxu1 %v13093_v33 }
 0x1d7   : > { %10953 = vmatprep.subr.mxu0 %v16802_v26  ;;  %11002 = vmatprep.subr.mxu1 %v16802_v26 }
 0x1d8   : > { %10954 = vmatpush3.msra.mxu0 %v13076_v23  ;;  %11003 = vmatpush3.msra.mxu1 %v13109_v5 }
 0x1d9   : > { %10955 = vmatprep.subr.mxu0 %v16802_v26  ;;  %11004 = vmatprep.subr.mxu1 %v16802_v26 }
 0x1da   : > { %10956 = vmatpush3.msra.mxu0 %v13091_v12  ;;  %11005 = vmatpush3.msra.mxu1 %v13121_v46 }
 0x1db   : > { %11006 = vmatprep.mubr.msk.f32.mxu1 %vm12161_vm1, %v16802_v26  ;;  %10957 = vmatprep.subr.mxu0 %v16802_v26 }
 0x1dc   : > { %11007 = vmatmul.mubr.f32.vlgmr.msra.gmra.mxu1 %v12733_v51  ;;  %11056 = vmatprep.subr.mxu1 %v16802_v26  ;;  %v16869_v51 = vand.u32 4294901760, %v13107_v25 }
 0x1dd   : > { %10958 = vmatpush3.msra.mxu0 %v13107_v25  ;;  %11057 = vmatpush3.msra.mxu1 %v12874_v58 }
 0x1de   : > { %10959 = vmatprep.subr.mxu0 %v16802_v26  ;;  %11058 = vmatprep.subr.mxu1 %v16802_v26 }
 0x1df   : > { %10960 = vmatpush3.msra.mxu0 %v13119_v14  ;;  %11009 = vmatprep.mubr.msk.f32.mxu1 %vm12161_vm1, %v16802_v26 }
 0x1e0   : > { %11059 = vmatpush3.msra.mxu1 %v12890_v1  ;;  %10961 = vmatprep.subr.mxu0 %v16802_v26 }
 0x1e1   : > { %11010 = vmatmul.mubr.f32.gmra.mxu1 %v12754_v43  ;;  %11060 = vmatprep.subr.mxu1 %v16802_v26 }
 0x1e2   : > { %10962 = vmatpush3.msra.mxu0 %v13131_v62  ;;  %11061 = vmatpush3.msra.mxu1 %v12901_v35 }
 0x1e3   : > { %10963 = vmatprep.subr.mxu0 %v16802_v26  ;;  %11062 = vmatprep.subr.mxu1 %v16802_v26 }
 0x1e4   : > { %10964 = vmatpush3.msra.mxu0 %v13141_v60  ;;  %10965 = vmatprep.mubr.msk.f32.mxu0 %vm12161_vm1, %v16802_v26 }
 0x1e5   : > { %11012 = vmatprep.mubr.msk.f32.mxu1 %vm12161_vm1, %v16802_v26  ;;  %11063 = vmatpush3.msra.mxu1 %v12919_v59 }
 0x1e6   : > { %10966 = vmatmul.mubr.f32.vlgmr.msra.gmra.mxu0 %v12725_v50  ;;  %11013 = vmatmul.mubr.f32.gmra.mxu1 %v12763_v42  ;;  %v16868_v50 = vand.u32 4294901760, %v13091_v12 }
 0x1e7   : > { %11015 = vmatprep.subr.mxu0 %v16802_v26  ;;  %11064 = vmatprep.subr.mxu1 %v16802_v26 }
 0x1e8   : > { %11016 = vmatpush3.msra.mxu0 %v1687_v45  ;;  %11065 = vmatpush3.msra.mxu1 %v12937_v55 }
 0x1e9   : > { %11017 = vmatprep.subr.mxu0 %v16802_v26  ;;  %11066 = vmatprep.subr.mxu1 %v16802_v26 }
 0x1ea   : > { %10968 = vmatprep.mubr.msk.f32.mxu0 %vm12161_vm1, %v16802_v26  ;;  %11018 = vmatpush3.msra.mxu0 %v1694_v54  ;;  %v605_v54 = vlaneseq }
 0x1eb   : > { %11067 = vmatpush3.msra.mxu1 %v12961_v15  ;;  %10969 = vmatmul.mubr.f32.gmra.mxu0 %v12743_v34 }
 0x1ec   : > { %11019 = vmatprep.subr.mxu0 %v16802_v26  ;;  %11068 = vmatprep.subr.mxu1 %v16802_v26 }
 0x1ed   : > { %11020 = vmatpush3.msra.mxu0 %v1701_v13  ;;  %11069 = vmatpush3.msra.mxu1 %v12979_v38  ;;  %v13393_v13 = vshrl.u32 %v605_v54, 7 }
 0x1ee   : > { %11021 = vmatprep.subr.mxu0 %v16802_v26  ;;  %11070 = vmatprep.subr.mxu1 %v16802_v26 }
 0x1ef   : > { %10971 = vmatprep.mubr.msk.f32.mxu0 %vm12161_vm1, %v16802_v26  ;;  %11022 = vmatpush3.msra.mxu0 %v1708_v21  ;;  %16870 = vst [vmem:[#allocation10_spill] sm:$0xff] %v13393_v13  ;;  %v16543_v21 = vsub.s32 0, %v13393_v13  ;;  %v16542_v40 = vsub.s32 1, %v13393_v13 }
 0x1f0   : > { %11071 = vmatpush3.msra.mxu1 %v12993_v27  ;;  %10972 = vmatmul.mubr.f32.gmra.mxu0 %v12746_v2 }
 0x1f1   : > { %11023 = vmatprep.subr.mxu0 %v16802_v26  ;;  %11072 = vmatprep.subr.mxu1 %v16802_v26 }
 0x1f2   : > { %11024 = vmatpush3.msra.mxu0 %v1715_v16  ;;  %11073 = vmatpush3.msra.mxu1 %v13015_v24 }
 0x1f3   : > { %11025 = vmatprep.subr.mxu0 %v16802_v26  ;;  %11074 = vmatprep.subr.mxu1 %v16802_v26 }
 0x1f4   : > { %11026 = vmatpush3.msra.mxu0 %v1722_v56  ;;  %11075 = vmatpush3.msra.mxu1 %v13032_v41  ;;  %v612_v41 = vrot.slane %v13399_v29, %v16542_v40 }
 0x1f5   : > { %11027 = vmatprep.subr.mxu0 %v16802_v26  ;;  %11076 = vmatprep.subr.mxu1 %v16802_v26 }
 0x1f6   : > { %11028 = vmatpush3.msra.mxu0 %v1729_v53  ;;  %11077 = vmatpush3.msra.mxu1 %v13045_v17 }
 0x1f7   : > { %11029 = vmatprep.subr.mxu0 %v16802_v26  ;;  %11078 = vmatprep.subr.mxu1 %v16802_v26 }
 0x1f8   : > { %11030 = vmatpush3.msra.mxu0 %v1736_v20  ;;  %11079 = vmatpush3.msra.mxu1 %v13063_v19 }
 0x1f9   : > { %11031 = vmatprep.subr.mxu0 %v16802_v26  ;;  %11080 = vmatprep.subr.mxu1 %v16802_v26 }
 0x1fa   : > { %11032 = vmatpush3.msra.mxu0 %v1743_v61  ;;  %11081 = vmatpush3.msra.mxu1 %v13078_v31 }
 0x1fb   : > { %11033 = vmatprep.subr.mxu0 %v16802_v26  ;;  %11082 = vmatprep.subr.mxu1 %v16802_v26 }
 0x1fc   : > { %11034 = vmatpush3.msra.mxu0 %v1750_v36  ;;  %11083 = vmatpush3.msra.mxu1 %v13093_v33 }
 0x1fd   : > { %11035 = vmatprep.subr.mxu0 %v16802_v26  ;;  %11084 = vmatprep.subr.mxu1 %v16802_v26 }
 0x1fe   : > { %11036 = vmatpush3.msra.mxu0 %v1757_v10  ;;  %11085 = vmatpush3.msra.mxu1 %v13109_v5 }
 0x1ff   : > { %11037 = vmatprep.subr.mxu0 %v16802_v26  ;;  %11086 = vmatprep.subr.mxu1 %v16802_v26 }
 0x200   : > { %11038 = vmatpush3.msra.mxu0 %v16868_v50  ;;  %11087 = vmatpush3.msra.mxu1 %v13121_v46 }
 0x201   : > { %11088 = vmatprep.mubr.msk.f32.mxu1 %vm12161_vm1, %v16802_v26  ;;  %11039 = vmatprep.subr.mxu0 %v16802_v26 }
 0x202   : > { %11089 = vmatmul.mubr.f32.vlgmr.msra.gmra.mxu1 %v16855_v0  ;;  %11040 = vmatpush3.msra.mxu0 %v16869_v51 }
 0x203   : > { %11041 = vmatprep.subr.mxu0 %v16802_v26  ;;  %11091 = vmatprep.mubr.msk.f32.mxu1 %vm12161_vm1, %v16802_v26 }
 0x204   : > { %11042 = vmatpush3.msra.mxu0 %v1778_v11  ;;  %11047 = vmatprep.mubr.msk.f32.mxu0 %vm12161_vm1, %v16802_v26 }
 0x205   : > { %11043 = vmatprep.subr.mxu0 %v16802_v26  ;;  %11112 = vmatprep.subr.mxu1 %v16802_v26 }
 0x206   : > { %11092 = vmatmul.mubr.f32.gmra.mxu1 %v16860_v37  ;;  %11044 = vmatpush3.msra.mxu0 %v1785_v49  ;;  %v977_v34 = vpop.f32.mrf.mxu1 }
 0x207   : > { %11045 = vmatprep.subr.mxu0 %v16802_v26  ;;  %11094 = vmatprep.mubr.msk.f32.mxu1 %vm12161_vm1, %v16802_v26 }
 0x208   : > { %11046 = vmatpush3.msra.mxu0 %v1792_v63  ;;  %v979_v2 = vpop.f32.mrf.mxu1 }
 0x209   : > { %11048 = vmatmul.mubr.f32.vlgmr.msra.gmra.mxu0 %v16855_v0  ;;  %11097 = vmatprep.subr.mxu0 %v16802_v26  ;;  %v608_v0 = vrot.slane %v13399_v29, %v16543_v21 }
 0x20a   : > { %11095 = vmatmul.mubr.f32.gmra.mxu1 %v16864_v22  ;;  %11050 = vmatprep.mubr.msk.f32.mxu0 %vm12161_vm1, %v16802_v26 }
 0x20b   : > { %11118 = vmatprep.mubr.msk.f32.mxu1 %vm12161_vm1, %v16802_v26  ;;  %v984_v42 = vpop.f32.mrf.mxu1 }
 0x20d   : > { %11051 = vmatmul.mubr.f32.gmra.mxu0 %v16860_v37  ;;  %v986_v1 = vpop.f32.mrf.mxu1 }
 0x20e   : > { %11053 = vmatprep.mubr.msk.f32.mxu0 %vm12161_vm1, %v16802_v26  ;;  %v723_v43 = vpop.f32.mrf.mxu0 }
 0x20f   : > { %v991_v35 = vpop.f32.mrf.mxu1  ;;  %v724_v56 = vadd.f32 %v723_v43, %v608_v0 }
 0x210   : > { %v725_v58 = vpop.f32.mrf.mxu0 }
 0x211   : > { %11054 = vmatmul.mubr.f32.gmra.mxu0 %v16864_v22  ;;  %v993_v45 = vpop.f32.mrf.mxu1  ;;  %v978_v9 = vadd.f32 %v977_v34, %v724_v56  ;;  %v726_v28 = vadd.f32 %v725_v58, %v612_v41 }
 0x212   : > { %11103 = vmatprep.mubr.msk.f32.mxu0 %vm12161_vm1, %v16802_v26 }
 0x213   : > { %v980_v12 = vadd.f32 %v979_v2, %v726_v28 }
 0x214   : > { %v734_v3 = vpop.f32.mrf.mxu0 }
 0x215   : > { %v735_v53 = vadd.f32 %v734_v3, %v608_v0 }
 0x216   : > { %v736_v39 = vpop.f32.mrf.mxu0 }
 0x217   : > { %v737_v19 = vadd.f32 %v736_v39, %v612_v41  ;;  %v985_v61 = vadd.f32 %v984_v42, %v735_v53 }
 0x219   : > { %v745_v59 = vpop.f32.mrf.mxu0  ;;  %v987_v10 = vadd.f32 %v986_v1, %v737_v19 }
 0x21a   : > { %v746_v36 = vadd.f32 %v745_v59, %v608_v0 }
 0x21b   : > { %v747_v55 = vpop.f32.mrf.mxu0 }
 0x21c   : > { %v748_v14 = vadd.f32 %v747_v55, %v612_v41  ;;  %v992_v63 = vadd.f32 %v991_v35, %v746_v36 }
 0x21e   : > { %v994_v4 = vadd.f32 %v993_v45, %v748_v14 }
 0x22a   : > { %v1250_v52 = vpop.f32.mrf.mxu1 }
 0x22c   : > { %v1252_v47 = vpop.f32.mrf.mxu1 }
 0x22f   : > { %v1259_v18 = vpop.f32.mrf.mxu1 }
 0x231   : > { %v1261_v27 = vpop.f32.mrf.mxu1 }
 0x234   : > { %v1128_v15 = vpop.f32.mrf.mxu0  ;;  %v1268_v24 = vpop.f32.mrf.mxu1 }
 0x235   : > { %v1129_v22 = vadd.f32 %v1128_v15, %v978_v9 }
 0x236   : > { %v1130_v38 = vpop.f32.mrf.mxu0  ;;  %v1270_v37 = vpop.f32.mrf.mxu1 }
 0x237   : > { %v1251_v25 = vadd.f32 %v1250_v52, %v1129_v22  ;;  %v1131_v46 = vadd.f32 %v1130_v38, %v980_v12 }
 0x239   : > { %v1136_v16 = vpop.f32.mrf.mxu0  ;;  %v1253_v6 = vadd.f32 %v1252_v47, %v1131_v46 }
 0x23a   : > { %v1137_v33 = vadd.f32 %v1136_v16, %v985_v61 }
 0x23b   : > { %v1138_v30 = vpop.f32.mrf.mxu0 }
 0x23c   : > { %v1139_v62 = vadd.f32 %v1138_v30, %v987_v10  ;;  %v1260_v57 = vadd.f32 %v1259_v18, %v1137_v33 }
 0x23e   : > { %v1144_v17 = vpop.f32.mrf.mxu0  ;;  %v1262_v50 = vadd.f32 %v1261_v27, %v1139_v62 }
 0x23f   : > { %v1145_v7 = vadd.f32 %v1144_v17, %v992_v63 }
 0x240   : > { %v1146_v23 = vpop.f32.mrf.mxu0 }
 0x241   : > { %v1147_v51 = vadd.f32 %v1146_v23, %v994_v4  ;;  %v1269_v42 = vadd.f32 %v1268_v24, %v1145_v7  ;;  %v615_v7 = vsub.s32 2, %v13393_v13 }
 0x243   : > { %v1271_v52 = vadd.f32 %v1270_v37, %v1147_v51 }
 0x250   : > { %v1554_v20 = vpop.f32.mrf.mxu1 }
 0x252   : > { %v1556_v31 = vpop.f32.mrf.mxu1 }
 0x255   : > { %v1561_v11 = vpop.f32.mrf.mxu1 }
 0x257   : > { %v1563_v48 = vpop.f32.mrf.mxu1 }
 0x25a   : > { %v1436_v5 = vpop.f32.mrf.mxu0  ;;  %v1568_v1 = vpop.f32.mrf.mxu1 }
 0x25b   : > { %v1437_v60 = vadd.f32 %v1436_v5, %v1251_v25 }
 0x25c   : > { %v1438_v49 = vpop.f32.mrf.mxu0  ;;  %v1570_v18 = vpop.f32.mrf.mxu1 }
 0x25d   : > { %v13408_v8 = vadd.f32 %v1554_v20, %v1437_v60  ;;  %v1439_v34 = vadd.f32 %v1438_v49, %v1253_v6 }
 0x25f   : > { %v1443_v32 = vpop.f32.mrf.mxu0  ;;  %v2302_v58 = vsel %vm2300_vm2, %v13408_v8, 0  ;;  %v13416_v45 = vadd.f32 %v1556_v31, %v1439_v34 }
 0x260   : > { %v1444_v44 = vadd.f32 %v1443_v32, %v1260_v57  ;;  %v13420_v47 = vand.u32 4294901760, %v2302_v58 }
 0x261   : > { %v1445_v2 = vpop.f32.mrf.mxu0  ;;  %v2311_v24 = vsel %vm2300_vm2, %v13416_v45, 0 }
 0x262   : > { %v1446_v43 = vadd.f32 %v1445_v2, %v1262_v50  ;;  %v13412_v3 = vadd.f32 %v1561_v11, %v1444_v44  ;;  %v13433_v56 = vsub.f32 %v2302_v58, %v13420_v47  ;;  %v13444_v9 = vand.u32 4294901760, %v2311_v24 }
 0x263   : > { %v13498_v50 = vrot.slane %v13399_v29, %v615_v7 }
 0x264   : > { %v13414_v35 = vadd.f32 %v1563_v48, %v1446_v43  ;;  %v1450_v39 = vpop.f32.mrf.mxu0  ;;  %v2305_v0 = vsel %vm2300_vm2, %v13412_v3, 0  ;;  %v2389_v28 = vand.u32 4294901760, %v13433_v56  ;;  %v13460_v61 = vsub.f32 %v2311_v24, %v13444_v9 }
 0x265   : > { %v1451_v59 = vadd.f32 %v1450_v39, %v1269_v42  ;;  %v13437_v41 = vand.u32 4294901760, %v2305_v0 }
 0x266   : > { %v1452_v54 = vpop.f32.mrf.mxu0  ;;  %v2314_v55 = vsel %vm2300_vm2, %v13414_v35, 0  ;;  %v2390_v12 = vsub.f32 %v13433_v56, %v2389_v28  ;;  %v2460_v14 = vand.u32 4294901760, %v13460_v61 }
 0x267   : > { %v1453_v15 = vadd.f32 %v1452_v54, %v1271_v52  ;;  %v13422_v38 = vadd.f32 %v1568_v1, %v1451_v59  ;;  %v13424_v27 = vand.u32 4294901760, %v2314_v55  ;;  %v13455_v19 = vsub.f32 %v2305_v0, %v13437_v41 }
 0x268   : > { %v2391_v62 = vand.u32 4294901760, %v2390_v12  ;;  %v2461_v57 = vsub.f32 %v13460_v61, %v2460_v14 }
 0x269   : > { %v13428_v16 = vadd.f32 %v1570_v18, %v1453_v15  ;;  %v13442_v53 = vsub.f32 %v2314_v55, %v13424_v27  ;;  %v2308_v17 = vsel %vm2300_vm2, %v13422_v38, 0  ;;  %v2399_v33 = vand.u32 4294901760, %v13455_v19 }
 0x26a   : > { %v13457_v22 = vand.u32 4294901760, %v2308_v17  ;;  %v2462_v48 = vand.u32 4294901760, %v2461_v57 }
 0x26b   : > { %v2317_v30 = vsel %vm2300_vm2, %v13428_v16, 0  ;;  %v2453_v31 = vand.u32 4294901760, %v13442_v53  ;;  %v2400_v11 = vsub.f32 %v13455_v19, %v2399_v33 }
 0x26c   : > { %v13439_v37 = vand.u32 4294901760, %v2317_v30  ;;  %v13472_v10 = vsub.f32 %v2308_v17, %v13457_v22 }
 0x26d   : > { %v2454_v5 = vsub.f32 %v13442_v53, %v2453_v31  ;;  %v2401_v6 = vand.u32 4294901760, %v2400_v11 }
 0x26e   : > { %11098 = vmatpush3.xpose.msra.mxu0 %v13439_v37  ;;  %v13450_v20 = vsub.f32 %v2317_v30, %v13439_v37  ;;  %v2409_v60 = vand.u32 4294901760, %v13472_v10 }
 0x26f   : > { %11099 = vmatprep.subr.mxu0 %v16802_v26  ;;  %v2455_v63 = vand.u32 4294901760, %v2454_v5 }
 0x270   : > { %v2446_v23 = vand.u32 4294901760, %v13450_v20  ;;  %v2410_v32 = vsub.f32 %v13472_v10, %v2409_v60 }
 0x272   : > { %11100 = vmatpush3.xpose.msra.mxu0 %v13424_v27  ;;  %v2447_v36 = vsub.f32 %v13450_v20, %v2446_v23  ;;  %v2411_v51 = vand.u32 4294901760, %v2410_v32 }
 0x273   : > { %11101 = vmatprep.subr.mxu0 %v16802_v26 }
 0x274   : > { %v2448_v25 = vand.u32 4294901760, %v2447_v36 }
 0x276   : > { %v1831_v46 = vpop.f32.mrf.mxu1  ;;  %11102 = vmatpush3.xpose.msra.mxu0 %v13444_v9  ;;  %11113 = vmatpush3.xpose.msra.mxu1 %v2448_v25 }
 0x277   : > { %11114 = vmatprep.subr.mxu1 %v16802_v26  ;;  %11127 = vmatprep.subr.mxu0 %v16802_v26 }
 0x278   : > { %v10926_v49 = vpop.f32.mrf.mxu1 }
 0x279   : > { %11104 = vmatmul.mubr.f32.vlgmr.msra.gmra.mxu0 %v2391_v62 }
 0x27a   : > { %11115 = vmatpush3.xpose.msra.mxu1 %v2455_v63  ;;  %11128 = vmatpush3.xpose.msra.mxu0 %v13450_v20 }
 0x27b   : > { %v1837_v4 = vpop.f32.mrf.mxu1  ;;  %11106 = vmatprep.mubr.msk.f32.mxu0 %vm12161_vm1, %v16802_v26  ;;  %11116 = vmatprep.subr.mxu1 %v16802_v26 }
 0x27c   : > { %11129 = vmatprep.subr.mxu0 %v16802_v26 }
 0x27d   : > { %v10929_v44 = vpop.f32.mrf.mxu1  ;;  %11107 = vmatmul.mubr.f32.gmra.mxu0 %v2401_v6 }
 0x27e   : > { %11117 = vmatpush3.xpose.msra.mxu1 %v2462_v48  ;;  %11130 = vmatpush3.xpose.msra.mxu0 %v13442_v53 }
 0x27f   : > { %11109 = vmatprep.mubr.msk.f32.mxu0 %vm12161_vm1, %v16802_v26  ;;  %11131 = vmatprep.subr.mxu0 %v16802_v26 }
 0x280   : > { %v1660_v34 = vpop.f32.mrf.mxu0  ;;  %v13504_v2 = vpop.f32.mrf.mxu1  ;;  %11142 = vmatprep.subr.mxu1 %v16802_v26 }
 0x281   : > { %v1661_v43 = vadd.f32 %v1660_v34, %v13498_v50  ;;  %11110 = vmatmul.mubr.f32.gmra.mxu0 %v2411_v51  ;;  %11119 = vmatmul.mubr.f32.vlgmr.msra.gmra.mxu1 %v13420_v47 }
 0x282   : > { %v10885_v29 = vpop.f32.mrf.mxu0  ;;  %v10932_v42 = vpop.f32.mrf.mxu1  ;;  %11132 = vmatpush3.xpose.msra.mxu0 %v13460_v61  ;;  %11143 = vmatpush3.xpose.msra.mxu1 %v13439_v37 }
 0x283   : > { %11121 = vmatprep.mubr.msk.f32.mxu1 %vm12161_vm1, %v16802_v26  ;;  %11133 = vmatprep.mubr.msk.f32.mxu0 %vm12161_vm1, %v16802_v26  ;;  %v13515_v58 = vadd.f32 %v1831_v46, %v1661_v43 }
 0x284   : > { %11144 = vmatprep.subr.mxu1 %v16802_v26  ;;  %11157 = vmatprep.subr.mxu0 %v16802_v26 }
 0x285   : > { %v1670_v1 = vpop.f32.mrf.mxu0  ;;  %11122 = vmatmul.mubr.f32.gmra.mxu1 %v13437_v41  ;;  %11134 = vmatmul.mubr.f32.vlgmr.msra.gmra.mxu0 %v13433_v56 }
 0x286   : > { %v1671_v39 = vadd.f32 %v1670_v1, %v13498_v50  ;;  %11145 = vmatpush3.xpose.msra.mxu1 %v13424_v27  ;;  %11158 = vmatpush3.xpose.msra.mxu0 %v2446_v23 }
 0x287   : > { %v10888_v59 = vpop.f32.mrf.mxu0  ;;  %11124 = vmatprep.mubr.msk.f32.mxu1 %vm12161_vm1, %v16802_v26  ;;  %11136 = vmatprep.mubr.msk.f32.mxu0 %vm12161_vm1, %v16802_v26 }
 0x288   : > { %11146 = vmatprep.subr.mxu1 %v16802_v26  ;;  %11159 = vmatprep.subr.mxu0 %v16802_v26  ;;  %v1838_v52 = vadd.f32 %v1837_v4, %v1671_v39 }
 0x289   : > { %11125 = vmatmul.mubr.f32.gmra.mxu1 %v13457_v22  ;;  %11137 = vmatmul.mubr.f32.gmra.mxu0 %v13455_v19 }
 0x28a   : > { %v1680_v54 = vpop.f32.mrf.mxu0  ;;  %11147 = vmatpush3.xpose.msra.mxu1 %v13444_v9  ;;  %11160 = vmatpush3.xpose.msra.mxu0 %v2453_v31 }
 0x28b   : > { %11139 = vmatprep.mubr.msk.f32.mxu0 %vm12161_vm1, %v16802_v26  ;;  %11148 = vmatprep.mubr.msk.f32.mxu1 %vm12161_vm1, %v16802_v26  ;;  %v1681_v19 = vadd.f32 %v1680_v54, %v13498_v50 }
 0x28c   : > { %v10891_v55 = vpop.f32.mrf.mxu0  ;;  %11161 = vmatprep.subr.mxu0 %v16802_v26  ;;  %11172 = vmatprep.subr.mxu1 %v16802_v26 }
 0x28d   : > { %11140 = vmatmul.mubr.f32.gmra.mxu0 %v13472_v10  ;;  %11149 = vmatmul.mubr.f32.vlgmr.msra.gmra.mxu1 %v2389_v28  ;;  %v1844_v12 = vadd.f32 %v13504_v2, %v1681_v19 }
 0x28e   : > { %11162 = vmatpush3.xpose.msra.mxu0 %v2460_v14  ;;  %11173 = vmatpush3.xpose.msra.mxu1 %v13439_v37 }
 0x28f   : > { %11151 = vmatprep.mubr.msk.f32.mxu1 %vm12161_vm1, %v16802_v26  ;;  %11163 = vmatprep.mubr.msk.f32.mxu0 %vm12161_vm1, %v16802_v26 }
 0x290   : > { %11174 = vmatprep.subr.mxu1 %v16802_v26  ;;  %11187 = vmatprep.subr.mxu0 %v16802_v26 }
 0x291   : > { %11152 = vmatmul.mubr.f32.gmra.mxu1 %v2399_v33  ;;  %11164 = vmatmul.mubr.f32.vlgmr.msra.gmra.mxu0 %v13420_v47 }
 0x292   : > { %11175 = vmatpush3.xpose.msra.mxu1 %v13424_v27  ;;  %11154 = vmatprep.mubr.msk.f32.mxu1 %vm12161_vm1, %v16802_v26 }
 0x293   : > { %11166 = vmatprep.mubr.msk.f32.mxu0 %vm12161_vm1, %v16802_v26  ;;  %11176 = vmatprep.subr.mxu1 %v16802_v26 }
 0x295   : > { %11155 = vmatmul.mubr.f32.gmra.mxu1 %v2409_v60  ;;  %11167 = vmatmul.mubr.f32.gmra.mxu0 %v13437_v41 }
 0x296   : > { %11177 = vmatpush3.xpose.msra.mxu1 %v13444_v9  ;;  %11169 = vmatprep.mubr.msk.f32.mxu0 %vm12161_vm1, %v16802_v26 }
 0x297   : > { %11178 = vmatprep.mubr.msk.f32.mxu1 %vm12161_vm1, %v16802_v26  ;;  %11202 = vmatprep.subr.mxu1 %v16802_v26 }
 0x299   : > { %11170 = vmatmul.mubr.f32.gmra.mxu0 %v13457_v22  ;;  %11179 = vmatmul.mubr.f32.vlgmr.msra.gmra.mxu1 %v13420_v47 }
 0x29a   : > { %11181 = vmatprep.mubr.msk.f32.mxu1 %vm12161_vm1, %v16802_v26  ;;  %11193 = vmatprep.mubr.msk.f32.mxu0 %vm12161_vm1, %v16802_v26 }
 0x29c   : > { %v2050_v15 = vpop.f32.mrf.mxu1 }
 0x29d   : > { %11182 = vmatmul.mubr.f32.gmra.mxu1 %v13437_v41 }
 0x29e   : > { %v11008_v18 = vpop.f32.mrf.mxu1  ;;  %11184 = vmatprep.mubr.msk.f32.mxu1 %vm12161_vm1, %v16802_v26 }
 0x2a1   : > { %v2058_v27 = vpop.f32.mrf.mxu1  ;;  %11185 = vmatmul.mubr.f32.gmra.mxu1 %v13457_v22 }
 0x2a2   : > { %11208 = vmatprep.mubr.msk.f32.mxu1 %vm12161_vm1, %v16802_v26 }
 0x2a3   : > { %v11011_v47 = vpop.f32.mrf.mxu1 }
 0x2a6   : > { %v1947_v0 = vpop.f32.mrf.mxu0  ;;  %v2066_v24 = vpop.f32.mrf.mxu1 }
 0x2a7   : > { %v1948_v28 = vadd.f32 %v1947_v0, %v13515_v58 }
 0x2a8   : > { %v10967_v56 = vpop.f32.mrf.mxu0  ;;  %v11014_v30 = vpop.f32.mrf.mxu1 }
 0x2a9   : > { %v2051_v31 = vadd.f32 %v2050_v15, %v1948_v28 }
 0x2ab   : > { %v1954_v37 = vpop.f32.mrf.mxu0 }
 0x2ac   : > { %v1955_v22 = vadd.f32 %v1954_v37, %v1838_v52 }
 0x2ad   : > { %v10970_v53 = vpop.f32.mrf.mxu0 }
 0x2ae   : > { %v2059_v46 = vadd.f32 %v2058_v27, %v1955_v22 }
 0x2b0   : > { %v1961_v9 = vpop.f32.mrf.mxu0 }
 0x2b1   : > { %v1962_v5 = vadd.f32 %v1961_v9, %v1844_v12 }
 0x2b2   : > { %v10973_v17 = vpop.f32.mrf.mxu0 }
 0x2b3   : > { %v2067_v57 = vadd.f32 %v2066_v24, %v1962_v5 }
 0x2c2   : > { %v2284_v41 = vpop.f32.mrf.mxu1 }
 0x2c4   : > { %v11090_v20 = vpop.f32.mrf.mxu1 }
 0x2c6   : > { %v2290_v61 = vpop.f32.mrf.mxu1 }
 0x2c8   : > { %v11093_v23 = vpop.f32.mrf.mxu1 }
 0x2c9   : > { %v2185_v36 = vpop.f32.mrf.mxu0 }
 0x2ca   : > { %v2296_v33 = vpop.f32.mrf.mxu1  ;;  %v2186_v10 = vadd.f32 %v2185_v36, %v2051_v31 }
 0x2cb   : > { %v11049_v25 = vpop.f32.mrf.mxu0 }
 0x2cc   : > { %v11096_v14 = vpop.f32.mrf.mxu1  ;;  %v13585_v60 = vadd.f32 %v2284_v41, %v2186_v10 }
 0x2cd   : > { %v2191_v62 = vpop.f32.mrf.mxu0 }
 0x2ce   : > { %v2192_v11 = vadd.f32 %v2191_v62, %v2059_v46  ;;  %v13593_v48 = vand.u32 4294901760, %v13585_v60 }
 0x2cf   : > { %v11052_v49 = vpop.f32.mrf.mxu0 }
 0x2d0   : > { %v13587_v63 = vadd.f32 %v2290_v61, %v2192_v11  ;;  %v13607_v2 = vsub.f32 %v13585_v60, %v13593_v48 }
 0x2d1   : > { %v2197_v7 = vpop.f32.mrf.mxu0 }
 0x2d2   : > { %v2198_v4 = vadd.f32 %v2197_v7, %v2067_v57  ;;  %v13590_v6 = vand.u32 4294901760, %v13587_v63  ;;  %v3068_v58 = vand.u32 4294901760, %v13607_v2 }
 0x2d3   : > { %v11055_v32 = vpop.f32.mrf.mxu0 }
 0x2d4   : > { %v13595_v44 = vadd.f32 %v2296_v33, %v2198_v4  ;;  %v13599_v50 = vsub.f32 %v13587_v63, %v13590_v6  ;;  %v3069_v52 = vsub.f32 %v13607_v2, %v3068_v58 }
 0x2d6   : > { %v2925_v51 = vsel %vm502_vm0, %v13595_v44, 0  ;;  %v3061_v29 = vand.u32 4294901760, %v13599_v50  ;;  %v3070_v55 = vand.u32 4294901760, %v3069_v52 }
 0x2d7   : > { %v13603_v34 = vand.u32 4294901760, %v2925_v51 }
 0x2d8   : > { %v3062_v39 = vsub.f32 %v13599_v50, %v3061_v29 }
 0x2d9   : > { %11188 = vmatpush3.msra.mxu0 %v13603_v34  ;;  %v13611_v43 = vsub.f32 %v2925_v51, %v13603_v34 }
 0x2da   : > { %11189 = vmatprep.subr.mxu0 %v16802_v26  ;;  %v3063_v54 = vand.u32 4294901760, %v3062_v39 }
 0x2db   : > { %11190 = vmatpush3.msra.mxu0 %v13590_v6  ;;  %v3054_v42 = vand.u32 4294901760, %v13611_v43 }
 0x2dc   : > { %11191 = vmatprep.subr.mxu0 %v16802_v26 }
 0x2dd   : > { %11192 = vmatpush3.msra.mxu0 %v13593_v48  ;;  %v3055_v1 = vsub.f32 %v13611_v43, %v3054_v42 }
 0x2de   : > { %11217 = vmatprep.subr.mxu0 %v16802_v26 }
 0x2df   : > { %v3056_v59 = vand.u32 4294901760, %v3055_v1 }
 0x2e1   : > { %11203 = vmatpush3.msra.mxu1 %v3056_v59 }
 0x2e2   : > { %11204 = vmatprep.subr.mxu1 %v16802_v26 }
 0x2e3   : > { %11205 = vmatpush3.msra.mxu1 %v3063_v54 }
 0x2e4   : > { %11206 = vmatprep.subr.mxu1 %v16802_v26 }
 0x2e5   : > { %11207 = vmatpush3.msra.mxu1 %v3070_v55 }
 0x2e6   : > { %11232 = vmatprep.subr.mxu1 %v16802_v26 }
 0x339   : > { %v2393_v15 = vpop.f32.mrf.mxu0 }
 0x33b   : > { %v11105_v18 = vpop.f32.mrf.mxu0 }
 0x33d   : > { %v2403_v27 = vpop.f32.mrf.mxu0 }
 0x33f   : > { %v11108_v47 = vpop.f32.mrf.mxu0 }
 0x341   : > { %v2413_v0 = vpop.f32.mrf.mxu0  ;;  %v2499_v24 = vpop.f32.mrf.mxu1 }
 0x342   : > { %v2500_v33 = vadd.f32 %v2499_v24, %v2393_v15 }
 0x343   : > { %v11111_v56 = vpop.f32.mrf.mxu0  ;;  %v11120_v30 = vpop.f32.mrf.mxu1 }
 0x345   : > { %v2505_v37 = vpop.f32.mrf.mxu1  ;;  %v2589_v53 = vpop.f32.mrf.mxu0 }
 0x346   : > { %v2590_v5 = vadd.f32 %v2589_v53, %v2500_v33  ;;  %v2506_v62 = vadd.f32 %v2505_v37, %v2403_v27 }
 0x347   : > { %v11123_v9 = vpop.f32.mrf.mxu1  ;;  %v11135_v17 = vpop.f32.mrf.mxu0 }
 0x349   : > { %v2511_v41 = vpop.f32.mrf.mxu1  ;;  %v2596_v20 = vpop.f32.mrf.mxu0 }
 0x34a   : > { %v2597_v7 = vadd.f32 %v2596_v20, %v2506_v62  ;;  %v2512_v1 = vadd.f32 %v2511_v41, %v2413_v0 }
 0x34b   : > { %v11126_v28 = vpop.f32.mrf.mxu1  ;;  %v11138_v19 = vpop.f32.mrf.mxu0 }
 0x34d   : > { %v2603_v61 = vpop.f32.mrf.mxu0  ;;  %v2679_v22 = vpop.f32.mrf.mxu1 }
 0x34e   : > { %v2680_v11 = vadd.f32 %v2679_v22, %v2590_v5  ;;  %v2604_v55 = vadd.f32 %v2603_v61, %v2512_v1 }
 0x34f   : > { %v11141_v23 = vpop.f32.mrf.mxu0  ;;  %v11150_v31 = vpop.f32.mrf.mxu1 }
 0x351   : > { %v2687_v36 = vpop.f32.mrf.mxu1  ;;  %v2775_v12 = vpop.f32.mrf.mxu0 }
 0x352   : > { %v2776_v4 = vadd.f32 %v2775_v12, %v2680_v11  ;;  %v2688_v39 = vadd.f32 %v2687_v36, %v2597_v7 }
 0x353   : > { %v11153_v10 = vpop.f32.mrf.mxu1  ;;  %v11165_v25 = vpop.f32.mrf.mxu0 }
 0x355   : > { %v2695_v14 = vpop.f32.mrf.mxu1  ;;  %v2781_v46 = vpop.f32.mrf.mxu0 }
 0x356   : > { %v2782_v15 = vadd.f32 %v2781_v46, %v2688_v39  ;;  %v2696_v24 = vadd.f32 %v2695_v14, %v2604_v55 }
 0x357   : > { %v11156_v49 = vpop.f32.mrf.mxu1  ;;  %v11168_v57 = vpop.f32.mrf.mxu0 }
 0x359   : > { %v2787_v32 = vpop.f32.mrf.mxu0  ;;  %v2861_v51 = vpop.f32.mrf.mxu1 }
 0x35a   : > { %v2862_v59 = vadd.f32 %v2861_v51, %v2776_v4  ;;  %v2788_v37 = vadd.f32 %v2787_v32, %v2696_v24 }
 0x35b   : > { %v11171_v52 = vpop.f32.mrf.mxu0  ;;  %v11180_v54 = vpop.f32.mrf.mxu1 }
 0x35c   : > { %v2877_v18 = vmul.f32 0.17677669, %v2862_v59 }
 0x35d   : > { %v2867_v47 = vpop.f32.mrf.mxu1 }
 0x35e   : > { %v2868_v56 = vadd.f32 %v2867_v47, %v2782_v15  ;;  %v2881_v27 = vsel %vm2880_vm3, %v2877_v18, -inf }
 0x35f   : > { %v11183_v30 = vpop.f32.mrf.mxu1  ;;  %2882 = vmax.xlane.f32.xlu0 %v2881_v27 }
 0x360   : > { %v2878_v53 = vmul.f32 0.17677669, %v2868_v56 }
 0x361   : > { %v2873_v9 = vpop.f32.mrf.mxu1 }
 0x362   : > { %v2874_v17 = vadd.f32 %v2873_v9, %v2788_v37  ;;  %v2884_v0 = vsel %vm2880_vm3, %v2878_v53, -inf }
 0x363   : > { %v11186_v41 = vpop.f32.mrf.mxu1  ;;  %2885 = vmax.xlane.f32.xlu1 %v2884_v0 }
 0x364   : > { %v2879_v20 = vmul.f32 0.17677669, %v2874_v17 }
 0x366   : > { %v2888_v28 = vsel %vm2887_vm4, %v2879_v20, -inf }
 0x367   : > { %2889 = vmax.xlane.f32.xlu0 %v2888_v28 }
 0x3e8   : > { %v2883_v19 = vpop.xlane.xlu0 %2882 }
 0x3e9   : > { %v2891_v61 = vsub.f32 %v2877_v18, %v2883_v19 }
 0x3eb   : > { %v2894_v22 = vmul.f32 1.442695, %v2891_v61 }
 0x3ec   : > { %v2886_v23 = vpop.xlane.xlu1 %2885 }
 0x3ed   : > { %12083 = vpow2.f32 %v2894_v22  ;;  %v2892_v31 = vsub.f32 %v2878_v53, %v2886_v23 }
 0x3ef   : > { %v2896_v36 = vmul.f32 1.442695, %v2892_v31 }
 0x3f0   : > { %v2890_v12 = vpop.xlane.xlu0 %2889 }
 0x3f1   : > { %12085 = vpow2.f32 %v2896_v36  ;;  %v2893_v33 = vsub.f32 %v2879_v20, %v2890_v12 }
 0x3f3   : > { %v2898_v10 = vmul.f32 1.442695, %v2893_v33 }
 0x3f5   : > { %12087 = vpow2.f32 %v2898_v10 }
 0x3fa   : > { %v12084_v25 = vpop.eup %12083 }
 0x3fb   : > { %v2900_v5 = vsel %vm2880_vm3, %v12084_v25, 0.0 }
 0x3fc   : > { %2901 = vadd.xlane.f32.xlu1 %v2900_v5 }
 0x3fe   : > { %v12086_v14 = vpop.eup %12085 }
 0x3ff   : > { %v2903_v46 = vsel %vm2880_vm3, %v12086_v14, 0.0 }
 0x400   : > { %2904 = vadd.xlane.f32.xlu0 %v2903_v46 }
 0x402   : > { %v12088_v62 = vpop.eup %12087 }
 0x403   : > { %v2906_v11 = vsel %vm2887_vm4, %v12088_v62, 0.0 }
 0x404   : > { %2907 = vadd.xlane.f32.xlu1 %v2906_v11 }
 0x415   : > { %3493 = vrot.lane.b32.xlu1 %v13414_v35, %s12162_s27 }
 0x416   : > { %3495 = vrot.lane.b32.xlu0 %v13428_v16, %s12162_s27 }
 0x419   : > { %3491 = vrot.lane.b32.xlu1 %v13416_v45, %s12162_s27 }
 0x41a   : > { %3487 = vrot.lane.b32.xlu0 %v13412_v3, %s12162_s27 }
 0x41d   : > { %3485 = vrot.lane.b32.xlu1 %v13408_v8, %s12162_s27 }
 0x421   : > { %3489 = vrot.lane.b32.xlu1 %v13422_v38, %s12162_s27 }
 0x485   : > { %v2902_v49 = vpop.xlane.xlu1 %2901 }
 0x486   : > { %12089 = vrcp.f32 %v2902_v49 }
 0x489   : > { %v2905_v57 = vpop.xlane.xlu0 %2904 }
 0x48a   : > { %12091 = vrcp.f32 %v2905_v57 }
 0x48d   : > { %v2908_v7 = vpop.xlane.xlu1 %2907  ;;  %v3496_v18 = vpop.permute.xlu0 %3495 }
 0x48e   : > { %12093 = vrcp.f32 %v2908_v7  ;;  %v3507_v53 = vsel %vm2300_vm2, %v3496_v18, 0 }
 0x48f   : > { %v13685_v20 = vand.u32 4294901760, %v3507_v53 }
 0x491   : > { %v3494_v27 = vpop.permute.xlu1 %3493  ;;  %v13700_v36 = vsub.f32 %v3507_v53, %v13685_v20 }
 0x492   : > { %v3505_v19 = vsel %vm2300_vm2, %v3494_v27, 0 }
 0x493   : > { %v12090_v4 = vpop.eup %12089  ;;  %v13702_v12 = vand.u32 4294901760, %v3505_v19 }
 0x494   : > { %v2912_v32 = vmul.f32 %v12090_v4, %v12084_v25  ;;  %v3636_v25 = vand.u32 4294901760, %v13700_v36 }
 0x495   : > { %v3492_v22 = vpop.permute.xlu1 %3491  ;;  %v13715_v5 = vsub.f32 %v3505_v19, %v13702_v12 }
 0x496   : > { %v2916_v51 = vsel %vm2880_vm3, %v2912_v32, 0  ;;  %v3503_v33 = vsel %vm2300_vm2, %v3492_v22, 0 }
 0x497   : > { %v12092_v1 = vpop.eup %12091  ;;  %v13652_v39 = vand.u32 4294901760, %v2916_v51 }
 0x498   : > { %v2913_v59 = vmul.f32 %v12092_v1, %v12086_v14  ;;  %v13717_v14 = vand.u32 4294901760, %v3503_v33 }
 0x499   : > { %v13655_v52 = vsub.f32 %v2916_v51, %v13652_v39  ;;  %11209 = vmatmul.mubr.f32.vlgmr.msra.gmra.mxu1 %v13652_v39 }
 0x49a   : > { %v2919_v54 = vsel %vm2880_vm3, %v2913_v59, 0  ;;  %11233 = vmatpush3.msra.mxu1 %v13603_v34  ;;  %11211 = vmatprep.mubr.msk.f32.mxu1 %vm12161_vm1, %v16802_v26  ;;  %v13732_v46 = vsub.f32 %v3503_v33, %v13717_v14 }
 0x49b   : > { %v12094_v55 = vpop.eup %12093  ;;  %v13662_v15 = vand.u32 4294901760, %v2919_v54  ;;  %11234 = vmatprep.subr.mxu1 %v16802_v26  ;;  %v2997_v47 = vand.u32 4294901760, %v13655_v52 }
 0x49c   : > { %v2914_v24 = vmul.f32 %v12094_v55, %v12088_v62  ;;  %11235 = vmatpush3.msra.mxu1 %v13590_v6  ;;  %v3486_v62 = vpop.permute.xlu1 %3485 }
 0x49d   : > { %v13668_v56 = vsub.f32 %v2919_v54, %v13662_v15  ;;  %11236 = vmatprep.subr.mxu1 %v16802_v26  ;;  %11212 = vmatmul.mubr.f32.gmra.mxu1 %v13662_v15  ;;  %v2998_v30 = vsub.f32 %v13655_v52, %v2997_v47 }
 0x49e   : > { %v2922_v37 = vsel %vm2880_vm3, %v2914_v24, 0  ;;  %11237 = vmatpush3.msra.mxu1 %v13593_v48  ;;  %11214 = vmatprep.mubr.msk.f32.mxu1 %vm12161_vm1, %v16802_v26 }
 0x49f   : > { %v13678_v9 = vand.u32 4294901760, %v2922_v37  ;;  %v2999_v17 = vand.u32 4294901760, %v2998_v30  ;;  %11262 = vmatprep.subr.mxu1 %v16802_v26  ;;  %v3007_v0 = vand.u32 4294901760, %v13668_v56 }
 0x4a1   : > { %v13683_v41 = vsub.f32 %v2922_v37, %v13678_v9  ;;  %11194 = vmatmul.mubr.f32.vlgmr.msra.gmra.mxu0 %v2999_v17  ;;  %11215 = vmatmul.mubr.f32.gmra.mxu1 %v13678_v9  ;;  %v3008_v28 = vsub.f32 %v13668_v56, %v3007_v0 }
 0x4a2   : > { %11218 = vmatpush3.msra.mxu0 %v13611_v43  ;;  %11196 = vmatprep.mubr.msk.f32.mxu0 %vm12161_vm1, %v16802_v26  ;;  %v3488_v43 = vpop.permute.xlu0 %3487 }
 0x4a3   : > { %v3017_v61 = vand.u32 4294901760, %v13683_v41  ;;  %11219 = vmatprep.subr.mxu0 %v16802_v26  ;;  %11238 = vmatprep.mubr.msk.f32.mxu1 %vm12161_vm1, %v16802_v26  ;;  %v3009_v23 = vand.u32 4294901760, %v3008_v28 }
 0x4a4   : > { %11220 = vmatpush3.msra.mxu0 %v13599_v50 }
 0x4a5   : > { %v3018_v31 = vsub.f32 %v13683_v41, %v3017_v61  ;;  %11221 = vmatprep.subr.mxu0 %v16802_v26  ;;  %11197 = vmatmul.mubr.f32.gmra.mxu0 %v3009_v23 }
 0x4a6   : > { %11222 = vmatpush3.msra.mxu0 %v13607_v2  ;;  %11239 = vmatmul.mubr.f32.vlgmr.msra.gmra.mxu1 %v2997_v47 }
 0x4a7   : > { %v3019_v10 = vand.u32 4294901760, %v3018_v31  ;;  %11263 = vmatpush3.msra.mxu1 %v13603_v34  ;;  %11199 = vmatprep.mubr.msk.f32.mxu0 %vm12161_vm1, %v16802_v26  ;;  %v3637_v34 = vsub.f32 %v13700_v36, %v3636_v25 }
 0x4a8   : > { %11264 = vmatprep.subr.mxu1 %v16802_v26  ;;  %11241 = vmatprep.mubr.msk.f32.mxu1 %vm12161_vm1, %v16802_v26 }
 0x4a9   : > { %11265 = vmatpush3.msra.mxu1 %v13590_v6  ;;  %11200 = vmatmul.mubr.f32.gmra.mxu0 %v3019_v10  ;;  %v3643_v6 = vand.u32 4294901760, %v13715_v5  ;;  %v3638_v11 = vand.u32 4294901760, %v3637_v34 }
 0x4aa   : > { %11266 = vmatprep.subr.mxu1 %v16802_v26  ;;  %11242 = vmatmul.mubr.f32.gmra.mxu1 %v3007_v0 }
 0x4ab   : > { %11267 = vmatpush3.msra.mxu1 %v13593_v48  ;;  %11223 = vmatprep.mubr.msk.f32.mxu0 %vm12161_vm1, %v16802_v26  ;;  %v3497_v48 = vsel %vm2300_vm2, %v3486_v62, 0  ;;  %v3644_v49 = vsub.f32 %v13715_v5, %v3643_v6 }
 0x4ac   : > { %11244 = vmatprep.mubr.msk.f32.mxu1 %vm12161_vm1, %v16802_v26  ;;  %11247 = vmatprep.subr.mxu0 %v16802_v26  ;;  %v13755_v50 = vand.u32 4294901760, %v3497_v48 }
 0x4ad   : > { %11224 = vmatmul.mubr.f32.vlgmr.msra.gmra.mxu0 %v13655_v52  ;;  %11292 = vmatprep.subr.mxu1 %v16802_v26  ;;  %v3645_v57 = vand.u32 4294901760, %v3644_v49 }
 0x4ae   : > { %11245 = vmatmul.mubr.f32.gmra.mxu1 %v3017_v61  ;;  %11248 = vmatpush3.msra.mxu0 %v3054_v42  ;;  %v3650_v42 = vand.u32 4294901760, %v13732_v46  ;;  %v13774_v4 = vsub.f32 %v3497_v48, %v13755_v50 }
 0x4af   : > { %11249 = vmatprep.subr.mxu0 %v16802_v26  ;;  %11226 = vmatprep.mubr.msk.f32.mxu0 %vm12161_vm1, %v16802_v26 }
 0x4b0   : > { %11250 = vmatpush3.msra.mxu0 %v3061_v29  ;;  %11268 = vmatprep.mubr.msk.f32.mxu1 %vm12161_vm1, %v16802_v26  ;;  %v3499_v29 = vsel %vm2300_vm2, %v3488_v43, 0  ;;  %v3651_v2 = vsub.f32 %v13732_v46, %v3650_v42  ;;  %v3579_v59 = vand.u32 4294901760, %v13774_v4 }
 0x4b1   : > { %11251 = vmatprep.subr.mxu0 %v16802_v26  ;;  %11227 = vmatmul.mubr.f32.gmra.mxu0 %v13668_v56  ;;  %v13771_v7 = vand.u32 4294901760, %v3499_v29 }
 0x4b2   : > { %11252 = vmatpush3.msra.mxu0 %v3068_v58  ;;  %11269 = vmatmul.mubr.f32.vlgmr.msra.gmra.mxu1 %v13652_v39  ;;  %v3490_v58 = vpop.permute.xlu1 %3489  ;;  %v3652_v51 = vand.u32 4294901760, %v3651_v2  ;;  %v3580_v54 = vsub.f32 %v13774_v4, %v3579_v59 }
 0x4b3   : > { %11293 = vmatpush3.xpose.msra.mxu1 %v3638_v11  ;;  %11229 = vmatprep.mubr.msk.f32.mxu0 %vm12161_vm1, %v16802_v26  ;;  %v3501_v32 = vsel %vm2300_vm2, %v3490_v58, 0  ;;  %v13784_v1 = vsub.f32 %v3499_v29, %v13771_v7 }
 0x4b4   : > { %11271 = vmatprep.mubr.msk.f32.mxu1 %vm12161_vm1, %v16802_v26  ;;  %11294 = vmatprep.subr.mxu1 %v16802_v26  ;;  %v13787_v52 = vand.u32 4294901760, %v3501_v32 }
 0x4b5   : > { %11230 = vmatmul.mubr.f32.gmra.mxu0 %v13683_v41  ;;  %11277 = vmatprep.subr.mxu0 %v16802_v26 }
 0x4b6   : > { %11272 = vmatmul.mubr.f32.gmra.mxu1 %v13662_v15  ;;  %11253 = vmatprep.mubr.msk.f32.mxu0 %vm12161_vm1, %v16802_v26  ;;  %v3598_v55 = vsub.f32 %v3501_v32, %v13787_v52 }
 0x4b7   : > { %11295 = vmatpush3.xpose.msra.mxu1 %v3645_v57  ;;  %11274 = vmatprep.mubr.msk.f32.mxu1 %vm12161_vm1, %v16802_v26 }
 0x4b8   : > { %11296 = vmatprep.subr.mxu1 %v16802_v26  ;;  %v3599_v18 = vand.u32 4294901760, %v3598_v55 }
 0x4b9   : > { %11254 = vmatmul.mubr.f32.vlgmr.msra.gmra.mxu0 %v13652_v39  ;;  %v3589_v39 = vand.u32 4294901760, %v13784_v1 }
 0x4ba   : > { %11275 = vmatmul.mubr.f32.gmra.mxu1 %v13678_v9  ;;  %11278 = vmatpush3.xpose.msra.mxu0 %v13685_v20  ;;  %v3600_v56 = vsub.f32 %v3598_v55, %v3599_v18 }
 0x4bb   : > { %11297 = vmatpush3.xpose.msra.mxu1 %v3652_v51  ;;  %11256 = vmatprep.mubr.msk.f32.mxu0 %vm12161_vm1, %v16802_v26  ;;  %v3590_v47 = vsub.f32 %v13784_v1, %v3589_v39 }
 0x4bc   : > { %11279 = vmatprep.subr.mxu0 %v16802_v26  ;;  %11298 = vmatprep.mubr.msk.f32.mxu1 %vm12161_vm1, %v16802_v26  ;;  %v3601_v27 = vand.u32 4294901760, %v3600_v56 }
 0x4bd   : > { %11322 = vmatprep.subr.mxu1 %v16802_v26  ;;  %11257 = vmatmul.mubr.f32.gmra.mxu0 %v13662_v15  ;;  %v3581_v15 = vand.u32 4294901760, %v3580_v54  ;;  %v3591_v24 = vand.u32 4294901760, %v3590_v47 }
 0x4be   : > { %11280 = vmatpush3.xpose.msra.mxu0 %v13702_v12  ;;  %11299 = vmatmul.mubr.f32.vlgmr.msra.gmra.mxu1 %v13755_v50 }
 0x4bf   : > { %11323 = vmatpush3.xpose.msra.mxu1 %v13685_v20  ;;  %11259 = vmatprep.mubr.msk.f32.mxu0 %vm12161_vm1, %v16802_v26 }
 0x4c0   : > { %11281 = vmatprep.subr.mxu0 %v16802_v26  ;;  %11301 = vmatprep.mubr.msk.f32.mxu1 %vm12161_vm1, %v16802_v26 }
 0x4c1   : > { %11324 = vmatprep.subr.mxu1 %v16802_v26  ;;  %11260 = vmatmul.mubr.f32.gmra.mxu0 %v13678_v9 }
 0x4c2   : > { %11282 = vmatpush3.xpose.msra.mxu0 %v13717_v14  ;;  %11302 = vmatmul.mubr.f32.gmra.mxu1 %v13771_v7 }
 0x4c3   : > { %11325 = vmatpush3.xpose.msra.mxu1 %v13702_v12  ;;  %11283 = vmatprep.mubr.msk.f32.mxu0 %vm12161_vm1, %v16802_v26 }
 0x4c4   : > { %11304 = vmatprep.mubr.msk.f32.mxu1 %vm12161_vm1, %v16802_v26  ;;  %11307 = vmatprep.subr.mxu0 %v16802_v26 }
 0x4c5   : > { %11326 = vmatprep.subr.mxu1 %v16802_v26  ;;  %11284 = vmatmul.mubr.f32.vlgmr.msra.gmra.mxu0 %v3581_v15 }
 0x4c6   : > { %11305 = vmatmul.mubr.f32.gmra.mxu1 %v13787_v52  ;;  %11308 = vmatpush3.xpose.msra.mxu0 %v13700_v36 }
 0x4c7   : > { %11327 = vmatpush3.xpose.msra.mxu1 %v13717_v14  ;;  %11286 = vmatprep.mubr.msk.f32.mxu0 %vm12161_vm1, %v16802_v26 }
 0x4c8   : > { %11309 = vmatprep.subr.mxu0 %v16802_v26  ;;  %11328 = vmatprep.mubr.msk.f32.mxu1 %vm12161_vm1, %v16802_v26 }
 0x4c9   : > { %11352 = vmatprep.subr.mxu1 %v16802_v26  ;;  %11287 = vmatmul.mubr.f32.gmra.mxu0 %v3591_v24 }
 0x4ca   : > { %11310 = vmatpush3.xpose.msra.mxu0 %v13715_v5  ;;  %11329 = vmatmul.mubr.f32.vlgmr.msra.gmra.mxu1 %v3579_v59 }
 0x4cb   : > { %11353 = vmatpush3.xpose.msra.mxu1 %v13685_v20  ;;  %11289 = vmatprep.mubr.msk.f32.mxu0 %vm12161_vm1, %v16802_v26 }
 0x4cc   : > { %11311 = vmatprep.subr.mxu0 %v16802_v26  ;;  %11331 = vmatprep.mubr.msk.f32.mxu1 %vm12161_vm1, %v16802_v26 }
 0x4cd   : > { %11354 = vmatprep.subr.mxu1 %v16802_v26  ;;  %11290 = vmatmul.mubr.f32.gmra.mxu0 %v3601_v27 }
 0x4ce   : > { %11312 = vmatpush3.xpose.msra.mxu0 %v13732_v46  ;;  %11332 = vmatmul.mubr.f32.gmra.mxu1 %v3589_v39 }
 0x4cf   : > { %11355 = vmatpush3.xpose.msra.mxu1 %v13702_v12  ;;  %11313 = vmatprep.mubr.msk.f32.mxu0 %vm12161_vm1, %v16802_v26 }
 0x4d0   : > { %11334 = vmatprep.mubr.msk.f32.mxu1 %vm12161_vm1, %v16802_v26  ;;  %11337 = vmatprep.subr.mxu0 %v16802_v26 }
 0x4d1   : > { %11356 = vmatprep.subr.mxu1 %v16802_v26  ;;  %11314 = vmatmul.mubr.f32.vlgmr.msra.gmra.mxu0 %v13774_v4 }
 0x4d2   : > { %11335 = vmatmul.mubr.f32.gmra.mxu1 %v3599_v18  ;;  %11338 = vmatpush3.xpose.msra.mxu0 %v3636_v25 }
 0x4d3   : > { %11357 = vmatpush3.xpose.msra.mxu1 %v13717_v14  ;;  %11316 = vmatprep.mubr.msk.f32.mxu0 %vm12161_vm1, %v16802_v26 }
 0x4d4   : > { %11339 = vmatprep.subr.mxu0 %v16802_v26  ;;  %11358 = vmatprep.mubr.msk.f32.mxu1 %vm12161_vm1, %v16802_v26 }
 0x4d5   : > { %11317 = vmatmul.mubr.f32.gmra.mxu0 %v13784_v1  ;;  %11382 = vmatprep.subr.mxu1 %v16802_v26 }
 0x4d6   : > { %11340 = vmatpush3.xpose.msra.mxu0 %v3643_v6  ;;  %11359 = vmatmul.mubr.f32.vlgmr.msra.gmra.mxu1 %v13755_v50 }
 0x4d7   : > { %11319 = vmatprep.mubr.msk.f32.mxu0 %vm12161_vm1, %v16802_v26  ;;  %11341 = vmatprep.subr.mxu0 %v16802_v26 }
 0x4d8   : > { %11361 = vmatprep.mubr.msk.f32.mxu1 %vm12161_vm1, %v16802_v26 }
 0x4d9   : > { %11320 = vmatmul.mubr.f32.gmra.mxu0 %v3598_v55 }
 0x4da   : > { %11342 = vmatpush3.xpose.msra.mxu0 %v3650_v42  ;;  %11362 = vmatmul.mubr.f32.gmra.mxu1 %v13771_v7 }
 0x4db   : > { %11343 = vmatprep.mubr.msk.f32.mxu0 %vm12161_vm1, %v16802_v26  ;;  %11364 = vmatprep.mubr.msk.f32.mxu1 %vm12161_vm1, %v16802_v26 }
 0x4dc   : > { %11367 = vmatprep.subr.mxu0 %v16802_v26 }
 0x4dd   : > { %11344 = vmatmul.mubr.f32.vlgmr.msra.gmra.mxu0 %v13755_v50 }
 0x4de   : > { %11365 = vmatmul.mubr.f32.gmra.mxu1 %v13787_v52  ;;  %11346 = vmatprep.mubr.msk.f32.mxu0 %vm12161_vm1, %v16802_v26 }
 0x4df   : > { %11388 = vmatprep.mubr.msk.f32.mxu1 %vm12161_vm1, %v16802_v26 }
 0x4e1   : > { %11347 = vmatmul.mubr.f32.gmra.mxu0 %v13771_v7 }
 0x4e2   : > { %11349 = vmatprep.mubr.msk.f32.mxu0 %vm12161_vm1, %v16802_v26 }
 0x4e5   : > { %11350 = vmatmul.mubr.f32.gmra.mxu0 %v13787_v52 }
 0x4e6   : > { %11373 = vmatprep.mubr.msk.f32.mxu0 %vm12161_vm1, %v16802_v26 }
 0x559   : > { %v3107_v30 = vpop.f32.mrf.mxu1 }
 0x55b   : > { %v11210_v37 = vpop.f32.mrf.mxu1 }
 0x55d   : > { %v3113_v53 = vpop.f32.mrf.mxu1 }
 0x55f   : > { %v11213_v9 = vpop.f32.mrf.mxu1 }
 0x561   : > { %v3001_v17 = vpop.f32.mrf.mxu0  ;;  %v3119_v0 = vpop.f32.mrf.mxu1 }
 0x562   : > { %v3108_v41 = vadd.f32 %v3107_v30, %v3001_v17 }
 0x563   : > { %v11195_v20 = vpop.f32.mrf.mxu0  ;;  %v11216_v28 = vpop.f32.mrf.mxu1 }
 0x565   : > { %v3011_v19 = vpop.f32.mrf.mxu0 }
 0x566   : > { %v3114_v61 = vadd.f32 %v3113_v53, %v3011_v19  ;;  %v3287_v22 = vpop.f32.mrf.mxu1 }
 0x567   : > { %v11198_v23 = vpop.f32.mrf.mxu0 }
 0x568   : > { %v11240_v31 = vpop.f32.mrf.mxu1 }
 0x569   : > { %v3021_v36 = vpop.f32.mrf.mxu0 }
 0x56a   : > { %v3120_v12 = vadd.f32 %v3119_v0, %v3021_v36  ;;  %v3295_v33 = vpop.f32.mrf.mxu1 }
 0x56b   : > { %v11201_v10 = vpop.f32.mrf.mxu0 }
 0x56c   : > { %v11243_v25 = vpop.f32.mrf.mxu1 }
 0x56d   : > { %v3197_v5 = vpop.f32.mrf.mxu0 }
 0x56e   : > { %v3198_v14 = vadd.f32 %v3197_v5, %v3108_v41  ;;  %v3303_v34 = vpop.f32.mrf.mxu1 }
 0x56f   : > { %v11225_v6 = vpop.f32.mrf.mxu0 }
 0x570   : > { %v11246_v46 = vpop.f32.mrf.mxu1  ;;  %v3288_v62 = vadd.f32 %v3287_v22, %v3198_v14 }
 0x571   : > { %v3204_v48 = vpop.f32.mrf.mxu0 }
 0x572   : > { %v3205_v11 = vadd.f32 %v3204_v48, %v3114_v61  ;;  %v3469_v49 = vpop.f32.mrf.mxu1 }
 0x573   : > { %v11228_v43 = vpop.f32.mrf.mxu0 }
 0x574   : > { %v11270_v42 = vpop.f32.mrf.mxu1  ;;  %v3296_v50 = vadd.f32 %v3295_v33, %v3205_v11 }
 0x575   : > { %v3211_v29 = vpop.f32.mrf.mxu0 }
 0x576   : > { %v3212_v57 = vadd.f32 %v3211_v29, %v3120_v12  ;;  %v3475_v2 = vpop.f32.mrf.mxu1 }
 0x577   : > { %v11231_v58 = vpop.f32.mrf.mxu0 }
 0x578   : > { %v11273_v7 = vpop.f32.mrf.mxu1  ;;  %v3304_v4 = vadd.f32 %v3303_v34, %v3212_v57 }
 0x579   : > { %v3383_v32 = vpop.f32.mrf.mxu0 }
 0x57a   : > { %v3384_v51 = vadd.f32 %v3383_v32, %v3288_v62  ;;  %v3481_v1 = vpop.f32.mrf.mxu1 }
 0x57b   : > { %v11255_v59 = vpop.f32.mrf.mxu0 }
 0x57c   : > { %v13883_v52 = vadd.f32 %v3469_v49, %v3384_v51  ;;  %v11276_v39 = vpop.f32.mrf.mxu1 }
 0x57d   : > { %v3389_v54 = vpop.f32.mrf.mxu0 }
 0x57e   : > { %v3390_v55 = vadd.f32 %v3389_v54, %v3296_v50  ;;  %v3689_v15 = vpop.f32.mrf.mxu1 }
 0x57f   : > { %v11258_v18 = vpop.f32.mrf.mxu0 }
 0x580   : > { %v13885_v47 = vadd.f32 %v3475_v2, %v3390_v55  ;;  %v11300_v24 = vpop.f32.mrf.mxu1 }
 0x581   : > { %v3395_v56 = vpop.f32.mrf.mxu0 }
 0x582   : > { %v3396_v27 = vadd.f32 %v3395_v56, %v3304_v4  ;;  %v3695_v30 = vpop.f32.mrf.mxu1 }
 0x583   : > { %v11261_v37 = vpop.f32.mrf.mxu0 }
 0x584   : > { %v13887_v53 = vadd.f32 %v3481_v1, %v3396_v27  ;;  %v11303_v9 = vpop.f32.mrf.mxu1 }
 0x585   : > { %v3583_v17 = vpop.f32.mrf.mxu0 }
 0x586   : > { %v3701_v0 = vpop.f32.mrf.mxu1  ;;  %v3690_v34 = vadd.f32 %v3689_v15, %v3583_v17 }
 0x587   : > { %v11285_v41 = vpop.f32.mrf.mxu0 }
 0x588   : > { %v11306_v20 = vpop.f32.mrf.mxu1 }
 0x589   : > { %v3593_v28 = vpop.f32.mrf.mxu0 }
 0x58a   : > { %v3869_v19 = vpop.f32.mrf.mxu1  ;;  %v3696_v49 = vadd.f32 %v3695_v30, %v3593_v28 }
 0x58b   : > { %v11288_v61 = vpop.f32.mrf.mxu0 }
 0x58c   : > { %v11330_v22 = vpop.f32.mrf.mxu1 }
 0x58d   : > { %v3603_v23 = vpop.f32.mrf.mxu0 }
 0x58e   : > { %v3877_v31 = vpop.f32.mrf.mxu1  ;;  %v3702_v58 = vadd.f32 %v3701_v0, %v3603_v23 }
 0x58f   : > { %v11291_v36 = vpop.f32.mrf.mxu0 }
 0x590   : > { %v11333_v12 = vpop.f32.mrf.mxu1 }
 0x591   : > { %v3779_v33 = vpop.f32.mrf.mxu0 }
 0x592   : > { %v3885_v10 = vpop.f32.mrf.mxu1  ;;  %v3780_v62 = vadd.f32 %v3779_v33, %v3690_v34 }
 0x593   : > { %v11315_v25 = vpop.f32.mrf.mxu0 }
 0x594   : > { %v11336_v5 = vpop.f32.mrf.mxu1  ;;  %v3870_v57 = vadd.f32 %v3869_v19, %v3780_v62 }
 0x595   : > { %v3786_v14 = vpop.f32.mrf.mxu0 }
 0x596   : > { %v4051_v6 = vpop.f32.mrf.mxu1  ;;  %v3787_v50 = vadd.f32 %v3786_v14, %v3696_v49 }
 0x597   : > { %v11318_v46 = vpop.f32.mrf.mxu0 }
 0x598   : > { %v11360_v48 = vpop.f32.mrf.mxu1  ;;  %v3878_v39 = vadd.f32 %v3877_v31, %v3787_v50 }
 0x599   : > { %v3793_v11 = vpop.f32.mrf.mxu0 }
 0x59a   : > { %v4057_v43 = vpop.f32.mrf.mxu1  ;;  %v3794_v51 = vadd.f32 %v3793_v11, %v3702_v58 }
 0x59b   : > { %v11321_v42 = vpop.f32.mrf.mxu0 }
 0x59c   : > { %v11363_v29 = vpop.f32.mrf.mxu1  ;;  %v3886_v27 = vadd.f32 %v3885_v10, %v3794_v51 }
 0x59d   : > { %v3965_v2 = vpop.f32.mrf.mxu0 }
 0x59e   : > { %v3966_v7 = vadd.f32 %v3965_v2, %v3870_v57  ;;  %v4063_v4 = vpop.f32.mrf.mxu1 }
 0x59f   : > { %v11345_v32 = vpop.f32.mrf.mxu0 }
 0x5a0   : > { %v4052_v1 = vadd.f32 %v4051_v6, %v3966_v7  ;;  %v11366_v59 = vpop.f32.mrf.mxu1 }
 0x5a1   : > { %v3971_v54 = vpop.f32.mrf.mxu0 }
 0x5a2   : > { %v3972_v55 = vadd.f32 %v3971_v54, %v3878_v39  ;;  %v4067_v15 = vmul.f32 0.17677669, %v4052_v1 }
 0x5a3   : > { %v11348_v18 = vpop.f32.mrf.mxu0 }
 0x5a4   : > { %v4058_v24 = vadd.f32 %v4057_v43, %v3972_v55  ;;  %v4070_v56 = vsel %vm2880_vm3, %v4067_v15, -inf }
 0x5a5   : > { %4071 = vmax.xlane.f32.xlu0 %v4070_v56  ;;  %v3977_v30 = vpop.f32.mrf.mxu0 }
 0x5a6   : > { %v3978_v37 = vadd.f32 %v3977_v30, %v3886_v27  ;;  %v4068_v9 = vmul.f32 0.17677669, %v4058_v24 }
 0x5a7   : > { %v11351_v17 = vpop.f32.mrf.mxu0 }
 0x5a8   : > { %v4064_v0 = vadd.f32 %v4063_v4, %v3978_v37  ;;  %v4073_v41 = vsel %vm2880_vm3, %v4068_v9, -inf }
 0x5a9   : > { %4074 = vmax.xlane.f32.xlu1 %v4073_v41 }
 0x5aa   : > { %v4069_v20 = vmul.f32 0.17677669, %v4064_v0 }
 0x5ac   : > { %v4076_v28 = vsel %vm2887_vm4, %v4069_v20, -inf }
 0x5ad   : > { %4077 = vmax.xlane.f32.xlu0 %v4076_v28 }
 0x5ba   : > { %4107 = vrot.lane.b32.xlu1 %v13587_v63, %s12162_s27 }
 0x62e   : > { %v4072_v19 = vpop.xlane.xlu0 %4071 }
 0x62f   : > { %v4079_v61 = vsub.f32 %v4067_v15, %v4072_v19 }
 0x631   : > { %v4082_v22 = vmul.f32 1.442695, %v4079_v61 }
 0x632   : > { %v4075_v23 = vpop.xlane.xlu1 %4074 }
 0x633   : > { %12095 = vpow2.f32 %v4082_v22  ;;  %v4080_v31 = vsub.f32 %v4068_v9, %v4075_v23 }
 0x635   : > { %v4084_v36 = vmul.f32 1.442695, %v4080_v31 }
 0x636   : > { %v4078_v12 = vpop.xlane.xlu0 %4077  ;;  %v4108_v48 = vpop.permute.xlu1 %4107 }
 0x637   : > { %12097 = vpow2.f32 %v4084_v36  ;;  %v4081_v33 = vsub.f32 %v4069_v20, %v4078_v12  ;;  %v13913_v11 = vand.u32 4294901760, %v4108_v48 }
 0x639   : > { %v4086_v10 = vmul.f32 1.442695, %v4081_v33  ;;  %v13916_v43 = vsub.f32 %v4108_v48, %v13913_v11 }
 0x63b   : > { %12099 = vpow2.f32 %v4086_v10  ;;  %v4258_v2 = vand.u32 4294901760, %v13916_v43 }
 0x63d   : > { %v4259_v39 = vsub.f32 %v13916_v43, %v4258_v2 }
 0x63f   : > { %v4260_v37 = vand.u32 4294901760, %v4259_v39 }
 0x640   : > { %v12096_v25 = vpop.eup %12095 }
 0x641   : > { %v4088_v5 = vsel %vm2880_vm3, %v12096_v25, 0.0 }
 0x642   : > { %4089 = vadd.xlane.f32.xlu0 %v4088_v5 }
 0x644   : > { %v12098_v14 = vpop.eup %12097 }
 0x645   : > { %v4091_v34 = vsel %vm2880_vm3, %v12098_v14, 0.0 }
 0x646   : > { %4092 = vadd.xlane.f32.xlu0 %v4091_v34 }
 0x648   : > { %v12100_v6 = vpop.eup %12099 }
 0x649   : > { %v4094_v46 = vsel %vm2887_vm4, %v12100_v6, 0.0 }
 0x64a   : > { %4095 = vadd.xlane.f32.xlu1 %v4094_v46 }
 0x65b   : > { %4105 = vrot.lane.b32.xlu1 %v13585_v60, %s12162_s27 }
 0x65c   : > { %4109 = vrot.lane.b32.xlu0 %v13595_v44, %s12162_s27 }
 0x65f   : > { %4692 = vrot.lane.b32.xlu1 %v13428_v16, %s12163_s28 }
 0x660   : > { %4690 = vrot.lane.b32.xlu0 %v13414_v35, %s12163_s28 }
 0x663   : > { %4688 = vrot.lane.b32.xlu1 %v13416_v45, %s12163_s28 }
 0x664   : > { %4682 = vrot.lane.b32.xlu0 %v13408_v8, %s12163_s28 }
 0x667   : > { %4684 = vrot.lane.b32.xlu1 %v13412_v3, %s12163_s28 }
 0x668   : > { %4686 = vrot.lane.b32.xlu0 %v13422_v38, %s12163_s28 }
 0x6cb   : > { %v4090_v62 = vpop.xlane.xlu0 %4089 }
 0x6cc   : > { %12101 = vrcp.f32 %v4090_v62 }
 0x6cf   : > { %v4093_v49 = vpop.xlane.xlu0 %4092 }
 0x6d0   : > { %12103 = vrcp.f32 %v4093_v49 }
 0x6d3   : > { %v4096_v42 = vpop.xlane.xlu1 %4095  ;;  %v4110_v50 = vpop.permute.xlu0 %4109 }
 0x6d4   : > { %12105 = vrcp.f32 %v4096_v42  ;;  %v4122_v29 = vsel %vm502_vm0, %v4110_v50, 0 }
 0x6d5   : > { %v13919_v57 = vand.u32 4294901760, %v4122_v29 }
 0x6d7   : > { %v13923_v58 = vsub.f32 %v4122_v29, %v13919_v57  ;;  %v4106_v7 = vpop.permute.xlu1 %4105  ;;  %11368 = vmatpush3.msra.mxu0 %v13919_v57  ;;  %v4691_v5 = vpop.permute.xlu0 %4690 }
 0x6d8   : > { %v13926_v4 = vand.u32 4294901760, %v4106_v7  ;;  %11369 = vmatprep.subr.mxu0 %v16802_v26  ;;  %v4702_v48 = vsel %vm2300_vm2, %v4691_v5, 0 }
 0x6d9   : > { %v12102_v32 = vpop.eup %12101  ;;  %v4251_v51 = vand.u32 4294901760, %v13923_v58  ;;  %11370 = vmatpush3.msra.mxu0 %v13913_v11  ;;  %v13998_v50 = vand.u32 4294901760, %v4702_v48 }
 0x6da   : > { %v4100_v1 = vmul.f32 %v12102_v32, %v12096_v25  ;;  %v13932_v59 = vsub.f32 %v4106_v7, %v13926_v4  ;;  %11371 = vmatprep.subr.mxu0 %v16802_v26 }
 0x6db   : > { %v4252_v54 = vsub.f32 %v13923_v58, %v4251_v51  ;;  %11372 = vmatpush3.msra.mxu0 %v13926_v4  ;;  %v4693_v23 = vpop.permute.xlu1 %4692  ;;  %v14010_v32 = vsub.f32 %v4702_v48, %v13998_v50 }
 0x6dc   : > { %v4265_v55 = vand.u32 4294901760, %v13932_v59  ;;  %v4114_v15 = vsel %vm2880_vm3, %v4100_v1, 0  ;;  %11397 = vmatprep.subr.mxu0 %v16802_v26  ;;  %v4704_v25 = vsel %vm2300_vm2, %v4693_v23, 0 }
 0x6dd   : > { %v12104_v18 = vpop.eup %12103  ;;  %v4253_v24 = vand.u32 4294901760, %v4252_v54  ;;  %v13948_v27 = vand.u32 4294901760, %v4114_v15  ;;  %v4840_v54 = vand.u32 4294901760, %v14010_v32 }
 0x6de   : > { %v4266_v56 = vsub.f32 %v13932_v59, %v4265_v55  ;;  %v4101_v30 = vmul.f32 %v12104_v18, %v12098_v14 }
 0x6df   : > { %11383 = vmatpush3.msra.mxu1 %v4253_v24  ;;  %v13952_v17 = vsub.f32 %v4114_v15, %v13948_v27  ;;  %v4689_v49 = vpop.permute.xlu1 %4688 }
 0x6e0   : > { %v4267_v9 = vand.u32 4294901760, %v4266_v56  ;;  %11384 = vmatprep.subr.mxu1 %v16802_v26  ;;  %v4117_v20 = vsel %vm2880_vm3, %v4101_v30, 0  ;;  %v4700_v7 = vsel %vm2300_vm2, %v4689_v49, 0 }
 0x6e1   : > { %v12106_v0 = vpop.eup %12105  ;;  %11385 = vmatpush3.msra.mxu1 %v4260_v37  ;;  %v4194_v41 = vand.u32 4294901760, %v13952_v17  ;;  %v13957_v19 = vand.u32 4294901760, %v4117_v20  ;;  %v14013_v39 = vand.u32 4294901760, %v4700_v7 }
 0x6e2   : > { %11386 = vmatprep.subr.mxu1 %v16802_v26  ;;  %v4102_v28 = vmul.f32 %v12106_v0, %v12100_v6  ;;  %v13984_v6 = vand.u32 4294901760, %v4704_v25 }
 0x6e3   : > { %11387 = vmatpush3.msra.mxu1 %v4267_v9  ;;  %v4195_v61 = vsub.f32 %v13952_v17, %v4194_v41  ;;  %v4203_v36 = vsub.f32 %v4117_v20, %v13957_v19  ;;  %v14030_v15 = vsub.f32 %v4700_v7, %v14013_v39 }
 0x6e4   : > { %11389 = vmatmul.mubr.f32.vlgmr.msra.gmra.mxu1 %v13948_v27  ;;  %11412 = vmatprep.subr.mxu1 %v16802_v26  ;;  %v4120_v22 = vsel %vm2880_vm3, %v4102_v28, 0  ;;  %v14001_v29 = vsub.f32 %v4704_v25, %v13984_v6 }
 0x6e5   : > { %11413 = vmatpush3.msra.mxu1 %v13919_v57  ;;  %11391 = vmatprep.mubr.msk.f32.mxu1 %vm12161_vm1, %v16802_v26  ;;  %v4196_v31 = vand.u32 4294901760, %v4195_v61  ;;  %v13968_v12 = vand.u32 4294901760, %v4120_v22  ;;  %v4204_v33 = vand.u32 4294901760, %v4203_v36 }
 0x6e6   : > { %11414 = vmatprep.subr.mxu1 %v16802_v26  ;;  %v4833_v1 = vand.u32 4294901760, %v14001_v29 }
 0x6e7   : > { %11415 = vmatpush3.msra.mxu1 %v13913_v11  ;;  %11374 = vmatmul.mubr.f32.vlgmr.msra.gmra.mxu0 %v4196_v31  ;;  %v13973_v10 = vsub.f32 %v4120_v22, %v13968_v12  ;;  %v4205_v14 = vsub.f32 %v4203_v36, %v4204_v33 }
 0x6e8   : > { %11392 = vmatmul.mubr.f32.gmra.mxu1 %v13957_v19  ;;  %11398 = vmatpush3.msra.mxu0 %v13923_v58 }
 0x6e9   : > { %11416 = vmatprep.subr.mxu1 %v16802_v26  ;;  %11399 = vmatprep.subr.mxu0 %v16802_v26  ;;  %v4214_v34 = vand.u32 4294901760, %v13973_v10  ;;  %v4206_v46 = vand.u32 4294901760, %v4205_v14 }
 0x6ea   : > { %11417 = vmatpush3.msra.mxu1 %v13926_v4  ;;  %11400 = vmatpush3.msra.mxu0 %v13916_v43  ;;  %v4847_v43 = vand.u32 4294901760, %v14030_v15 }
 0x6eb   : > { %11376 = vmatprep.mubr.msk.f32.mxu0 %vm12161_vm1, %v16802_v26  ;;  %11401 = vmatprep.subr.mxu0 %v16802_v26  ;;  %v4215_v62 = vsub.f32 %v13973_v10, %v4214_v34 }
 0x6ec   : > { %11394 = vmatprep.mubr.msk.f32.mxu1 %vm12161_vm1, %v16802_v26  ;;  %11402 = vmatpush3.msra.mxu0 %v13932_v59  ;;  %v4848_v30 = vsub.f32 %v14030_v15, %v4847_v43 }
 0x6ed   : > { %11395 = vmatmul.mubr.f32.gmra.mxu1 %v13968_v12  ;;  %11377 = vmatmul.mubr.f32.gmra.mxu0 %v4206_v46  ;;  %v4216_v42 = vand.u32 4294901760, %v4215_v62 }
 0x6ee   : > { %11418 = vmatprep.mubr.msk.f32.mxu1 %vm12161_vm1, %v16802_v26  ;;  %11379 = vmatprep.mubr.msk.f32.mxu0 %vm12161_vm1, %v16802_v26  ;;  %v4849_v0 = vand.u32 4294901760, %v4848_v30 }
 0x6ef   : > { %11442 = vmatprep.subr.mxu1 %v16802_v26  ;;  %11427 = vmatprep.subr.mxu0 %v16802_v26 }
 0x6f1   : > { %11419 = vmatmul.mubr.f32.vlgmr.msra.gmra.mxu1 %v4194_v41  ;;  %11380 = vmatmul.mubr.f32.gmra.mxu0 %v4216_v42 }
 0x6f2   : > { %11443 = vmatpush3.msra.mxu1 %v13919_v57  ;;  %11403 = vmatprep.mubr.msk.f32.mxu0 %vm12161_vm1, %v16802_v26  ;;  %v4683_v57 = vpop.permute.xlu0 %4682 }
 0x6f3   : > { %11444 = vmatprep.subr.mxu1 %v16802_v26  ;;  %11421 = vmatprep.mubr.msk.f32.mxu1 %vm12161_vm1, %v16802_v26  ;;  %v4694_v58 = vsel %vm2300_vm2, %v4683_v57, 0 }
 0x6f4   : > { %11445 = vmatpush3.msra.mxu1 %v13913_v11  ;;  %v4834_v11 = vsub.f32 %v14001_v29, %v4833_v1  ;;  %v14046_v24 = vand.u32 4294901760, %v4694_v58 }
 0x6f5   : > { %11446 = vmatprep.subr.mxu1 %v16802_v26  ;;  %11422 = vmatmul.mubr.f32.gmra.mxu1 %v4204_v33 }
 0x6f6   : > { %11404 = vmatmul.mubr.f32.vlgmr.msra.gmra.mxu0 %v13952_v17  ;;  %11447 = vmatpush3.msra.mxu1 %v13926_v4  ;;  %v4685_v4 = vpop.permute.xlu1 %4684  ;;  %v4835_v18 = vand.u32 4294901760, %v4834_v11  ;;  %v4687_v59 = vpop.permute.xlu0 %4686  ;;  %v14061_v56 = vsub.f32 %v4694_v58, %v14046_v24 }
 0x6f7   : > { %11428 = vmatpush3.msra.mxu0 %v4251_v51  ;;  %11406 = vmatprep.mubr.msk.f32.mxu0 %vm12161_vm1, %v16802_v26  ;;  %v4841_v51 = vsub.f32 %v14010_v32, %v4840_v54  ;;  %v4698_v9 = vsel %vm2300_vm2, %v4687_v59, 0 }
 0x6f8   : > { %11429 = vmatprep.subr.mxu0 %v16802_v26  ;;  %11424 = vmatprep.mubr.msk.f32.mxu1 %vm12161_vm1, %v16802_v26  ;;  %v4776_v17 = vand.u32 4294901760, %v14061_v56  ;;  %v14076_v41 = vand.u32 4294901760, %v4698_v9 }
 0x6f9   : > { %11430 = vmatpush3.msra.mxu0 %v4258_v2  ;;  %11425 = vmatmul.mubr.f32.gmra.mxu1 %v4214_v34  ;;  %v4696_v2 = vsel %vm2300_vm2, %v4685_v4, 0 }
 0x6fa   : > { %11431 = vmatprep.subr.mxu0 %v16802_v26  ;;  %11407 = vmatmul.mubr.f32.gmra.mxu0 %v4203_v36  ;;  %v14066_v37 = vand.u32 4294901760, %v4696_v2  ;;  %v4795_v28 = vsub.f32 %v4698_v9, %v14076_v41 }
 0x6fb   : > { %11432 = vmatpush3.msra.mxu0 %v4265_v55  ;;  %11409 = vmatprep.mubr.msk.f32.mxu0 %vm12161_vm1, %v16802_v26  ;;  %v4842_v55 = vand.u32 4294901760, %v4841_v51 }
 0x6fc   : > { %11448 = vmatprep.mubr.msk.f32.mxu1 %vm12161_vm1, %v16802_v26  ;;  %11472 = vmatprep.subr.mxu1 %v16802_v26  ;;  %v4785_v20 = vsub.f32 %v4696_v2, %v14066_v37  ;;  %v4796_v22 = vand.u32 4294901760, %v4795_v28 }
 0x6fd   : > { %11449 = vmatmul.mubr.f32.vlgmr.msra.gmra.mxu1 %v13948_v27  ;;  %11457 = vmatprep.subr.mxu0 %v16802_v26 }
 0x6fe   : > { %11410 = vmatmul.mubr.f32.gmra.mxu0 %v13973_v10  ;;  %11473 = vmatpush3.xpose.msra.mxu1 %v4835_v18  ;;  %v4786_v61 = vand.u32 4294901760, %v4785_v20  ;;  %v4797_v31 = vsub.f32 %v4795_v28, %v4796_v22 }
 0x6ff   : > { %11433 = vmatprep.mubr.msk.f32.mxu0 %vm12161_vm1, %v16802_v26  ;;  %11451 = vmatprep.mubr.msk.f32.mxu1 %vm12161_vm1, %v16802_v26 }
 0x700   : > { %11474 = vmatprep.subr.mxu1 %v16802_v26  ;;  %v4787_v23 = vsub.f32 %v4785_v20, %v4786_v61 }
 0x701   : > { %11452 = vmatmul.mubr.f32.gmra.mxu1 %v13957_v19 }
 0x702   : > { %11434 = vmatmul.mubr.f32.vlgmr.msra.gmra.mxu0 %v13948_v27  ;;  %11475 = vmatpush3.xpose.msra.mxu1 %v4842_v55  ;;  %v4777_v27 = vsub.f32 %v14061_v56, %v4776_v17  ;;  %v4788_v36 = vand.u32 4294901760, %v4787_v23 }
 0x703   : > { %11458 = vmatpush3.xpose.msra.mxu0 %v13984_v6  ;;  %11436 = vmatprep.mubr.msk.f32.mxu0 %vm12161_vm1, %v16802_v26 }
 0x704   : > { %11459 = vmatprep.subr.mxu0 %v16802_v26  ;;  %11454 = vmatprep.mubr.msk.f32.mxu1 %vm12161_vm1, %v16802_v26 }
 0x705   : > { %11476 = vmatprep.subr.mxu1 %v16802_v26  ;;  %11455 = vmatmul.mubr.f32.gmra.mxu1 %v13968_v12 }
 0x706   : > { %11437 = vmatmul.mubr.f32.gmra.mxu0 %v13957_v19  ;;  %11477 = vmatpush3.xpose.msra.mxu1 %v4849_v0  ;;  %v4778_v19 = vand.u32 4294901760, %v4777_v27 }
 0x707   : > { %11460 = vmatpush3.xpose.msra.mxu0 %v13998_v50  ;;  %11439 = vmatprep.mubr.msk.f32.mxu0 %vm12161_vm1, %v16802_v26 }
 0x708   : > { %11461 = vmatprep.subr.mxu0 %v16802_v26  ;;  %11478 = vmatprep.mubr.msk.f32.mxu1 %vm12161_vm1, %v16802_v26 }
 0x709   : > { %11502 = vmatprep.subr.mxu1 %v16802_v26  ;;  %11479 = vmatmul.mubr.f32.vlgmr.msra.gmra.mxu1 %v14046_v24 }
 0x70a   : > { %11440 = vmatmul.mubr.f32.gmra.mxu0 %v13968_v12  ;;  %11503 = vmatpush3.xpose.msra.mxu1 %v13984_v6  ;;  %v4798_v12 = vand.u32 4294901760, %v4797_v31 }
 0x70b   : > { %11462 = vmatpush3.xpose.msra.mxu0 %v14013_v39  ;;  %11463 = vmatprep.mubr.msk.f32.mxu0 %vm12161_vm1, %v16802_v26 }
 0x70c   : > { %11487 = vmatprep.subr.mxu0 %v16802_v26  ;;  %11481 = vmatprep.mubr.msk.f32.mxu1 %vm12161_vm1, %v16802_v26 }
 0x70d   : > { %11504 = vmatprep.subr.mxu1 %v16802_v26  ;;  %11482 = vmatmul.mubr.f32.gmra.mxu1 %v14066_v37 }
 0x70e   : > { %11464 = vmatmul.mubr.f32.vlgmr.msra.gmra.mxu0 %v4778_v19  ;;  %11505 = vmatpush3.xpose.msra.mxu1 %v13998_v50 }
 0x70f   : > { %11488 = vmatpush3.xpose.msra.mxu0 %v14001_v29  ;;  %11466 = vmatprep.mubr.msk.f32.mxu0 %vm12161_vm1, %v16802_v26 }
 0x710   : > { %11489 = vmatprep.subr.mxu0 %v16802_v26  ;;  %11484 = vmatprep.mubr.msk.f32.mxu1 %vm12161_vm1, %v16802_v26 }
 0x711   : > { %11506 = vmatprep.subr.mxu1 %v16802_v26  ;;  %11485 = vmatmul.mubr.f32.gmra.mxu1 %v14076_v41 }
 0x712   : > { %11467 = vmatmul.mubr.f32.gmra.mxu0 %v4788_v36  ;;  %11507 = vmatpush3.xpose.msra.mxu1 %v14013_v39 }
 0x713   : > { %11490 = vmatpush3.xpose.msra.mxu0 %v14010_v32  ;;  %11469 = vmatprep.mubr.msk.f32.mxu0 %vm12161_vm1, %v16802_v26 }
 0x714   : > { %11491 = vmatprep.subr.mxu0 %v16802_v26  ;;  %11508 = vmatprep.mubr.msk.f32.mxu1 %vm12161_vm1, %v16802_v26 }
 0x715   : > { %11532 = vmatprep.subr.mxu1 %v16802_v26  ;;  %11509 = vmatmul.mubr.f32.vlgmr.msra.gmra.mxu1 %v4776_v17 }
 0x716   : > { %11470 = vmatmul.mubr.f32.gmra.mxu0 %v4798_v12  ;;  %11533 = vmatpush3.xpose.msra.mxu1 %v13984_v6 }
 0x717   : > { %11492 = vmatpush3.xpose.msra.mxu0 %v14030_v15  ;;  %11493 = vmatprep.mubr.msk.f32.mxu0 %vm12161_vm1, %v16802_v26 }
 0x718   : > { %11517 = vmatprep.subr.mxu0 %v16802_v26  ;;  %11511 = vmatprep.mubr.msk.f32.mxu1 %vm12161_vm1, %v16802_v26 }
 0x719   : > { %11534 = vmatprep.subr.mxu1 %v16802_v26  ;;  %11512 = vmatmul.mubr.f32.gmra.mxu1 %v4786_v61 }
 0x71a   : > { %11494 = vmatmul.mubr.f32.vlgmr.msra.gmra.mxu0 %v14061_v56  ;;  %11535 = vmatpush3.xpose.msra.mxu1 %v13998_v50 }
 0x71b   : > { %11518 = vmatpush3.xpose.msra.mxu0 %v4833_v1  ;;  %11496 = vmatprep.mubr.msk.f32.mxu0 %vm12161_vm1, %v16802_v26 }
 0x71c   : > { %11519 = vmatprep.subr.mxu0 %v16802_v26  ;;  %11514 = vmatprep.mubr.msk.f32.mxu1 %vm12161_vm1, %v16802_v26 }
 0x71d   : > { %11536 = vmatprep.subr.mxu1 %v16802_v26  ;;  %11515 = vmatmul.mubr.f32.gmra.mxu1 %v4796_v22 }
 0x71e   : > { %11497 = vmatmul.mubr.f32.gmra.mxu0 %v4785_v20  ;;  %11537 = vmatpush3.xpose.msra.mxu1 %v14013_v39 }
 0x71f   : > { %11520 = vmatpush3.xpose.msra.mxu0 %v4840_v54  ;;  %11499 = vmatprep.mubr.msk.f32.mxu0 %vm12161_vm1, %v16802_v26 }
 0x720   : > { %11521 = vmatprep.subr.mxu0 %v16802_v26  ;;  %11538 = vmatprep.mubr.msk.f32.mxu1 %vm12161_vm1, %v16802_v26 }
 0x721   : > { %11539 = vmatmul.mubr.f32.vlgmr.msra.gmra.mxu1 %v14046_v24  ;;  %11562 = vmatprep.subr.mxu1 %v16802_v26 }
 0x722   : > { %11500 = vmatmul.mubr.f32.gmra.mxu0 %v4795_v28  ;;  %11541 = vmatprep.mubr.msk.f32.mxu1 %vm12161_vm1, %v16802_v26 }
 0x723   : > { %11522 = vmatpush3.xpose.msra.mxu0 %v4847_v43  ;;  %11523 = vmatprep.mubr.msk.f32.mxu0 %vm12161_vm1, %v16802_v26 }
 0x724   : > { %11547 = vmatprep.subr.mxu0 %v16802_v26 }
 0x725   : > { %11542 = vmatmul.mubr.f32.gmra.mxu1 %v14066_v37 }
 0x726   : > { %11524 = vmatmul.mubr.f32.vlgmr.msra.gmra.mxu0 %v14046_v24  ;;  %11544 = vmatprep.mubr.msk.f32.mxu1 %vm12161_vm1, %v16802_v26 }
 0x727   : > { %11526 = vmatprep.mubr.msk.f32.mxu0 %vm12161_vm1, %v16802_v26 }
 0x729   : > { %11545 = vmatmul.mubr.f32.gmra.mxu1 %v14076_v41 }
 0x72a   : > { %11527 = vmatmul.mubr.f32.gmra.mxu0 %v14066_v37  ;;  %11568 = vmatprep.mubr.msk.f32.mxu1 %vm12161_vm1, %v16802_v26 }
 0x72b   : > { %11529 = vmatprep.mubr.msk.f32.mxu0 %vm12161_vm1, %v16802_v26 }
 0x72e   : > { %11530 = vmatmul.mubr.f32.gmra.mxu0 %v14076_v41 }
 0x72f   : > { %11553 = vmatprep.mubr.msk.f32.mxu0 %vm12161_vm1, %v16802_v26 }
 0x7a4   : > { %v4304_v33 = vpop.f32.mrf.mxu1 }
 0x7a6   : > { %v11390_v10 = vpop.f32.mrf.mxu1 }
 0x7a7   : > { %v4198_v25 = vpop.f32.mrf.mxu0 }
 0x7a8   : > { %v4310_v5 = vpop.f32.mrf.mxu1  ;;  %v4305_v14 = vadd.f32 %v4304_v33, %v4198_v25 }
 0x7a9   : > { %v11375_v34 = vpop.f32.mrf.mxu0 }
 0x7aa   : > { %v11393_v6 = vpop.f32.mrf.mxu1 }
 0x7ad   : > { %v4316_v46 = vpop.f32.mrf.mxu1  ;;  %v4208_v62 = vpop.f32.mrf.mxu0 }
 0x7ae   : > { %v4311_v48 = vadd.f32 %v4310_v5, %v4208_v62 }
 0x7af   : > { %v11396_v49 = vpop.f32.mrf.mxu1  ;;  %v11378_v42 = vpop.f32.mrf.mxu0 }
 0x7b1   : > { %v4484_v50 = vpop.f32.mrf.mxu1  ;;  %v4218_v29 = vpop.f32.mrf.mxu0 }
 0x7b2   : > { %v4317_v7 = vadd.f32 %v4316_v46, %v4218_v29 }
 0x7b3   : > { %v11420_v32 = vpop.f32.mrf.mxu1  ;;  %v11381_v1 = vpop.f32.mrf.mxu0 }
 0x7b5   : > { %v4492_v39 = vpop.f32.mrf.mxu1 }
 0x7b6   : > { %v4394_v57 = vpop.f32.mrf.mxu0 }
 0x7b7   : > { %v4395_v54 = vadd.f32 %v4394_v57, %v4305_v14  ;;  %v11423_v11 = vpop.f32.mrf.mxu1 }
 0x7b8   : > { %v11405_v15 = vpop.f32.mrf.mxu0 }
 0x7b9   : > { %v4500_v58 = vpop.f32.mrf.mxu1  ;;  %v4485_v4 = vadd.f32 %v4484_v50, %v4395_v54 }
 0x7ba   : > { %v4401_v51 = vpop.f32.mrf.mxu0 }
 0x7bb   : > { %v4402_v18 = vadd.f32 %v4401_v51, %v4311_v48  ;;  %v11426_v24 = vpop.f32.mrf.mxu1 }
 0x7bc   : > { %v11408_v43 = vpop.f32.mrf.mxu0 }
 0x7bd   : > { %v4666_v2 = vpop.f32.mrf.mxu1  ;;  %v4493_v59 = vadd.f32 %v4492_v39, %v4402_v18 }
 0x7be   : > { %v4408_v55 = vpop.f32.mrf.mxu0 }
 0x7bf   : > { %v4409_v56 = vadd.f32 %v4408_v55, %v4317_v7  ;;  %v11450_v30 = vpop.f32.mrf.mxu1 }
 0x7c0   : > { %v11411_v37 = vpop.f32.mrf.mxu0 }
 0x7c1   : > { %v4672_v9 = vpop.f32.mrf.mxu1  ;;  %v4501_v17 = vadd.f32 %v4500_v58, %v4409_v56 }
 0x7c2   : > { %v4580_v0 = vpop.f32.mrf.mxu0 }
 0x7c3   : > { %v4581_v41 = vadd.f32 %v4580_v0, %v4485_v4  ;;  %v11453_v20 = vpop.f32.mrf.mxu1 }
 0x7c4   : > { %v11435_v27 = vpop.f32.mrf.mxu0 }
 0x7c5   : > { %v14172_v28 = vadd.f32 %v4666_v2, %v4581_v41  ;;  %v4678_v61 = vpop.f32.mrf.mxu1 }
 0x7c6   : > { %v4586_v19 = vpop.f32.mrf.mxu0 }
 0x7c7   : > { %v4587_v22 = vadd.f32 %v4586_v19, %v4493_v59  ;;  %v11456_v23 = vpop.f32.mrf.mxu1 }
 0x7c8   : > { %v11438_v31 = vpop.f32.mrf.mxu0 }
 0x7c9   : > { %v14174_v36 = vadd.f32 %v4672_v9, %v4587_v22  ;;  %v4886_v12 = vpop.f32.mrf.mxu1 }
 0x7ca   : > { %v4592_v33 = vpop.f32.mrf.mxu0 }
 0x7cb   : > { %v4593_v10 = vadd.f32 %v4592_v33, %v4501_v17  ;;  %v11480_v25 = vpop.f32.mrf.mxu1 }
 0x7cc   : > { %v11441_v5 = vpop.f32.mrf.mxu0 }
 0x7cd   : > { %v14176_v14 = vadd.f32 %v4678_v61, %v4593_v10  ;;  %v4892_v34 = vpop.f32.mrf.mxu1 }
 0x7ce   : > { %v4780_v6 = vpop.f32.mrf.mxu0 }
 0x7cf   : > { %v11483_v46 = vpop.f32.mrf.mxu1  ;;  %v4887_v4 = vadd.f32 %v4886_v12, %v4780_v6 }
 0x7d0   : > { %v11465_v62 = vpop.f32.mrf.mxu0 }
 0x7d1   : > { %v4898_v48 = vpop.f32.mrf.mxu1 }
 0x7d2   : > { %v4790_v49 = vpop.f32.mrf.mxu0 }
 0x7d3   : > { %v11486_v42 = vpop.f32.mrf.mxu1  ;;  %v4893_v59 = vadd.f32 %v4892_v34, %v4790_v49 }
 0x7d4   : > { %v11468_v50 = vpop.f32.mrf.mxu0 }
 0x7d5   : > { %v5066_v29 = vpop.f32.mrf.mxu1 }
 0x7d6   : > { %v4800_v7 = vpop.f32.mrf.mxu0 }
 0x7d7   : > { %v11510_v32 = vpop.f32.mrf.mxu1  ;;  %v4899_v0 = vadd.f32 %v4898_v48, %v4800_v7 }
 0x7d8   : > { %v11471_v1 = vpop.f32.mrf.mxu0 }
 0x7d9   : > { %v5074_v39 = vpop.f32.mrf.mxu1 }
 0x7da   : > { %v4976_v57 = vpop.f32.mrf.mxu0 }
 0x7db   : > { %v11513_v54 = vpop.f32.mrf.mxu1  ;;  %v4977_v24 = vadd.f32 %v4976_v57, %v4887_v4 }
 0x7dc   : > { %v11495_v11 = vpop.f32.mrf.mxu0 }
 0x7dd   : > { %v5082_v15 = vpop.f32.mrf.mxu1  ;;  %v5067_v37 = vadd.f32 %v5066_v29, %v4977_v24 }
 0x7de   : > { %v4983_v58 = vpop.f32.mrf.mxu0 }
 0x7df   : > { %v11516_v51 = vpop.f32.mrf.mxu1  ;;  %v4984_v30 = vadd.f32 %v4983_v58, %v4893_v59 }
 0x7e0   : > { %v11498_v18 = vpop.f32.mrf.mxu0 }
 0x7e1   : > { %v5248_v43 = vpop.f32.mrf.mxu1  ;;  %v5075_v22 = vadd.f32 %v5074_v39, %v4984_v30 }
 0x7e2   : > { %v4990_v2 = vpop.f32.mrf.mxu0 }
 0x7e3   : > { %v11540_v55 = vpop.f32.mrf.mxu1  ;;  %v4991_v61 = vadd.f32 %v4990_v2, %v4899_v0 }
 0x7e4   : > { %v11501_v56 = vpop.f32.mrf.mxu0 }
 0x7e5   : > { %v5254_v9 = vpop.f32.mrf.mxu1  ;;  %v5083_v6 = vadd.f32 %v5082_v15, %v4991_v61 }
 0x7e6   : > { %v5162_v17 = vpop.f32.mrf.mxu0 }
 0x7e7   : > { %v5163_v41 = vadd.f32 %v5162_v17, %v5067_v37  ;;  %v11543_v20 = vpop.f32.mrf.mxu1 }
 0x7e8   : > { %v11525_v27 = vpop.f32.mrf.mxu0 }
 0x7e9   : > { %v5249_v19 = vadd.f32 %v5248_v43, %v5163_v41  ;;  %v5260_v23 = vpop.f32.mrf.mxu1 }
 0x7ea   : > { %v5168_v31 = vpop.f32.mrf.mxu0 }
 0x7eb   : > { %v5169_v12 = vadd.f32 %v5168_v31, %v5075_v22  ;;  %v11546_v33 = vpop.f32.mrf.mxu1  ;;  %v5264_v10 = vmul.f32 0.17677669, %v5249_v19 }
 0x7ec   : > { %v11528_v25 = vpop.f32.mrf.mxu0 }
 0x7ed   : > { %v5255_v5 = vadd.f32 %v5254_v9, %v5169_v12  ;;  %v5267_v34 = vsel %vm2880_vm3, %v5264_v10, -inf }
 0x7ee   : > { %5268 = vmax.xlane.f32.xlu1 %v5267_v34  ;;  %v5174_v46 = vpop.f32.mrf.mxu0 }
 0x7ef   : > { %v5175_v62 = vadd.f32 %v5174_v46, %v5083_v6  ;;  %v5265_v48 = vmul.f32 0.17677669, %v5255_v5 }
 0x7f0   : > { %v11531_v49 = vpop.f32.mrf.mxu0 }
 0x7f1   : > { %v5261_v42 = vadd.f32 %v5260_v23, %v5175_v62  ;;  %v5270_v50 = vsel %vm2880_vm3, %v5265_v48, -inf }
 0x7f2   : > { %5271 = vmax.xlane.f32.xlu0 %v5270_v50 }
 0x7f3   : > { %v5266_v29 = vmul.f32 0.17677669, %v5261_v42 }
 0x7f5   : > { %v5273_v7 = vsel %vm2887_vm4, %v5266_v29, -inf }
 0x7f6   : > { %5274 = vmax.xlane.f32.xlu0 %v5273_v7 }
 0x7ff   : > { %5304 = vrot.lane.b32.xlu1 %v13595_v44, %s12163_s28 }
 0x877   : > { %v5269_v32 = vpop.xlane.xlu1 %5268 }
 0x878   : > { %v5276_v1 = vsub.f32 %v5264_v10, %v5269_v32 }
 0x87a   : > { %v5279_v39 = vmul.f32 1.442695, %v5276_v1 }
 0x87b   : > { %v5305_v57 = vpop.permute.xlu1 %5304  ;;  %v5272_v54 = vpop.xlane.xlu0 %5271 }
 0x87c   : > { %12107 = vpow2.f32 %v5279_v39  ;;  %v5317_v11 = vsel %vm502_vm0, %v5305_v57, 0  ;;  %v5277_v15 = vsub.f32 %v5265_v48, %v5272_v54 }
 0x87d   : > { %v14184_v58 = vand.u32 4294901760, %v5317_v11 }
 0x87e   : > { %v5281_v4 = vmul.f32 1.442695, %v5277_v15 }
 0x87f   : > { %v14187_v51 = vsub.f32 %v5317_v11, %v14184_v58  ;;  %11548 = vmatpush3.msra.mxu0 %v14184_v58  ;;  %v5275_v18 = vpop.xlane.xlu0 %5274 }
 0x880   : > { %12109 = vpow2.f32 %v5281_v4  ;;  %v5278_v24 = vsub.f32 %v5266_v29, %v5275_v18  ;;  %11549 = vmatprep.subr.mxu0 %v16802_v26 }
 0x881   : > { %v5446_v43 = vand.u32 4294901760, %v14187_v51 }
 0x882   : > { %v5283_v2 = vmul.f32 1.442695, %v5278_v24 }
 0x883   : > { %v5447_v59 = vsub.f32 %v14187_v51, %v5446_v43 }
 0x884   : > { %12111 = vpow2.f32 %v5283_v2 }
 0x885   : > { %v5448_v55 = vand.u32 4294901760, %v5447_v59 }
 0x887   : > { %11563 = vmatpush3.msra.mxu1 %v5448_v55 }
 0x888   : > { %11564 = vmatprep.subr.mxu1 %v16802_v26 }
 0x889   : > { %v12108_v56 = vpop.eup %12107 }
 0x88a   : > { %v5285_v30 = vsel %vm2880_vm3, %v12108_v56, 0.0 }
 0x88b   : > { %5286 = vadd.xlane.f32.xlu0 %v5285_v30 }
 0x88d   : > { %v12110_v37 = vpop.eup %12109 }
 0x88e   : > { %v5288_v9 = vsel %vm2880_vm3, %v12110_v37, 0.0 }
 0x88f   : > { %5289 = vadd.xlane.f32.xlu1 %v5288_v9 }
 0x891   : > { %v12112_v17 = vpop.eup %12111 }
 0x892   : > { %v5291_v0 = vsel %vm2887_vm4, %v12112_v17, 0.0 }
 0x893   : > { %5292 = vadd.xlane.f32.xlu0 %v5291_v0 }
 0x8a0   : > { %5300 = vrot.lane.b32.xlu1 %v13585_v60, %s12163_s28 }
 0x8a4   : > { %5887 = vrot.lane.b32.xlu1 %v13428_v16, %s12164_s29 }
 0x8a8   : > { %5885 = vrot.lane.b32.xlu1 %v13414_v35, %s12164_s29 }
 0x8a9   : > { %5302 = vrot.lane.b32.xlu0 %v13587_v63, %s12163_s28 }
 0x8ac   : > { %5877 = vrot.lane.b32.xlu1 %v13408_v8, %s12164_s29 }
 0x8ad   : > { %5883 = vrot.lane.b32.xlu0 %v13416_v45, %s12164_s29 }
 0x8b0   : > { %5881 = vrot.lane.b32.xlu1 %v13422_v38, %s12164_s29 }
 0x8b1   : > { %5879 = vrot.lane.b32.xlu0 %v13412_v3, %s12164_s29 }
 0x914   : > { %v5287_v41 = vpop.xlane.xlu0 %5286 }
 0x915   : > { %12113 = vrcp.f32 %v5287_v41 }
 0x918   : > { %v5290_v16 = vpop.xlane.xlu1 %5289 }
 0x919   : > { %12115 = vrcp.f32 %v5290_v16 }
 0x91c   : > { %v5301_v35 = vpop.permute.xlu1 %5300  ;;  %v5293_v20 = vpop.xlane.xlu0 %5292 }
 0x91d   : > { %v14215_v27 = vand.u32 4294901760, %v5301_v35  ;;  %12117 = vrcp.f32 %v5293_v20 }
 0x91f   : > { %v14218_v8 = vsub.f32 %v5301_v35, %v14215_v27 }
 0x920   : > { %v5303_v61 = vpop.permute.xlu0 %5302  ;;  %v5888_v57 = vpop.permute.xlu1 %5887 }
 0x921   : > { %v14220_v45 = vand.u32 4294901760, %v5303_v61  ;;  %v5460_v22 = vand.u32 4294901760, %v14218_v8  ;;  %v5899_v18 = vsel %vm2300_vm2, %v5888_v57, 0 }
 0x922   : > { %v12114_v19 = vpop.eup %12113 }
 0x923   : > { %v5297_v38 = vmul.f32 %v12114_v19, %v12108_v56  ;;  %v14224_v3 = vsub.f32 %v5303_v61, %v14220_v45  ;;  %11550 = vmatpush3.msra.mxu0 %v14220_v45  ;;  %v5461_v10 = vsub.f32 %v14218_v8, %v5460_v22  ;;  %v14275_v56 = vand.u32 4294901760, %v5899_v18 }
 0x924   : > { %11551 = vmatprep.subr.mxu0 %v16802_v26  ;;  %v5886_v59 = vpop.permute.xlu1 %5885 }
 0x925   : > { %v5309_v23 = vsel %vm2880_vm3, %v5297_v38, 0  ;;  %v5453_v31 = vand.u32 4294901760, %v14224_v3  ;;  %11552 = vmatpush3.msra.mxu0 %v14215_v27  ;;  %v5462_v62 = vand.u32 4294901760, %v5461_v10  ;;  %v5897_v30 = vsel %vm2300_vm2, %v5886_v59, 0 }
 0x926   : > { %v12116_v12 = vpop.eup %12115  ;;  %v14231_v33 = vand.u32 4294901760, %v5309_v23  ;;  %11577 = vmatprep.subr.mxu0 %v16802_v26  ;;  %v14285_v9 = vsub.f32 %v5899_v18, %v14275_v56 }
 0x927   : > { %v5454_v25 = vsub.f32 %v14224_v3, %v5453_v31  ;;  %v5298_v5 = vmul.f32 %v12116_v12, %v12110_v37  ;;  %v5884_v37 = vpop.permute.xlu0 %5883 }
 0x928   : > { %v5388_v34 = vsub.f32 %v5309_v23, %v14231_v33  ;;  %v5895_v0 = vsel %vm2300_vm2, %v5884_v37, 0  ;;  %v5878_v41 = vpop.permute.xlu1 %5877  ;;  %v6028_v16 = vand.u32 4294901760, %v14285_v9 }
 0x929   : > { %v5455_v6 = vand.u32 4294901760, %v5454_v25  ;;  %v5312_v49 = vsel %vm2880_vm3, %v5298_v5, 0  ;;  %v14302_v35 = vand.u32 4294901760, %v5895_v0  ;;  %v5889_v20 = vsel %vm2300_vm2, %v5878_v41, 0 }
 0x92a   : > { %v12118_v46 = vpop.eup %12117  ;;  %v5389_v48 = vand.u32 4294901760, %v5388_v34  ;;  %v14243_v50 = vand.u32 4294901760, %v5312_v49 }
 0x92b   : > { %11565 = vmatpush3.msra.mxu1 %v5455_v6  ;;  %v5299_v42 = vmul.f32 %v12118_v46, %v12112_v17  ;;  %v14287_v17 = vand.u32 4294901760, %v5897_v30  ;;  %v5880_v61 = vpop.permute.xlu0 %5879 }
 0x92c   : > { %11566 = vmatprep.subr.mxu1 %v16802_v26  ;;  %v5390_v29 = vsub.f32 %v5388_v34, %v5389_v48  ;;  %v5398_v1 = vsub.f32 %v5312_v49, %v14243_v50  ;;  %v5891_v19 = vsel %vm2300_vm2, %v5880_v61, 0  ;;  %v5882_v38 = vpop.permute.xlu1 %5881 }
 0x92d   : > { %11567 = vmatpush3.msra.mxu1 %v5462_v62  ;;  %v5315_v7 = vsel %vm2880_vm3, %v5299_v42, 0  ;;  %v5893_v12 = vsel %vm2300_vm2, %v5882_v38, 0 }
 0x92e   : > { %11569 = vmatmul.mubr.f32.vlgmr.msra.gmra.mxu1 %v14231_v33  ;;  %11592 = vmatprep.subr.mxu1 %v16802_v26  ;;  %v5391_v32 = vand.u32 4294901760, %v5390_v29  ;;  %v14252_v39 = vand.u32 4294901760, %v5315_v7  ;;  %v5399_v54 = vand.u32 4294901760, %v5398_v1  ;;  %v14362_v6 = vand.u32 4294901760, %v5893_v12 }
 0x92f   : > { %11593 = vmatpush3.msra.mxu1 %v14184_v58  ;;  %11571 = vmatprep.mubr.msk.f32.mxu1 %vm12161_vm1, %v16802_v26 }
 0x930   : > { %11594 = vmatprep.subr.mxu1 %v16802_v26  ;;  %11554 = vmatmul.mubr.f32.vlgmr.msra.gmra.mxu0 %v5391_v32  ;;  %v14257_v11 = vsub.f32 %v5315_v7, %v14252_v39  ;;  %v5400_v15 = vsub.f32 %v5398_v1, %v5399_v54 }
 0x931   : > { %11595 = vmatpush3.msra.mxu1 %v14220_v45  ;;  %11578 = vmatpush3.msra.mxu0 %v14187_v51  ;;  %v6029_v51 = vsub.f32 %v14285_v9, %v6028_v16 }
 0x932   : > { %11572 = vmatmul.mubr.f32.gmra.mxu1 %v14243_v50  ;;  %11579 = vmatprep.subr.mxu0 %v16802_v26  ;;  %v5409_v4 = vand.u32 4294901760, %v14257_v11  ;;  %v5401_v24 = vand.u32 4294901760, %v5400_v15 }
 0x933   : > { %11596 = vmatprep.subr.mxu1 %v16802_v26  ;;  %11580 = vmatpush3.msra.mxu0 %v14224_v3 }
 0x934   : > { %11556 = vmatprep.mubr.msk.f32.mxu0 %vm12161_vm1, %v16802_v26  ;;  %11581 = vmatprep.subr.mxu0 %v16802_v26  ;;  %v5410_v2 = vsub.f32 %v14257_v11, %v5409_v4 }
 0x935   : > { %11597 = vmatpush3.msra.mxu1 %v14215_v27  ;;  %11582 = vmatpush3.msra.mxu0 %v14218_v8  ;;  %v6030_v8 = vand.u32 4294901760, %v6029_v51 }
 0x936   : > { %11574 = vmatprep.mubr.msk.f32.mxu1 %vm12161_vm1, %v16802_v26  ;;  %11557 = vmatmul.mubr.f32.gmra.mxu0 %v5401_v24  ;;  %v5411_v55 = vand.u32 4294901760, %v5410_v2 }
 0x937   : > { %11575 = vmatmul.mubr.f32.gmra.mxu1 %v14252_v39  ;;  %11559 = vmatprep.mubr.msk.f32.mxu0 %vm12161_vm1, %v16802_v26 }
 0x938   : > { %11598 = vmatprep.mubr.msk.f32.mxu1 %vm12161_vm1, %v16802_v26  ;;  %11622 = vmatprep.subr.mxu1 %v16802_v26 }
 0x939   : > { %11607 = vmatprep.subr.mxu0 %v16802_v26 }
 0x93a   : > { %11560 = vmatmul.mubr.f32.gmra.mxu0 %v5411_v55 }
 0x93b   : > { %11599 = vmatmul.mubr.f32.vlgmr.msra.gmra.mxu1 %v5389_v48  ;;  %11583 = vmatprep.mubr.msk.f32.mxu0 %vm12161_vm1, %v16802_v26  ;;  %v5990_v48 = vsub.f32 %v5893_v12, %v14362_v6 }
 0x93c   : > { %11623 = vmatpush3.msra.mxu1 %v14184_v58  ;;  %11601 = vmatprep.mubr.msk.f32.mxu1 %vm12161_vm1, %v16802_v26  ;;  %v14300_v58 = vsub.f32 %v5897_v30, %v14287_v17 }
 0x93d   : > { %11624 = vmatprep.subr.mxu1 %v16802_v26 }
 0x93e   : > { %11625 = vmatpush3.msra.mxu1 %v14220_v45  ;;  %11584 = vmatmul.mubr.f32.vlgmr.msra.gmra.mxu0 %v5388_v34  ;;  %v14325_v45 = vand.u32 4294901760, %v5889_v20 }
 0x93f   : > { %11626 = vmatprep.subr.mxu1 %v16802_v26  ;;  %11608 = vmatpush3.msra.mxu0 %v5446_v43  ;;  %v6035_v43 = vand.u32 4294901760, %v14300_v58 }
 0x940   : > { %11602 = vmatmul.mubr.f32.gmra.mxu1 %v5399_v54  ;;  %11609 = vmatprep.subr.mxu0 %v16802_v26  ;;  %v14342_v23 = vsub.f32 %v5889_v20, %v14325_v45 }
 0x941   : > { %11627 = vmatpush3.msra.mxu1 %v14215_v27  ;;  %11610 = vmatpush3.msra.mxu0 %v5453_v31  ;;  %v14319_v27 = vsub.f32 %v5895_v0, %v14302_v35  ;;  %v14344_v31 = vand.u32 4294901760, %v5891_v19 }
 0x942   : > { %11586 = vmatprep.mubr.msk.f32.mxu0 %vm12161_vm1, %v16802_v26  ;;  %11611 = vmatprep.subr.mxu0 %v16802_v26  ;;  %v5971_v5 = vand.u32 4294901760, %v14342_v23 }
 0x943   : > { %11587 = vmatmul.mubr.f32.gmra.mxu0 %v5398_v1  ;;  %11604 = vmatprep.mubr.msk.f32.mxu1 %vm12161_vm1, %v16802_v26  ;;  %v6042_v3 = vand.u32 4294901760, %v14319_v27  ;;  %v14360_v34 = vsub.f32 %v5891_v19, %v14344_v31 }
 0x944   : > { %11612 = vmatpush3.msra.mxu0 %v5460_v22  ;;  %11605 = vmatmul.mubr.f32.gmra.mxu1 %v5409_v4  ;;  %v6036_v22 = vsub.f32 %v14300_v58, %v6035_v43  ;;  %v5972_v46 = vsub.f32 %v14342_v23, %v5971_v5 }
 0x945   : > { %11589 = vmatprep.mubr.msk.f32.mxu0 %vm12161_vm1, %v16802_v26  ;;  %11628 = vmatprep.mubr.msk.f32.mxu1 %vm12161_vm1, %v16802_v26  ;;  %v6043_v25 = vsub.f32 %v14319_v27, %v6042_v3  ;;  %v5981_v62 = vand.u32 4294901760, %v14360_v34 }
 0x946   : > { %11652 = vmatprep.subr.mxu1 %v16802_v26  ;;  %11637 = vmatprep.subr.mxu0 %v16802_v26  ;;  %v6037_v10 = vand.u32 4294901760, %v6036_v22  ;;  %v5973_v49 = vand.u32 4294901760, %v5972_v46 }
 0x947   : > { %11590 = vmatmul.mubr.f32.gmra.mxu0 %v14257_v11  ;;  %v5982_v42 = vsub.f32 %v14360_v34, %v5981_v62 }
 0x948   : > { %11613 = vmatprep.mubr.msk.f32.mxu0 %vm12161_vm1, %v16802_v26  ;;  %11629 = vmatmul.mubr.f32.vlgmr.msra.gmra.mxu1 %v14231_v33 }
 0x949   : > { %11653 = vmatpush3.xpose.msra.mxu1 %v6030_v8  ;;  %11631 = vmatprep.mubr.msk.f32.mxu1 %vm12161_vm1, %v16802_v26  ;;  %v5983_v29 = vand.u32 4294901760, %v5982_v42 }
 0x94a   : > { %11654 = vmatprep.subr.mxu1 %v16802_v26 }
 0x94b   : > { %11614 = vmatmul.mubr.f32.vlgmr.msra.gmra.mxu0 %v14231_v33  ;;  %v6044_v33 = vand.u32 4294901760, %v6043_v25 }
 0x94c   : > { %11638 = vmatpush3.xpose.msra.mxu0 %v14275_v56  ;;  %11616 = vmatprep.mubr.msk.f32.mxu0 %vm12161_vm1, %v16802_v26 }
 0x94d   : > { %11632 = vmatmul.mubr.f32.gmra.mxu1 %v14243_v50  ;;  %11639 = vmatprep.subr.mxu0 %v16802_v26 }
 0x94e   : > { %11655 = vmatpush3.xpose.msra.mxu1 %v6037_v10  ;;  %11634 = vmatprep.mubr.msk.f32.mxu1 %vm12161_vm1, %v16802_v26 }
 0x94f   : > { %11617 = vmatmul.mubr.f32.gmra.mxu0 %v14243_v50  ;;  %11656 = vmatprep.subr.mxu1 %v16802_v26  ;;  %v5991_v50 = vand.u32 4294901760, %v5990_v48 }
 0x950   : > { %11640 = vmatpush3.xpose.msra.mxu0 %v14287_v17  ;;  %11619 = vmatprep.mubr.msk.f32.mxu0 %vm12161_vm1, %v16802_v26 }
 0x951   : > { %11635 = vmatmul.mubr.f32.gmra.mxu1 %v14252_v39  ;;  %11641 = vmatprep.subr.mxu0 %v16802_v26  ;;  %v5992_v7 = vsub.f32 %v5990_v48, %v5991_v50 }
 0x952   : > { %11657 = vmatpush3.xpose.msra.mxu1 %v6044_v33  ;;  %11658 = vmatprep.mubr.msk.f32.mxu1 %vm12161_vm1, %v16802_v26 }
 0x953   : > { %11620 = vmatmul.mubr.f32.gmra.mxu0 %v14252_v39  ;;  %11682 = vmatprep.subr.mxu1 %v16802_v26  ;;  %v5993_v32 = vand.u32 4294901760, %v5992_v7 }
 0x954   : > { %11642 = vmatpush3.xpose.msra.mxu0 %v14302_v35  ;;  %11643 = vmatprep.mubr.msk.f32.mxu0 %vm12161_vm1, %v16802_v26 }
 0x955   : > { %11659 = vmatmul.mubr.f32.vlgmr.msra.gmra.mxu1 %v14325_v45  ;;  %11667 = vmatprep.subr.mxu0 %v16802_v26 }
 0x956   : > { %11683 = vmatpush3.xpose.msra.mxu1 %v14275_v56  ;;  %11661 = vmatprep.mubr.msk.f32.mxu1 %vm12161_vm1, %v16802_v26 }
 0x957   : > { %11644 = vmatmul.mubr.f32.vlgmr.msra.gmra.mxu0 %v5973_v49  ;;  %11684 = vmatprep.subr.mxu1 %v16802_v26 }
 0x958   : > { %11668 = vmatpush3.xpose.msra.mxu0 %v14285_v9  ;;  %11646 = vmatprep.mubr.msk.f32.mxu0 %vm12161_vm1, %v16802_v26 }
 0x959   : > { %11662 = vmatmul.mubr.f32.gmra.mxu1 %v14344_v31  ;;  %11669 = vmatprep.subr.mxu0 %v16802_v26 }
 0x95a   : > { %11685 = vmatpush3.xpose.msra.mxu1 %v14287_v17  ;;  %11664 = vmatprep.mubr.msk.f32.mxu1 %vm12161_vm1, %v16802_v26 }
 0x95b   : > { %11647 = vmatmul.mubr.f32.gmra.mxu0 %v5983_v29  ;;  %11686 = vmatprep.subr.mxu1 %v16802_v26 }
 0x95c   : > { %11670 = vmatpush3.xpose.msra.mxu0 %v14300_v58  ;;  %11649 = vmatprep.mubr.msk.f32.mxu0 %vm12161_vm1, %v16802_v26 }
 0x95d   : > { %11665 = vmatmul.mubr.f32.gmra.mxu1 %v14362_v6  ;;  %11671 = vmatprep.subr.mxu0 %v16802_v26 }
 0x95e   : > { %11687 = vmatpush3.xpose.msra.mxu1 %v14302_v35  ;;  %11688 = vmatprep.mubr.msk.f32.mxu1 %vm12161_vm1, %v16802_v26 }
 0x95f   : > { %11650 = vmatmul.mubr.f32.gmra.mxu0 %v5993_v32  ;;  %11712 = vmatprep.subr.mxu1 %v16802_v26 }
 0x960   : > { %11672 = vmatpush3.xpose.msra.mxu0 %v14319_v27  ;;  %11673 = vmatprep.mubr.msk.f32.mxu0 %vm12161_vm1, %v16802_v26 }
 0x961   : > { %11689 = vmatmul.mubr.f32.vlgmr.msra.gmra.mxu1 %v5971_v5  ;;  %11697 = vmatprep.subr.mxu0 %v16802_v26 }
 0x962   : > { %11713 = vmatpush3.xpose.msra.mxu1 %v14275_v56  ;;  %11691 = vmatprep.mubr.msk.f32.mxu1 %vm12161_vm1, %v16802_v26 }
 0x963   : > { %11674 = vmatmul.mubr.f32.vlgmr.msra.gmra.mxu0 %v14342_v23  ;;  %11714 = vmatprep.subr.mxu1 %v16802_v26 }
 0x964   : > { %11698 = vmatpush3.xpose.msra.mxu0 %v6028_v16  ;;  %11676 = vmatprep.mubr.msk.f32.mxu0 %vm12161_vm1, %v16802_v26 }
 0x965   : > { %11692 = vmatmul.mubr.f32.gmra.mxu1 %v5981_v62  ;;  %11699 = vmatprep.subr.mxu0 %v16802_v26 }
 0x966   : > { %11715 = vmatpush3.xpose.msra.mxu1 %v14287_v17  ;;  %11694 = vmatprep.mubr.msk.f32.mxu1 %vm12161_vm1, %v16802_v26 }
 0x967   : > { %11677 = vmatmul.mubr.f32.gmra.mxu0 %v14360_v34  ;;  %11716 = vmatprep.subr.mxu1 %v16802_v26 }
 0x968   : > { %11700 = vmatpush3.xpose.msra.mxu0 %v6035_v43  ;;  %11679 = vmatprep.mubr.msk.f32.mxu0 %vm12161_vm1, %v16802_v26 }
 0x969   : > { %11695 = vmatmul.mubr.f32.gmra.mxu1 %v5991_v50  ;;  %11701 = vmatprep.subr.mxu0 %v16802_v26 }
 0x96a   : > { %11717 = vmatpush3.xpose.msra.mxu1 %v14302_v35  ;;  %11718 = vmatprep.mubr.msk.f32.mxu1 %vm12161_vm1, %v16802_v26 }
 0x96b   : > { %11680 = vmatmul.mubr.f32.gmra.mxu0 %v5990_v48  ;;  %11742 = vmatprep.subr.mxu1 %v16802_v26 }
 0x96c   : > { %11702 = vmatpush3.xpose.msra.mxu0 %v6042_v3  ;;  %11703 = vmatprep.mubr.msk.f32.mxu0 %vm12161_vm1, %v16802_v26 }
 0x96d   : > { %11719 = vmatmul.mubr.f32.vlgmr.msra.gmra.mxu1 %v14325_v45  ;;  %11727 = vmatprep.subr.mxu0 %v16802_v26 }
 0x96e   : > { %11721 = vmatprep.mubr.msk.f32.mxu1 %vm12161_vm1, %v16802_v26 }
 0x96f   : > { %11704 = vmatmul.mubr.f32.vlgmr.msra.gmra.mxu0 %v14325_v45 }
 0x970   : > { %11706 = vmatprep.mubr.msk.f32.mxu0 %vm12161_vm1, %v16802_v26 }
 0x971   : > { %11722 = vmatmul.mubr.f32.gmra.mxu1 %v14344_v31 }
 0x972   : > { %11724 = vmatprep.mubr.msk.f32.mxu1 %vm12161_vm1, %v16802_v26 }
 0x973   : > { %11707 = vmatmul.mubr.f32.gmra.mxu0 %v14344_v31 }
 0x974   : > { %11709 = vmatprep.mubr.msk.f32.mxu0 %vm12161_vm1, %v16802_v26 }
 0x975   : > { %11725 = vmatmul.mubr.f32.gmra.mxu1 %v14362_v6 }
 0x976   : > { %11748 = vmatprep.mubr.msk.f32.mxu1 %vm12161_vm1, %v16802_v26 }
 0x977   : > { %11710 = vmatmul.mubr.f32.gmra.mxu0 %v14362_v6 }
 0x978   : > { %11733 = vmatprep.mubr.msk.f32.mxu0 %vm12161_vm1, %v16802_v26 }
 0x9ee   : > { %v5499_v1 = vpop.f32.mrf.mxu1 }
 0x9f0   : > { %v11570_v39 = vpop.f32.mrf.mxu1  ;;  %v5393_v57 = vpop.f32.mrf.mxu0 }
 0x9f1   : > { %v5500_v54 = vadd.f32 %v5499_v1, %v5393_v57 }
 0x9f2   : > { %v5505_v11 = vpop.f32.mrf.mxu1  ;;  %v11555_v15 = vpop.f32.mrf.mxu0 }
 0x9f4   : > { %v11573_v4 = vpop.f32.mrf.mxu1 }
 0x9f6   : > { %v5403_v18 = vpop.f32.mrf.mxu0 }
 0x9f7   : > { %v5511_v24 = vpop.f32.mrf.mxu1  ;;  %v5506_v2 = vadd.f32 %v5505_v11, %v5403_v18 }
 0x9f8   : > { %v11558_v59 = vpop.f32.mrf.mxu0 }
 0x9f9   : > { %v11576_v55 = vpop.f32.mrf.mxu1 }
 0x9fa   : > { %v5413_v56 = vpop.f32.mrf.mxu0 }
 0x9fb   : > { %v5679_v30 = vpop.f32.mrf.mxu1  ;;  %v5512_v37 = vadd.f32 %v5511_v24, %v5413_v56 }
 0x9fc   : > { %v11561_v9 = vpop.f32.mrf.mxu0 }
 0x9fd   : > { %v11600_v17 = vpop.f32.mrf.mxu1 }
 0x9fe   : > { %v5589_v0 = vpop.f32.mrf.mxu0 }
 0x9ff   : > { %v5590_v41 = vadd.f32 %v5589_v0, %v5500_v54 }
 0xa00   : > { %v5687_v16 = vpop.f32.mrf.mxu1  ;;  %v11585_v58 = vpop.f32.mrf.mxu0 }
 0xa01   : > { %v5680_v20 = vadd.f32 %v5679_v30, %v5590_v41 }
 0xa02   : > { %v11603_v35 = vpop.f32.mrf.mxu1 }
 0xa03   : > { %v5596_v61 = vpop.f32.mrf.mxu0 }
 0xa04   : > { %v5597_v51 = vadd.f32 %v5596_v61, %v5506_v2  ;;  %v5695_v27 = vpop.f32.mrf.mxu1 }
 0xa05   : > { %v11588_v43 = vpop.f32.mrf.mxu0 }
 0xa06   : > { %v5688_v45 = vadd.f32 %v5687_v16, %v5597_v51  ;;  %v11606_v38 = vpop.f32.mrf.mxu1 }
 0xa07   : > { %v5603_v19 = vpop.f32.mrf.mxu0 }
 0xa08   : > { %v5604_v8 = vadd.f32 %v5603_v19, %v5512_v37  ;;  %v5861_v3 = vpop.f32.mrf.mxu1 }
 0xa09   : > { %v11591_v22 = vpop.f32.mrf.mxu0 }
 0xa0a   : > { %v5696_v23 = vadd.f32 %v5695_v27, %v5604_v8  ;;  %v11630_v12 = vpop.f32.mrf.mxu1 }
 0xa0b   : > { %v5775_v31 = vpop.f32.mrf.mxu0 }
 0xa0c   : > { %v5776_v10 = vadd.f32 %v5775_v31, %v5680_v20 }
 0xa0d   : > { %v11615_v25 = vpop.f32.mrf.mxu0  ;;  %v5867_v5 = vpop.f32.mrf.mxu1 }
 0xa0e   : > { %v14461_v34 = vadd.f32 %v5861_v3, %v5776_v10 }
 0xa0f   : > { %v5781_v6 = vpop.f32.mrf.mxu0  ;;  %v11633_v33 = vpop.f32.mrf.mxu1 }
 0xa10   : > { %v5782_v46 = vadd.f32 %v5781_v6, %v5688_v45 }
 0xa11   : > { %v11618_v62 = vpop.f32.mrf.mxu0  ;;  %v5873_v48 = vpop.f32.mrf.mxu1 }
 0xa12   : > { %v14463_v49 = vadd.f32 %v5867_v5, %v5782_v46 }
 0xa13   : > { %v5787_v42 = vpop.f32.mrf.mxu0  ;;  %v11636_v50 = vpop.f32.mrf.mxu1 }
 0xa14   : > { %v5788_v29 = vadd.f32 %v5787_v42, %v5696_v23 }
 0xa15   : > { %v11621_v7 = vpop.f32.mrf.mxu0  ;;  %v6081_v32 = vpop.f32.mrf.mxu1 }
 0xa16   : > { %v14465_v1 = vadd.f32 %v5873_v48, %v5788_v29 }
 0xa17   : > { %v5975_v39 = vpop.f32.mrf.mxu0  ;;  %v11660_v57 = vpop.f32.mrf.mxu1 }
 0xa18   : > { %v6082_v16 = vadd.f32 %v6081_v32, %v5975_v39 }
 0xa19   : > { %v11645_v54 = vpop.f32.mrf.mxu0  ;;  %v6087_v11 = vpop.f32.mrf.mxu1 }
 0xa1b   : > { %v5985_v15 = vpop.f32.mrf.mxu0  ;;  %v11663_v4 = vpop.f32.mrf.mxu1 }
 0xa1c   : > { %v6088_v43 = vadd.f32 %v6087_v11, %v5985_v15 }
 0xa1d   : > { %v11648_v18 = vpop.f32.mrf.mxu0  ;;  %v6093_v24 = vpop.f32.mrf.mxu1 }
 0xa1f   : > { %v5995_v2 = vpop.f32.mrf.mxu0  ;;  %v11666_v59 = vpop.f32.mrf.mxu1 }
 0xa20   : > { %v6094_v3 = vadd.f32 %v6093_v24, %v5995_v2 }
 0xa21   : > { %v11651_v55 = vpop.f32.mrf.mxu0  ;;  %v6261_v56 = vpop.f32.mrf.mxu1 }
 0xa23   : > { %v6171_v30 = vpop.f32.mrf.mxu0  ;;  %v11690_v37 = vpop.f32.mrf.mxu1 }
 0xa24   : > { %v6172_v20 = vadd.f32 %v6171_v30, %v6082_v16 }
 0xa25   : > { %v11675_v9 = vpop.f32.mrf.mxu0  ;;  %v6269_v17 = vpop.f32.mrf.mxu1 }
 0xa26   : > { %v6262_v38 = vadd.f32 %v6261_v56, %v6172_v20 }
 0xa27   : > { %v6178_v0 = vpop.f32.mrf.mxu0  ;;  %v11693_v41 = vpop.f32.mrf.mxu1 }
 0xa28   : > { %v6179_v19 = vadd.f32 %v6178_v0, %v6088_v43 }
 0xa29   : > { %v11678_v58 = vpop.f32.mrf.mxu0  ;;  %v6277_v35 = vpop.f32.mrf.mxu1 }
 0xa2a   : > { %v6270_v5 = vadd.f32 %v6269_v17, %v6179_v19 }
 0xa2b   : > { %v6185_v61 = vpop.f32.mrf.mxu0  ;;  %v11696_v51 = vpop.f32.mrf.mxu1 }
 0xa2c   : > { %v6186_v10 = vadd.f32 %v6185_v61, %v6094_v3 }
 0xa2d   : > { %v11681_v27 = vpop.f32.mrf.mxu0  ;;  %v6443_v45 = vpop.f32.mrf.mxu1 }
 0xa2e   : > { %v6278_v7 = vadd.f32 %v6277_v35, %v6186_v10 }
 0xa2f   : > { %v6357_v8 = vpop.f32.mrf.mxu0  ;;  %v11720_v22 = vpop.f32.mrf.mxu1 }
 0xa30   : > { %v6358_v23 = vadd.f32 %v6357_v8, %v6262_v38 }
 0xa31   : > { %v11705_v31 = vpop.f32.mrf.mxu0  ;;  %v6449_v12 = vpop.f32.mrf.mxu1 }
 0xa32   : > { %v6444_v25 = vadd.f32 %v6443_v45, %v6358_v23 }
 0xa33   : > { %v6363_v6 = vpop.f32.mrf.mxu0  ;;  %v11723_v33 = vpop.f32.mrf.mxu1 }
 0xa34   : > { %v6364_v46 = vadd.f32 %v6363_v6, %v6270_v5  ;;  %v6459_v62 = vmul.f32 0.17677669, %v6444_v25 }
 0xa35   : > { %v11708_v48 = vpop.f32.mrf.mxu0  ;;  %v6455_v42 = vpop.f32.mrf.mxu1 }
 0xa36   : > { %v6450_v50 = vadd.f32 %v6449_v12, %v6364_v46  ;;  %v6462_v29 = vsel %vm2880_vm3, %v6459_v62, -inf }
 0xa37   : > { %v11726_v32 = vpop.f32.mrf.mxu1  ;;  %6463 = vmax.xlane.f32.xlu0 %v6462_v29  ;;  %v6369_v39 = vpop.f32.mrf.mxu0 }
 0xa38   : > { %v6370_v57 = vadd.f32 %v6369_v39, %v6278_v7  ;;  %v6460_v54 = vmul.f32 0.17677669, %v6450_v50 }
 0xa39   : > { %v11711_v11 = vpop.f32.mrf.mxu0 }
 0xa3a   : > { %v6456_v15 = vadd.f32 %v6455_v42, %v6370_v57  ;;  %v6465_v4 = vsel %vm2880_vm3, %v6460_v54, -inf }
 0xa3b   : > { %6466 = vmax.xlane.f32.xlu1 %v6465_v4 }
 0xa3c   : > { %v6461_v18 = vmul.f32 0.17677669, %v6456_v15 }
 0xa3e   : > { %v6468_v24 = vsel %vm2887_vm4, %v6461_v18, -inf }
 0xa3f   : > { %6469 = vmax.xlane.f32.xlu0 %v6468_v24 }
 0xa4c   : > { %6497 = vrot.lane.b32.xlu1 %v13587_v63, %s12164_s29 }
 0xac0   : > { %v6464_v2 = vpop.xlane.xlu0 %6463 }
 0xac1   : > { %v6471_v59 = vsub.f32 %v6459_v62, %v6464_v2 }
 0xac3   : > { %v6474_v55 = vmul.f32 1.442695, %v6471_v59 }
 0xac4   : > { %v6467_v56 = vpop.xlane.xlu1 %6466 }
 0xac5   : > { %12119 = vpow2.f32 %v6474_v55  ;;  %v6472_v30 = vsub.f32 %v6460_v54, %v6467_v56 }
 0xac7   : > { %v6476_v37 = vmul.f32 1.442695, %v6472_v30 }
 0xac8   : > { %v6470_v9 = vpop.xlane.xlu0 %6469  ;;  %v6498_v51 = vpop.permute.xlu1 %6497 }
 0xac9   : > { %12121 = vpow2.f32 %v6476_v37  ;;  %v6473_v17 = vsub.f32 %v6461_v18, %v6470_v9  ;;  %v14485_v43 = vand.u32 4294901760, %v6498_v51 }
 0xacb   : > { %v6478_v0 = vmul.f32 1.442695, %v6473_v17  ;;  %v7134_v17 = vld [vmem:[%s16454_s5 + $0x78] sm:$0xff] }
 0xacd   : > { %12123 = vpow2.f32 %v6478_v0  ;;  %v7133_v0 = vld [vmem:[%s16454_s5 + $0x70] sm:$0xff] }
 0xad2   : > { %v12120_v41 = vpop.eup %12119 }
 0xad3   : > { %v6480_v16 = vsel %vm2880_vm3, %v12120_v41, 0.0 }
 0xad4   : > { %6481 = vadd.xlane.f32.xlu0 %v6480_v16  ;;  %v14609_v16 = vand.u32 4294901760, %v7134_v17 }
 0xad6   : > { %v12122_v58 = vpop.eup %12121 }
 0xad7   : > { %v6483_v35 = vsel %vm2880_vm3, %v12122_v58, 0.0 }
 0xad8   : > { %6484 = vadd.xlane.f32.xlu0 %v6483_v35 }
 0xada   : > { %v12124_v63 = vpop.eup %12123 }
 0xadb   : > { %v6486_v20 = vsel %vm2887_vm4, %v12124_v63, 0.0 }
 0xadc   : > { %6487 = vadd.xlane.f32.xlu1 %v6486_v20  ;;  %v7130_v20 = vld [vmem:[%s16454_s5 + $0x58] sm:$0xff] }
 0xaed   : > { %6495 = vrot.lane.b32.xlu1 %v13585_v60, %s12164_s29  ;;  %v14488_v60 = vsub.f32 %v6498_v51, %v14485_v43 }
 0xaee   : > { %6499 = vrot.lane.b32.xlu0 %v13595_v44, %s12164_s29 }
 0xaf1   : > { %7075 = vrot.lane.b32.xlu1 %v14172_v28, %s12164_s29 }
 0xaf2   : > { %7087 = vrot.lane.b32.xlu0 %v14461_v34, %s12163_s28  ;;  %v6648_v34 = vand.u32 4294901760, %v14488_v60 }
 0xaf4   : > { %v6649_v12 = vsub.f32 %v14488_v60, %v6648_v34 }
 0xaf6   : > { %7077 = vrot.lane.b32.xlu0 %v14174_v36, %s12164_s29  ;;  %v6650_v42 = vand.u32 4294901760, %v6649_v12 }
 0xb5d   : > { %v6482_v61 = vpop.xlane.xlu0 %6481 }
 0xb5e   : > { %12125 = vrcp.f32 %v6482_v61  ;;  %v7129_v61 = vld [vmem:[%s16454_s5 + $0x50] sm:$0xff] }
 0xb61   : > { %v6485_v27 = vpop.xlane.xlu0 %6484 }
 0xb62   : > { %12127 = vrcp.f32 %v6485_v27  ;;  %v14628_v27 = vand.u32 4294901760, %v7129_v61 }
 0xb65   : > { %v6488_v44 = vpop.xlane.xlu1 %6487  ;;  %v6500_v45 = vpop.permute.xlu0 %6499 }
 0xb66   : > { %12129 = vrcp.f32 %v6488_v44  ;;  %v6512_v28 = vsel %vm502_vm0, %v6500_v45, 0  ;;  %v7127_v44 = vld [vmem:[%s16454_s5 + $0x40] sm:$0xff]  ;;  %v14637_v45 = vsub.f32 %v7134_v17, %v14609_v16  ;;  %v7121_v17 = vld [vmem:[%s16454_s5 + $0x10] sm:$0xff] }
 0xb67   : > { %v14491_v19 = vand.u32 4294901760, %v6512_v28 }
 0xb69   : > { %v14495_v36 = vsub.f32 %v6512_v28, %v14491_v19  ;;  %v6496_v38 = vpop.permute.xlu1 %6495  ;;  %11728 = vmatpush3.msra.mxu0 %v14491_v19 }
 0xb6a   : > { %v14498_v8 = vand.u32 4294901760, %v6496_v38  ;;  %11729 = vmatprep.subr.mxu0 %v16802_v26 }
 0xb6b   : > { %v12126_v22 = vpop.eup %12125  ;;  %v6641_v3 = vand.u32 4294901760, %v14495_v36  ;;  %11730 = vmatpush3.msra.mxu0 %v14485_v43 }
 0xb6c   : > { %v6492_v23 = vmul.f32 %v12126_v22, %v12120_v41  ;;  %v14504_v31 = vsub.f32 %v6496_v38, %v14498_v8  ;;  %11731 = vmatprep.subr.mxu0 %v16802_v26  ;;  %v7132_v41 = vld [vmem:[%s16454_s5 + $0x68] sm:$0xff]  ;;  %v14658_v22 = vand.u32 4294901760, %v7127_v44 }
 0xb6d   : > { %v6642_v10 = vsub.f32 %v14495_v36, %v6641_v3  ;;  %11732 = vmatpush3.msra.mxu0 %v14498_v8  ;;  %v14613_v35 = vand.u32 4294901760, %v7132_v41 }
 0xb6e   : > { %v6504_v25 = vsel %vm2880_vm3, %v6492_v23, 0  ;;  %v6655_v5 = vand.u32 4294901760, %v14504_v31  ;;  %11757 = vmatprep.subr.mxu0 %v16802_v26 }
 0xb6f   : > { %v12128_v6 = vpop.eup %12127  ;;  %v14517_v33 = vand.u32 4294901760, %v6504_v25  ;;  %v6643_v46 = vand.u32 4294901760, %v6642_v10 }
 0xb70   : > { %v6656_v62 = vsub.f32 %v14504_v31, %v6655_v5  ;;  %v6493_v48 = vmul.f32 %v12128_v6, %v12122_v58  ;;  %v14611_v58 = vand.u32 4294901760, %v7133_v0 }
 0xb71   : > { %v6583_v50 = vsub.f32 %v6504_v25, %v14517_v33  ;;  %11743 = vmatpush3.msra.mxu1 %v6643_v46 }
 0xb72   : > { %v6657_v29 = vand.u32 4294901760, %v6656_v62  ;;  %11744 = vmatprep.subr.mxu1 %v16802_v26  ;;  %v6507_v7 = vsel %vm2880_vm3, %v6493_v48, 0  ;;  %v14640_v28 = vsub.f32 %v7133_v0, %v14611_v58  ;;  %v14683_v62 = vsub.f32 %v7127_v44, %v14658_v22  ;;  %v7126_v48 = vld [vmem:[%s16454_s5 + $0x38] sm:$0xff] }
 0xb73   : > { %v12130_v32 = vpop.eup %12129  ;;  %11745 = vmatpush3.msra.mxu1 %v6650_v42  ;;  %v6584_v39 = vand.u32 4294901760, %v6583_v50  ;;  %v14525_v57 = vand.u32 4294901760, %v6507_v7  ;;  %v7125_v42 = vld [vmem:[%s16454_s5 + $0x30] sm:$0xff] }
 0xb74   : > { %11746 = vmatprep.subr.mxu1 %v16802_v26  ;;  %v6494_v54 = vmul.f32 %v12130_v32, %v12124_v63  ;;  %v7131_v63 = vld [vmem:[%s16454_s5 + $0x60] sm:$0xff]  ;;  %v16557_v23 = vand.u32 4294901760, %v14640_v28 }
 0xb75   : > { %11747 = vmatpush3.msra.mxu1 %v6657_v29  ;;  %v6585_v11 = vsub.f32 %v6583_v50, %v6584_v39  ;;  %v6593_v15 = vsub.f32 %v6507_v7, %v14525_v57  ;;  %v14624_v51 = vand.u32 4294901760, %v7131_v63 }
 0xb76   : > { %11749 = vmatmul.mubr.f32.vlgmr.msra.gmra.mxu1 %v14517_v33  ;;  %11772 = vmatprep.subr.mxu1 %v16802_v26  ;;  %v6510_v4 = vsel %vm2880_vm3, %v6494_v54, 0  ;;  %v7264_v6 = vsub.f32 %v14640_v28, %v16557_v23  ;;  %v7123_v54 = vld [vmem:[%s16454_s5 + $0x20] sm:$0xff] }
 0xb77   : > { %11773 = vmatpush3.msra.mxu1 %v14491_v19  ;;  %v6586_v18 = vand.u32 4294901760, %v6585_v11  ;;  %11751 = vmatprep.mubr.msk.f32.mxu1 %vm12161_vm1, %v16802_v26  ;;  %v6594_v24 = vand.u32 4294901760, %v6593_v15  ;;  %v6602_v2 = vand.u32 4294901760, %v6510_v4 }
 0xb78   : > { %11774 = vmatprep.subr.mxu1 %v16802_v26  ;;  %v7265_v7 = vand.u32 4294901760, %v7264_v6 }
 0xb79   : > { %11734 = vmatmul.mubr.f32.vlgmr.msra.gmra.mxu0 %v6586_v18  ;;  %11775 = vmatpush3.msra.mxu1 %v14485_v43  ;;  %v6595_v59 = vsub.f32 %v6593_v15, %v6594_v24  ;;  %v6603_v55 = vsub.f32 %v6510_v4, %v6602_v2  ;;  %v14709_v4 = vand.u32 4294901760, %v7125_v42 }
 0xb7a   : > { %11758 = vmatpush3.msra.mxu0 %v14495_v36  ;;  %11752 = vmatmul.mubr.f32.gmra.mxu1 %v14525_v57  ;;  %v14649_v36 = vsub.f32 %v7131_v63, %v14624_v51 }
 0xb7b   : > { %11759 = vmatprep.subr.mxu0 %v16802_v26  ;;  %11776 = vmatprep.subr.mxu1 %v16802_v26  ;;  %v6596_v56 = vand.u32 4294901760, %v6595_v59  ;;  %v6604_v30 = vand.u32 4294901760, %v6603_v55  ;;  %v7122_v59 = vld [vmem:[%s16454_s5 + $0x18] sm:$0xff] }
 0xb7c   : > { %11760 = vmatpush3.msra.mxu0 %v14488_v60  ;;  %11777 = vmatpush3.msra.mxu1 %v14498_v8  ;;  %v7128_v60 = vld [vmem:[%s16454_s5 + $0x48] sm:$0xff]  ;;  %v16555_v12 = vand.u32 4294901760, %v14649_v36 }
 0xb7d   : > { %11736 = vmatprep.mubr.msk.f32.mxu0 %vm12161_vm1, %v16802_v26  ;;  %11761 = vmatprep.subr.mxu0 %v16802_v26  ;;  %v6605_v37 = vsub.f32 %v6603_v55, %v6604_v30 }
 0xb7e   : > { %11737 = vmatmul.mubr.f32.gmra.mxu0 %v6596_v56  ;;  %11754 = vmatprep.mubr.msk.f32.mxu1 %vm12161_vm1, %v16802_v26  ;;  %v7278_v32 = vsub.f32 %v14649_v36, %v16555_v12 }
 0xb7f   : > { %11762 = vmatpush3.msra.mxu0 %v14504_v31  ;;  %11755 = vmatmul.mubr.f32.gmra.mxu1 %v6602_v2  ;;  %v6606_v9 = vand.u32 4294901760, %v6605_v37  ;;  %v14729_v37 = vand.u32 4294901760, %v7123_v54 }
 0xb80   : > { %11739 = vmatprep.mubr.msk.f32.mxu0 %vm12161_vm1, %v16802_v26  ;;  %11778 = vmatprep.mubr.msk.f32.mxu1 %vm12161_vm1, %v16802_v26 }
 0xb81   : > { %11802 = vmatprep.subr.mxu1 %v16802_v26  ;;  %11787 = vmatprep.subr.mxu0 %v16802_v26  ;;  %v14757_v6 = vsub.f32 %v7123_v54, %v14729_v37 }
 0xb82   : > { %11740 = vmatmul.mubr.f32.gmra.mxu0 %v6606_v9 }
 0xb83   : > { %11779 = vmatmul.mubr.f32.vlgmr.msra.gmra.mxu1 %v6584_v39  ;;  %11763 = vmatprep.mubr.msk.f32.mxu0 %vm12161_vm1, %v16802_v26  ;;  %v16547_v54 = vand.u32 4294901760, %v14757_v6 }
 0xb84   : > { %11803 = vmatpush3.msra.mxu1 %v14491_v19  ;;  %11781 = vmatprep.mubr.msk.f32.mxu1 %vm12161_vm1, %v16802_v26  ;;  %v14643_v19 = vsub.f32 %v7132_v41, %v14613_v35 }
 0xb85   : > { %11804 = vmatprep.subr.mxu1 %v16802_v26 }
 0xb86   : > { %11805 = vmatpush3.msra.mxu1 %v14485_v43  ;;  %11764 = vmatmul.mubr.f32.vlgmr.msra.gmra.mxu0 %v6583_v50  ;;  %v14626_v43 = vand.u32 4294901760, %v7130_v20  ;;  %v16556_v31 = vand.u32 4294901760, %v14643_v19  ;;  %v7124_v50 = vld [vmem:[%s16454_s5 + $0x28] sm:$0xff] }
 0xb87   : > { %11788 = vmatpush3.msra.mxu0 %v6641_v3  ;;  %11806 = vmatprep.subr.mxu1 %v16802_v26  ;;  %v16558_v3 = vand.u32 4294901760, %v14637_v45  ;;  %v14711_v18 = vand.u32 4294901760, %v7124_v50 }
 0xb88   : > { %11782 = vmatmul.mubr.f32.gmra.mxu1 %v6594_v24  ;;  %11789 = vmatprep.subr.mxu0 %v16802_v26  ;;  %v14652_v38 = vsub.f32 %v7130_v20, %v14626_v43  ;;  %v14744_v20 = vand.u32 4294901760, %v7122_v59 }
 0xb89   : > { %11807 = vmatpush3.msra.mxu1 %v14498_v8  ;;  %11790 = vmatpush3.msra.mxu0 %v6648_v34  ;;  %v14646_v34 = vand.u32 4294901760, %v7128_v60  ;;  %v14656_v8 = vsub.f32 %v7129_v61, %v14628_v27  ;;  %v14742_v63 = vsub.f32 %v7124_v50, %v14711_v18 }
 0xb8a   : > { %11766 = vmatprep.mubr.msk.f32.mxu0 %vm12161_vm1, %v16802_v26  ;;  %11791 = vmatprep.subr.mxu0 %v16802_v26  ;;  %v16554_v10 = vand.u32 4294901760, %v14652_v38 }
 0xb8b   : > { %11767 = vmatmul.mubr.f32.gmra.mxu0 %v6593_v15  ;;  %11784 = vmatprep.mubr.msk.f32.mxu1 %vm12161_vm1, %v16802_v26  ;;  %v14668_v25 = vsub.f32 %v7128_v60, %v14646_v34  ;;  %v16553_v46 = vand.u32 4294901760, %v14656_v8  ;;  %v14707_v15 = vand.u32 4294901760, %v7126_v48  ;;  %v7120_v60 = vld [vmem:[%s16454_s5 + $0x8] sm:$0xff]  ;;  %v16548_v50 = vand.u32 4294901760, %v14742_v63 }
 0xb8c   : > { %11792 = vmatpush3.msra.mxu0 %v6655_v5  ;;  %11785 = vmatmul.mubr.f32.gmra.mxu1 %v6604_v30  ;;  %v7257_v5 = vsub.f32 %v14637_v45, %v16558_v3  ;;  %v7285_v39 = vsub.f32 %v14652_v38, %v16554_v10  ;;  %v14727_v30 = vsub.f32 %v7125_v42, %v14709_v4 }
 0xb8d   : > { %11769 = vmatprep.mubr.msk.f32.mxu0 %vm12161_vm1, %v16802_v26  ;;  %11808 = vmatprep.mubr.msk.f32.mxu1 %vm12161_vm1, %v16802_v26  ;;  %v7292_v24 = vsub.f32 %v14656_v8, %v16553_v46  ;;  %v14723_v56 = vsub.f32 %v7126_v48, %v14707_v15 }
 0xb8e   : > { %11858 = vmatprep.subr.mxu1 %v16802_v26  ;;  %11817 = vmatprep.subr.mxu0 %v16802_v26  ;;  %v7258_v29 = vand.u32 4294901760, %v7257_v5  ;;  %v7286_v0 = vand.u32 4294901760, %v7285_v39  ;;  %v16549_v5 = vand.u32 4294901760, %v14727_v30 }
 0xb8f   : > { %11770 = vmatmul.mubr.f32.gmra.mxu0 %v6603_v55  ;;  %v7279_v55 = vand.u32 4294901760, %v7278_v32  ;;  %v16550_v41 = vand.u32 4294901760, %v14723_v56  ;;  %v7293_v61 = vand.u32 4294901760, %v7292_v24 }
 0xb90   : > { %11809 = vmatmul.mubr.f32.vlgmr.msra.gmra.mxu1 %v14517_v33  ;;  %11793 = vmatprep.mubr.msk.f32.mxu0 %vm12161_vm1, %v16802_v26  ;;  %v7320_v39 = vsub.f32 %v14727_v30, %v16549_v5 }
 0xb91   : > { %11811 = vmatprep.mubr.msk.f32.mxu1 %vm12161_vm1, %v16802_v26  ;;  %11859 = vmatpush3.msra.mxu1 %v7258_v29  ;;  %v7313_v42 = vsub.f32 %v14723_v56, %v16550_v41  ;;  %v14769_v29 = vsub.f32 %v7122_v59, %v14744_v20  ;;  %v7327_v59 = vsub.f32 %v14742_v63, %v16548_v50 }
 0xb92   : > { %11860 = vmatprep.subr.mxu1 %v16802_v26 }
 0xb93   : > { %11794 = vmatmul.mubr.f32.vlgmr.msra.gmra.mxu0 %v14517_v33  ;;  %v7271_v33 = vsub.f32 %v14643_v19, %v16556_v31  ;;  %11861 = vmatpush3.msra.mxu1 %v7265_v7  ;;  %16871 = vst [vmem:[#allocation3_spill] sm:$0xff] %v14769_v29  ;;  %v14771_v7 = vand.u32 4294901760, %v7120_v60  ;;  %v7314_v24 = vand.u32 4294901760, %v7313_v42 }
 0xb94   : > { %11812 = vmatmul.mubr.f32.gmra.mxu1 %v14525_v57  ;;  %11796 = vmatprep.mubr.msk.f32.mxu0 %vm12161_vm1, %v16802_v26 }
 0xb95   : > { %11814 = vmatprep.mubr.msk.f32.mxu1 %vm12161_vm1, %v16802_v26  ;;  %11818 = vmatpush3.msra.mxu0 %v14609_v16  ;;  %v7272_v11 = vand.u32 4294901760, %v7271_v33  ;;  %v14759_v33 = vand.u32 4294901760, %v7121_v17 }
 0xb96   : > { %11819 = vmatprep.subr.mxu0 %v16802_v26  ;;  %11862 = vmatprep.subr.mxu1 %v16802_v26 }
 0xb97   : > { %11797 = vmatmul.mubr.f32.gmra.mxu0 %v14525_v57  ;;  %v16552_v57 = vand.u32 4294901760, %v14668_v25  ;;  %11863 = vmatpush3.msra.mxu1 %v7272_v11  ;;  %v14781_v11 = vsub.f32 %v7121_v17, %v14759_v33  ;;  %v7321_v17 = vand.u32 4294901760, %v7320_v39 }
 0xb98   : > { %11815 = vmatmul.mubr.f32.gmra.mxu1 %v6602_v2  ;;  %11799 = vmatprep.mubr.msk.f32.mxu0 %vm12161_vm1, %v16802_v26 }
 0xb99   : > { %11890 = vmatprep.mubr.msk.f32.mxu1 %vm12161_vm1, %v16802_v26  ;;  %11820 = vmatpush3.msra.mxu0 %v14611_v58  ;;  %v7299_v9 = vsub.f32 %v14668_v25, %v16552_v57  ;;  %16872 = vst [vmem:[#allocation4_spill] sm:$0xff] %v14781_v11 }
 0xb9a   : > { %11821 = vmatprep.subr.mxu0 %v16802_v26  ;;  %11864 = vmatprep.subr.mxu1 %v16802_v26 }
 0xb9b   : > { %11800 = vmatmul.mubr.f32.gmra.mxu0 %v6602_v2  ;;  %v16551_v2 = vand.u32 4294901760, %v14683_v62  ;;  %11865 = vmatpush3.msra.mxu1 %v7279_v55  ;;  %v7300_v48 = vand.u32 4294901760, %v7299_v9  ;;  %v16546_v55 = vand.u32 4294901760, %v14769_v29  ;;  %v14791_v9 = vsub.f32 %v7120_v60, %v14771_v7 }
 0xb9c   : > { %11849 = vmatprep.mubr.msk.f32.mxu0 %vm12161_vm1, %v16802_v26  ;;  %11822 = vmatpush3.msra.mxu0 %v14613_v35  ;;  %v7328_v60 = vand.u32 4294901760, %v7327_v59 }
 0xb9d   : > { %11823 = vmatprep.subr.mxu0 %v16802_v26  ;;  %v7306_v44 = vsub.f32 %v14683_v62, %v16551_v2  ;;  %11866 = vmatprep.subr.mxu1 %v16802_v26  ;;  %16873 = vst [vmem:[#allocation5_spill] sm:$0xff] %v14791_v9 }
 0xb9e   : > { %11824 = vmatpush3.msra.mxu0 %v14624_v51  ;;  %11867 = vmatpush3.msra.mxu1 %v7286_v0  ;;  %v7334_v0 = vsub.f32 %v14757_v6, %v16547_v54 }
 0xb9f   : > { %11825 = vmatprep.subr.mxu0 %v16802_v26  ;;  %11868 = vmatprep.subr.mxu1 %v16802_v26  ;;  %v7307_v32 = vand.u32 4294901760, %v7306_v44  ;;  %v7341_v44 = vsub.f32 %v14769_v29, %v16546_v55 }
 0xba0   : > { %11826 = vmatpush3.msra.mxu0 %v14626_v43  ;;  %11869 = vmatpush3.msra.mxu1 %v7293_v61  ;;  %v16545_v61 = vand.u32 4294901760, %v14781_v11  ;;  %v7335_v42 = vand.u32 4294901760, %v7334_v0 }
 0xba1   : > { %11827 = vmatprep.subr.mxu0 %v16802_v26  ;;  %11870 = vmatprep.subr.mxu1 %v16802_v26  ;;  %v7342_v39 = vand.u32 4294901760, %v7341_v44 }
 0xba2   : > { %11828 = vmatpush3.msra.mxu0 %v14628_v27  ;;  %11871 = vmatpush3.msra.mxu1 %v7300_v48  ;;  %v16544_v48 = vand.u32 4294901760, %v14791_v9 }
 0xba3   : > { %11829 = vmatprep.subr.mxu0 %v16802_v26  ;;  %11872 = vmatprep.subr.mxu1 %v16802_v26 }
 0xba4   : > { %11830 = vmatpush3.msra.mxu0 %v14646_v34  ;;  %11873 = vmatpush3.msra.mxu1 %v7307_v32  ;;  %v7348_v32 = vsub.f32 %v14781_v11, %v16545_v61 }
 0xba5   : > { %11831 = vmatprep.subr.mxu0 %v16802_v26  ;;  %11874 = vmatprep.subr.mxu1 %v16802_v26 }
 0xba6   : > { %11832 = vmatpush3.msra.mxu0 %v14658_v22  ;;  %11875 = vmatpush3.msra.mxu1 %v7314_v24  ;;  %v7355_v24 = vsub.f32 %v14791_v9, %v16544_v48  ;;  %v7349_v59 = vand.u32 4294901760, %v7348_v32 }
 0xba7   : > { %11833 = vmatprep.subr.mxu0 %v16802_v26  ;;  %11876 = vmatprep.subr.mxu1 %v16802_v26 }
 0xba8   : > { %11834 = vmatpush3.msra.mxu0 %v14707_v15  ;;  %11877 = vmatpush3.msra.mxu1 %v7321_v17  ;;  %v7356_v17 = vand.u32 4294901760, %v7355_v24 }
 0xba9   : > { %11835 = vmatprep.subr.mxu0 %v16802_v26  ;;  %11878 = vmatprep.subr.mxu1 %v16802_v26 }
 0xbaa   : > { %11836 = vmatpush3.msra.mxu0 %v14709_v4  ;;  %11879 = vmatpush3.msra.mxu1 %v7328_v60 }
 0xbab   : > { %11837 = vmatprep.subr.mxu0 %v16802_v26  ;;  %11880 = vmatprep.subr.mxu1 %v16802_v26 }
 0xbac   : > { %11838 = vmatpush3.msra.mxu0 %v14711_v18  ;;  %11881 = vmatpush3.msra.mxu1 %v7335_v42 }
 0xbad   : > { %11839 = vmatprep.subr.mxu0 %v16802_v26  ;;  %11882 = vmatprep.subr.mxu1 %v16802_v26 }
 0xbae   : > { %11840 = vmatpush3.msra.mxu0 %v14729_v37  ;;  %11883 = vmatpush3.msra.mxu1 %v7342_v39 }
 0xbaf   : > { %11841 = vmatprep.subr.mxu0 %v16802_v26  ;;  %11884 = vmatprep.subr.mxu1 %v16802_v26 }
 0xbb0   : > { %11842 = vmatpush3.msra.mxu0 %v14744_v20  ;;  %11885 = vmatpush3.msra.mxu1 %v7349_v59 }
 0xbb1   : > { %11843 = vmatprep.subr.mxu0 %v16802_v26  ;;  %11886 = vmatprep.subr.mxu1 %v16802_v26 }
 0xbb2   : > { %11844 = vmatpush3.msra.mxu0 %v14759_v33  ;;  %11887 = vmatpush3.msra.mxu1 %v7356_v17  ;;  %v7119_v17 = vld [vmem:[%s16454_s5] sm:$0xff] }
 0xbb3   : > { %11845 = vmatprep.subr.mxu0 %v16802_v26  ;;  %11888 = vmatprep.subr.mxu1 %v16802_v26  ;;  %v14828_v5 = vand.u32 4294901760, %v7119_v17 }
 0xbb4   : > { %11846 = vmatpush3.msra.mxu0 %v14771_v7 }
 0xbb5   : > { %11847 = vmatprep.subr.mxu0 %v16802_v26 }
 0xbb6   : > { %11848 = vmatpush3.msra.mxu0 %v14828_v5 }
 0xbb7   : > { %11899 = vmatprep.subr.mxu0 %v16802_v26 }
 0xc36   : > { %v6694_v0 = vpop.f32.mrf.mxu1 }
 0xc38   : > { %v11750_v60 = vpop.f32.mrf.mxu1 }
 0xc39   : > { %v6588_v44 = vpop.f32.mrf.mxu0 }
 0xc3a   : > { %v6700_v40 = vpop.f32.mrf.mxu1 }
 0xc3b   : > { %v11735_v21 = vpop.f32.mrf.mxu0 }
 0xc3c   : > { %v11753_v48 = vpop.f32.mrf.mxu1  ;;  %v14831_v21 = vsub.f32 %v7119_v17, %v14828_v5 }
 0xc3e   : > { %v6598_v42 = vpop.f32.mrf.mxu0 }
 0xc3f   : > { %v6706_v32 = vpop.f32.mrf.mxu1  ;;  %v6701_v12 = vadd.f32 %v6700_v40, %v6598_v42 }
 0xc40   : > { %v11738_v61 = vpop.f32.mrf.mxu0 }
 0xc41   : > { %v11756_v55 = vpop.f32.mrf.mxu1 }
 0xc42   : > { %v6608_v39 = vpop.f32.mrf.mxu0 }
 0xc43   : > { %v6874_v24 = vpop.f32.mrf.mxu1  ;;  %v6707_v11 = vadd.f32 %v6706_v32, %v6608_v39 }
 0xc44   : > { %v11741_v54 = vpop.f32.mrf.mxu0 }
 0xc45   : > { %v11780_v50 = vpop.f32.mrf.mxu1  ;;  %v6695_v54 = vadd.f32 %v6694_v0, %v6588_v44 }
 0xc46   : > { %v6784_v59 = vpop.f32.mrf.mxu0  ;;  %v16567_v50 = vand.u32 4294901760, %v14831_v21 }
 0xc47   : > { %v6785_v46 = vadd.f32 %v6784_v59, %v6695_v54 }
 0xc48   : > { %v6882_v60 = vpop.f32.mrf.mxu1  ;;  %v11765_v41 = vpop.f32.mrf.mxu0  ;;  %v7362_v57 = vsub.f32 %v14831_v21, %v16567_v50 }
 0xc49   : > { %v6875_v13 = vadd.f32 %v6874_v24, %v6785_v46 }
 0xc4a   : > { %v11783_v61 = vpop.f32.mrf.mxu1  ;;  %v7363_v17 = vand.u32 4294901760, %v7362_v57 }
 0xc4b   : > { %v6791_v55 = vpop.f32.mrf.mxu0 }
 0xc4c   : > { %v6890_v48 = vpop.f32.mrf.mxu1  ;;  %11889 = vmatpush3.msra.mxu1 %v7363_v17  ;;  %v6792_v61 = vadd.f32 %v6791_v55, %v6701_v12 }
 0xc4d   : > { %v11768_v2 = vpop.f32.mrf.mxu0  ;;  %11940 = vmatprep.subr.mxu1 %v16802_v26 }
 0xc4e   : > { %v11786_v41 = vpop.f32.mrf.mxu1  ;;  %v6883_v59 = vadd.f32 %v6882_v60, %v6792_v61 }
 0xc4f   : > { %v6798_v10 = vpop.f32.mrf.mxu0 }
 0xc50   : > { %v7056_v31 = vpop.f32.mrf.mxu1  ;;  %v6799_v41 = vadd.f32 %v6798_v10, %v6707_v11  ;;  %v7076_v11 = vpop.permute.xlu1 %7075 }
 0xc51   : > { %v11771_v23 = vpop.f32.mrf.mxu0 }
 0xc52   : > { %v11810_v3 = vpop.f32.mrf.mxu1  ;;  %v6891_v42 = vadd.f32 %v6890_v48, %v6799_v41 }
 0xc53   : > { %v6970_v0 = vpop.f32.mrf.mxu0 }
 0xc54   : > { %v6971_v44 = vadd.f32 %v6970_v0, %v6875_v13  ;;  %v7062_v2 = vpop.f32.mrf.mxu1 }
 0xc55   : > { %v11795_v9 = vpop.f32.mrf.mxu0 }
 0xc56   : > { %v7057_v29 = vadd.f32 %v7056_v31, %v6971_v44  ;;  %v11813_v50 = vpop.f32.mrf.mxu1  ;;  %v7108_v9 = vsel %vm2300_vm2, %v13883_v52, %v7076_v11  ;;  %v16876_v11 = vld [vmem:[#allocation5_spill] sm:$0xff] }
 0xc57   : > { %v6976_v54 = vpop.f32.mrf.mxu0 }
 0xc58   : > { %v6977_v57 = vadd.f32 %v6976_v54, %v6883_v59  ;;  %v7068_v40 = vpop.f32.mrf.mxu1  ;;  %7099 = vrot.lane.b32.xlu1 %v7057_v29, %s12162_s27  ;;  %v7088_v29 = vpop.permute.xlu0 %7087 }
 0xc59   : > { %v11798_v23 = vpop.f32.mrf.mxu0  ;;  %v7112_v32 = vsel %vm7111_vm5, %v7108_v9, %v7088_v29  ;;  %v16875_v29 = vld [vmem:[#allocation4_spill] sm:$0xff] }
 0xc5a   : > { %v7063_v12 = vadd.f32 %v7062_v2, %v6977_v57  ;;  %v11816_v3 = vpop.f32.mrf.mxu1 }
 0xc5b   : > { %v6982_v46 = vpop.f32.mrf.mxu0 }
 0xc5c   : > { %7089 = vrot.lane.b32.xlu1 %v14463_v49, %s12163_s28  ;;  %7101 = vrot.lane.b32.xlu0 %v7063_v12, %s12162_s27  ;;  %v6983_v31 = vadd.f32 %v6982_v46, %v6891_v42  ;;  %v7078_v49 = vpop.permute.xlu0 %7077 }
 0xc5d   : > { %v11801_v13 = vpop.f32.mrf.mxu0 }
 0xc5e   : > { %v7069_v10 = vadd.f32 %v7068_v40, %v6983_v31 }
 0xc60   : > { %7079 = vrot.lane.b32.xlu1 %v14176_v14, %s12164_s29  ;;  %7091 = vrot.lane.b32.xlu0 %v14465_v1, %s12163_s28  ;;  %v7109_v1 = vsel %vm2300_vm2, %v13885_v47, %v7078_v49 }
 0xc64   : > { %7103 = vrot.lane.b32.xlu1 %v7069_v10, %s12162_s27  ;;  %v16874_v10 = vld [vmem:[#allocation3_spill] sm:$0xff]  ;;  %s494_s27 = scalar_lea.vmem %s16464_s15, %s12063_s20 }
 0xcca   : > { %v7100_v39 = vpop.permute.xlu1 %7099 }
 0xccb   : > { %v7116_v24 = vsel %vm7115_vm6, %v7112_v32, %v7100_v39 }
 0xccc   : > { %v14853_v14 = vand.u32 4294901760, %v7116_v24 }
 0xcce   : > { %v14858_v60 = vsub.f32 %v7116_v24, %v14853_v14  ;;  %11891 = vmatmul.mubr.f32.vlgmr.msra.gmra.mxu1 %v14853_v14  ;;  %v7090_v55 = vpop.permute.xlu1 %7089  ;;  %v7102_v52 = vpop.permute.xlu0 %7101 }
 0xccf   : > { %11941 = vmatpush3.msra.mxu1 %v14609_v16  ;;  %v7113_v50 = vsel %vm7111_vm5, %v7109_v1, %v7090_v55  ;;  %11893 = vmatprep.mubr.msk.f32.mxu1 %vm12161_vm1, %v16802_v26 }
 0xcd0   : > { %v7225_v48 = vand.u32 4294901760, %v14858_v60  ;;  %v7117_v17 = vsel %vm7115_vm6, %v7113_v50, %v7102_v52  ;;  %11942 = vmatprep.subr.mxu1 %v16802_v26 }
 0xcd1   : > { %v14868_v47 = vand.u32 4294901760, %v7117_v17  ;;  %11943 = vmatpush3.msra.mxu1 %v14611_v58 }
 0xcd2   : > { %v7226_v61 = vsub.f32 %v14858_v60, %v7225_v48  ;;  %11944 = vmatprep.subr.mxu1 %v16802_v26  ;;  %v7080_v0 = vpop.permute.xlu1 %7079  ;;  %v7092_v59 = vpop.permute.xlu0 %7091 }
 0xcd3   : > { %v14876_v44 = vsub.f32 %v7117_v17, %v14868_v47  ;;  %11945 = vmatpush3.msra.mxu1 %v14613_v35  ;;  %v7110_v2 = vsel %vm2300_vm2, %v13887_v53, %v7080_v0 }
 0xcd4   : > { %v7227_v54 = vand.u32 4294901760, %v7226_v61  ;;  %11894 = vmatmul.mubr.f32.gmra.mxu1 %v14868_v47  ;;  %11946 = vmatprep.subr.mxu1 %v16802_v26  ;;  %v7114_v57 = vsel %vm7111_vm5, %v7110_v2, %v7092_v59 }
 0xcd5   : > { %v7235_v41 = vand.u32 4294901760, %v14876_v44  ;;  %11947 = vmatpush3.msra.mxu1 %v14624_v51  ;;  %11896 = vmatprep.mubr.msk.f32.mxu1 %vm12161_vm1, %v16802_v26 }
 0xcd6   : > { %11948 = vmatprep.subr.mxu1 %v16802_v26  ;;  %11850 = vmatmul.mubr.f32.vlgmr.msra.gmra.mxu0 %v7227_v54  ;;  %v7104_v40 = vpop.permute.xlu1 %7103 }
 0xcd7   : > { %v7236_v53 = vsub.f32 %v14876_v44, %v7235_v41  ;;  %11900 = vmatpush3.msra.mxu0 %v14637_v45  ;;  %11949 = vmatpush3.msra.mxu1 %v14626_v43  ;;  %v7118_v23 = vsel %vm7115_vm6, %v7114_v57, %v7104_v40 }
 0xcd8   : > { %v14895_v12 = vand.u32 4294901760, %v7118_v23  ;;  %11901 = vmatprep.subr.mxu0 %v16802_v26  ;;  %11950 = vmatprep.subr.mxu1 %v16802_v26 }
 0xcd9   : > { %11902 = vmatpush3.msra.mxu0 %v14640_v28  ;;  %11951 = vmatpush3.msra.mxu1 %v14628_v27  ;;  %v7237_v3 = vand.u32 4294901760, %v7236_v53 }
 0xcda   : > { %v14902_v46 = vsub.f32 %v7118_v23, %v14895_v12  ;;  %11903 = vmatprep.subr.mxu0 %v16802_v26  ;;  %11952 = vmatprep.subr.mxu1 %v16802_v26 }
 0xcdb   : > { %11852 = vmatprep.mubr.msk.f32.mxu0 %vm12161_vm1, %v16802_v26  ;;  %11897 = vmatmul.mubr.f32.gmra.mxu1 %v14895_v12 }
 0xcdc   : > { %v7245_v42 = vand.u32 4294901760, %v14902_v46  ;;  %11904 = vmatpush3.msra.mxu0 %v14643_v19  ;;  %11953 = vmatpush3.msra.mxu1 %v14646_v34 }
 0xcdd   : > { %11853 = vmatmul.mubr.f32.gmra.mxu0 %v7237_v3  ;;  %11905 = vmatprep.subr.mxu0 %v16802_v26 }
 0xcde   : > { %v7246_v13 = vsub.f32 %v14902_v46, %v7245_v42  ;;  %11954 = vmatprep.subr.mxu1 %v16802_v26  ;;  %11906 = vmatpush3.msra.mxu0 %v14649_v36 }
 0xcdf   : > { %11955 = vmatpush3.msra.mxu1 %v14658_v22  ;;  %11907 = vmatprep.subr.mxu0 %v16802_v26 }
 0xce0   : > { %11956 = vmatprep.subr.mxu1 %v16802_v26  ;;  %11908 = vmatpush3.msra.mxu0 %v14652_v38  ;;  %v7247_v31 = vand.u32 4294901760, %v7246_v13 }
 0xce1   : > { %11957 = vmatpush3.msra.mxu1 %v14707_v15  ;;  %11909 = vmatprep.subr.mxu0 %v16802_v26 }
 0xce2   : > { %11958 = vmatprep.subr.mxu1 %v16802_v26  ;;  %11910 = vmatpush3.msra.mxu0 %v14656_v8 }
 0xce3   : > { %11959 = vmatpush3.msra.mxu1 %v14709_v4  ;;  %11855 = vmatprep.mubr.msk.f32.mxu0 %vm12161_vm1, %v16802_v26 }
 0xce4   : > { %11911 = vmatprep.subr.mxu0 %v16802_v26  ;;  %11960 = vmatprep.subr.mxu1 %v16802_v26 }
 0xce5   : > { %11856 = vmatmul.mubr.f32.gmra.mxu0 %v7247_v31  ;;  %11961 = vmatpush3.msra.mxu1 %v14711_v18 }
 0xce6   : > { %11912 = vmatpush3.msra.mxu0 %v14668_v25  ;;  %11962 = vmatprep.subr.mxu1 %v16802_v26 }
 0xce7   : > { %11913 = vmatprep.subr.mxu0 %v16802_v26  ;;  %11963 = vmatpush3.msra.mxu1 %v14729_v37 }
 0xce8   : > { %11914 = vmatpush3.msra.mxu0 %v14683_v62  ;;  %11964 = vmatprep.subr.mxu1 %v16802_v26 }
 0xce9   : > { %11915 = vmatprep.subr.mxu0 %v16802_v26  ;;  %11965 = vmatpush3.msra.mxu1 %v14744_v20 }
 0xcea   : > { %11916 = vmatpush3.msra.mxu0 %v14723_v56  ;;  %11966 = vmatprep.subr.mxu1 %v16802_v26 }
 0xceb   : > { %11917 = vmatprep.subr.mxu0 %v16802_v26  ;;  %11967 = vmatpush3.msra.mxu1 %v14759_v33 }
 0xcec   : > { %11918 = vmatpush3.msra.mxu0 %v14727_v30  ;;  %11968 = vmatprep.subr.mxu1 %v16802_v26 }
 0xced   : > { %11919 = vmatprep.subr.mxu0 %v16802_v26  ;;  %11969 = vmatpush3.msra.mxu1 %v14771_v7 }
 0xcee   : > { %11920 = vmatpush3.msra.mxu0 %v14742_v63  ;;  %11970 = vmatprep.subr.mxu1 %v16802_v26 }
 0xcef   : > { %11921 = vmatprep.subr.mxu0 %v16802_v26  ;;  %11971 = vmatpush3.msra.mxu1 %v14828_v5 }
 0xcf0   : > { %11922 = vmatpush3.msra.mxu0 %v14757_v6  ;;  %11972 = vmatprep.mubr.msk.f32.mxu1 %vm12161_vm1, %v16802_v26 }
 0xcf1   : > { %11923 = vmatprep.subr.mxu0 %v16802_v26  ;;  %11973 = vmatmul.mubr.f32.vlgmr.msra.gmra.mxu1 %v7225_v48 }
 0xcf2   : > { %12022 = vmatprep.subr.mxu1 %v16802_v26  ;;  %11924 = vmatpush3.msra.mxu0 %v16874_v10 }
 0xcf3   : > { %12023 = vmatpush3.msra.mxu1 %v14609_v16  ;;  %11925 = vmatprep.subr.mxu0 %v16802_v26  ;;  %v16877_v16 = vand.u32 4294901760, %v14637_v45  ;;  %v16883_v45 = vand.u32 4294901760, %v14668_v25  ;;  %v16891_v25 = vand.u32 4294901760, %v16876_v11 }
 0xcf4   : > { %12024 = vmatprep.subr.mxu1 %v16802_v26  ;;  %11926 = vmatpush3.msra.mxu0 %v16875_v29 }
 0xcf5   : > { %11975 = vmatprep.mubr.msk.f32.mxu1 %vm12161_vm1, %v16802_v26  ;;  %12025 = vmatpush3.msra.mxu1 %v14611_v58  ;;  %v16878_v58 = vand.u32 4294901760, %v14640_v28  ;;  %v16884_v28 = vand.u32 4294901760, %v14683_v62  ;;  %v16892_v62 = vand.u32 4294901760, %v14831_v21 }
 0xcf6   : > { %11927 = vmatprep.subr.mxu0 %v16802_v26  ;;  %11976 = vmatmul.mubr.f32.gmra.mxu1 %v7235_v41 }
 0xcf7   : > { %12026 = vmatprep.subr.mxu1 %v16802_v26  ;;  %11928 = vmatpush3.msra.mxu0 %v16876_v11 }
 0xcf8   : > { %12027 = vmatpush3.msra.mxu1 %v14613_v35  ;;  %11929 = vmatprep.subr.mxu0 %v16802_v26  ;;  %v16879_v35 = vand.u32 4294901760, %v14643_v19  ;;  %v16885_v19 = vand.u32 4294901760, %v14723_v56  ;;  %v10081_v56 = vld [vmem:[%s16455_s6] ss:$0 sm:$0xff] }
 0xcf9   : > { %12028 = vmatprep.subr.mxu1 %v16802_v26  ;;  %11930 = vmatpush3.msra.mxu0 %v14831_v21 }
 0xcfa   : > { %11931 = vmatprep.mubr.msk.f32.mxu0 %vm12161_vm1, %v16802_v26  ;;  %11978 = vmatprep.mubr.msk.f32.mxu1 %vm12161_vm1, %v16802_v26 }
 0xcfb   : > { %12029 = vmatpush3.msra.mxu1 %v14624_v51  ;;  %11932 = vmatmul.mubr.f32.vlgmr.msra.gmra.mxu0 %v14858_v60  ;;  %v16880_v51 = vand.u32 4294901760, %v14649_v36  ;;  %v16887_v36 = vand.u32 4294901760, %v14742_v63 }
 0xcfc   : > { %11979 = vmatmul.mubr.f32.gmra.mxu1 %v7245_v42  ;;  %11981 = vmatprep.subr.mxu0 %v16802_v26  ;;  %v10082_v42 = vld [vmem:[%s16456_s7] ss:$0 sm:$0xff] }
 0xcfd   : > { %12030 = vmatprep.subr.mxu1 %v16802_v26  ;;  %11982 = vmatpush3.msra.mxu0 %v16877_v16 }
 0xcfe   : > { %12031 = vmatpush3.msra.mxu1 %v14626_v43  ;;  %11983 = vmatprep.subr.mxu0 %v16802_v26  ;;  %v16881_v43 = vand.u32 4294901760, %v14652_v38  ;;  %v16888_v38 = vand.u32 4294901760, %v14757_v6 }
 0xcff   : > { %12032 = vmatprep.subr.mxu1 %v16802_v26  ;;  %11934 = vmatprep.mubr.msk.f32.mxu0 %vm12161_vm1, %v16802_v26 }
 0xd00   : > { %11984 = vmatpush3.msra.mxu0 %v16878_v58  ;;  %12033 = vmatpush3.msra.mxu1 %v14628_v27  ;;  %v16882_v27 = vand.u32 4294901760, %v14656_v8  ;;  %v16889_v8 = vand.u32 4294901760, %v16874_v10 }
 0xd01   : > { %11935 = vmatmul.mubr.f32.gmra.mxu0 %v14876_v44  ;;  %11985 = vmatprep.subr.mxu0 %v16802_v26 }
 0xd02   : > { %12034 = vmatprep.subr.mxu1 %v16802_v26  ;;  %11986 = vmatpush3.msra.mxu0 %v16879_v35 }
 0xd03   : > { %12035 = vmatpush3.msra.mxu1 %v14646_v34  ;;  %11987 = vmatprep.subr.mxu0 %v16802_v26  ;;  %v16886_v34 = vand.u32 4294901760, %v14727_v30 }
 0xd04   : > { %12036 = vmatprep.subr.mxu1 %v16802_v26  ;;  %11937 = vmatprep.mubr.msk.f32.mxu0 %vm12161_vm1, %v16802_v26 }
 0xd05   : > { %11988 = vmatpush3.msra.mxu0 %v16880_v51  ;;  %12037 = vmatpush3.msra.mxu1 %v14658_v22  ;;  %v16890_v22 = vand.u32 4294901760, %v16875_v29 }
 0xd06   : > { %11938 = vmatmul.mubr.f32.gmra.mxu0 %v14902_v46  ;;  %11989 = vmatprep.subr.mxu0 %v16802_v26 }
 0xd07   : > { %12038 = vmatprep.subr.mxu1 %v16802_v26  ;;  %11990 = vmatpush3.msra.mxu0 %v16881_v43 }
 0xd08   : > { %12039 = vmatpush3.msra.mxu1 %v14707_v15  ;;  %11991 = vmatprep.subr.mxu0 %v16802_v26 }
 0xd09   : > { %12040 = vmatprep.subr.mxu1 %v16802_v26  ;;  %11992 = vmatpush3.msra.mxu0 %v16882_v27 }
 0xd0a   : > { %12041 = vmatpush3.msra.mxu1 %v14709_v4  ;;  %11993 = vmatprep.subr.mxu0 %v16802_v26 }
 0xd0b   : > { %12042 = vmatprep.subr.mxu1 %v16802_v26  ;;  %11994 = vmatpush3.msra.mxu0 %v16883_v45  ;;  %v12149_v45 = vld [vmem:[%s12261_s23] sm:$0xff] }
 0xd0c   : > { %12043 = vmatpush3.msra.mxu1 %v14711_v18  ;;  %11995 = vmatprep.subr.mxu0 %v16802_v26 }
 0xd0d   : > { %12044 = vmatprep.subr.mxu1 %v16802_v26  ;;  %11996 = vmatpush3.msra.mxu0 %v16884_v28 }
 0xd0e   : > { %12045 = vmatpush3.msra.mxu1 %v14729_v37  ;;  %11997 = vmatprep.subr.mxu0 %v16802_v26 }
 0xd0f   : > { %12046 = vmatprep.subr.mxu1 %v16802_v26  ;;  %11998 = vmatpush3.msra.mxu0 %v16885_v19 }
 0xd10   : > { %12047 = vmatpush3.msra.mxu1 %v14744_v20  ;;  %11999 = vmatprep.subr.mxu0 %v16802_v26 }
 0xd11   : > { %12048 = vmatprep.subr.mxu1 %v16802_v26  ;;  %12000 = vmatpush3.msra.mxu0 %v16886_v34 }
 0xd12   : > { %12049 = vmatpush3.msra.mxu1 %v14759_v33  ;;  %12001 = vmatprep.subr.mxu0 %v16802_v26 }
 0xd13   : > { %12050 = vmatprep.subr.mxu1 %v16802_v26  ;;  %12002 = vmatpush3.msra.mxu0 %v16887_v36 }
 0xd14   : > { %12051 = vmatpush3.msra.mxu1 %v14771_v7  ;;  %12003 = vmatprep.subr.mxu0 %v16802_v26 }
 0xd15   : > { %12052 = vmatprep.subr.mxu1 %v16802_v26  ;;  %12004 = vmatpush3.msra.mxu0 %v16888_v38 }
 0xd16   : > { %12053 = vmatpush3.msra.mxu1 %v14828_v5  ;;  %12054 = vmatprep.mubr.msk.f32.mxu1 %vm12161_vm1, %v16802_v26 }
 0xd17   : > { %12005 = vmatprep.subr.mxu0 %v16802_v26  ;;  %12055 = vmatmul.mubr.f32.vlgmr.msra.gmra.mxu1 %v14853_v14 }
 0xd18   : > { %12006 = vmatpush3.msra.mxu0 %v16889_v8  ;;  %12057 = vmatprep.mubr.msk.f32.mxu1 %vm12161_vm1, %v16802_v26 }
 0xd19   : > { %12007 = vmatprep.subr.mxu0 %v16802_v26  ;;  %12013 = vmatprep.mubr.msk.f32.mxu0 %vm12161_vm1, %v16802_v26 }
 0xd1a   : > { %12008 = vmatpush3.msra.mxu0 %v16890_v22  ;;  %v12150_v22 = vld [vmem:[%s12261_s23 + $0x8] sm:$0xff] }
 0xd1b   : > { %12009 = vmatprep.subr.mxu0 %v16802_v26  ;;  %12058 = vmatmul.mubr.f32.gmra.mxu1 %v14868_v47 }
 0xd1c   : > { %12010 = vmatpush3.msra.mxu0 %v16891_v25  ;;  %12060 = vmatprep.mubr.msk.f32.mxu1 %vm12161_vm1, %v16802_v26 }
 0xd1d   : > { %12011 = vmatprep.subr.mxu0 %v16802_v26 }
 0xd1e   : > { %12012 = vmatpush3.msra.mxu0 %v16892_v62 }
 0xd1f   : > { %12014 = vmatmul.mubr.f32.vlgmr.msra.gmra.mxu0 %v14853_v14  ;;  %12061 = vmatmul.mubr.f32.gmra.mxu1 %v14895_v12 }
 0xd20   : > { %12016 = vmatprep.mubr.msk.f32.mxu0 %vm12161_vm1, %v16802_v26  ;;  %8335 = vmatprep.mubr.f32.mxu1 %v16802_v26 }
 0xd23   : > { %12017 = vmatmul.mubr.f32.gmra.mxu0 %v14868_v47 }
 0xd24   : > { %12019 = vmatprep.mubr.msk.f32.mxu0 %vm12161_vm1, %v16802_v26 }
 0xd27   : > { %12020 = vmatmul.mubr.f32.gmra.mxu0 %v14895_v12 }
 0xd28   : > { %8077 = vmatprep.mubr.f32.mxu0 %v16802_v26 }
 0xd8e   : > { %v7400_v15 = vpop.f32.mrf.mxu1 }
 0xd90   : > { %v11892_v4 = vpop.f32.mrf.mxu1 }
 0xd94   : > { %v7406_v18 = vpop.f32.mrf.mxu1 }
 0xd96   : > { %v11895_v30 = vpop.f32.mrf.mxu1  ;;  %v7229_v37 = vpop.f32.mrf.mxu0 }
 0xd97   : > { %v7230_v63 = vadd.f32 %v10081_v56, %v7229_v37  ;;  %v7967_v30 = vld [vmem:[%s16459_s10 + $0xf0] sm:$0xff]  ;;  %v7966_v37 = vld [vmem:[%s16459_s10 + $0xe8] sm:$0xff] }
 0xd98   : > { %v11851_v20 = vpop.f32.mrf.mxu0 }
 0xd99   : > { %v7401_v5 = vadd.f32 %v7400_v15, %v7230_v63  ;;  %v12151_v15 = vld [vmem:[%s12261_s23 + $0x10] sm:$0x1]  ;;  %v15112_v20 = vand.u32 4294901760, %v7967_v30 }
 0xd9b   : > { %v7412_v6 = vpop.f32.mrf.mxu1 }
 0xd9d   : > { %v7239_v33 = vpop.f32.mrf.mxu0  ;;  %v11898_v7 = vpop.f32.mrf.mxu1 }
 0xd9e   : > { %v7240_v0 = vadd.f32 %v10081_v56, %v7239_v33  ;;  %v7964_v33 = vld [vmem:[%s16459_s10 + $0xd8] sm:$0xff]  ;;  %v7963_v7 = vld [vmem:[%s16459_s10 + $0xd0] sm:$0xff] }
 0xd9f   : > { %v11854_v21 = vpop.f32.mrf.mxu0 }
 0xda0   : > { %v7407_v41 = vadd.f32 %v7406_v18, %v7240_v0 }
 0xda5   : > { %v7249_v9 = vpop.f32.mrf.mxu0 }
 0xda6   : > { %v7250_v54 = vadd.f32 %v10081_v56, %v7249_v9  ;;  %v7968_v56 = vld [vmem:[%s16459_s10 + $0xf8] sm:$0xff]  ;;  %v15127_v9 = vand.u32 4294901760, %v7964_v33 }
 0xda7   : > { %v11857_v49 = vpop.f32.mrf.mxu0  ;;  %v15110_v63 = vand.u32 4294901760, %v7968_v56 }
 0xda8   : > { %v7413_v3 = vadd.f32 %v7412_v6, %v7250_v54  ;;  %v7965_v6 = vld [vmem:[%s16459_s10 + $0xe0] sm:$0xff]  ;;  %v15129_v49 = vand.u32 4294901760, %v7963_v7 }
 0xda9   : > { %v15125_v21 = vand.u32 4294901760, %v7965_v6  ;;  %7982 = vmatprep.subr.mxu0 %v15110_v63 }
 0xdaa   : > { %7984 = vmatpush1.msra.mxu0 %v15112_v20 }
 0xdb1   : > { %v7619_v32 = vpop.f32.mrf.mxu1 }
 0xdb3   : > { %v11974_v39 = vpop.f32.mrf.mxu1 }
 0xdb4   : > { %v15135_v39 = vsub.f32 %v7968_v56, %v15110_v63 }
 0xdb6   : > { %v7627_v24 = vpop.f32.mrf.mxu1  ;;  %16896 = vst [vmem:[#allocation9_spill] sm:$0xff] %v15135_v39 }
 0xdb8   : > { %v11977_v14 = vpop.f32.mrf.mxu1 }
 0xdbb   : > { %v7516_v1 = vpop.f32.mrf.mxu0 }
 0xdbc   : > { %v7635_v60 = vpop.f32.mrf.mxu1  ;;  %v7517_v2 = vadd.f32 %v7516_v1, %v7401_v5  ;;  %v15114_v5 = vand.u32 4294901760, %v7966_v37 }
 0xdbd   : > { %v11933_v55 = vpop.f32.mrf.mxu0 }
 0xdbe   : > { %v11980_v52 = vpop.f32.mrf.mxu1  ;;  %v7620_v53 = vadd.f32 %v7619_v32, %v7517_v2  ;;  %v7962_v32 = vld [vmem:[%s16459_s10 + $0xc8] sm:$0xff]  ;;  %v15141_v14 = vsub.f32 %v7966_v37, %v15114_v5  ;;  %v15150_v55 = vsub.f32 %v7964_v33, %v15127_v9  ;;  %7986 = vmatprep.subr.mxu0 %v15114_v5  ;;  %v7957_v37 = vld [vmem:[%s16459_s10 + $0xa0] sm:$0xff] }
 0xdbf   : > { %v15143_v1 = vand.u32 4294901760, %v7962_v32  ;;  %v15153_v52 = vsub.f32 %v7963_v7, %v15129_v49  ;;  %7988 = vmatpush1.msra.mxu0 %v15125_v21  ;;  %v15237_v7 = vand.u32 4294901760, %v7957_v37 }
 0xdc0   : > { %v16577_v0 = vand.u32 4294901760, %v15150_v55  ;;  %7990 = vmatprep.subr.mxu0 %v15127_v9 }
 0xdc1   : > { %v7523_v50 = vpop.f32.mrf.mxu0  ;;  %7992 = vmatpush1.msra.mxu0 %v15129_v49 }
 0xdc2   : > { %v7524_v40 = vadd.f32 %v7523_v50, %v7407_v41  ;;  %v16584_v50 = vand.u32 4294901760, %v15135_v39  ;;  %7994 = vmatprep.subr.mxu0 %v15143_v1 }
 0xdc3   : > { %v11936_v48 = vpop.f32.mrf.mxu0 }
 0xdc4   : > { %v7628_v11 = vadd.f32 %v7627_v24, %v7524_v40  ;;  %v15138_v24 = vsub.f32 %v7967_v30, %v15112_v20  ;;  %v8114_v2 = vsub.f32 %v15135_v39, %v16584_v50  ;;  %v8138_v40 = vsub.f32 %v15150_v55, %v16577_v0 }
 0xdc6   : > { %v7530_v17 = vpop.f32.mrf.mxu0  ;;  %v16583_v48 = vand.u32 4294901760, %v15138_v24 }
 0xdc7   : > { %v7531_v10 = vadd.f32 %v7530_v17, %v7413_v3  ;;  %v16581_v17 = vand.u32 4294901760, %v15141_v14 }
 0xdc8   : > { %v11939_v47 = vpop.f32.mrf.mxu0 }
 0xdc9   : > { %v7636_v27 = vadd.f32 %v7635_v60, %v7531_v10  ;;  %v15147_v60 = vsub.f32 %v7965_v6, %v15125_v21  ;;  %v15160_v47 = vsub.f32 %v7962_v32, %v15143_v1  ;;  %v8126_v54 = vsub.f32 %v15141_v14, %v16581_v17  ;;  %v7956_v32 = vld [vmem:[%s16459_s10 + $0x98] sm:$0xff] }
 0xdcb   : > { %v16575_v41 = vand.u32 4294901760, %v15160_v47  ;;  %v8127_v3 = vand.u32 4294901760, %v8126_v54 }
 0xdd7   : > { %v7853_v61 = vpop.f32.mrf.mxu1 }
 0xdd9   : > { %v12056_v44 = vpop.f32.mrf.mxu1 }
 0xdda   : > { %v16576_v44 = vand.u32 4294901760, %v15153_v52 }
 0xddb   : > { %v7859_v59 = vpop.f32.mrf.mxu1 }
 0xddd   : > { %v12059_v57 = vpop.f32.mrf.mxu1 }
 0xddf   : > { %v7754_v23 = vpop.f32.mrf.mxu0  ;;  %v7865_v12 = vpop.f32.mrf.mxu1 }
 0xde0   : > { %v7755_v46 = vadd.f32 %v7754_v23, %v7620_v53  ;;  %v8144_v53 = vsub.f32 %v15153_v52, %v16576_v44  ;;  %v8115_v23 = vand.u32 4294901760, %v8114_v2 }
 0xde1   : > { %v12015_v13 = vpop.f32.mrf.mxu0  ;;  %v12062_v31 = vpop.f32.mrf.mxu1 }
 0xde2   : > { %v7854_v29 = vadd.f32 %v7853_v61, %v7755_v46  ;;  %v16579_v61 = vand.u32 4294901760, %v15147_v60  ;;  %v8150_v46 = vsub.f32 %v15160_v47, %v16575_v41  ;;  %8116 = vmatprep.subr.mxu1 %v8115_v23  ;;  %v8139_v13 = vand.u32 4294901760, %v8138_v40  ;;  %v7955_v40 = vld [vmem:[%s16459_s10 + $0x90] sm:$0xff] }
 0xde3   : > { %v7760_v16 = vpop.f32.mrf.mxu0  ;;  %v8145_v31 = vand.u32 4294901760, %v8144_v53 }
 0xde4   : > { %v7876_v58 = vmul.f32 %v10082_v42, %v7854_v29  ;;  %v7761_v35 = vadd.f32 %v7760_v16, %v7628_v11  ;;  %v8132_v57 = vsub.f32 %v15147_v60, %v16579_v61  ;;  %v8151_v10 = vand.u32 4294901760, %v8150_v46 }
 0xde5   : > { %v12018_v51 = vpop.f32.mrf.mxu0 }
 0xde6   : > { %v7860_v43 = vadd.f32 %v7859_v59, %v7761_v35  ;;  %v15089_v28 = vadd.f32 %v12149_v45, %v7876_v58  ;;  %v8120_v59 = vsub.f32 %v15138_v24, %v16583_v48  ;;  %v7944_v48 = vld [vmem:[%s16459_s10 + $0x38] sm:$0xff] }
 0xde7   : > { %v7766_v19 = vpop.f32.mrf.mxu0 }
 0xde8   : > { %16893 = vst [vmem:[#allocation16_spill] sm:$0xff] %v15089_v28  ;;  %v7877_v34 = vmul.f32 %v10082_v42, %v7860_v43  ;;  %v7767_v36 = vadd.f32 %v7766_v19, %v7636_v27  ;;  %7882 = vadd.xlane.f32.xlu0 %v15089_v28  ;;  %v7961_v43 = vld [vmem:[%s16459_s10 + $0xc0] sm:$0xff]  ;;  %v7960_v19 = vld [vmem:[%s16459_s10 + $0xb8] sm:$0xff] }
 0xde9   : > { %v12021_v38 = vpop.f32.mrf.mxu0  ;;  %v15203_v45 = vand.u32 4294901760, %v7961_v43 }
 0xdea   : > { %v7866_v8 = vadd.f32 %v7865_v12, %v7767_v36  ;;  %v15093_v25 = vadd.f32 %v12150_v22, %v7877_v34  ;;  %v8121_v12 = vand.u32 4294901760, %v8120_v59  ;;  %v15208_v34 = vand.u32 4294901760, %v7960_v19  ;;  %v7959_v36 = vld [vmem:[%s16459_s10 + $0xb0] sm:$0xff] }
 0xdeb   : > { %v15216_v22 = vsub.f32 %v7961_v43, %v15203_v45  ;;  %7996 = vmatpush1.msra.mxu0 %v15203_v45  ;;  %v7952_v43 = vld [vmem:[%s16459_s10 + $0x78] sm:$0xff] }
 0xdec   : > { %16894 = vst [vmem:[#allocation7_spill] sm:$0xff] %v15093_v25  ;;  %v7878_v62 = vmul.f32 %v10082_v42, %v7866_v8  ;;  %7884 = vadd.xlane.f32.xlu1 %v15093_v25  ;;  %v8133_v42 = vand.u32 4294901760, %v8132_v57  ;;  %8122 = vmatpush1.msra.mxu1 %v8121_v12  ;;  %v15225_v56 = vsub.f32 %v7960_v19, %v15208_v34  ;;  %v15250_v57 = vand.u32 4294901760, %v7956_v32 }
 0xded   : > { %8128 = vmatprep.subr.mxu1 %v8127_v3  ;;  %7998 = vmatprep.subr.mxu0 %v15208_v34  ;;  %v16574_v6 = vand.u32 4294901760, %v15216_v22  ;;  %v15261_v12 = vsub.f32 %v7957_v37, %v15237_v7  ;;  %v15263_v3 = vand.u32 4294901760, %v7955_v40 }
 0xdee   : > { %v15097_v4 = vadd.f32 %v12151_v15, %v7878_v62  ;;  %8134 = vmatpush1.msra.mxu1 %v8133_v42  ;;  %v15218_v62 = vand.u32 4294901760, %v7959_v36  ;;  %v7958_v15 = vld [vmem:[%s16459_s10 + $0xa8] sm:$0xff]  ;;  %v16573_v59 = vand.u32 4294901760, %v15225_v56 }
 0xdef   : > { %8140 = vmatprep.subr.mxu1 %v8139_v13  ;;  %v15227_v30 = vand.u32 4294901760, %v7958_v15  ;;  %v8156_v53 = vsub.f32 %v15216_v22, %v16574_v6 }
 0xdf0   : > { %16895 = vst [vmem:[#allocation8_spill] sm:$0xff] %v15097_v4  ;;  %v7886_v18 = vsel %vm502_vm0, %v15097_v4, 0.0  ;;  %8146 = vmatpush1.msra.mxu1 %v8145_v31  ;;  %v15235_v33 = vsub.f32 %v7959_v36, %v15218_v62  ;;  %8000 = vmatpush1.msra.mxu0 %v15218_v62  ;;  %v8162_v42 = vsub.f32 %v15225_v56, %v16573_v59 }
 0xdf1   : > { %7887 = vadd.xlane.f32.xlu0 %v7886_v18  ;;  %8152 = vmatprep.subr.mxu1 %v8151_v10  ;;  %v15248_v54 = vsub.f32 %v7958_v15, %v15227_v30  ;;  %v15273_v31 = vsub.f32 %v7956_v32, %v15250_v57  ;;  %v7954_v10 = vld [vmem:[%s16459_s10 + $0x88] sm:$0xff]  ;;  %v7951_v15 = vld [vmem:[%s16459_s10 + $0x70] sm:$0xff] }
 0xdf2   : > { %8002 = vmatprep.subr.mxu0 %v15227_v30  ;;  %v16571_v23 = vand.u32 4294901760, %v15235_v33  ;;  %v8163_v36 = vand.u32 4294901760, %v8162_v42 }
 0xdf3   : > { %8004 = vmatpush1.msra.mxu0 %v15237_v7  ;;  %v16569_v13 = vand.u32 4294901760, %v15248_v54 }
 0xdf4   : > { %8006 = vmatprep.subr.mxu0 %v15250_v57 }
 0xdf5   : > { %8008 = vmatpush1.msra.mxu0 %v15263_v3 }
 0xe71   : > { %v7883_v29 = vpop.xlane.xlu0 %7882 }
 0xe72   : > { %v7889_v11 = vmul.f32 0.0078125, %v7883_v29  ;;  %v8157_v29 = vand.u32 4294901760, %v8156_v53  ;;  %v7950_v53 = vld [vmem:[%s16459_s10 + $0x68] sm:$0xff] }
 0xe74   : > { %v15193_v16 = vsub.f32 %v15089_v28, %v7889_v11  ;;  %v8168_v11 = vsub.f32 %v15235_v33, %v16571_v23  ;;  %8158 = vmatpush1.msra.mxu1 %v8157_v29 }
 0xe75   : > { %v7885_v58 = vpop.xlane.xlu1 %7884  ;;  %8164 = vmatprep.subr.mxu1 %v8163_v36 }
 0xe76   : > { %v7890_v35 = vmul.f32 0.0078125, %v7885_v58  ;;  %v7895_v51 = vmul.f32 %v15193_v16, %v15193_v16  ;;  %v16568_v58 = vand.u32 4294901760, %v15261_v12 }
 0xe78   : > { %v15201_v27 = vsub.f32 %v15093_v25, %v7890_v35  ;;  %7898 = vadd.xlane.f32.xlu0 %v7895_v51  ;;  %v15284_v35 = vsub.f32 %v7955_v40, %v15263_v3  ;;  %v7953_v51 = vld [vmem:[%s16459_s10 + $0x80] sm:$0xff]  ;;  %v8180_v37 = vsub.f32 %v15261_v12, %v16568_v58  ;;  %v15305_v40 = vand.u32 4294901760, %v7954_v10 }
 0xe79   : > { %v15313_v29 = vand.u32 4294901760, %v7953_v51 }
 0xe7a   : > { %v7888_v38 = vpop.xlane.xlu0 %7887  ;;  %v7896_v8 = vmul.f32 %v15201_v27, %v15201_v27  ;;  %v16572_v32 = vand.u32 4294901760, %v15284_v35  ;;  %v8181_v58 = vand.u32 4294901760, %v8180_v37  ;;  %v15324_v36 = vsub.f32 %v7954_v10, %v15305_v40  ;;  %8010 = vmatprep.subr.mxu0 %v15305_v40  ;;  %v7947_v10 = vld [vmem:[%s16459_s10 + $0x50] sm:$0xff] }
 0xe7b   : > { %v7891_v18 = vmul.f32 0.0078125, %v7888_v38  ;;  %v8174_v38 = vsub.f32 %v15248_v54, %v16569_v13  ;;  %8012 = vmatpush1.msra.mxu0 %v15313_v29 }
 0xe7c   : > { %7900 = vadd.xlane.f32.xlu0 %v7896_v8  ;;  %v16570_v8 = vand.u32 4294901760, %v15273_v31  ;;  %v8192_v13 = vsub.f32 %v15284_v35, %v16572_v32  ;;  %16897 = vst [vmem:[#allocation12_spill] sm:$0xff] %v15324_v36  ;;  %v15338_v32 = vand.u32 4294901760, %v7950_v53  ;;  %v16578_v6 = vand.u32 4294901760, %v15324_v36 }
 0xe7d   : > { %v15244_v2 = vsub.f32 %v15097_v4, %v7891_v18  ;;  %v8169_v18 = vand.u32 4294901760, %v8168_v11  ;;  %v15315_v11 = vand.u32 4294901760, %v7952_v43 }
 0xe7e   : > { %v8186_v42 = vsub.f32 %v15273_v31, %v16570_v8  ;;  %v7948_v8 = vld [vmem:[%s16459_s10 + $0x58] sm:$0xff]  ;;  %v8193_v59 = vand.u32 4294901760, %v8192_v13  ;;  %v15354_v41 = vsub.f32 %v7950_v53, %v15338_v32  ;;  %v8198_v13 = vsub.f32 %v15324_v36, %v16578_v6 }
 0xe7f   : > { %v7897_v46 = vmul.f32 %v15244_v2, %v15244_v2  ;;  %8170 = vmatpush1.msra.mxu1 %v8169_v18  ;;  %v15333_v18 = vsub.f32 %v7953_v51, %v15313_v29  ;;  %v15336_v37 = vsub.f32 %v7952_v43, %v15315_v11  ;;  %8014 = vmatprep.subr.mxu0 %v15315_v11  ;;  %v15356_v44 = vand.u32 4294901760, %v7948_v8 }
 0xe80   : > { %v8187_v23 = vand.u32 4294901760, %v8186_v42  ;;  %16901 = vst [vmem:[#allocation20_spill] sm:$0xff] %v15354_v41  ;;  %v16589_v0 = vand.u32 4294901760, %v15354_v41  ;;  %v8199_v61 = vand.u32 4294901760, %v8198_v13 }
 0xe81   : > { %v7902_v19 = vsel %vm502_vm0, %v7897_v46, 0.0  ;;  %v8175_v46 = vand.u32 4294901760, %v8174_v38  ;;  %v15326_v38 = vand.u32 4294901760, %v7951_v15  ;;  %16898 = vst [vmem:[#allocation14_spill] sm:$0xff] %v15333_v18  ;;  %16899 = vst [vmem:[#allocation15_spill] sm:$0xff] %v15336_v37  ;;  %v16580_v43 = vand.u32 4294901760, %v15333_v18 }
 0xe82   : > { %7903 = vadd.xlane.f32.xlu1 %v7902_v19  ;;  %v7949_v19 = vld [vmem:[%s16459_s10 + $0x60] sm:$0xff]  ;;  %v16582_v42 = vand.u32 4294901760, %v15336_v37  ;;  %v15377_v6 = vsub.f32 %v7948_v8, %v15356_v44 }
 0xe83   : > { %8176 = vmatprep.subr.mxu1 %v8175_v46  ;;  %v15346_v46 = vsub.f32 %v7951_v15, %v15326_v38  ;;  %v15348_v51 = vand.u32 4294901760, %v7949_v19  ;;  %8016 = vmatpush1.msra.mxu0 %v15326_v38  ;;  %v15366_v15 = vand.u32 4294901760, %v7947_v10  ;;  %v8204_v53 = vsub.f32 %v15333_v18, %v16580_v43  ;;  %v7945_v8 = vld [vmem:[%s16459_s10 + $0x40] sm:$0xff] }
 0xe84   : > { %8182 = vmatpush1.msra.mxu1 %v8181_v58  ;;  %8018 = vmatprep.subr.mxu0 %v15338_v32  ;;  %16903 = vst [vmem:[#allocation11_spill] sm:$0xff] %v15377_v6 }
 0xe85   : > { %16900 = vst [vmem:[#allocation18_spill] sm:$0xff] %v15346_v46  ;;  %8188 = vmatprep.subr.mxu1 %v8187_v23  ;;  %v16585_v58 = vand.u32 4294901760, %v15346_v46  ;;  %v15364_v23 = vsub.f32 %v7949_v19, %v15348_v51  ;;  %v7946_v19 = vld [vmem:[%s16459_s10 + $0x48] sm:$0xff]  ;;  %8020 = vmatpush1.msra.mxu0 %v15348_v51  ;;  %v8205_v13 = vand.u32 4294901760, %v8204_v53 }
 0xe86   : > { %8194 = vmatpush1.msra.mxu1 %v8193_v59  ;;  %v8210_v59 = vsub.f32 %v15336_v37, %v16582_v42  ;;  %v15388_v42 = vsub.f32 %v7947_v10, %v15366_v15  ;;  %8022 = vmatprep.subr.mxu0 %v15356_v44  ;;  %v7943_v10 = vld [vmem:[%s16459_s10 + $0x30] sm:$0xff] }
 0xe87   : > { %16902 = vst [vmem:[#allocation2_spill] sm:$0xff] %v15364_v23  ;;  %v8216_v43 = vsub.f32 %v15346_v46, %v16585_v58  ;;  %v8222_v58 = vsub.f32 %v15354_v41, %v16589_v0  ;;  %8024 = vmatpush1.msra.mxu0 %v15366_v15  ;;  %8200 = vmatprep.subr.mxu1 %v8199_v61  ;;  %v16905_v25 = vand.u32 4294901760, %v15364_v23  ;;  %v7942_v0 = vld [vmem:[%s16459_s10 + $0x28] sm:$0xff]  ;;  %v16906_v41 = vand.u32 4294901760, %v15377_v6 }
 0xe88   : > { %16904 = vst [vmem:[#allocation13_spill] sm:$0xff] %v15388_v42  ;;  %v8211_v50 = vand.u32 4294901760, %v8210_v59  ;;  %v15409_v59 = vand.u32 4294901760, %v7946_v19  ;;  %8206 = vmatpush1.msra.mxu1 %v8205_v13  ;;  %v15417_v61 = vand.u32 4294901760, %v7945_v8  ;;  %v15430_v13 = vand.u32 4294901760, %v7943_v10 }
 0xe89   : > { %v8217_v4 = vand.u32 4294901760, %v8216_v43  ;;  %v8228_v28 = vsub.f32 %v15364_v23, %v16905_v25  ;;  %v8223_v17 = vand.u32 4294901760, %v8222_v58  ;;  %v8234_v46 = vsub.f32 %v15377_v6, %v16906_v41  ;;  %v7941_v25 = vld [vmem:[%s16459_s10 + $0x20] sm:$0xff]  ;;  %v7940_v41 = vld [vmem:[%s16459_s10 + $0x18] sm:$0xff] }
 0xe8a   : > { %16907 = vst [vmem:[#allocation6_spill] sm:$0xff] %v15417_v61  ;;  %v15419_v43 = vand.u32 4294901760, %v7944_v48  ;;  %8212 = vmatprep.subr.mxu1 %v8211_v50  ;;  %v16908_v23 = vand.u32 4294901760, %v15388_v42  ;;  %v15428_v58 = vsub.f32 %v7946_v19, %v15409_v59  ;;  %16910 = vst [vmem:[#allocation19_spill] sm:$0xff] %v15430_v13  ;;  %8026 = vmatprep.subr.mxu0 %v15409_v59  ;;  %v7939_v19 = vld [vmem:[%s16459_s10 + $0x10] sm:$0xff] }
 0xe8b   : > { %v8229_v53 = vand.u32 4294901760, %v8228_v28  ;;  %8218 = vmatpush1.msra.mxu1 %v8217_v4  ;;  %v8235_v6 = vand.u32 4294901760, %v8234_v46  ;;  %v15437_v50 = vsub.f32 %v7945_v8, %v15417_v61  ;;  %8028 = vmatpush1.msra.mxu0 %v15417_v61  ;;  %v15450_v4 = vsub.f32 %v7943_v10, %v15430_v13 }
 0xe8c   : > { %v8240_v37 = vsub.f32 %v15388_v42, %v16908_v23  ;;  %16909 = vst [vmem:[#allocation17_spill] sm:$0xff] %v15428_v58  ;;  %v15440_v28 = vsub.f32 %v7944_v48, %v15419_v43  ;;  %v15442_v23 = vand.u32 4294901760, %v7942_v0  ;;  %8224 = vmatprep.subr.mxu1 %v8223_v17  ;;  %v16608_v18 = vand.u32 4294901760, %v15428_v58  ;;  %8030 = vmatprep.subr.mxu0 %v15419_v43 }
 0xe8d   : > { %16911 = vst [vmem:[#allocation21_spill] sm:$0xff] %v15437_v50  ;;  %16914 = vst [vmem:[#allocation24_spill] sm:$0xff] %v15450_v4  ;;  %v15452_v46 = vand.u32 4294901760, %v7941_v25  ;;  %8230 = vmatpush1.msra.mxu1 %v8229_v53  ;;  %v16611_v48 = vand.u32 4294901760, %v15437_v50  ;;  %v15460_v61 = vand.u32 4294901760, %v7940_v41  ;;  %8032 = vmatpush1.msra.mxu0 %v15430_v13  ;;  %v15470_v53 = vand.u32 4294901760, %v7939_v19 }
 0xe8e   : > { %16912 = vst [vmem:[#allocation23_spill] sm:$0xff] %v15440_v28  ;;  %16913 = vst [vmem:[#allocation22_spill] sm:$0xff] %v15442_v23  ;;  %v8241_v42 = vand.u32 4294901760, %v8240_v37  ;;  %v16614_v8 = vand.u32 4294901760, %v15440_v28  ;;  %v15458_v36 = vsub.f32 %v7942_v0, %v15442_v23  ;;  %8236 = vmatprep.subr.mxu1 %v8235_v6  ;;  %v8246_v17 = vsub.f32 %v15428_v58, %v16608_v18 }
 0xe8f   : > { %16915 = vst [vmem:[#allocation25_spill] sm:$0xff] %v15452_v46  ;;  %16917 = vst [vmem:[#allocation3_spill] sm:$0xff] %v15460_v61  ;;  %v15468_v10 = vsub.f32 %v7941_v25, %v15452_v46  ;;  %8034 = vmatprep.subr.mxu0 %v15442_v23  ;;  %v8252_v0 = vsub.f32 %v15437_v50, %v16611_v48  ;;  %v15481_v37 = vsub.f32 %v7940_v41, %v15460_v61  ;;  %v7938_v25 = vld [vmem:[%s16459_s10 + $0x8] sm:$0xff]  ;;  %v7937_v41 = vld [vmem:[%s16459_s10] sm:$0xff] }
 0xe90   : > { %16916 = vst [vmem:[#allocation26_spill] sm:$0xff] %v15458_v36  ;;  %16918 = vst [vmem:[#allocation4_spill] sm:$0xff] %v15470_v53  ;;  %8242 = vmatpush1.msra.mxu1 %v8241_v42  ;;  %v8258_v6 = vsub.f32 %v15440_v28, %v16614_v8  ;;  %8036 = vmatpush1.msra.mxu0 %v15452_v46  ;;  %v8247_v42 = vand.u32 4294901760, %v8246_v17  ;;  %v16919_v58 = vand.u32 4294901760, %v15450_v4  ;;  %v16920_v46 = vand.u32 4294901760, %v15458_v36 }
 0xe91   : > { %v16629_v50 = vand.u32 4294901760, %v15468_v10  ;;  %v15492_v8 = vsub.f32 %v7939_v19, %v15470_v53  ;;  %8038 = vmatprep.subr.mxu0 %v15460_v61  ;;  %v8253_v18 = vand.u32 4294901760, %v8252_v0  ;;  %v16627_v23 = vand.u32 4294901760, %v15481_v37 }
 0xe92   : > { %v8264_v48 = vsub.f32 %v15450_v4, %v16919_v58  ;;  %v8259_v28 = vand.u32 4294901760, %v8258_v6  ;;  %v8270_v17 = vsub.f32 %v15458_v36, %v16920_v46  ;;  %8040 = vmatpush1.msra.mxu0 %v15470_v53  ;;  %8248 = vmatprep.subr.mxu1 %v8247_v42  ;;  %v15507_v13 = vand.u32 4294901760, %v7938_v25 }
 0xe93   : > { %v8276_v19 = vsub.f32 %v15468_v10, %v16629_v50  ;;  %v16628_v4 = vand.u32 4294901760, %v15492_v8  ;;  %8254 = vmatpush1.msra.mxu1 %v8253_v18  ;;  %v8282_v46 = vsub.f32 %v15481_v37, %v16627_v23  ;;  %v15512_v6 = vand.u32 4294901760, %v7937_v41 }
 0xe94   : > { %v8265_v58 = vand.u32 4294901760, %v8264_v48  ;;  %16921 = vst [vmem:[#allocation5_spill] sm:$0xff] %v15507_v13  ;;  %v8271_v0 = vand.u32 4294901760, %v8270_v17  ;;  %8260 = vmatprep.subr.mxu1 %v8259_v28  ;;  %v15518_v42 = vsub.f32 %v7938_v25, %v15507_v13  ;;  %8042 = vmatprep.subr.mxu0 %v15507_v13 }
 0xe95   : > { %v8277_v36 = vand.u32 4294901760, %v8276_v19  ;;  %v8288_v48 = vsub.f32 %v15492_v8, %v16628_v4  ;;  %v8283_v18 = vand.u32 4294901760, %v8282_v46  ;;  %v15522_v17 = vsub.f32 %v7937_v41, %v15512_v6  ;;  %8044 = vmatpush1.msra.mxu0 %v15512_v6 }
 0xe96   : > { %16922 = vst [vmem:[#allocation27_spill] sm:$0xff] %v15518_v42  ;;  %8266 = vmatpush1.msra.mxu1 %v8265_v58  ;;  %v16630_v28 = vand.u32 4294901760, %v15518_v42  ;;  %8359 = vmatprep.subr.mxu0 %v15135_v39 }
 0xe97   : > { %8272 = vmatprep.subr.mxu1 %v8271_v0  ;;  %v8289_v23 = vand.u32 4294901760, %v8288_v48  ;;  %v16634_v19 = vand.u32 4294901760, %v15522_v17 }
 0xe98   : > { %8278 = vmatpush1.msra.mxu1 %v8277_v36  ;;  %v8294_v25 = vsub.f32 %v15518_v42, %v16630_v28 }
 0xe99   : > { %8284 = vmatprep.subr.mxu1 %v8283_v18  ;;  %v8300_v41 = vsub.f32 %v15522_v17, %v16634_v19  ;;  %v16934_v19 = vld [vmem:[#allocation25_spill] sm:$0xff] }
 0xe9a   : > { %8290 = vmatpush1.msra.mxu1 %v8289_v23  ;;  %v8295_v58 = vand.u32 4294901760, %v8294_v25  ;;  %v10083_v25 = vld [vmem:[%s16457_s8] ss:$0 sm:$0xff] }
 0xe9b   : > { %v8301_v0 = vand.u32 4294901760, %v8300_v41 }
 0xe9c   : > { %8296 = vmatprep.subr.mxu1 %v8295_v58  ;;  %v10084_v58 = vld [vmem:[%s16458_s9] ss:$0 sm:$0xff] }
 0xe9d   : > { %8302 = vmatpush1.msra.mxu1 %v8301_v0 }
 0xe9e   : > { %8511 = vmatprep.subr.mxu1 %v15110_v63 }
 0xf01   : > { %v7899_v46 = vpop.xlane.xlu0 %7898 }
 0xf02   : > { %v7905_v36 = vmul.f32 0.0078125, %v7899_v46 }
 0xf04   : > { %v7908_v48 = vadd.f32 1e-06, %v7905_v36 }
 0xf05   : > { %v7901_v4 = vpop.xlane.xlu0 %7900 }
 0xf06   : > { %12131 = vrsqrt.f32 %v7908_v48  ;;  %v7906_v18 = vmul.f32 0.0078125, %v7901_v4 }
 0xf08   : > { %v7909_v50 = vadd.f32 1e-06, %v7906_v18 }
 0xf0a   : > { %12133 = vrsqrt.f32 %v7909_v50 }
 0xf0b   : > { %v7904_v28 = vpop.xlane.xlu1 %7903 }
 0xf0c   : > { %v7907_v23 = vmul.f32 0.0078125, %v7904_v28 }
 0xf0e   : > { %v7910_v39 = vadd.f32 1e-06, %v7907_v23 }
 0xf10   : > { %12135 = vrsqrt.f32 %v7910_v39 }
 0xf13   : > { %v12132_v42 = vpop.eup %12131 }
 0xf14   : > { %v7914_v41 = vmul.f32 %v12132_v42, %v15193_v16 }
 0xf16   : > { %v7924_v0 = vmul.f32 %v10083_v25, %v7914_v41 }
 0xf17   : > { %v12134_v46 = vpop.eup %12133 }
 0xf18   : > { %v7934_v4 = vadd.f32 %v10084_v58, %v7924_v0  ;;  %v7915_v50 = vmul.f32 %v12134_v46, %v15201_v27 }
 0xf1a   : > { %v15543_v36 = vand.u32 4294901760, %v7934_v4  ;;  %v7925_v28 = vmul.f32 %v10083_v25, %v7915_v50 }
 0xf1c   : > { %16923 = vst [vmem:[#allocation28_spill] sm:$0xff] %v15543_v36  ;;  %v15546_v39 = vsub.f32 %v7934_v4, %v15543_v36  ;;  %8337 = vmatmul.mubr.f32.vlgmr.msra.gmra.mxu1 %v15543_v36  ;;  %v7935_v48 = vadd.f32 %v10084_v58, %v7925_v28  ;;  %v16940_v36 = vld [vmem:[#allocation23_spill] sm:$0xff] }
 0xf1d   : > { %v12136_v18 = vpop.eup %12135  ;;  %8513 = vmatpush1.msra.mxu1 %v15112_v20  ;;  %8342 = vmatprep.mubr.f32.mxu1 %v16802_v26 }
 0xf1e   : > { %8515 = vmatprep.subr.mxu1 %v15114_v5  ;;  %v15552_v16 = vand.u32 4294901760, %v7935_v48  ;;  %v16637_v27 = vand.u32 4294901760, %v15546_v39  ;;  %v7916_v42 = vmul.f32 %v12136_v18, %v15244_v2 }
 0xf1f   : > { %8517 = vmatpush1.msra.mxu1 %v15125_v21 }
 0xf20   : > { %16924 = vst [vmem:[#allocation29_spill] sm:$0xff] %v15552_v16  ;;  %8519 = vmatprep.subr.mxu1 %v15127_v9  ;;  %v15559_v23 = vsub.f32 %v7935_v48, %v15552_v16  ;;  %8344 = vmatmul.mubr.f32.gmra.mxu1 %v15552_v16  ;;  %v8081_v41 = vsub.f32 %v15546_v39, %v16637_v27  ;;  %v16937_v27 = vld [vmem:[#allocation13_spill] sm:$0xff] }
 0xf21   : > { %v7926_v0 = vmul.f32 %v10083_v25, %v7916_v42  ;;  %8521 = vmatpush1.msra.mxu1 %v15129_v49  ;;  %8349 = vmatprep.mubr.f32.mxu1 %v16802_v26  ;;  %v16939_v16 = vld [vmem:[#allocation21_spill] sm:$0xff] }
 0xf22   : > { %8523 = vmatprep.subr.mxu1 %v15143_v1  ;;  %v8082_v2 = vand.u32 4294901760, %v8081_v41  ;;  %v16636_v4 = vand.u32 4294901760, %v15559_v23  ;;  %v16926_v41 = vld [vmem:[#allocation12_spill] sm:$0xff] }
 0xf23   : > { %v7936_v46 = vadd.f32 %v10084_v58, %v7926_v0  ;;  %8525 = vmatpush1.msra.mxu1 %v15203_v45  ;;  %v16927_v0 = vld [vmem:[#allocation6_spill] sm:$0xff] }
 0xf24   : > { %8527 = vmatprep.subr.mxu1 %v15208_v34  ;;  %8083 = vmatmul.mubr.f32.vlgmr.msra.gmra.mxu0 %v8082_v2  ;;  %v8092_v25 = vsub.f32 %v15559_v23, %v16636_v4  ;;  %v16928_v2 = vld [vmem:[#allocation14_spill] sm:$0xff]  ;;  %v16936_v4 = vld [vmem:[#allocation11_spill] sm:$0xff] }
 0xf25   : > { %v15571_v50 = vand.u32 4294901760, %v7936_v46  ;;  %8362 = vmatpush1.msra.mxu0 %v15138_v24  ;;  %8529 = vmatpush1.msra.mxu1 %v15218_v62 }
 0xf26   : > { %8365 = vmatprep.subr.mxu0 %v15141_v14  ;;  %8531 = vmatprep.subr.mxu1 %v15227_v30  ;;  %v8093_v28 = vand.u32 4294901760, %v8092_v25  ;;  %v16930_v25 = vld [vmem:[#allocation19_spill] sm:$0xff] }
 0xf27   : > { %16925 = vst [vmem:[#allocation30_spill] sm:$0xff] %v15571_v50  ;;  %v15581_v58 = vsub.f32 %v7936_v46, %v15571_v50  ;;  %8351 = vmatmul.mubr.f32.gmra.mxu1 %v15571_v50  ;;  %8368 = vmatpush1.msra.mxu0 %v15147_v60  ;;  %v16929_v46 = vld [vmem:[#allocation15_spill] sm:$0xff]  ;;  %v16938_v50 = vld [vmem:[#allocation17_spill] sm:$0xff] }
 0xf28   : > { %8533 = vmatpush1.msra.mxu1 %v15237_v7  ;;  %8088 = vmatprep.mubr.f32.mxu0 %v16802_v26 }
 0xf29   : > { %v16635_v48 = vand.u32 4294901760, %v15581_v58  ;;  %8371 = vmatprep.subr.mxu0 %v15150_v55  ;;  %8535 = vmatprep.subr.mxu1 %v15250_v57 }
 0xf2a   : > { %8094 = vmatmul.mubr.f32.gmra.mxu0 %v8093_v28  ;;  %8537 = vmatpush1.msra.mxu1 %v15263_v3  ;;  %v16931_v28 = vld [vmem:[#allocation18_spill] sm:$0xff] }
 0xf2b   : > { %v8103_v18 = vsub.f32 %v15581_v58, %v16635_v48  ;;  %8374 = vmatpush1.msra.mxu0 %v15153_v52  ;;  %8539 = vmatprep.subr.mxu1 %v15305_v40  ;;  %v16935_v48 = vld [vmem:[#allocation2_spill] sm:$0xff] }
 0xf2c   : > { %8377 = vmatprep.subr.mxu0 %v15160_v47  ;;  %8541 = vmatpush1.msra.mxu1 %v15313_v29 }
 0xf2d   : > { %8380 = vmatpush1.msra.mxu0 %v15216_v22  ;;  %8543 = vmatprep.subr.mxu1 %v15315_v11  ;;  %v8104_v42 = vand.u32 4294901760, %v8103_v18  ;;  %v16932_v18 = vld [vmem:[#allocation22_spill] sm:$0xff] }
 0xf2e   : > { %8383 = vmatprep.subr.mxu0 %v15225_v56  ;;  %8545 = vmatpush1.msra.mxu1 %v15326_v38 }
 0xf2f   : > { %8386 = vmatpush1.msra.mxu0 %v15235_v33  ;;  %8099 = vmatprep.mubr.f32.mxu0 %v16802_v26 }
 0xf30   : > { %8389 = vmatprep.subr.mxu0 %v15248_v54  ;;  %8547 = vmatprep.subr.mxu1 %v15338_v32 }
 0xf31   : > { %8105 = vmatmul.mubr.f32.gmra.mxu0 %v8104_v42  ;;  %8549 = vmatpush1.msra.mxu1 %v15348_v51  ;;  %v16933_v42 = vld [vmem:[#allocation20_spill] sm:$0xff] }
 0xf32   : > { %8392 = vmatpush1.msra.mxu0 %v15261_v12  ;;  %8551 = vmatprep.subr.mxu1 %v15356_v44 }
 0xf33   : > { %8395 = vmatprep.subr.mxu0 %v15273_v31  ;;  %8553 = vmatpush1.msra.mxu1 %v15366_v15 }
 0xf34   : > { %8398 = vmatpush1.msra.mxu0 %v15284_v35  ;;  %8555 = vmatprep.subr.mxu1 %v15409_v59 }
 0xf35   : > { %8401 = vmatprep.subr.mxu0 %v16926_v41  ;;  %8557 = vmatpush1.msra.mxu1 %v16927_v0 }
 0xf36   : > { %8404 = vmatpush1.msra.mxu0 %v16928_v2  ;;  %8559 = vmatprep.subr.mxu1 %v15419_v43 }
 0xf37   : > { %8407 = vmatprep.subr.mxu0 %v16929_v46  ;;  %8561 = vmatpush1.msra.mxu1 %v16930_v25 }
 0xf38   : > { %8410 = vmatpush1.msra.mxu0 %v16931_v28  ;;  %8563 = vmatprep.subr.mxu1 %v16932_v18 }
 0xf39   : > { %8413 = vmatprep.subr.mxu0 %v16933_v42  ;;  %8565 = vmatpush1.msra.mxu1 %v16934_v19 }
 0xf3a   : > { %8416 = vmatpush1.msra.mxu0 %v16935_v48  ;;  %8567 = vmatprep.subr.mxu1 %v15460_v61  ;;  %v16941_v61 = vand.u32 4294901760, %v15546_v39 }
 0xf3b   : > { %8419 = vmatprep.subr.mxu0 %v16936_v4  ;;  %8569 = vmatpush1.msra.mxu1 %v15470_v53  ;;  %v16942_v53 = vld [vmem:[#allocation24_spill] sm:$0xff] }
 0xf3c   : > { %8422 = vmatpush1.msra.mxu0 %v16937_v27  ;;  %8571 = vmatprep.subr.mxu1 %v15507_v13  ;;  %v16943_v13 = vld [vmem:[#allocation26_spill] sm:$0xff] }
 0xf3d   : > { %8425 = vmatprep.subr.mxu0 %v16938_v50  ;;  %8573 = vmatpush1.msra.mxu1 %v15512_v6 }
 0xf3e   : > { %8428 = vmatpush1.msra.mxu0 %v16939_v16  ;;  %8606 = vmatprep.mubr.f32.mxu1 %v16802_v26 }
 0xf3f   : > { %8431 = vmatprep.subr.mxu0 %v16940_v36  ;;  %8610 = vmatmul.mubr.f32.vlgmr.msra.gmra.mxu1 %v16941_v61  ;;  %v16944_v61 = vand.u32 4294901760, %v15559_v23 }
 0xf40   : > { %8817 = vmatprep.subr.mxu1 %v15110_v63  ;;  %8434 = vmatpush1.msra.mxu0 %v16942_v53  ;;  %v16945_v63 = vld [vmem:[#allocation27_spill] sm:$0xff] }
 0xf41   : > { %8819 = vmatpush1.msra.mxu1 %v15112_v20  ;;  %8437 = vmatprep.subr.mxu0 %v16943_v13  ;;  %v16946_v20 = vand.u32 4294901760, %v15581_v58 }
 0xf42   : > { %8821 = vmatprep.subr.mxu1 %v15114_v5  ;;  %8440 = vmatpush1.msra.mxu0 %v15468_v10  ;;  %v16947_v5 = vld [vmem:[#allocation9_spill] sm:$0xff] }
 0xf43   : > { %8615 = vmatprep.mubr.f32.mxu1 %v16802_v26  ;;  %8823 = vmatpush1.msra.mxu1 %v15125_v21  ;;  %v16948_v21 = vand.u32 4294901760, %v16947_v5 }
 0xf44   : > { %8443 = vmatprep.subr.mxu0 %v15481_v37  ;;  %8619 = vmatmul.mubr.f32.gmra.mxu1 %v16944_v61 }
 0xf45   : > { %8825 = vmatprep.subr.mxu1 %v15127_v9  ;;  %8446 = vmatpush1.msra.mxu0 %v15492_v8  ;;  %v16949_v9 = vand.u32 4294901760, %v15138_v24  ;;  %v16953_v24 = vand.u32 4294901760, %v15153_v52  ;;  %v16957_v52 = vand.u32 4294901760, %v15235_v33  ;;  %v16964_v33 = vand.u32 4294901760, %v16929_v46 }
 0xf46   : > { %8827 = vmatpush1.msra.mxu1 %v15129_v49  ;;  %8449 = vmatprep.subr.mxu0 %v16945_v63  ;;  %v16950_v49 = vand.u32 4294901760, %v15141_v14  ;;  %v16954_v14 = vand.u32 4294901760, %v15160_v47  ;;  %v16958_v47 = vand.u32 4294901760, %v15248_v54  ;;  %v16967_v54 = vand.u32 4294901760, %v16935_v48 }
 0xf47   : > { %8829 = vmatprep.subr.mxu1 %v15143_v1  ;;  %8452 = vmatpush1.msra.mxu0 %v15522_v17  ;;  %v16951_v1 = vand.u32 4294901760, %v15147_v60  ;;  %v16955_v60 = vand.u32 4294901760, %v15216_v22  ;;  %v16960_v22 = vand.u32 4294901760, %v15273_v31  ;;  %v16971_v31 = vld [vmem:[#allocation4_spill] sm:$0xff] }
 0xf48   : > { %8485 = vmatprep.mubr.f32.mxu0 %v16802_v26  ;;  %8624 = vmatprep.mubr.f32.mxu1 %v16802_v26 }
 0xf49   : > { %8831 = vmatpush1.msra.mxu1 %v15203_v45  ;;  %8488 = vmatmul.mubr.f32.vlgmr.msra.gmra.mxu0 %v15546_v39  ;;  %v16952_v45 = vand.u32 4294901760, %v15150_v55  ;;  %v16956_v55 = vand.u32 4294901760, %v15225_v56  ;;  %v16962_v56 = vand.u32 4294901760, %v16926_v41 }
 0xf4a   : > { %8628 = vmatmul.mubr.f32.gmra.mxu1 %v16946_v20  ;;  %8637 = vmatprep.subr.mxu0 %v16948_v21  ;;  %v9000_v20 = vld [vmem:[%s16461_s12 + $0x60] sm:$0xff] }
 0xf4b   : > { %8833 = vmatprep.subr.mxu1 %v15208_v34  ;;  %8641 = vmatpush1.msra.mxu0 %v16949_v9  ;;  %v16959_v34 = vand.u32 4294901760, %v15261_v12  ;;  %v16969_v12 = vld [vmem:[#allocation3_spill] sm:$0xff] }
 0xf4c   : > { %8835 = vmatpush1.msra.mxu1 %v15218_v62  ;;  %8645 = vmatprep.subr.mxu0 %v16950_v49  ;;  %v16961_v62 = vand.u32 4294901760, %v15284_v35  ;;  %v16972_v35 = vand.u32 4294901760, %v16938_v50 }
 0xf4d   : > { %8837 = vmatprep.subr.mxu1 %v15227_v30  ;;  %8493 = vmatprep.mubr.f32.mxu0 %v16802_v26  ;;  %v16963_v30 = vand.u32 4294901760, %v16928_v2 }
 0xf4e   : > { %8649 = vmatpush1.msra.mxu0 %v16951_v1  ;;  %8839 = vmatpush1.msra.mxu1 %v15237_v7  ;;  %v16966_v7 = vand.u32 4294901760, %v16933_v42  ;;  %v9015_v1 = vld [vmem:[%s16461_s12 + $0xd8] sm:$0xff] }
 0xf4f   : > { %8496 = vmatmul.mubr.f32.gmra.mxu0 %v15559_v23  ;;  %8653 = vmatprep.subr.mxu0 %v16952_v45 }
 0xf50   : > { %8841 = vmatprep.subr.mxu1 %v15250_v57  ;;  %8657 = vmatpush1.msra.mxu0 %v16953_v24  ;;  %v16968_v57 = vand.u32 4294901760, %v16936_v4 }
 0xf51   : > { %8843 = vmatpush1.msra.mxu1 %v15263_v3  ;;  %8661 = vmatprep.subr.mxu0 %v16954_v14  ;;  %v16970_v3 = vand.u32 4294901760, %v16937_v27  ;;  %v9002_v27 = vld [vmem:[%s16461_s12 + $0x70] sm:$0xff] }
 0xf52   : > { %8845 = vmatprep.subr.mxu1 %v15305_v40  ;;  %8501 = vmatprep.mubr.f32.mxu0 %v16802_v26  ;;  %v16974_v40 = vand.u32 4294901760, %v16939_v16  ;;  %v15793_v50 = vand.u32 4294901760, %v9002_v27 }
 0xf53   : > { %8665 = vmatpush1.msra.mxu0 %v16955_v60  ;;  %8847 = vmatpush1.msra.mxu1 %v15313_v29  ;;  %v16975_v29 = vand.u32 4294901760, %v16940_v36  ;;  %v9018_v36 = vld [vmem:[%s16461_s12 + $0xf0] sm:$0xff]  ;;  %v15845_v60 = vand.u32 4294901760, %v9000_v20 }
 0xf54   : > { %8504 = vmatmul.mubr.f32.gmra.mxu0 %v15581_v58  ;;  %8669 = vmatprep.subr.mxu0 %v16956_v55  ;;  %v15779_v39 = vand.u32 4294901760, %v9018_v36  ;;  %v9017_v58 = vld [vmem:[%s16461_s12 + $0xe8] sm:$0xff]  ;;  %v8999_v55 = vld [vmem:[%s16461_s12 + $0x58] sm:$0xff] }
 0xf55   : > { %8849 = vmatprep.subr.mxu1 %v15315_v11  ;;  %8673 = vmatpush1.msra.mxu0 %v16957_v52  ;;  %v16976_v11 = vld [vmem:[#allocation28_spill] sm:$0xff]  ;;  %v15800_v41 = vand.u32 4294901760, %v9017_v58 }
 0xf56   : > { %8851 = vmatpush1.msra.mxu1 %v15326_v38  ;;  %8677 = vmatprep.subr.mxu0 %v16958_v47  ;;  %v16977_v38 = vand.u32 4294901760, %v16942_v53  ;;  %v16983_v53 = vand.u32 4294901760, %v16945_v63  ;;  %v15791_v4 = vsub.f32 %v9018_v36, %v15779_v39 }
 0xf57   : > { %8853 = vmatprep.subr.mxu1 %v15338_v32  ;;  %8681 = vmatpush1.msra.mxu0 %v16959_v34  ;;  %v16973_v32 = vld [vmem:[#allocation5_spill] sm:$0xff]  ;;  %v15822_v61 = vsub.f32 %v9017_v58, %v15800_v41  ;;  %v8996_v58 = vld [vmem:[%s16461_s12 + $0x40] sm:$0xff] }
 0xf58   : > { %8855 = vmatpush1.msra.mxu1 %v15348_v51  ;;  %8685 = vmatprep.subr.mxu0 %v16960_v22  ;;  %v16978_v51 = vand.u32 4294901760, %v16943_v13  ;;  %v16984_v13 = vand.u32 4294901760, %v15522_v17  ;;  %v9003_v17 = vld [vmem:[%s16461_s12 + $0x78] sm:$0xff]  ;;  %v16663_v46 = vand.u32 4294901760, %v15791_v4  ;;  %v15855_v22 = vand.u32 4294901760, %v9015_v1 }
 0xf59   : > { %8857 = vmatprep.subr.mxu1 %v15356_v44  ;;  %8689 = vmatpush1.msra.mxu0 %v16961_v62  ;;  %v16965_v44 = vand.u32 4294901760, %v16931_v28  ;;  %v16660_v24 = vand.u32 4294901760, %v15822_v61  ;;  %v9014_v62 = vld [vmem:[%s16461_s12 + $0xd0] sm:$0xff] }
 0xf5a   : > { %8859 = vmatpush1.msra.mxu1 %v15366_v15  ;;  %8693 = vmatprep.subr.mxu0 %v16962_v56  ;;  %v16979_v15 = vand.u32 4294901760, %v15468_v10  ;;  %v16985_v10 = vld [vmem:[#allocation30_spill] sm:$0xff]  ;;  %v9292_v21 = vsub.f32 %v15791_v4, %v16663_v46 }
 0xf5b   : > { %8861 = vmatprep.subr.mxu1 %v15409_v59  ;;  %8697 = vmatpush1.msra.mxu0 %v16963_v30  ;;  %v16980_v59 = vand.u32 4294901760, %v15481_v37  ;;  %v9299_v56 = vsub.f32 %v15822_v61, %v16660_v24 }
 0xf5c   : > { %8863 = vmatpush1.msra.mxu1 %v16927_v0  ;;  %8701 = vmatprep.subr.mxu0 %v16964_v33  ;;  %v9001_v0 = vld [vmem:[%s16461_s12 + $0x68] sm:$0xff]  ;;  %v9293_v52 = vand.u32 4294901760, %v9292_v21  ;;  %v15865_v33 = vsub.f32 %v9000_v20, %v15845_v60  ;;  %v9011_v20 = vld [vmem:[%s16461_s12 + $0xb8] sm:$0xff] }
 0xf5d   : > { %8865 = vmatprep.subr.mxu1 %v15419_v43  ;;  %8705 = vmatpush1.msra.mxu0 %v16965_v44  ;;  %v16981_v43 = vld [vmem:[#allocation29_spill] sm:$0xff]  ;;  %v15812_v28 = vand.u32 4294901760, %v9001_v0  ;;  %v15867_v44 = vand.u32 4294901760, %v8999_v55 }
 0xf5e   : > { %8867 = vmatpush1.msra.mxu1 %v16930_v25  ;;  %8709 = vmatprep.subr.mxu0 %v16966_v7  ;;  %v15810_v25 = vsub.f32 %v9002_v27, %v15793_v50  ;;  %16989 = vst [vmem:[#allocation15_spill] sm:$0xff] %v15865_v33  ;;  %v8998_v7 = vld [vmem:[%s16461_s12 + $0x50] sm:$0xff] }
 0xf5f   : > { %8869 = vmatprep.subr.mxu1 %v16932_v18  ;;  %8713 = vmatpush1.msra.mxu0 %v16967_v54  ;;  %v9016_v18 = vld [vmem:[%s16461_s12 + $0xe0] sm:$0xff]  ;;  %v15835_v49 = vsub.f32 %v9001_v0, %v15812_v28 }
 0xf60   : > { %8871 = vmatpush1.msra.mxu1 %v16934_v19  ;;  %8717 = vmatprep.subr.mxu0 %v16968_v57  ;;  %v15771_v19 = vand.u32 4294901760, %v9003_v17  ;;  %v15824_v63 = vand.u32 4294901760, %v9016_v18  ;;  %v16662_v9 = vand.u32 4294901760, %v15810_v25 }
 0xf61   : > { %8873 = vmatprep.subr.mxu1 %v16969_v12  ;;  %8721 = vmatpush1.msra.mxu0 %v16970_v3  ;;  %v16659_v34 = vand.u32 4294901760, %v15835_v49  ;;  %v15877_v12 = vsub.f32 %v9015_v1, %v15855_v22  ;;  %v15879_v3 = vand.u32 4294901760, %v9014_v62 }
 0xf62   : > { %8875 = vmatpush1.msra.mxu1 %v16971_v31  ;;  %8725 = vmatprep.subr.mxu0 %v16972_v35  ;;  %v15783_v16 = vsub.f32 %v9003_v17, %v15771_v19  ;;  %v15843_v14 = vsub.f32 %v9016_v18, %v15824_v63  ;;  %v9180_v47 = vsub.f32 %v15810_v25, %v16662_v9  ;;  %v9013_v31 = vld [vmem:[%s16461_s12 + $0xc8] sm:$0xff]  ;;  %v9300_v35 = vand.u32 4294901760, %v9299_v56 }
 0xf63   : > { %8877 = vmatprep.subr.mxu1 %v16973_v32  ;;  %8729 = vmatpush1.msra.mxu0 %v16974_v40  ;;  %v9187_v57 = vsub.f32 %v15835_v49, %v16659_v34  ;;  %16990 = vst [vmem:[#allocation19_spill] sm:$0xff] %v15877_v12  ;;  %v16656_v40 = vand.u32 4294901760, %v15865_v33  ;;  %v15952_v56 = vand.u32 4294901760, %v8996_v58 }
 0xf64   : > { %8879 = vmatpush1.msra.mxu1 %v15512_v6  ;;  %8912 = vmatprep.mubr.f32.mxu1 %v16802_v26  ;;  %v16982_v6 = vand.u32 4294901760, %v15492_v8  ;;  %v9019_v8 = vld [vmem:[%s16461_s12 + $0xf8] sm:$0xff]  ;;  %v16664_v48 = vand.u32 4294901760, %v15783_v16  ;;  %16988 = vst [vmem:[#allocation14_spill] sm:$0xff] %v15843_v14  ;;  %v16658_v30 = vand.u32 4294901760, %v15843_v14  ;;  %v9181_v54 = vand.u32 4294901760, %v9180_v47 }
 0xf65   : > { %8733 = vmatprep.subr.mxu0 %v16975_v29  ;;  %8914 = vmatmul.mubr.f32.vlgmr.msra.gmra.mxu1 %v16976_v11  ;;  %v15766_v37 = vand.u32 4294901760, %v9019_v8  ;;  %v15890_v29 = vsub.f32 %v8999_v55, %v15867_v44  ;;  %v8995_v55 = vld [vmem:[%s16461_s12 + $0x38] sm:$0xff]  ;;  %16997 = vst [vmem:[#allocation13_spill] sm:$0xff] %v15952_v56 }
 0xf66   : > { %8737 = vmatpush1.msra.mxu0 %v16977_v38  ;;  %8919 = vmatprep.mubr.f32.mxu1 %v16802_v26  ;;  %v9173_v42 = vsub.f32 %v15783_v16, %v16664_v48  ;;  %v9306_v32 = vsub.f32 %v15843_v14, %v16658_v30  ;;  %v9188_v38 = vand.u32 4294901760, %v9187_v57 }
 0xf67   : > { %8741 = vmatprep.subr.mxu0 %v16978_v51  ;;  %8794 = vmatprep.mubr.f32.mxu0 %v16802_v26  ;;  %16986 = vst [vmem:[#allocation12_spill] sm:$0xff] %v15766_v37  ;;  %16991 = vst [vmem:[#allocation18_spill] sm:$0xff] %v15890_v29  ;;  %v16655_v51 = vand.u32 4294901760, %v15877_v12 }
 0xf68   : > { %8745 = vmatpush1.msra.mxu0 %v16979_v15  ;;  %v9174_v45 = vand.u32 4294901760, %v9173_v42  ;;  %v15898_v15 = vsub.f32 %v9014_v62, %v15879_v3 }
 0xf69   : > { %8749 = vmatprep.subr.mxu0 %v16980_v59  ;;  %8921 = vmatmul.mubr.f32.gmra.mxu1 %v16981_v43  ;;  %v15900_v59 = vand.u32 4294901760, %v8998_v7 }
 0xf6a   : > { %8753 = vmatpush1.msra.mxu0 %v16982_v6  ;;  %8926 = vmatprep.mubr.f32.mxu1 %v16802_v26  ;;  %16992 = vst [vmem:[#allocation22_spill] sm:$0xff] %v15898_v15  ;;  %v9307_v6 = vand.u32 4294901760, %v9306_v32  ;;  %v16651_v17 = vand.u32 4294901760, %v15898_v15 }
 0xf6b   : > { %8757 = vmatprep.subr.mxu0 %v16983_v53  ;;  %v9194_v53 = vsub.f32 %v15865_v33, %v16656_v40  ;;  %v15917_v36 = vsub.f32 %v8998_v7, %v15900_v59  ;;  %v9010_v7 = vld [vmem:[%s16461_s12 + $0xb0] sm:$0xff] }
 0xf6c   : > { %8761 = vmatpush1.msra.mxu0 %v16984_v13  ;;  %v16652_v13 = vand.u32 4294901760, %v15890_v29  ;;  %v9320_v21 = vsub.f32 %v15898_v15, %v16651_v17 }
 0xf6d   : > { %8796 = vmatmul.mubr.f32.vlgmr.msra.gmra.mxu0 %v16976_v11  ;;  %8928 = vmatmul.mubr.f32.gmra.mxu1 %v16985_v10  ;;  %v8997_v11 = vld [vmem:[%s16461_s12 + $0x48] sm:$0xff]  ;;  %16993 = vst [vmem:[#allocation20_spill] sm:$0xff] %v15917_v36  ;;  %v9195_v0 = vand.u32 4294901760, %v9194_v53  ;;  %v16650_v1 = vand.u32 4294901760, %v15917_v36 }
 0xf6e   : > { %8801 = vmatprep.mubr.f32.mxu0 %v16802_v26  ;;  %10605 = vmatprep.subr.mxu0 %v15766_v37  ;;  %v15919_v27 = vand.u32 4294901760, %v8997_v11 }
 0xf6f   : > { %10606 = vmatpush3.msra.mxu0 %v15771_v19  ;;  %v9208_v57 = vsub.f32 %v15917_v36, %v16650_v1 }
 0xf70   : > { %10607 = vmatprep.subr.mxu0 %v15779_v39 }
 0xf71   : > { %8803 = vmatmul.mubr.f32.gmra.mxu0 %v16981_v43  ;;  %v9012_v43 = vld [vmem:[%s16461_s12 + $0xc0] sm:$0xff]  ;;  %v9209_v53 = vand.u32 4294901760, %v9208_v57 }
 0xf72   : > { %8808 = vmatprep.mubr.f32.mxu0 %v16802_v26  ;;  %v15777_v26 = vsub.f32 %v9019_v8, %v15766_v37  ;;  %10608 = vmatpush3.msra.mxu0 %v15793_v50  ;;  %v9313_v8 = vsub.f32 %v15877_v12, %v16655_v51  ;;  %v15931_v42 = vand.u32 4294901760, %v9012_v43 }
 0xf73   : > { %10609 = vmatprep.subr.mxu0 %v15800_v41 }
 0xf74   : > { %16987 = vst [vmem:[#allocation6_spill] sm:$0xff] %v15777_v26  ;;  %v16667_v23 = vand.u32 4294901760, %v15777_v26  ;;  %10610 = vmatpush3.msra.mxu0 %v15812_v28  ;;  %v15950_v62 = vsub.f32 %v9012_v43, %v15931_v42  ;;  %v15971_v43 = vand.u32 4294901760, %v8995_v55 }
 0xf75   : > { %8810 = vmatmul.mubr.f32.gmra.mxu0 %v16985_v10  ;;  %10611 = vmatprep.subr.mxu0 %v15824_v63  ;;  %v15910_v10 = vand.u32 4294901760, %v9013_v31 }
 0xf76   : > { %v9285_v2 = vsub.f32 %v15777_v26, %v16667_v23  ;;  %10612 = vmatpush3.msra.mxu0 %v15845_v60  ;;  %16996 = vst [vmem:[#allocation11_spill] sm:$0xff] %v15950_v62  ;;  %17000 = vst [vmem:[#allocation23_spill] sm:$0xff] %v15971_v43 }
 0xf77   : > { %10613 = vmatprep.subr.mxu0 %v15855_v22  ;;  %v15929_v18 = vsub.f32 %v9013_v31, %v15910_v10 }
 0xf78   : > { %v9286_v5 = vand.u32 4294901760, %v9285_v2  ;;  %10614 = vmatpush3.msra.mxu0 %v15867_v44  ;;  %v9201_v2 = vsub.f32 %v15890_v29, %v16652_v13 }
 0xf79   : > { %10615 = vmatprep.subr.mxu0 %v15879_v3  ;;  %16994 = vst [vmem:[#allocation25_spill] sm:$0xff] %v15929_v18  ;;  %v16648_v47 = vand.u32 4294901760, %v15929_v18 }
 0xf7a   : > { %10646 = vmatprep.subr.mxu1 %v9286_v5  ;;  %10616 = vmatpush3.msra.mxu0 %v15900_v59  ;;  %v9314_v5 = vand.u32 4294901760, %v9313_v8 }
 0xf7b   : > { %10647 = vmatpush3.msra.mxu1 %v9174_v45  ;;  %10617 = vmatprep.subr.mxu0 %v15910_v10  ;;  %v15942_v45 = vsub.f32 %v8997_v11, %v15919_v27  ;;  %v9327_v32 = vsub.f32 %v15929_v18, %v16648_v47  ;;  %v16649_v11 = vand.u32 4294901760, %v15950_v62 }
 0xf7c   : > { %10648 = vmatprep.subr.mxu1 %v9293_v52  ;;  %10618 = vmatpush3.msra.mxu0 %v15919_v27  ;;  %v9202_v52 = vand.u32 4294901760, %v9201_v2  ;;  %v15983_v2 = vand.u32 4294901760, %v9010_v7 }
 0xf7d   : > { %10649 = vmatpush3.msra.mxu1 %v9181_v54  ;;  %16995 = vst [vmem:[#allocation2_spill] sm:$0xff] %v15942_v45  ;;  %10619 = vmatprep.subr.mxu0 %v15931_v42  ;;  %v9321_v54 = vand.u32 4294901760, %v9320_v21  ;;  %v16647_v31 = vand.u32 4294901760, %v15942_v45  ;;  %v9334_v21 = vsub.f32 %v15950_v62, %v16649_v11 }
 0xf7e   : > { %10650 = vmatprep.subr.mxu1 %v9300_v35  ;;  %v15962_v35 = vand.u32 4294901760, %v9011_v20  ;;  %10620 = vmatpush3.msra.mxu0 %v15952_v56  ;;  %17002 = vst [vmem:[#allocation26_spill] sm:$0xff] %v15983_v2 }
 0xf7f   : > { %10651 = vmatpush3.msra.mxu1 %v9188_v38  ;;  %v15969_v38 = vsub.f32 %v8996_v58, %v15952_v56  ;;  %v9215_v8 = vsub.f32 %v15942_v45, %v16647_v31  ;;  %v9009_v58 = vld [vmem:[%s16461_s12 + $0xa8] sm:$0xff]  ;;  %v9335_v11 = vand.u32 4294901760, %v9334_v21  ;;  %v8992_v21 = vld [vmem:[%s16461_s12 + $0x20] sm:$0xff] }
 0xf80   : > { %10652 = vmatprep.subr.mxu1 %v9307_v6  ;;  %16998 = vst [vmem:[#allocation17_spill] sm:$0xff] %v15962_v35  ;;  %v8994_v6 = vld [vmem:[%s16461_s12 + $0x30] sm:$0xff]  ;;  %10621 = vmatprep.subr.mxu0 %v15962_v35  ;;  %v16014_v1 = vand.u32 4294901760, %v9009_v58  ;;  %v16056_v24 = vand.u32 4294901760, %v8992_v21 }
 0xf81   : > { %10653 = vmatpush3.msra.mxu1 %v9195_v0  ;;  %16999 = vst [vmem:[#allocation21_spill] sm:$0xff] %v15969_v38  ;;  %v15981_v0 = vsub.f32 %v9011_v20, %v15962_v35  ;;  %v8993_v20 = vld [vmem:[%s16461_s12 + $0x28] sm:$0xff]  ;;  %10622 = vmatpush3.msra.mxu0 %v15971_v43  ;;  %v9216_v57 = vand.u32 4294901760, %v9215_v8  ;;  %v16004_v47 = vand.u32 4294901760, %v8994_v6 }
 0xf82   : > { %10654 = vmatprep.subr.mxu1 %v9314_v5  ;;  %v9328_v5 = vand.u32 4294901760, %v9327_v32  ;;  %v16002_v32 = vsub.f32 %v9010_v7, %v15983_v2  ;;  %10623 = vmatprep.subr.mxu0 %v15983_v2  ;;  %17006 = vst [vmem:[#allocation4_spill] sm:$0xff] %v16014_v1  ;;  %17013 = vst [vmem:[#allocation33_spill] sm:$0xff] %v16056_v24  ;;  %v16073_v48 = vsub.f32 %v8992_v21, %v16056_v24  ;;  %v9005_v21 = vld [vmem:[%s16461_s12 + $0x88] sm:$0xff] }
 0xf83   : > { %10655 = vmatpush3.msra.mxu1 %v9202_v52  ;;  %17001 = vst [vmem:[#allocation24_spill] sm:$0xff] %v15981_v0  ;;  %v16653_v52 = vand.u32 4294901760, %v15969_v38  ;;  %v16654_v31 = vand.u32 4294901760, %v15981_v0  ;;  %17005 = vst [vmem:[#allocation3_spill] sm:$0xff] %v16004_v47  ;;  %v16021_v13 = vsub.f32 %v8994_v6, %v16004_v47  ;;  %10624 = vmatpush3.msra.mxu0 %v16004_v47  ;;  %v9007_v6 = vld [vmem:[%s16461_s12 + $0x98] sm:$0xff] }
 0xf84   : > { %10656 = vmatprep.subr.mxu1 %v9321_v54  ;;  %v15994_v54 = vsub.f32 %v8995_v55, %v15971_v43  ;;  %17004 = vst [vmem:[#allocation9_spill] sm:$0xff] %v16002_v32  ;;  %v9008_v55 = vld [vmem:[%s16461_s12 + $0xa0] sm:$0xff]  ;;  %v16661_v17 = vand.u32 4294901760, %v16002_v32  ;;  %10625 = vmatprep.subr.mxu0 %v16014_v1  ;;  %v16066_v9 = vand.u32 4294901760, %v9007_v6  ;;  %17015 = vst [vmem:[#allocation35_spill] sm:$0xff] %v16073_v48 }
 0xf85   : > { %10657 = vmatpush3.msra.mxu1 %v9209_v53  ;;  %v9222_v53 = vsub.f32 %v15969_v38, %v16653_v52  ;;  %v9341_v7 = vsub.f32 %v15981_v0, %v16654_v31  ;;  %17007 = vst [vmem:[#allocation5_spill] sm:$0xff] %v16021_v13  ;;  %v16033_v31 = vsub.f32 %v9009_v58, %v16014_v1  ;;  %v16035_v51 = vand.u32 4294901760, %v9008_v55  ;;  %v8991_v58 = vld [vmem:[%s16461_s12 + $0x18] sm:$0xff] }
 0xf86   : > { %17003 = vst [vmem:[#allocation27_spill] sm:$0xff] %v15994_v54  ;;  %10658 = vmatprep.subr.mxu1 %v9328_v5  ;;  %v16657_v8 = vand.u32 4294901760, %v15994_v54  ;;  %v16023_v5 = vand.u32 4294901760, %v8993_v20  ;;  %17014 = vst [vmem:[#allocation34_spill] sm:$0xff] %v16066_v9 }
 0xf87   : > { %10659 = vmatpush3.msra.mxu1 %v9216_v57  ;;  %v9223_v52 = vand.u32 4294901760, %v9222_v53  ;;  %17009 = vst [vmem:[#allocation29_spill] sm:$0xff] %v16033_v31  ;;  %17010 = vst [vmem:[#allocation30_spill] sm:$0xff] %v16035_v51  ;;  %v9342_v40 = vand.u32 4294901760, %v9341_v7  ;;  %v16665_v53 = vand.u32 4294901760, %v16021_v13  ;;  %v16666_v34 = vand.u32 4294901760, %v16033_v31 }
 0xf88   : > { %17008 = vst [vmem:[#allocation28_spill] sm:$0xff] %v16023_v5  ;;  %10660 = vmatprep.subr.mxu1 %v9335_v11  ;;  %v9229_v57 = vsub.f32 %v15994_v54, %v16657_v8  ;;  %v9348_v11 = vsub.f32 %v16002_v32, %v16661_v17  ;;  %v16046_v8 = vsub.f32 %v8993_v20, %v16023_v5  ;;  %v9006_v20 = vld [vmem:[%s16461_s12 + $0x90] sm:$0xff] }
 0xf89   : > { %10626 = vmatpush3.msra.mxu0 %v16023_v5  ;;  %10661 = vmatpush3.msra.mxu1 %v9223_v52  ;;  %v16054_v7 = vsub.f32 %v9008_v55, %v16035_v51  ;;  %v9236_v52 = vsub.f32 %v16021_v13, %v16665_v53  ;;  %v9355_v55 = vsub.f32 %v16033_v31, %v16666_v34  ;;  %v16087_v23 = vand.u32 4294901760, %v9006_v20 }
 0xf8a   : > { %17011 = vst [vmem:[#allocation31_spill] sm:$0xff] %v16046_v8  ;;  %v9230_v30 = vand.u32 4294901760, %v9229_v57  ;;  %10627 = vmatprep.subr.mxu0 %v16035_v51  ;;  %10662 = vmatprep.subr.mxu1 %v9342_v40  ;;  %v9349_v17 = vand.u32 4294901760, %v9348_v11  ;;  %v16670_v57 = vand.u32 4294901760, %v16046_v8  ;;  %v16075_v40 = vand.u32 4294901760, %v8991_v58  ;;  %v8990_v11 = vld [vmem:[%s16461_s12 + $0x10] sm:$0xff] }
 0xf8b   : > { %17012 = vst [vmem:[#allocation32_spill] sm:$0xff] %v16054_v7  ;;  %10628 = vmatpush3.msra.mxu0 %v16056_v24  ;;  %v9237_v53 = vand.u32 4294901760, %v9236_v52  ;;  %v16085_v34 = vsub.f32 %v9007_v6, %v16066_v9  ;;  %17018 = vst [vmem:[#allocation38_spill] sm:$0xff] %v16087_v23  ;;  %v9356_v46 = vand.u32 4294901760, %v9355_v55  ;;  %v17019_v31 = vand.u32 4294901760, %v16054_v7  ;;  %v8989_v6 = vld [vmem:[%s16461_s12 + $0x8] sm:$0xff] }
 0xf8c   : > { %10663 = vmatpush3.msra.mxu1 %v9230_v30  ;;  %17016 = vst [vmem:[#allocation36_spill] sm:$0xff] %v16075_v40  ;;  %v9243_v30 = vsub.f32 %v16046_v8, %v16670_v57  ;;  %10629 = vmatprep.subr.mxu0 %v16066_v9  ;;  %v16683_v52 = vand.u32 4294901760, %v16073_v48  ;;  %v16098_v57 = vsub.f32 %v8991_v58, %v16075_v40  ;;  %v16108_v32 = vand.u32 4294901760, %v8990_v11 }
 0xf8d   : > { %10664 = vmatprep.subr.mxu1 %v9349_v17  ;;  %17017 = vst [vmem:[#allocation37_spill] sm:$0xff] %v16085_v34  ;;  %v9362_v17 = vsub.f32 %v16054_v7, %v17019_v31  ;;  %10630 = vmatpush3.msra.mxu0 %v16075_v40  ;;  %v16106_v55 = vsub.f32 %v9006_v20, %v16087_v23  ;;  %v9004_v31 = vld [vmem:[%s16461_s12 + $0x80] sm:$0xff]  ;;  %v16118_v13 = vand.u32 4294901760, %v9005_v21  ;;  %v17024_v20 = vand.u32 4294901760, %v16085_v34 }
 0xf8e   : > { %17020 = vst [vmem:[#allocation39_spill] sm:$0xff] %v16098_v57  ;;  %10665 = vmatpush3.msra.mxu1 %v9237_v53  ;;  %v9244_v8 = vand.u32 4294901760, %v9243_v30  ;;  %17022 = vst [vmem:[#allocation41_spill] sm:$0xff] %v16108_v32  ;;  %10631 = vmatprep.subr.mxu0 %v16087_v23  ;;  %v9250_v53 = vsub.f32 %v16073_v48, %v16683_v52  ;;  %v16690_v30 = vand.u32 4294901760, %v16098_v57  ;;  %v16139_v40 = vand.u32 4294901760, %v9004_v31 }
 0xf8f   : > { %17021 = vst [vmem:[#allocation40_spill] sm:$0xff] %v16106_v55  ;;  %10666 = vmatprep.subr.mxu1 %v9356_v46  ;;  %v9363_v58 = vand.u32 4294901760, %v9362_v17  ;;  %17023 = vst [vmem:[#allocation42_spill] sm:$0xff] %v16118_v13  ;;  %v9369_v7 = vsub.f32 %v16085_v34, %v17024_v20  ;;  %v16125_v54 = vsub.f32 %v8990_v11, %v16108_v32  ;;  %v16127_v46 = vand.u32 4294901760, %v8989_v6  ;;  %v8988_v17 = vld [vmem:[%s16461_s12] sm:$0xff] }
 0xf90   : > { %10667 = vmatpush3.msra.mxu1 %v9244_v8  ;;  %10632 = vmatpush3.msra.mxu0 %v16108_v32  ;;  %v9251_v52 = vand.u32 4294901760, %v9250_v53  ;;  %v9257_v8 = vsub.f32 %v16098_v57, %v16690_v30  ;;  %v16137_v20 = vsub.f32 %v9005_v21, %v16118_v13  ;;  %17028 = vst [vmem:[#allocation46_spill] sm:$0xff] %v16139_v40  ;;  %v17029_v34 = vand.u32 4294901760, %v16106_v55 }
 0xf91   : > { %17025 = vst [vmem:[#allocation43_spill] sm:$0xff] %v16125_v54  ;;  %17026 = vst [vmem:[#allocation44_spill] sm:$0xff] %v16127_v46  ;;  %10668 = vmatprep.subr.mxu1 %v9363_v58  ;;  %10633 = vmatprep.subr.mxu0 %v16118_v13  ;;  %v9370_v11 = vand.u32 4294901760, %v9369_v7  ;;  %v16694_v32 = vand.u32 4294901760, %v16125_v54  ;;  %v16147_v58 = vsub.f32 %v8989_v6, %v16127_v46  ;;  %v16154_v57 = vand.u32 4294901760, %v8988_v17 }
 0xf92   : > { %17027 = vst [vmem:[#allocation45_spill] sm:$0xff] %v16137_v20  ;;  %v9376_v48 = vsub.f32 %v16106_v55, %v17029_v34  ;;  %10634 = vmatpush3.msra.mxu0 %v16127_v46  ;;  %10669 = vmatpush3.msra.mxu1 %v9251_v52  ;;  %v9258_v53 = vand.u32 4294901760, %v9257_v8  ;;  %v16693_v21 = vand.u32 4294901760, %v16137_v20  ;;  %v16152_v30 = vsub.f32 %v9004_v31, %v16139_v40 }
 0xf93   : > { %17030 = vst [vmem:[#allocation47_spill] sm:$0xff] %v16147_v58  ;;  %17032 = vst [vmem:[#allocation49_spill] sm:$0xff] %v16154_v57  ;;  %10635 = vmatprep.subr.mxu0 %v16139_v40  ;;  %10670 = vmatprep.subr.mxu1 %v9370_v11  ;;  %v9264_v7 = vsub.f32 %v16125_v54, %v16694_v32  ;;  %v16697_v6 = vand.u32 4294901760, %v16147_v58  ;;  %v16166_v8 = vsub.f32 %v8988_v17, %v16154_v57 }
 0xf94   : > { %17031 = vst [vmem:[#allocation48_spill] sm:$0xff] %v16152_v30  ;;  %v9377_v34 = vand.u32 4294901760, %v9376_v48  ;;  %10671 = vmatpush3.msra.mxu1 %v9258_v53  ;;  %v9383_v52 = vsub.f32 %v16137_v20, %v16693_v21  ;;  %v16699_v31 = vand.u32 4294901760, %v16152_v30  ;;  %10636 = vmatpush3.msra.mxu0 %v16154_v57 }
 0xf95   : > { %17033 = vst [vmem:[#allocation50_spill] sm:$0xff] %v16166_v8  ;;  %v9265_v48 = vand.u32 4294901760, %v9264_v7  ;;  %v9271_v11 = vsub.f32 %v16147_v58, %v16697_v6  ;;  %10687 = vmatprep.subr.mxu0 %v15777_v26  ;;  %v16710_v32 = vand.u32 4294901760, %v16166_v8 }
 0xf96   : > { %10672 = vmatprep.subr.mxu1 %v9377_v34  ;;  %v9384_v53 = vand.u32 4294901760, %v9383_v52  ;;  %v9390_v21 = vsub.f32 %v16152_v30, %v16699_v31 }
 0xf97   : > { %10673 = vmatpush3.msra.mxu1 %v9265_v48  ;;  %v9272_v17 = vand.u32 4294901760, %v9271_v11  ;;  %v9278_v34 = vsub.f32 %v16166_v8, %v16710_v32 }
 0xf98   : > { %10674 = vmatprep.subr.mxu1 %v9384_v53  ;;  %v9391_v20 = vand.u32 4294901760, %v9390_v21 }
 0xf99   : > { %10675 = vmatpush3.msra.mxu1 %v9272_v17  ;;  %v9279_v7 = vand.u32 4294901760, %v9278_v34  ;;  %v7969_v34 = vld [vmem:[%s16460_s11] sm:$0x3] }
 0xf9a   : > { %10676 = vmatprep.subr.mxu1 %v9391_v20 }
 0xf9b   : > { %10677 = vmatpush3.msra.mxu1 %v9279_v7 }
 0xf9c   : > { %10728 = vmatprep.subr.mxu1 %v15766_v37  ;;  %v17034_v37 = vld [vmem:[#allocation10_spill] sm:$0xff] }
 0xf9d   : > { %v17035_v40 = vsub.s32 0, %v17034_v37  ;;  %v17036_v23 = vsub.s32 1, %v17034_v37 }
 0xf9f   : > { %v7974_v46 = vrot.slane %v7969_v34, %v17035_v40  ;;  %v7978_v9 = vrot.slane %v7969_v34, %v17036_v23 }
 0xfdc   : > { %v8338_v52 = vpop.f32.mrf.mxu1 }
 0xfde   : > { %v8340_v6 = vpop.f32.mrf.mxu1 }
 0xfe0   : > { %v8345_v31 = vpop.f32.mrf.mxu1 }
 0xfe2   : > { %v8347_v58 = vpop.f32.mrf.mxu1 }
 0xfe4   : > { %v8084_v26 = vpop.f32.mrf.mxu0 }
 0xfe5   : > { %v8085_v24 = vadd.f32 %v8084_v26, %v7974_v46 }
 0xfe6   : > { %v8086_v30 = vpop.f32.mrf.mxu0 }
 0xfe7   : > { %v8352_v48 = vpop.f32.mrf.mxu1  ;;  %v8087_v51 = vadd.f32 %v8086_v30, %v7978_v9  ;;  %v8339_v45 = vadd.f32 %v8338_v52, %v8085_v24 }
 0xfe9   : > { %v8354_v53 = vpop.f32.mrf.mxu1  ;;  %v8341_v2 = vadd.f32 %v8340_v6, %v8087_v51 }
 0xfea   : > { %v8095_v11 = vpop.f32.mrf.mxu0 }
 0xfeb   : > { %v8096_v5 = vadd.f32 %v8095_v11, %v7974_v46 }
 0xfec   : > { %v8097_v21 = vpop.f32.mrf.mxu0 }
 0xfed   : > { %v8098_v47 = vadd.f32 %v8097_v21, %v7978_v9  ;;  %v8346_v29 = vadd.f32 %v8345_v31, %v8096_v5 }
 0xfef   : > { %v8348_v37 = vadd.f32 %v8347_v58, %v8098_v47 }
 0xff1   : > { %v8106_v55 = vpop.f32.mrf.mxu0 }
 0xff2   : > { %v8107_v40 = vadd.f32 %v8106_v55, %v7974_v46 }
 0xff3   : > { %v8108_v32 = vpop.f32.mrf.mxu0 }
 0xff4   : > { %v8109_v34 = vadd.f32 %v8108_v32, %v7978_v9  ;;  %v8353_v24 = vadd.f32 %v8352_v48, %v8107_v40 }
 0xfff   : > { %v8611_v54 = vpop.f32.mrf.mxu1 }
0x1001   : > { %v8613_v57 = vpop.f32.mrf.mxu1 }
0x1004   : > { %v8620_v20 = vpop.f32.mrf.mxu1 }
0x1006   : > { %v8622_v8 = vpop.f32.mrf.mxu1 }
0x1009   : > { %v8489_v17 = vpop.f32.mrf.mxu0 }
0x100a   : > { %v8629_v0 = vpop.f32.mrf.mxu1  ;;  %v8490_v36 = vadd.f32 %v8489_v17, %v8339_v45 }
0x100b   : > { %v8491_v7 = vpop.f32.mrf.mxu0 }
0x100c   : > { %v8631_v62 = vpop.f32.mrf.mxu1  ;;  %v8492_v15 = vadd.f32 %v8491_v7, %v8341_v2  ;;  %v8612_v23 = vadd.f32 %v8611_v54, %v8490_v36  ;;  %v8355_v2 = vadd.f32 %v8354_v53, %v8109_v34 }
0x100e   : > { %v8614_v11 = vadd.f32 %v8613_v57, %v8492_v15 }
0x100f   : > { %v8497_v13 = vpop.f32.mrf.mxu0 }
0x1010   : > { %v8498_v12 = vadd.f32 %v8497_v13, %v8346_v29 }
0x1011   : > { %v8499_v38 = vpop.f32.mrf.mxu0 }
0x1012   : > { %v8500_v33 = vadd.f32 %v8499_v38, %v8348_v37  ;;  %v8621_v45 = vadd.f32 %v8620_v20, %v8498_v12 }
0x1014   : > { %v8505_v18 = vpop.f32.mrf.mxu0  ;;  %v8623_v13 = vadd.f32 %v8622_v8, %v8500_v33 }
0x1015   : > { %v8506_v51 = vadd.f32 %v8505_v18, %v8353_v24 }
0x1016   : > { %v8507_v35 = vpop.f32.mrf.mxu0 }
0x1017   : > { %v8508_v36 = vadd.f32 %v8507_v35, %v8355_v2  ;;  %v8630_v15 = vadd.f32 %v8629_v0, %v8506_v51 }
0x1019   : > { %v8632_v48 = vadd.f32 %v8631_v62, %v8508_v36 }
0x1025   : > { %v8915_v1 = vpop.f32.mrf.mxu1 }
0x1027   : > { %v8917_v43 = vpop.f32.mrf.mxu1 }
0x1029   : > { %v8922_v30 = vpop.f32.mrf.mxu1 }
0x102b   : > { %v8924_v6 = vpop.f32.mrf.mxu1 }
0x102d   : > { %v8797_v26 = vpop.f32.mrf.mxu0 }
0x102e   : > { %v8798_v56 = vadd.f32 %v8797_v26, %v8612_v23 }
0x102f   : > { %v8799_v52 = vpop.f32.mrf.mxu0 }
0x1030   : > { %v8916_v14 = vadd.f32 %v8915_v1, %v8798_v56  ;;  %v8800_v21 = vadd.f32 %v8799_v52, %v8614_v11  ;;  %v8929_v1 = vpop.f32.mrf.mxu1 }
0x1031   : > { %v8804_v5 = vpop.f32.mrf.mxu0 }
0x1032   : > { %v8940_v55 = vmul.f32 0.044715, %v8916_v14  ;;  %v8918_v46 = vadd.f32 %v8917_v43, %v8800_v21  ;;  %v8805_v29 = vadd.f32 %v8804_v5, %v8621_v45  ;;  %v8931_v37 = vpop.f32.mrf.mxu1 }
0x1033   : > { %v8806_v9 = vpop.f32.mrf.mxu0 }
0x1034   : > { %v8946_v47 = vmul.f32 %v8940_v55, %v8916_v14  ;;  %v8941_v38 = vmul.f32 0.044715, %v8918_v46  ;;  %v8923_v54 = vadd.f32 %v8922_v30, %v8805_v29  ;;  %v8807_v32 = vadd.f32 %v8806_v9, %v8623_v13 }
0x1035   : > { %v8811_v57 = vpop.f32.mrf.mxu0 }
0x1036   : > { %v8952_v58 = vmul.f32 %v8946_v47, %v8916_v14  ;;  %v8947_v56 = vmul.f32 %v8941_v38, %v8918_v46  ;;  %v8942_v12 = vmul.f32 0.044715, %v8923_v54  ;;  %v8925_v18 = vadd.f32 %v8924_v6, %v8807_v32 }
0x1037   : > { %v8812_v31 = vadd.f32 %v8811_v57, %v8630_v15  ;;  %v8813_v53 = vpop.f32.mrf.mxu0  ;;  %v8934_v47 = vmul.f32 0.5, %v8916_v14  ;;  %v8935_v57 = vmul.f32 0.5, %v8918_v46 }
0x1038   : > { %v8958_v17 = vadd.f32 %v8952_v58, %v8916_v14  ;;  %v8953_v43 = vmul.f32 %v8947_v56, %v8918_v46  ;;  %v8948_v20 = vmul.f32 %v8942_v12, %v8923_v54  ;;  %v8943_v33 = vmul.f32 0.044715, %v8925_v18 }
0x1039   : > { %v8930_v35 = vadd.f32 %v8929_v1, %v8812_v31  ;;  %v8814_v8 = vadd.f32 %v8813_v53, %v8632_v48  ;;  %v8936_v31 = vmul.f32 0.5, %v8923_v54 }
0x103a   : > { %v8964_v7 = vmul.f32 0.7978846, %v8958_v17  ;;  %v8959_v40 = vadd.f32 %v8953_v43, %v8918_v46  ;;  %v8954_v23 = vmul.f32 %v8948_v20, %v8923_v54  ;;  %v8949_v0 = vmul.f32 %v8943_v33, %v8925_v18 }
0x103b   : > { %v8944_v34 = vmul.f32 0.044715, %v8930_v35  ;;  %v8932_v26 = vadd.f32 %v8931_v37, %v8814_v8  ;;  %v8937_v17 = vmul.f32 0.5, %v8925_v18 }
0x103c   : > { %12137 = vtanh.f32 %v8964_v7  ;;  %v8960_v30 = vadd.f32 %v8954_v23, %v8923_v54  ;;  %v8955_v11 = vmul.f32 %v8949_v0, %v8925_v18  ;;  %v8965_v24 = vmul.f32 0.7978846, %v8959_v40 }
0x103d   : > { %v8950_v52 = vmul.f32 %v8944_v34, %v8930_v35  ;;  %v8945_v62 = vmul.f32 0.044715, %v8932_v26 }
0x103e   : > { %v8961_v21 = vadd.f32 %v8955_v11, %v8925_v18  ;;  %12139 = vtanh.f32 %v8965_v24  ;;  %v8966_v45 = vmul.f32 0.7978846, %v8960_v30  ;;  %v8938_v18 = vmul.f32 0.5, %v8930_v35 }
0x103f   : > { %v8956_v51 = vmul.f32 %v8950_v52, %v8930_v35  ;;  %v8951_v2 = vmul.f32 %v8945_v62, %v8932_v26  ;;  %v8939_v11 = vmul.f32 0.5, %v8932_v26 }
0x1040   : > { %v8967_v5 = vmul.f32 0.7978846, %v8961_v21  ;;  %12141 = vtanh.f32 %v8966_v45 }
0x1041   : > { %v8962_v6 = vadd.f32 %v8956_v51, %v8930_v35  ;;  %v8957_v55 = vmul.f32 %v8951_v2, %v8932_v26 }
0x1042   : > { %12143 = vtanh.f32 %v8967_v5 }
0x1043   : > { %v8963_v29 = vadd.f32 %v8957_v55, %v8932_v26  ;;  %v8968_v13 = vmul.f32 0.7978846, %v8962_v6 }
0x1045   : > { %v8969_v36 = vmul.f32 0.7978846, %v8963_v29  ;;  %12145 = vtanh.f32 %v8968_v13 }
0x1047   : > { %12147 = vtanh.f32 %v8969_v36 }
0x1049   : > { %v12138_v9 = vpop.eup %12137 }
0x104a   : > { %v8976_v38 = vadd.f32 1.0, %v12138_v9 }
0x104b   : > { %v12140_v32 = vpop.eup %12139 }
0x104c   : > { %v8982_v15 = vmul.f32 %v8976_v38, %v8934_v47  ;;  %v8977_v58 = vadd.f32 1.0, %v12140_v32 }
0x104d   : > { %v12142_v1 = vpop.eup %12141 }
0x104e   : > { %v8983_v56 = vmul.f32 %v8977_v58, %v8935_v57  ;;  %v16188_v12 = vand.u32 4294901760, %v8982_v15  ;;  %v8978_v48 = vadd.f32 1.0, %v12142_v1 }
0x104f   : > { %v12144_v53 = vpop.eup %12143 }
0x1050   : > { %17037 = vst [vmem:[#allocation10_spill] sm:$0xff] %v16188_v12  ;;  %v16190_v43 = vand.u32 4294901760, %v8983_v56  ;;  %v8979_v20 = vadd.f32 1.0, %v12144_v53  ;;  %v8984_v33 = vmul.f32 %v8978_v48, %v8936_v31  ;;  %v16193_v8 = vsub.f32 %v8982_v15, %v16188_v12  ;;  %v17043_v31 = vld [vmem:[#allocation13_spill] sm:$0xff]  ;;  %v17044_v48 = vld [vmem:[#allocation15_spill] sm:$0xff] }
0x1052   : > { %v12146_v14 = vpop.eup %12145  ;;  %9394 = vmatprep.mubr.f32.mxu1 %v16190_v43  ;;  %v8985_v46 = vmul.f32 %v8979_v20, %v8937_v17  ;;  %v16196_v7 = vand.u32 4294901760, %v8984_v33  ;;  %v16199_v40 = vsub.f32 %v8983_v56, %v16190_v43  ;;  %v16768_v54 = vand.u32 4294901760, %v16193_v8  ;;  %v17042_v56 = vld [vmem:[#allocation14_spill] sm:$0xff]  ;;  %v17045_v17 = vld [vmem:[#allocation19_spill] sm:$0xff]  ;;  %v17046_v20 = vld [vmem:[#allocation17_spill] sm:$0xff] }
0x1053   : > { %9396 = vmatmul.mubr.f32.vlgmr.msra.gmra.mxu1 %v16188_v12  ;;  %v8980_v37 = vadd.f32 1.0, %v12146_v14  ;;  %v17048_v14 = vld [vmem:[#allocation18_spill] sm:$0xff]  ;;  %v17080_v12 = vld [vmem:[#allocation39_spill] sm:$0xff] }
0x1054   : > { %17038 = vst [vmem:[#allocation51_spill] sm:$0xff] %v16196_v7  ;;  %v12148_v23 = vpop.eup %12147  ;;  %10729 = vmatpush3.msra.mxu1 %v15771_v19  ;;  %v16204_v0 = vand.u32 4294901760, %v8985_v46  ;;  %v16207_v34 = vsub.f32 %v8984_v33, %v16196_v7  ;;  %v9125_v30 = vand.u32 4294901760, %v16199_v40  ;;  %v9132_v62 = vsub.f32 %v16193_v8, %v16768_v54  ;;  %v17047_v33 = vld [vmem:[#allocation23_spill] sm:$0xff] }
0x1055   : > { %10730 = vmatprep.subr.mxu1 %v15779_v39  ;;  %v8981_v24 = vadd.f32 1.0, %v12148_v23  ;;  %v8986_v52 = vmul.f32 %v8980_v37, %v8938_v18  ;;  %v17050_v18 = vld [vmem:[#allocation26_spill] sm:$0xff]  ;;  %v17051_v37 = vld [vmem:[#allocation20_spill] sm:$0xff]  ;;  %v17052_v23 = vld [vmem:[#allocation3_spill] sm:$0xff] }
0x1056   : > { %17039 = vst [vmem:[#allocation52_spill] sm:$0xff] %v16204_v0  ;;  %10731 = vmatpush3.msra.mxu1 %v15793_v50  ;;  %9401 = vmatprep.mubr.f32.mxu1 %v16204_v0  ;;  %v9126_v35 = vsub.f32 %v16199_v40, %v9125_v30  ;;  %v16218_v21 = vsub.f32 %v8985_v46, %v16204_v0  ;;  %v16766_v5 = vand.u32 4294901760, %v16207_v34  ;;  %v9133_v29 = vand.u32 4294901760, %v9132_v62  ;;  %v17049_v46 = vld [vmem:[#allocation22_spill] sm:$0xff]  ;;  %v17075_v54 = vld [vmem:[#allocation35_spill] sm:$0xff]  ;;  %v17079_v0 = vld [vmem:[#allocation12_spill] sm:$0xff] }
0x1057   : > { %10732 = vmatprep.subr.mxu1 %v15800_v41  ;;  %9403 = vmatmul.mubr.f32.gmra.mxu1 %v16196_v7  ;;  %v8987_v26 = vmul.f32 %v8981_v24, %v8939_v11  ;;  %v16222_v45 = vand.u32 4294901760, %v8986_v52  ;;  %v17054_v11 = vld [vmem:[#allocation4_spill] sm:$0xff]  ;;  %v17055_v24 = vld [vmem:[#allocation2_spill] sm:$0xff]  ;;  %v17078_v7 = vand.u32 4294901760, %v16193_v8 }
0x1058   : > { %10733 = vmatpush3.msra.mxu1 %v15812_v28  ;;  %v9127_v51 = vand.u32 4294901760, %v9126_v35  ;;  %v16767_v2 = vand.u32 4294901760, %v16218_v21  ;;  %v9147_v47 = vsub.f32 %v16207_v34, %v16766_v5  ;;  %v17057_v35 = vld [vmem:[#allocation11_spill] sm:$0xff]  ;;  %v17058_v62 = vld [vmem:[#allocation30_spill] sm:$0xff]  ;;  %v17073_v5 = vld [vmem:[#allocation32_spill] sm:$0xff] }
0x1059   : > { %17040 = vst [vmem:[#allocation53_spill] sm:$0xff] %v16222_v45  ;;  %10734 = vmatprep.subr.mxu1 %v15824_v63  ;;  %v16228_v6 = vand.u32 4294901760, %v8987_v26  ;;  %v16231_v55 = vsub.f32 %v8986_v52, %v16222_v45  ;;  %v17056_v52 = vld [vmem:[#allocation28_spill] sm:$0xff] }
0x105a   : > { %10735 = vmatpush3.msra.mxu1 %v15845_v60  ;;  %9128 = vmatprep.mubr.f32.mxu0 %v9127_v51  ;;  %v9141_v13 = vsub.f32 %v16218_v21, %v16767_v2  ;;  %v9148_v57 = vand.u32 4294901760, %v9147_v47  ;;  %v17061_v51 = vld [vmem:[#allocation24_spill] sm:$0xff]  ;;  %v17065_v47 = vld [vmem:[#allocation9_spill] sm:$0xff]  ;;  %v17074_v2 = vld [vmem:[#allocation46_spill] sm:$0xff] }
0x105b   : > { %17041 = vst [vmem:[#allocation54_spill] sm:$0xff] %v16228_v6  ;;  %9408 = vmatprep.mubr.f32.mxu1 %v16228_v6  ;;  %10736 = vmatprep.subr.mxu1 %v15855_v22  ;;  %v16240_v36 = vsub.f32 %v8987_v26, %v16228_v6  ;;  %v16764_v32 = vand.u32 4294901760, %v16231_v55  ;;  %v17060_v26 = vld [vmem:[#allocation33_spill] sm:$0xff] }
0x105c   : > { %9134 = vmatmul.mubr.f32.vlgmr.msra.gmra.mxu0 %v9133_v29  ;;  %9410 = vmatmul.mubr.f32.gmra.mxu1 %v16222_v45  ;;  %v9142_v9 = vand.u32 4294901760, %v9141_v13  ;;  %v17062_v29 = vld [vmem:[#allocation34_spill] sm:$0xff]  ;;  %v17063_v13 = vld [vmem:[#allocation27_spill] sm:$0xff]  ;;  %v17076_v45 = vld [vmem:[#allocation49_spill] sm:$0xff] }
0x105d   : > { %10688 = vmatpush3.msra.mxu0 %v15783_v16  ;;  %10737 = vmatpush3.msra.mxu1 %v15867_v44  ;;  %v16765_v38 = vand.u32 4294901760, %v16240_v36  ;;  %v9162_v1 = vsub.f32 %v16231_v55, %v16764_v32  ;;  %v17071_v32 = vld [vmem:[#allocation31_spill] sm:$0xff]  ;;  %v17077_v6 = vld [vmem:[#allocation37_spill] sm:$0xff] }
0x105e   : > { %10689 = vmatprep.subr.mxu0 %v15791_v4  ;;  %10738 = vmatprep.subr.mxu1 %v15879_v3 }
0x105f   : > { %9670 = vmatprep.mubr.f32.mxu1 %v9125_v30  ;;  %10690 = vmatpush3.msra.mxu0 %v15810_v25  ;;  %v9156_v15 = vsub.f32 %v16240_v36, %v16765_v38  ;;  %v9163_v53 = vand.u32 4294901760, %v9162_v1  ;;  %v17053_v30 = vld [vmem:[#allocation25_spill] sm:$0xff]  ;;  %v17072_v38 = vld [vmem:[#allocation44_spill] sm:$0xff] }
0x1060   : > { %10739 = vmatpush3.msra.mxu1 %v15900_v59  ;;  %9143 = vmatprep.mubr.f32.mxu0 %v9142_v9  ;;  %v17064_v9 = vld [vmem:[#allocation36_spill] sm:$0xff]  ;;  %v17069_v1 = vld [vmem:[#allocation29_spill] sm:$0xff] }
0x1061   : > { %10691 = vmatprep.subr.mxu0 %v15822_v61  ;;  %10740 = vmatprep.subr.mxu1 %v15910_v10  ;;  %v9157_v58 = vand.u32 4294901760, %v9156_v15  ;;  %v17066_v15 = vld [vmem:[#allocation38_spill] sm:$0xff] }
0x1062   : > { %9149 = vmatmul.mubr.f32.gmra.mxu0 %v9148_v57  ;;  %10741 = vmatpush3.msra.mxu1 %v15919_v27  ;;  %v17067_v57 = vld [vmem:[#allocation5_spill] sm:$0xff] }
0x1063   : > { %10692 = vmatpush3.msra.mxu0 %v15835_v49  ;;  %10742 = vmatprep.subr.mxu1 %v15931_v42 }
0x1064   : > { %10693 = vmatprep.subr.mxu0 %v17042_v56  ;;  %10743 = vmatpush3.msra.mxu1 %v17043_v31 }
0x1065   : > { %10694 = vmatpush3.msra.mxu0 %v17044_v48  ;;  %9158 = vmatprep.mubr.f32.mxu0 %v9157_v58  ;;  %v17068_v58 = vld [vmem:[#allocation41_spill] sm:$0xff] }
0x1066   : > { %10695 = vmatprep.subr.mxu0 %v17045_v17  ;;  %10744 = vmatprep.subr.mxu1 %v17046_v20 }
0x1067   : > { %9164 = vmatmul.mubr.f32.gmra.mxu0 %v9163_v53  ;;  %10745 = vmatpush3.msra.mxu1 %v17047_v33  ;;  %v17070_v53 = vld [vmem:[#allocation42_spill] sm:$0xff] }
0x1068   : > { %10696 = vmatpush3.msra.mxu0 %v17048_v14  ;;  %9545 = vmatprep.mubr.f32.mxu0 %v16199_v40  ;;  %v17059_v40 = vld [vmem:[#allocation21_spill] sm:$0xff] }
0x1069   : > { %10697 = vmatprep.subr.mxu0 %v17049_v46  ;;  %10746 = vmatprep.subr.mxu1 %v17050_v18 }
0x106a   : > { %10698 = vmatpush3.msra.mxu0 %v17051_v37  ;;  %10747 = vmatpush3.msra.mxu1 %v17052_v23 }
0x106b   : > { %10699 = vmatprep.subr.mxu0 %v17053_v30  ;;  %10748 = vmatprep.subr.mxu1 %v17054_v11 }
0x106c   : > { %10700 = vmatpush3.msra.mxu0 %v17055_v24  ;;  %10749 = vmatpush3.msra.mxu1 %v17056_v52 }
0x106d   : > { %10701 = vmatprep.subr.mxu0 %v17057_v35  ;;  %10750 = vmatprep.subr.mxu1 %v17058_v62 }
0x106e   : > { %10702 = vmatpush3.msra.mxu0 %v17059_v40  ;;  %10751 = vmatpush3.msra.mxu1 %v17060_v26 }
0x106f   : > { %10703 = vmatprep.subr.mxu0 %v17061_v51  ;;  %10752 = vmatprep.subr.mxu1 %v17062_v29 }
0x1070   : > { %10704 = vmatpush3.msra.mxu0 %v17063_v13  ;;  %10753 = vmatpush3.msra.mxu1 %v17064_v9 }
0x1071   : > { %10705 = vmatprep.subr.mxu0 %v17065_v47  ;;  %10754 = vmatprep.subr.mxu1 %v17066_v15 }
0x1072   : > { %10706 = vmatpush3.msra.mxu0 %v17067_v57  ;;  %10755 = vmatpush3.msra.mxu1 %v17068_v58 }
0x1073   : > { %10707 = vmatprep.subr.mxu0 %v17069_v1  ;;  %10756 = vmatprep.subr.mxu1 %v17070_v53 }
0x1074   : > { %10708 = vmatpush3.msra.mxu0 %v17071_v32  ;;  %10757 = vmatpush3.msra.mxu1 %v17072_v38  ;;  %v17081_v32 = vand.u32 4294901760, %v16218_v21 }
0x1075   : > { %10709 = vmatprep.subr.mxu0 %v17073_v5  ;;  %10758 = vmatprep.subr.mxu1 %v17074_v2  ;;  %v17082_v5 = vld [vmem:[#allocation40_spill] sm:$0xff] }
0x1076   : > { %10710 = vmatpush3.msra.mxu0 %v17075_v54  ;;  %10759 = vmatpush3.msra.mxu1 %v17076_v45  ;;  %v17083_v54 = vld [vmem:[#allocation43_spill] sm:$0xff] }
0x1077   : > { %10711 = vmatprep.subr.mxu0 %v17077_v6  ;;  %9674 = vmatmul.mubr.f32.vlgmr.msra.gmra.mxu1 %v17078_v7  ;;  %v17084_v6 = vld [vmem:[#allocation45_spill] sm:$0xff]  ;;  %v17085_v7 = vand.u32 4294901760, %v16207_v34 }
0x1078   : > { %10810 = vmatprep.subr.mxu1 %v17079_v0  ;;  %10712 = vmatpush3.msra.mxu0 %v17080_v12  ;;  %v17086_v0 = vld [vmem:[#allocation47_spill] sm:$0xff] }
0x1079   : > { %9681 = vmatprep.mubr.f32.mxu1 %v17081_v32  ;;  %10811 = vmatpush3.msra.mxu1 %v15771_v19  ;;  %v17087_v32 = vand.u32 4294901760, %v16240_v36  ;;  %v17088_v19 = vld [vmem:[#allocation48_spill] sm:$0xff] }
0x107a   : > { %10713 = vmatprep.subr.mxu0 %v17082_v5  ;;  %10812 = vmatprep.subr.mxu1 %v15779_v39  ;;  %v17089_v39 = vld [vmem:[#allocation50_spill] sm:$0xff] }
0x107b   : > { %10714 = vmatpush3.msra.mxu0 %v17083_v54  ;;  %10813 = vmatpush3.msra.mxu1 %v15793_v50  ;;  %v17090_v50 = vand.u32 4294901760, %v16231_v55 }
0x107c   : > { %10715 = vmatprep.subr.mxu0 %v17084_v6  ;;  %9685 = vmatmul.mubr.f32.gmra.mxu1 %v17085_v7 }
0x107d   : > { %10814 = vmatprep.subr.mxu1 %v15800_v41  ;;  %10716 = vmatpush3.msra.mxu0 %v17086_v0  ;;  %v17091_v41 = vld [vmem:[#allocation6_spill] sm:$0xff] }
0x107e   : > { %9692 = vmatprep.mubr.f32.mxu1 %v17087_v32  ;;  %10815 = vmatpush3.msra.mxu1 %v15812_v28  ;;  %v17092_v7 = vand.u32 4294901760, %v17091_v41  ;;  %v17093_v28 = vand.u32 4294901760, %v15783_v16  ;;  %v17097_v16 = vand.u32 4294901760, %v15835_v49  ;;  %v17101_v49 = vand.u32 4294901760, %v17048_v14 }
0x107f   : > { %10717 = vmatprep.subr.mxu0 %v17088_v19  ;;  %10816 = vmatprep.subr.mxu1 %v15824_v63  ;;  %v17094_v63 = vand.u32 4294901760, %v15791_v4  ;;  %v17098_v4 = vand.u32 4294901760, %v17042_v56 }
0x1080   : > { %10718 = vmatpush3.msra.mxu0 %v17089_v39  ;;  %10817 = vmatpush3.msra.mxu1 %v15845_v60  ;;  %v17095_v60 = vand.u32 4294901760, %v15810_v25  ;;  %v17099_v25 = vand.u32 4294901760, %v17044_v48 }
0x1081   : > { %9548 = vmatmul.mubr.f32.vlgmr.msra.gmra.mxu0 %v16193_v8  ;;  %9696 = vmatmul.mubr.f32.gmra.mxu1 %v17090_v50  ;;  %v17109_v8 = vand.u32 4294901760, %v17063_v13  ;;  %v10085_v50 = vld [vmem:[%s16462_s13] ss:$0 sm:$0xff] }
0x1082   : > { %10769 = vmatprep.subr.mxu0 %v17092_v7  ;;  %10818 = vmatprep.subr.mxu1 %v15855_v22  ;;  %v17096_v22 = vand.u32 4294901760, %v15822_v61  ;;  %v17100_v61 = vand.u32 4294901760, %v17045_v17  ;;  %v17117_v17 = vld [vmem:[#allocation35_spill] sm:$0xff] }
0x1083   : > { %9554 = vmatprep.mubr.f32.mxu0 %v16218_v21  ;;  %10770 = vmatpush3.msra.mxu0 %v17093_v28  ;;  %v17111_v21 = vand.u32 4294901760, %v17067_v57 }
0x1084   : > { %10819 = vmatpush3.msra.mxu1 %v15867_v44  ;;  %9980 = vmatprep.mubr.f32.mxu1 %v16190_v43  ;;  %v17102_v44 = vand.u32 4294901760, %v17049_v46  ;;  %v17121_v46 = vld [vmem:[#allocation10_spill] sm:$0xff] }
0x1085   : > { %10771 = vmatprep.subr.mxu0 %v17094_v63  ;;  %10820 = vmatprep.subr.mxu1 %v15879_v3  ;;  %v17103_v3 = vand.u32 4294901760, %v17051_v37  ;;  %v17123_v37 = vld [vmem:[#allocation52_spill] sm:$0xff] }
0x1086   : > { %10772 = vmatpush3.msra.mxu0 %v17095_v60  ;;  %10821 = vmatpush3.msra.mxu1 %v15900_v59  ;;  %v17104_v59 = vand.u32 4294901760, %v17053_v30  ;;  %v17128_v30 = vand.u32 4294901760, %v17086_v0 }
0x1087   : > { %9557 = vmatmul.mubr.f32.gmra.mxu0 %v16207_v34  ;;  %10773 = vmatprep.subr.mxu0 %v17096_v22  ;;  %v17110_v34 = vand.u32 4294901760, %v17065_v47 }
0x1088   : > { %10822 = vmatprep.subr.mxu1 %v15910_v10  ;;  %9563 = vmatprep.mubr.f32.mxu0 %v16240_v36  ;;  %v17105_v10 = vand.u32 4294901760, %v17055_v24  ;;  %v17113_v36 = vld [vmem:[#allocation31_spill] sm:$0xff]  ;;  %v17131_v24 = vand.u32 4294901760, %v17089_v39 }
0x1089   : > { %10774 = vmatpush3.msra.mxu0 %v17097_v16  ;;  %10823 = vmatpush3.msra.mxu1 %v15919_v27  ;;  %v17106_v27 = vand.u32 4294901760, %v17057_v35  ;;  %v17114_v56 = vand.u32 4294901760, %v17113_v36 }
0x108a   : > { %10775 = vmatprep.subr.mxu0 %v17098_v4  ;;  %10824 = vmatprep.subr.mxu1 %v15931_v42  ;;  %v17107_v42 = vand.u32 4294901760, %v17059_v40 }
0x108b   : > { %10776 = vmatpush3.msra.mxu0 %v17099_v25  ;;  %10825 = vmatpush3.msra.mxu1 %v17043_v31  ;;  %v17115_v31 = vld [vmem:[#allocation32_spill] sm:$0xff] }
0x108c   : > { %9566 = vmatmul.mubr.f32.gmra.mxu0 %v16231_v55  ;;  %10777 = vmatprep.subr.mxu0 %v17100_v61  ;;  %v17112_v55 = vand.u32 4294901760, %v17069_v1  ;;  %v17116_v48 = vand.u32 4294901760, %v17115_v31 }
0x108d   : > { %10826 = vmatprep.subr.mxu1 %v17046_v20  ;;  %10778 = vmatpush3.msra.mxu0 %v17101_v49  ;;  %v17118_v20 = vand.u32 4294901760, %v17117_v17 }
0x108e   : > { %9862 = vmatprep.mubr.f32.mxu0 %v16190_v43  ;;  %10827 = vmatpush3.msra.mxu1 %v17047_v33  ;;  %v17108_v43 = vand.u32 4294901760, %v17061_v51  ;;  %v17119_v33 = vld [vmem:[#allocation37_spill] sm:$0xff] }
0x108f   : > { %10779 = vmatprep.subr.mxu0 %v17102_v44  ;;  %10828 = vmatprep.subr.mxu1 %v17050_v18  ;;  %v17120_v14 = vand.u32 4294901760, %v17119_v33  ;;  %v17122_v18 = vand.u32 4294901760, %v17080_v12  ;;  %v17130_v12 = vand.u32 4294901760, %v17088_v19 }
0x1090   : > { %10780 = vmatpush3.msra.mxu0 %v17103_v3  ;;  %10829 = vmatpush3.msra.mxu1 %v17052_v23  ;;  %v17126_v23 = vand.u32 4294901760, %v17084_v6 }
0x1091   : > { %10781 = vmatprep.subr.mxu0 %v17104_v59  ;;  %10830 = vmatprep.subr.mxu1 %v17054_v11  ;;  %v17129_v11 = vld [vmem:[#allocation54_spill] sm:$0xff] }
0x1092   : > { %10782 = vmatpush3.msra.mxu0 %v17105_v10  ;;  %10831 = vmatpush3.msra.mxu1 %v17056_v52 }
0x1093   : > { %10783 = vmatprep.subr.mxu0 %v17106_v27  ;;  %10832 = vmatprep.subr.mxu1 %v17058_v62 }
0x1094   : > { %10784 = vmatpush3.msra.mxu0 %v17107_v42  ;;  %10833 = vmatpush3.msra.mxu1 %v17060_v26 }
0x1095   : > { %10785 = vmatprep.subr.mxu0 %v17108_v43  ;;  %10834 = vmatprep.subr.mxu1 %v17062_v29 }
0x1096   : > { %10786 = vmatpush3.msra.mxu0 %v17109_v8  ;;  %10835 = vmatpush3.msra.mxu1 %v17064_v9 }
0x1097   : > { %10787 = vmatprep.subr.mxu0 %v17110_v34  ;;  %10836 = vmatprep.subr.mxu1 %v17066_v15 }
0x1098   : > { %10788 = vmatpush3.msra.mxu0 %v17111_v21  ;;  %10837 = vmatpush3.msra.mxu1 %v17068_v58 }
0x1099   : > { %10789 = vmatprep.subr.mxu0 %v17112_v55  ;;  %10838 = vmatprep.subr.mxu1 %v17070_v53 }
0x109a   : > { %10790 = vmatpush3.msra.mxu0 %v17114_v56  ;;  %10839 = vmatpush3.msra.mxu1 %v17072_v38  ;;  %v17124_v38 = vand.u32 4294901760, %v17082_v5 }
0x109b   : > { %10791 = vmatprep.subr.mxu0 %v17116_v48  ;;  %10840 = vmatprep.subr.mxu1 %v17074_v2  ;;  %v17125_v2 = vand.u32 4294901760, %v17083_v54  ;;  %v17132_v54 = vld [vmem:[#allocation53_spill] sm:$0xff] }
0x109c   : > { %10792 = vmatpush3.msra.mxu0 %v17118_v20  ;;  %10841 = vmatpush3.msra.mxu1 %v17076_v45  ;;  %v17127_v45 = vld [vmem:[#allocation51_spill] sm:$0xff] }
0x109d   : > { %10793 = vmatprep.subr.mxu0 %v17120_v14  ;;  %9982 = vmatmul.mubr.f32.vlgmr.msra.gmra.mxu1 %v17121_v46 }
0x109e   : > { %10794 = vmatpush3.msra.mxu0 %v17122_v18  ;;  %9987 = vmatprep.mubr.f32.mxu1 %v17123_v37 }
0x109f   : > { %10795 = vmatprep.subr.mxu0 %v17124_v38 }
0x10a0   : > { %10796 = vmatpush3.msra.mxu0 %v17125_v2  ;;  %v10086_v2 = vld [vmem:[%s16463_s14] ss:$0 sm:$0xff] }
0x10a1   : > { %10797 = vmatprep.subr.mxu0 %v17126_v23  ;;  %9989 = vmatmul.mubr.f32.gmra.mxu1 %v17127_v45 }
0x10a2   : > { %10798 = vmatpush3.msra.mxu0 %v17128_v30  ;;  %9994 = vmatprep.mubr.f32.mxu1 %v17129_v11 }
0x10a3   : > { %10799 = vmatprep.subr.mxu0 %v17130_v12 }
0x10a4   : > { %10800 = vmatpush3.msra.mxu0 %v17131_v24 }
0x10a5   : > { %9864 = vmatmul.mubr.f32.vlgmr.msra.gmra.mxu0 %v17121_v46  ;;  %9996 = vmatmul.mubr.f32.gmra.mxu1 %v17132_v54 }
0x10a6   : > { %9869 = vmatprep.mubr.f32.mxu0 %v17123_v37 }
0x10a9   : > { %9871 = vmatmul.mubr.f32.gmra.mxu0 %v17127_v45 }
0x10aa   : > { %9876 = vmatprep.mubr.f32.mxu0 %v17129_v11 }
0x10ad   : > { %9878 = vmatmul.mubr.f32.gmra.mxu0 %v17132_v54 }
0x1113   : > { %v10678_v5 = vpop.f32.mrf.mxu1 }
0x1115   : > { %v10679_v6 = vpop.f32.mrf.mxu1 }
0x1116   : > { %v10680_v4 = vadd.f32 %v10679_v6, %v10678_v5 }
0x1117   : > { %v10681_v52 = vpop.f32.mrf.mxu1 }
0x1119   : > { %v10682_v62 = vpop.f32.mrf.mxu1 }
0x111a   : > { %v10683_v10 = vadd.f32 %v10682_v62, %v10681_v52 }
0x111c   : > { %v10637_v35 = vpop.f32.mrf.mxu0  ;;  %v10684_v26 = vpop.f32.mrf.mxu1 }
0x111e   : > { %v10638_v40 = vpop.f32.mrf.mxu0  ;;  %v10685_v29 = vpop.f32.mrf.mxu1 }
0x111f   : > { %v10639_v39 = vadd.f32 %v10638_v40, %v10637_v35  ;;  %v10686_v55 = vadd.f32 %v10685_v29, %v10684_v26  ;;  %v17133_v40 = vld [vmem:[#allocation16_spill] sm:$0xff] }
0x1121   : > { %v9136_v63 = vadd.f32 %v10639_v39, %v10085_v50 }
0x1122   : > { %v10640_v51 = vpop.f32.mrf.mxu0 }
0x1123   : > { %v9398_v44 = vadd.f32 %v10680_v4, %v9136_v63 }
0x1124   : > { %v10641_v13 = vpop.f32.mrf.mxu0 }
0x1125   : > { %v10642_v60 = vadd.f32 %v10641_v13, %v10640_v51 }
0x1127   : > { %v10643_v47 = vpop.f32.mrf.mxu0  ;;  %v9151_v61 = vadd.f32 %v10642_v60, %v10085_v50 }
0x1129   : > { %v10644_v57 = vpop.f32.mrf.mxu0  ;;  %v9405_v21 = vadd.f32 %v10683_v10, %v9151_v61 }
0x112a   : > { %v10645_v49 = vadd.f32 %v10644_v57, %v10643_v47  ;;  %v17134_v57 = vld [vmem:[#allocation7_spill] sm:$0xff] }
0x112c   : > { %v9166_v8 = vadd.f32 %v10645_v49, %v10085_v50 }
0x112e   : > { %v9412_v46 = vadd.f32 %v10686_v55, %v9166_v8 }
0x1137   : > { %v10760_v9 = vpop.f32.mrf.mxu1 }
0x1139   : > { %v10761_v15 = vpop.f32.mrf.mxu1 }
0x113a   : > { %v10762_v34 = vadd.f32 %v10761_v15, %v10760_v9 }
0x113c   : > { %v10763_v58 = vpop.f32.mrf.mxu1 }
0x113e   : > { %v10764_v53 = vpop.f32.mrf.mxu1 }
0x113f   : > { %v10765_v14 = vadd.f32 %v10764_v53, %v10763_v58 }
0x1141   : > { %v10719_v1 = vpop.f32.mrf.mxu0  ;;  %v10766_v32 = vpop.f32.mrf.mxu1 }
0x1143   : > { %v10720_v0 = vpop.f32.mrf.mxu0  ;;  %v10767_v41 = vpop.f32.mrf.mxu1 }
0x1144   : > { %v10721_v25 = vadd.f32 %v10720_v0, %v10719_v1  ;;  %v10768_v54 = vadd.f32 %v10767_v41, %v10766_v32  ;;  %v17135_v0 = vld [vmem:[#allocation8_spill] sm:$0xff] }
0x1146   : > { %v9550_v27 = vadd.f32 %v10721_v25, %v9398_v44 }
0x1147   : > { %v10722_v19 = vpop.f32.mrf.mxu0 }
0x1148   : > { %v9676_v17 = vadd.f32 %v10762_v34, %v9550_v27 }
0x1149   : > { %v10723_v7 = vpop.f32.mrf.mxu0 }
0x114a   : > { %v10724_v42 = vadd.f32 %v10723_v7, %v10722_v19 }
0x114c   : > { %v10725_v22 = vpop.f32.mrf.mxu0  ;;  %v9559_v31 = vadd.f32 %v10724_v42, %v9405_v21 }
0x114e   : > { %v10726_v3 = vpop.f32.mrf.mxu0  ;;  %v9687_v11 = vadd.f32 %v10765_v14, %v9559_v31 }
0x114f   : > { %v10727_v48 = vadd.f32 %v10726_v3, %v10725_v22 }
0x1151   : > { %v9568_v45 = vadd.f32 %v10727_v48, %v9412_v46 }
0x1153   : > { %v9698_v29 = vadd.f32 %v10768_v54, %v9568_v45 }
0x115d   : > { %v10842_v28 = vpop.f32.mrf.mxu1 }
0x115f   : > { %v10843_v16 = vpop.f32.mrf.mxu1 }
0x1160   : > { %v10844_v18 = vadd.f32 %v10843_v16, %v10842_v28 }
0x1161   : > { %v10845_v59 = vpop.f32.mrf.mxu1 }
0x1163   : > { %v10846_v36 = vpop.f32.mrf.mxu1 }
0x1164   : > { %v10847_v5 = vadd.f32 %v10846_v36, %v10845_v59 }
0x1165   : > { %v10801_v43 = vpop.f32.mrf.mxu0  ;;  %v10848_v38 = vpop.f32.mrf.mxu1 }
0x1167   : > { %v10802_v56 = vpop.f32.mrf.mxu0  ;;  %v10849_v35 = vpop.f32.mrf.mxu1 }
0x1168   : > { %v10803_v20 = vadd.f32 %v10802_v56, %v10801_v43  ;;  %v10850_v9 = vadd.f32 %v10849_v35, %v10848_v38 }
0x1169   : > { %v10804_v33 = vpop.f32.mrf.mxu0 }
0x116a   : > { %v9866_v37 = vadd.f32 %v10803_v20, %v9676_v17 }
0x116b   : > { %v10805_v23 = vpop.f32.mrf.mxu0 }
0x116c   : > { %v9984_v30 = vadd.f32 %v10844_v18, %v9866_v37  ;;  %v10806_v12 = vadd.f32 %v10805_v23, %v10804_v33 }
0x116d   : > { %v10807_v24 = vpop.f32.mrf.mxu0 }
0x116e   : > { %v10008_v6 = vmul.f32 %v10086_v2, %v9984_v30  ;;  %v9873_v52 = vadd.f32 %v10806_v12, %v9687_v11 }
0x116f   : > { %v10808_v62 = vpop.f32.mrf.mxu0 }
0x1170   : > { %v10011_v26 = vadd.f32 %v10008_v6, %v17133_v40  ;;  %v9991_v51 = vadd.f32 %v10847_v5, %v9873_v52  ;;  %v10809_v13 = vadd.f32 %v10808_v62, %v10807_v24 }
0x1172   : > { %10014 = vst [vmem:[%s494_s27] sm:$0xff] %v10011_v26  ;;  %v10009_v47 = vmul.f32 %v10086_v2, %v9991_v51  ;;  %v9880_v15 = vadd.f32 %v10809_v13, %v9698_v29 }
0x1174   : > { %v10012_v58 = vadd.f32 %v10009_v47, %v17134_v57  ;;  %v9998_v1 = vadd.f32 %v10850_v9, %v9880_v15 }
0x1176   : > { %10015 = vst [vmem:[%s494_s27 + $0x8] sm:$0xff] %v10012_v58  ;;  %v10010_v53 = vmul.f32 %v10086_v2, %v9998_v1 }
0x1178   : > { %v10013_v32 = vadd.f32 %v10010_v53, %v17135_v0 }
0x117a   : > { %10016 = vst [vmem:[%s494_s27 + $0x10] sm:$0x1] %v10013_v32 }
0x117b PF: > { %s25_s18 = sadd.s32 1, %s12158_s18  }
0x117c   : > { %p22_p4 = scmp.ge.s32.totalorder %s25_s18, 4  }
0x117e   :  { %24 = sbr.rel (!%p22_p4) target bundleno = 1 (0x1), region = 110 }

</bundles_post_ra>
